<compile_context>
chip_gen: v7x
topology: tpu7x:2x2x1
jax: 0.10.0
libtpu: 0.0.40
codegen_flags: <defaults>
</compile_context>

<pallas_src>
import functools
import math

import numpy as np
import jax
import jax.numpy as jnp
from jax.experimental import pallas as pl
from jax.experimental.pallas import tpu as pltpu

LRELU_SLOPE = 0.2
PIXNORM_EPS = 1e-8


# ----------------------------------------------------------------------------
# Generation-dependent tuning (row-tile cap + scoped VMEM limit)
# ----------------------------------------------------------------------------
@functools.lru_cache(maxsize=None)
def _tpu_tuning():
    """Returns (row_tile_cap, vmem_limit_bytes or None)."""
    try:
        info = pltpu.get_tpu_info()
        vmem = int(getattr(info, "vmem_capacity_bytes", 0) or 0)
    except Exception:                      # query unavailable -> safe defaults
        vmem = 0
    if vmem >= 96 * 1024 * 1024:           # 128 MiB parts (v5e / v6e)
        return 128, 96 * 1024 * 1024
    if vmem > 0:                           # 64 MiB parts (v7x)
        return 32, int(vmem * 3 // 4)
    return 32, None


def _cparams(dims):
    _, vmem_limit = _tpu_tuning()
    if vmem_limit is None:
        return pltpu.CompilerParams(dimension_semantics=dims)
    return pltpu.CompilerParams(dimension_semantics=dims,
                                vmem_limit_bytes=vmem_limit)


def _row_tile(H):
    th_max, _ = _tpu_tuning()
    return min(th_max, H)


# ----------------------------------------------------------------------------
# small in-kernel helpers
# ----------------------------------------------------------------------------
def _repeat_rows_x2(a):
    """2x nearest-neighbour duplication along axis 0 (leading dim only:
    slab copies, no lane/sublane reshuffle -> always Mosaic-safe)."""
    r = a.shape[0]
    return jnp.broadcast_to(a[:, None], (r, 2) + a.shape[1:]).reshape(
        (2 * r,) + a.shape[1:])


def _lrelu(y):
    return jnp.where(y >= 0, y, LRELU_SLOPE * y)


def _pixnorm(y):  # reduce over the FULL (untiled) channel axis
    return y * jax.lax.rsqrt(jnp.mean(y * y, axis=-1, keepdims=True) + PIXNORM_EPS)


# ----------------------------------------------------------------------------
# Kernel 1: fused matmul (+bias [+lrelu] [+pixnorm] [+tanh]) and the grouped
#   pixel-norm variant (one channel group per 4x4 deconv output pixel).
#   Used for: latent->4x4 deconv, the tiny 4x4 initial conv (wrapper im2col),
#   and the depth==0 toRGB.
# ----------------------------------------------------------------------------
def _mm_act_kernel(p_ref, w_ref, b_ref, o_ref, *, lrelu, pixnorm, tanh):
    y = jnp.dot(p_ref[...].astype(w_ref.dtype), w_ref[...],
                preferred_element_type=jnp.float32)
    y = y + b_ref[...]
    if lrelu:
        y = _lrelu(y)
    if pixnorm:
        y = _pixnorm(y)
    if tanh:
        y = jnp.tanh(y)
    o_ref[...] = y.astype(o_ref.dtype)


def _mm_gpix_kernel(p_ref, w_ref, b_ref, gat_ref, sct_ref, o_ref, *, lrelu):
    y = jnp.dot(p_ref[...].astype(w_ref.dtype), w_ref[...],
                preferred_element_type=jnp.float32)
    y = y + b_ref[...]
    if lrelu:
        y = _lrelu(y)
    # Grouped pixel-norm via precomputed one-hot gather/scatter matmuls
    # (no lane-splitting reshape, no in-kernel iota constant building).
    groups, n = sct_ref.shape
    gsz = n // groups
    msq = jnp.dot(y * y, gat_ref[...], preferred_element_type=jnp.float32) * (1.0 / gsz)
    inv = jax.lax.rsqrt(msq + PIXNORM_EPS)                       # (M, G)
    y = y * jnp.dot(inv, sct_ref[...], preferred_element_type=jnp.float32)
    o_ref[...] = y.astype(o_ref.dtype)


def mm_act(p, w, b, *, lrelu, pixnorm=False, tanh=False,
           gather=None, scatter=None, out_dtype=jnp.float32):
    M, K = p.shape
    N = w.shape[1]
    tm = M if M <= 512 else 512          # M is tiny here (batch / B*16 pixels)
    assert M % tm == 0
    if gather is not None:
        G = gather.shape[1]
        return pl.pallas_call(
            functools.partial(_mm_gpix_kernel, lrelu=lrelu),
            out_shape=jax.ShapeDtypeStruct((M, N), out_dtype),
            grid=(M // tm,),
            in_specs=[pl.BlockSpec((tm, K), lambda i: (i, 0)),
                      pl.BlockSpec((K, N), lambda i: (0, 0)),
                      pl.BlockSpec((1, N), lambda i: (0, 0)),
                      pl.BlockSpec((N, G), lambda i: (0, 0)),
                      pl.BlockSpec((G, N), lambda i: (0, 0))],
            out_specs=pl.BlockSpec((tm, N), lambda i: (i, 0)),
            compiler_params=_cparams(("parallel",)),
        )(p, w, b, gather, scatter)
    return pl.pallas_call(
        functools.partial(_mm_act_kernel, lrelu=lrelu, pixnorm=pixnorm, tanh=tanh),
        out_shape=jax.ShapeDtypeStruct((M, N), out_dtype),
        grid=(M // tm,),
        in_specs=[pl.BlockSpec((tm, K), lambda i: (i, 0)),
                  pl.BlockSpec((K, N), lambda i: (0, 0)),
                  pl.BlockSpec((1, N), lambda i: (0, 0))],
        out_specs=pl.BlockSpec((tm, N), lambda i: (i, 0)),
        compiler_params=_cparams(("parallel",)),
    )(p, w, b)


# ----------------------------------------------------------------------------
# Kernel 2: 3x3 conv (+bias+lrelu+pixnorm) with fused im2col (single K=9*Cin
#           MXU matmul) and optional fused 2x row-upsample.
#           Grid = (batch, output-row-tile).
# ----------------------------------------------------------------------------
def _conv3x3_kernel(x_ref, w_ref, b_ref, o_ref, *, row_upsample):
    th, W, cout = o_ref.shape
    cin = x_ref.shape[-1]
    i = pl.program_id(1)
    if row_upsample:
        # x_ref is the column-upsampled, zero-padded LOW-RES map (h+2, W+2, Cin);
        # rows are duplicated in-kernel.
        s0 = pl.multiple_of(i * (th // 2), th // 2)
        lo = x_ref[pl.ds(s0, th // 2 + 2), :, :]
        win = _repeat_rows_x2(lo)[1:th + 3]            # (th+2, W+2, Cin)
    else:
        r0 = pl.multiple_of(i * th, th)
        win = x_ref[pl.ds(r0, th + 2), :, :]           # (th+2, W+2, Cin)
    win = win.astype(w_ref.dtype)                      # single cast, not per-tap

    # Fused im2col: 9 shifted windows concatenated along the lane (channel)
    # axis, then ONE K=9*Cin matmul -> accumulation stays inside the MXU.
    taps = [win[dy:dy + th, dx:dx + W, :].reshape(th * W, cin)
            for dy in range(3) for dx in range(3)]
    patch = jnp.concatenate(taps, axis=-1)             # (th*W, 9*Cin)
    y = jnp.dot(patch, w_ref[...], preferred_element_type=jnp.float32)
    y = _pixnorm(_lrelu(y + b_ref[...]))
    o_ref[...] = y.reshape(th, W, cout).astype(o_ref.dtype)


def conv3x3_block(x_nhwc, w_flat, bias, *, upsample, out_dtype):
    """3x3 pad=1 conv (+bias+lrelu+pixnorm); optional fused 2x nearest upsample.
    w_flat is the pre-flattened (9*Cin, Cout) weight from prepare_params."""
    B, hin, win_in, cin = x_nhwc.shape
    cout = w_flat.shape[-1]
    if upsample:
        H, W = 2 * hin, 2 * win_in
        # Columns duplicated in the wrapper (bf16, 2x low-res intermediate),
        # rows duplicated in-kernel from the resident low-res map.
        # TODO(synk): fuse the column duplication + padding into the kernel too.
        xk = jnp.pad(jnp.repeat(x_nhwc, 2, axis=2), ((0, 0), (1, 1), (1, 1), (0, 0)))
    else:
        H, W = hin, win_in
        xk = jnp.pad(x_nhwc, ((0, 0), (1, 1), (1, 1), (0, 0)))
    th = _row_tile(H)
    rows_in = xk.shape[1]
    # TODO(synk): at very large resolutions on v7x, switch the resident padded
    #             map to a halo'd (th+2)-row manual-DMA window to bound VMEM.
    return pl.pallas_call(
        functools.partial(_conv3x3_kernel, row_upsample=upsample),
        out_shape=jax.ShapeDtypeStruct((B, H, W, cout), out_dtype),
        grid=(B, H // th),
        in_specs=[
            # padded input resident per batch item (one DMA, reused by all row tiles)
            pl.BlockSpec((None, rows_in, W + 2, cin), lambda b, i: (b, 0, 0, 0)),
            pl.BlockSpec(w_flat.shape, lambda b, i: (0, 0)),
            pl.BlockSpec((1, cout), lambda b, i: (0, 0)),
        ],
        out_specs=pl.BlockSpec((None, th, W, cout), lambda b, i: (b, i, 0, 0)),
        compiler_params=_cparams(("parallel", "parallel")),
    )(xk, w_flat, bias)


# ----------------------------------------------------------------------------
# Kernel 3: fused tail  toRGB(straight) + toRGB(up2x(residual)) + blend + tanh
#           Single stacked matmul; alpha through SMEM (no recompile per value).
# ----------------------------------------------------------------------------
def _rgb_blend_tanh_kernel(alpha_ref, ys_ref, yr_ref, w_ref, bs_ref, br_ref, o_ref):
    th, W, _ = o_ref.shape
    Cs = ys_ref.shape[-1]
    Cr = yr_ref.shape[-1]
    a = alpha_ref[0]
    s = ys_ref[...].astype(jnp.float32).reshape(th * W, Cs)
    r = _repeat_rows_x2(yr_ref[...]).astype(jnp.float32).reshape(th * W, Cr)
    # pre-scale on the VPU, then ONE K=(Cs+Cr) matmul against the stacked weight
    feat = jnp.concatenate([a * s, (1.0 - a) * r], axis=-1).astype(w_ref.dtype)
    rgb = jnp.dot(feat, w_ref[...], preferred_element_type=jnp.float32)
    rgb = rgb + (a * bs_ref[...] + (1.0 - a) * br_ref[...])
    # TODO(synk): lane-dense (th, W*3) store (needs sublane->lane relayout); the
    #             3-channel writeback is tiny next to the feature reads here.
    o_ref[...] = jnp.tanh(rgb).reshape(th, W, 3).astype(o_ref.dtype)


def rgb_blend_tanh(ys, yr_colup, w_stack, b_s, b_r, alpha):
    B, H, W, Cs = ys.shape
    Cr = yr_colup.shape[-1]
    th = _row_tile(H)
    alpha_arr = jnp.asarray(alpha, jnp.float32).reshape(1)
    return pl.pallas_call(
        _rgb_blend_tanh_kernel,
        out_shape=jax.ShapeDtypeStruct((B, H, W, 3), jnp.float32),
        grid=(B, H // th),
        in_specs=[
            pl.BlockSpec(memory_space=pltpu.MemorySpace.SMEM),               # alpha
            pl.BlockSpec((None, th, W, Cs), lambda b, i: (b, i, 0, 0)),      # straight feats
            pl.BlockSpec((None, th // 2, W, Cr), lambda b, i: (b, i, 0, 0)), # residual (col-up, half rows)
            pl.BlockSpec((Cs + Cr, 3), lambda b, i: (0, 0)),                 # stacked rgb weights
            pl.BlockSpec((1, 3), lambda b, i: (0, 0)),
            pl.BlockSpec((1, 3), lambda b, i: (0, 0)),
        ],
        out_specs=pl.BlockSpec((None, th, W, 3), lambda b, i: (b, i, 0, 0)),
        compiler_params=_cparams(("parallel", "parallel")),
    )(alpha_arr, ys, yr_colup, w_stack, b_s, b_r)


# ----------------------------------------------------------------------------
# Glue (layout plumbing, wrapper side)
# ----------------------------------------------------------------------------
def im2col3x3_small(x_nhwc):
    """Wrapper-side im2col; only used for the tiny 4x4 initial-block conv so
    in-kernel reshapes stay sublane(8)-aligned. Negligible HBM cost at 4x4."""
    B, H, W, C = x_nhwc.shape
    xp = jnp.pad(x_nhwc, ((0, 0), (1, 1), (1, 1), (0, 0)))
    cols = [xp[:, dy:dy + H, dx:dx + W, :] for dy in range(3) for dx in range(3)]
    return jnp.concatenate(cols, axis=-1).reshape(B * H * W, 9 * C)


def _group_onehots(n, groups):
    """Precomputed one-hot gather/scatter for grouped pixel-norm."""
    gsz = n // groups
    g = np.arange(n) // gsz
    gather = (g[:, None] == np.arange(groups)[None, :]).astype(np.float32)  # (n, G)
    return jnp.asarray(gather), jnp.asarray(gather.T)                       # , (G, n)


def prepare_params(params, mxu_dtype=jnp.bfloat16):
    """One-time layout & dtype conversion of the PyTorch-style weights into the
    kernel-friendly forms (no per-call astype/transpose).  `mxu_dtype` also
    sets the inter-layer activation storage dtype."""
    def conv_w_flat(w):    # OIHW -> (9*Cin, Cout), row index = (dy*3+dx)*Cin + ci
        return (jnp.transpose(w, (2, 3, 1, 0))
                   .reshape(9 * w.shape[1], w.shape[0]).astype(mxu_dtype))

    C = params["init_deconv_w"].shape[0]
    O = params["init_deconv_w"].shape[1]
    gat, sct = _group_onehots(16 * O, 16)
    prep = {
        # ConvTranspose2d(4x4) on a 1x1 input == dense (B,C)@(C,16*O) matmul
        "deconv_w": jnp.transpose(params["init_deconv_w"], (0, 2, 3, 1))
                       .reshape(C, 16 * O).astype(mxu_dtype),
        "deconv_b": jnp.tile(params["init_deconv_b"], 16).reshape(1, 16 * O).astype(jnp.float32),
        "gpix_gather": gat,                 # (16*O, 16) one-hot, f32
        "gpix_scatter": sct,                # (16, 16*O) one-hot, f32
        # initial 4x4 conv uses wrapper-side im2col -> flat (9*Cin, Cout) weight
        "init_conv_w": jnp.transpose(params["init_conv_w"], (2, 3, 1, 0))
                          .reshape(9 * C, O).astype(mxu_dtype),
        "init_conv_b": params["init_conv_b"].reshape(1, -1).astype(jnp.float32),
        "layers": [
            {"w1": conv_w_flat(lp["conv1_w"]), "b1": lp["conv1_b"].reshape(1, -1).astype(jnp.float32),
             "w2": conv_w_flat(lp["conv2_w"]), "b2": lp["conv2_b"].reshape(1, -1).astype(jnp.float32)}
            for lp in params["layers"]],
        "rgb": [{"w": jnp.transpose(r["w"]).astype(mxu_dtype),
                 "b": r["b"].reshape(1, 3).astype(jnp.float32)}
                for r in params["rgb"]],
    }
    return prep


# ----------------------------------------------------------------------------
# Generator forward (Pallas)
# ----------------------------------------------------------------------------
def generator_forward(prep, x, alpha, *, depth):
    """Pallas version of Generator.forward(x, depth, alpha).  Returns NCHW."""
    B = x.shape[0]
    O = prep["deconv_w"].shape[1] // 16
    act_dt = prep["deconv_w"].dtype        # bf16 fast path / f32 reference path

    # ---- GenInitialBlock -------------------------------------------------
    y = mm_act(x, prep["deconv_w"], prep["deconv_b"], lrelu=True,
               gather=prep["gpix_gather"], scatter=prep["gpix_scatter"],
               out_dtype=act_dt)                               # (B, 16*O)
    y = y.reshape(B, 4, 4, O)
    y = mm_act(im2col3x3_small(y), prep["init_conv_w"], prep["init_conv_b"],
               lrelu=True, pixnorm=True, out_dtype=act_dt).reshape(B, 4, 4, O)

    layers, rgbs = prep["layers"], prep["rgb"]
    assert depth < len(rgbs), "Requested output depth cannot be produced"

    if depth > 0:
        for lp in layers[:depth - 1]:
            y = conv3x3_block(y, lp["w1"], lp["b1"], upsample=True, out_dtype=act_dt)
            y = conv3x3_block(y, lp["w2"], lp["b2"], upsample=False, out_dtype=act_dt)
        lp = layers[depth - 1]
        # residual branch: columns pre-upsampled (2x low-res, bf16), rows in-kernel
        y_res_colup = jnp.repeat(y, 2, axis=2)
        ys = conv3x3_block(y, lp["w1"], lp["b1"], upsample=True, out_dtype=act_dt)
        ys = conv3x3_block(ys, lp["w2"], lp["b2"], upsample=False, out_dtype=act_dt)
        w_stack = jnp.concatenate([rgbs[depth]["w"], rgbs[depth - 1]["w"]], axis=0)
        out = rgb_blend_tanh(ys, y_res_colup, w_stack,
                             rgbs[depth]["b"], rgbs[depth - 1]["b"], alpha)
    else:
        Bh, H4, W4, C4 = y.shape
        rgb = mm_act(y.reshape(Bh * H4 * W4, C4), rgbs[0]["w"], rgbs[0]["b"],
                     lrelu=False, tanh=True, out_dtype=jnp.float32)
        out = rgb.reshape(Bh, H4, W4, 3)

    return jnp.transpose(out, (0, 3, 1, 2))                   # -> NCHW like PyTorch


# ----------------------------------------------------------------------------
# Deterministic parameter init (equalized-lr scale sqrt(2/fan_in) folded in)
# ----------------------------------------------------------------------------
def channel_plan(depth, latent):
    blocks, rgb_ch = [], [latent]
    for i in range(depth - 1):
        if i <= 2:
            blocks.append((latent, latent)); rgb_ch.append(latent)
        else:
            cin = int(latent // 2 ** (i - 3)); cout = int(latent // 2 ** (i - 2))
            blocks.append((cin, cout)); rgb_ch.append(cout)
    return blocks, rgb_ch


def init_params(key, depth=3, latent=32):
    blocks, rgb_ch = channel_plan(depth, latent)
    keys = iter(jax.random.split(key, 8 + 4 * len(blocks) + 2 * len(rgb_ch)))

    def nrm(shape):
        return jax.random.normal(next(keys), shape, jnp.float32)

    params = {
        "init_deconv_w": nrm((latent, latent, 4, 4)) * math.sqrt(2.0 / latent),
        "init_deconv_b": 0.1 * nrm((latent,)),
        "init_conv_w": nrm((latent, latent, 3, 3)) * math.sqrt(2.0 / (latent * 9)),
        "init_conv_b": 0.1 * nrm((latent,)),
    }
    params["layers"] = [
        {"conv1_w": nrm((co, ci, 3, 3)) * math.sqrt(2.0 / (ci * 9)),
         "conv1_b": 0.1 * nrm((co,)),
         "conv2_w": nrm((co, co, 3, 3)) * math.sqrt(2.0 / (co * 9)),
         "conv2_b": 0.1 * nrm((co,))}
        for (ci, co) in blocks
    ]
    params["rgb"] = [
        {"w": nrm((3, c)) * math.sqrt(2.0 / c), "b": 0.1 * nrm((3,))}
        for c in rgb_ch
    ]
    return params


# ----------------------------------------------------------------------------
# Pure-JAX (NCHW) reference for validation
# ----------------------------------------------------------------------------
def ref_forward(params, x, depth, alpha):
    HI = jax.lax.Precision.HIGHEST
    pixnorm = lambda t: t * jax.lax.rsqrt(jnp.mean(t * t, axis=1, keepdims=True) + PIXNORM_EPS)
    lrelu = lambda t: jnp.where(t >= 0, t, LRELU_SLOPE * t)
    up = lambda t: jnp.repeat(jnp.repeat(t, 2, axis=2), 2, axis=3)

    def c3(t, w, b):
        y = jax.lax.conv_general_dilated(t, w, (1, 1), ((1, 1), (1, 1)),
                                         dimension_numbers=("NCHW", "OIHW", "NCHW"),
                                         precision=HI)
        return y + b[None, :, None, None]

    def c1(t, w, b):
        return jnp.einsum("bchw,oc->bohw", t, w, precision=HI) + b[None, :, None, None]

    y = jnp.einsum("bc,cohw->bohw", x, params["init_deconv_w"], precision=HI) \
        + params["init_deconv_b"][None, :, None, None]
    y = pixnorm(lrelu(y))
    y = pixnorm(lrelu(c3(y, params["init_conv_w"], params["init_conv_b"])))

    def block(t, lp):
        t = up(t)
        t = pixnorm(lrelu(c3(t, lp["conv1_w"], lp["conv1_b"])))
        t = pixnorm(lrelu(c3(t, lp["conv2_w"], lp["conv2_b"])))
        return t

    if depth > 0:
        for lp in params["layers"][:depth - 1]:
            y = block(y, lp)
        residual = c1(up(y), params["rgb"][depth - 1]["w"], params["rgb"][depth - 1]["b"])
        straight = c1(block(y, params["layers"][depth - 1]),
                      params["rgb"][depth]["w"], params["rgb"][depth]["b"])
        out = alpha * straight + (1 - alpha) * residual
    else:
        out = c1(y, params["rgb"][0]["w"], params["rgb"][0]["b"])
    return jnp.tanh(out)


# ----------------------------------------------------------------------------
if __name__ == "__main__":
    DEPTH_TOTAL, LATENT, B = 3, 32, 2
    OUT_DEPTH, ALPHA = 2, 0.6

    key = jax.random.PRNGKey(0)
    pkey, xkey = jax.random.split(key)
    params = init_params(pkey, DEPTH_TOTAL, LATENT)
    x = jax.random.normal(xkey, (B, LATENT), jnp.float32)

    ref = ref_forward(params, x, OUT_DEPTH, ALPHA)
    fwd = jax.jit(functools.partial(generator_forward, depth=OUT_DEPTH))

    # f32 MXU path (f32 activations): tight check vs the high-precision reference.
    prep32 = prepare_params(params, mxu_dtype=jnp.float32)
    out32 = jax.block_until_ready(fwd(prep32, x, ALPHA))
    assert out32.shape == (B, 3, 16, 16), out32.shape
    np.testing.assert_allclose(np.asarray(out32), np.asarray(ref), atol=3e-3, rtol=3e-3)

    # bf16 fast path (bf16 MXU inputs + bf16 inter-layer activations,
    # f32 accumulation and f32 VPU/EUP math).
    prep16 = prepare_params(params, mxu_dtype=jnp.bfloat16)
    out16 = jax.block_until_ready(fwd(prep16, x, ALPHA))
    np.testing.assert_allclose(np.asarray(out16), np.asarray(ref), atol=6e-2, rtol=6e-2)

    print("KERNEL_OK")
</pallas_src>

<mosaic_0001>
module attributes {stable_mosaic.version = 11 : i64} {
  func.func @_mm_gpix_kernel(%arg0: i32, %arg1: memref<2x32xf32, #tpu.memory_space<vmem>>, %arg2: memref<32x512xf32, #tpu.memory_space<vmem>>, %arg3: memref<1x512xf32, #tpu.memory_space<vmem>>, %arg4: memref<512x16xf32, #tpu.memory_space<vmem>>, %arg5: memref<16x512xf32, #tpu.memory_space<vmem>>, %arg6: memref<2x512xf32, #tpu.memory_space<vmem>>) attributes {dimension_semantics = [#tpu.dimension_semantics<parallel>], iteration_bounds = array<i64: 1>, scalar_prefetch = 0 : i64, scratch_operands = 0 : i64, tpu.core_type = #tpu.core_type<tc>, window_params = [{transform_indices = @transform_0, window_bounds = array<i64: 2, 32>}, {pipeline_mode = #tpu.pipeline_mode<synchronous>, transform_indices = @transform_1, window_bounds = array<i64: 32, 512>}, {pipeline_mode = #tpu.pipeline_mode<synchronous>, transform_indices = @transform_2, window_bounds = array<i64: 1, 512>}, {pipeline_mode = #tpu.pipeline_mode<synchronous>, transform_indices = @transform_3, window_bounds = array<i64: 512, 16>}, {pipeline_mode = #tpu.pipeline_mode<synchronous>, transform_indices = @transform_4, window_bounds = array<i64: 16, 512>}, {transform_indices = @transform_5, window_bounds = array<i64: 2, 512>}]} {
    %c0 = arith.constant 0 : index
    %c0_0 = arith.constant 0 : index
    %0 = vector.load %arg1[%c0, %c0_0] : memref<2x32xf32, #tpu.memory_space<vmem>>, vector<2x32xf32>
    %c0_1 = arith.constant 0 : index
    %c0_2 = arith.constant 0 : index
    %1 = vector.load %arg2[%c0_1, %c0_2] : memref<32x512xf32, #tpu.memory_space<vmem>>, vector<32x512xf32>
    %cst = arith.constant dense<0.000000e+00> : vector<2x512xf32>
    %2 = tpu.matmul %0, %1, %cst {dimension_numbers = #tpu.dot_dimension_numbers<[1], [0], [0], [1], [0, 0, 1, 1], [], []>} : vector<2x32xf32>, vector<32x512xf32>, vector<2x512xf32> -> vector<2x512xf32>
    %c0_3 = arith.constant 0 : index
    %c0_4 = arith.constant 0 : index
    %3 = vector.load %arg3[%c0_3, %c0_4] : memref<1x512xf32, #tpu.memory_space<vmem>>, vector<1x512xf32>
    %4 = vector.broadcast %3 : vector<1x512xf32> to vector<2x512xf32>
    %5 = arith.addf %2, %4 : vector<2x512xf32>
    %cst_5 = arith.constant 0.000000e+00 : f32
    %6 = vector.broadcast %cst_5 : f32 to vector<2x512xf32>
    %7 = arith.cmpf oge, %5, %6 : vector<2x512xf32>
    %cst_6 = arith.constant 2.000000e-01 : f32
    %8 = vector.broadcast %cst_6 : f32 to vector<2x512xf32>
    %9 = arith.mulf %8, %5 : vector<2x512xf32>
    %10 = arith.select %7, %5, %9 : vector<2x512xi1>, vector<2x512xf32>
    %11 = arith.mulf %10, %10 : vector<2x512xf32>
    %c0_7 = arith.constant 0 : index
    %c0_8 = arith.constant 0 : index
    %12 = vector.load %arg4[%c0_7, %c0_8] : memref<512x16xf32, #tpu.memory_space<vmem>>, vector<512x16xf32>
    %cst_9 = arith.constant dense<0.000000e+00> : vector<2x16xf32>
    %13 = tpu.matmul %11, %12, %cst_9 {dimension_numbers = #tpu.dot_dimension_numbers<[1], [0], [0], [1], [0, 0, 1, 1], [], []>} : vector<2x512xf32>, vector<512x16xf32>, vector<2x16xf32> -> vector<2x16xf32>
    %cst_10 = arith.constant 3.125000e-02 : f32
    %14 = vector.broadcast %cst_10 : f32 to vector<2x16xf32>
    %15 = arith.mulf %13, %14 : vector<2x16xf32>
    %cst_11 = arith.constant 9.99999993E-9 : f32
    %16 = vector.broadcast %cst_11 : f32 to vector<2x16xf32>
    %17 = arith.addf %15, %16 : vector<2x16xf32>
    %18 = math.rsqrt %17 : vector<2x16xf32>
    %c0_12 = arith.constant 0 : index
    %c0_13 = arith.constant 0 : index
    %19 = vector.load %arg5[%c0_12, %c0_13] : memref<16x512xf32, #tpu.memory_space<vmem>>, vector<16x512xf32>
    %cst_14 = arith.constant dense<0.000000e+00> : vector<2x512xf32>
    %20 = tpu.matmul %18, %19, %cst_14 {dimension_numbers = #tpu.dot_dimension_numbers<[1], [0], [0], [1], [0, 0, 1, 1], [], []>} : vector<2x16xf32>, vector<16x512xf32>, vector<2x512xf32> -> vector<2x512xf32>
    %21 = arith.mulf %10, %20 : vector<2x512xf32>
    %c0_15 = arith.constant 0 : index
    %c0_16 = arith.constant 0 : index
    %22 = vector.load %arg6[%c0_15, %c0_16] : memref<2x512xf32, #tpu.memory_space<vmem>>, vector<2x512xf32>
    tpu.vector_store %arg6[%c0_15, %c0_16], %21 {strides = array<i32>} : memref<2x512xf32, #tpu.memory_space<vmem>>, vector<2x512xf32>,
    return
  }
  func.func @transform_0(%arg0: i32) -> (i32, i32) {
    %c0_i32 = arith.constant 0 : i32
    %c0_i32_0 = arith.constant 0 : i32
    return %arg0, %c0_i32 : i32, i32
  }
  func.func @transform_1(%arg0: i32) -> (i32, i32) {
    %c0_i32 = arith.constant 0 : i32
    %c0_i32_0 = arith.constant 0 : i32
    %c0_i32_1 = arith.constant 0 : i32
    return %c0_i32, %c0_i32_0 : i32, i32
  }
  func.func @transform_2(%arg0: i32) -> (i32, i32) {
    %c0_i32 = arith.constant 0 : i32
    %c0_i32_0 = arith.constant 0 : i32
    %c0_i32_1 = arith.constant 0 : i32
    return %c0_i32, %c0_i32_0 : i32, i32
  }
  func.func @transform_3(%arg0: i32) -> (i32, i32) {
    %c0_i32 = arith.constant 0 : i32
    %c0_i32_0 = arith.constant 0 : i32
    %c0_i32_1 = arith.constant 0 : i32
    return %c0_i32, %c0_i32_0 : i32, i32
  }
  func.func @transform_4(%arg0: i32) -> (i32, i32) {
    %c0_i32 = arith.constant 0 : i32
    %c0_i32_0 = arith.constant 0 : i32
    %c0_i32_1 = arith.constant 0 : i32
    return %c0_i32, %c0_i32_0 : i32, i32
  }
  func.func @transform_5(%arg0: i32) -> (i32, i32) {
    %c0_i32 = arith.constant 0 : i32
    %c0_i32_0 = arith.constant 0 : i32
    return %arg0, %c0_i32 : i32, i32
  }
}

module attributes {stable_mosaic.version = 11 : i64} {
  func.func @_conv3x3_kernel(%arg0: i32, %arg1: i32, %arg2: memref<1x6x10x32xf32, #tpu.memory_space<vmem>>, %arg3: memref<288x32xf32, #tpu.memory_space<vmem>>, %arg4: memref<1x32xf32, #tpu.memory_space<vmem>>, %arg5: memref<1x8x8x32xf32, #tpu.memory_space<vmem>>) attributes {dimension_semantics = [#tpu.dimension_semantics<parallel>, #tpu.dimension_semantics<parallel>], iteration_bounds = array<i64: 2, 1>, scalar_prefetch = 0 : i64, scratch_operands = 0 : i64, tpu.core_type = #tpu.core_type<tc>, window_params = [{transform_indices = @transform_0, window_bounds = array<i64: 1, 6, 10, 32>}, {pipeline_mode = #tpu.pipeline_mode<synchronous>, transform_indices = @transform_1, window_bounds = array<i64: 288, 32>}, {pipeline_mode = #tpu.pipeline_mode<synchronous>, transform_indices = @transform_2, window_bounds = array<i64: 1, 32>}, {transform_indices = @transform_3, window_bounds = array<i64: 1, 8, 8, 32>}]} {
    %c4_i32 = arith.constant 4 : i32
    %0 = arith.muli %arg1, %c4_i32 : i32
    %1 = tpu.assume_multiple %0, 4 : i32
    %c0 = arith.constant 0 : index
    %2 = arith.index_cast %1 : i32 to index
    %c0_0 = arith.constant 0 : index
    %c0_1 = arith.constant 0 : index
    %3 = vector.load %arg2[%c0, %2, %c0_0, %c0_1] : memref<1x6x10x32xf32, #tpu.memory_space<vmem>>, vector<1x6x10x32xf32>
    %4 = vector.shape_cast %3 : vector<1x6x10x32xf32> to vector<6x10x32xf32>
    %5 = vector.shape_cast %4 : vector<6x10x32xf32> to vector<6x1x10x32xf32>
    %6 = vector.shape_cast %5 : vector<6x1x10x32xf32> to vector<6x1x10x32xf32>
    %7 = vector.broadcast %6 : vector<6x1x10x32xf32> to vector<6x2x10x32xf32>
    %8 = vector.shape_cast %7 : vector<6x2x10x32xf32> to vector<12x10x32xf32>
    %9 = vector.extract_strided_slice %8 {offsets = [1, 0, 0], sizes = [10, 10, 32], strides = [1, 1, 1]} : vector<12x10x32xf32> to vector<10x10x32xf32>
    %10 = vector.extract_strided_slice %9 {offsets = [0, 0, 0], sizes = [8, 8, 32], strides = [1, 1, 1]} : vector<10x10x32xf32> to vector<8x8x32xf32>
    %11 = vector.shape_cast %10 : vector<8x8x32xf32> to vector<64x32xf32>
    %12 = vector.extract_strided_slice %9 {offsets = [0, 1, 0], sizes = [8, 8, 32], strides = [1, 1, 1]} : vector<10x10x32xf32> to vector<8x8x32xf32>
    %13 = vector.shape_cast %12 : vector<8x8x32xf32> to vector<64x32xf32>
    %14 = vector.extract_strided_slice %9 {offsets = [0, 2, 0], sizes = [8, 8, 32], strides = [1, 1, 1]} : vector<10x10x32xf32> to vector<8x8x32xf32>
    %15 = vector.shape_cast %14 : vector<8x8x32xf32> to vector<64x32xf32>
    %16 = vector.extract_strided_slice %9 {offsets = [1, 0, 0], sizes = [8, 8, 32], strides = [1, 1, 1]} : vector<10x10x32xf32> to vector<8x8x32xf32>
    %17 = vector.shape_cast %16 : vector<8x8x32xf32> to vector<64x32xf32>
    %18 = vector.extract_strided_slice %9 {offsets = [1, 1, 0], sizes = [8, 8, 32], strides = [1, 1, 1]} : vector<10x10x32xf32> to vector<8x8x32xf32>
    %19 = vector.shape_cast %18 : vector<8x8x32xf32> to vector<64x32xf32>
    %20 = vector.extract_strided_slice %9 {offsets = [1, 2, 0], sizes = [8, 8, 32], strides = [1, 1, 1]} : vector<10x10x32xf32> to vector<8x8x32xf32>
    %21 = vector.shape_cast %20 : vector<8x8x32xf32> to vector<64x32xf32>
    %22 = vector.extract_strided_slice %9 {offsets = [2, 0, 0], sizes = [8, 8, 32], strides = [1, 1, 1]} : vector<10x10x32xf32> to vector<8x8x32xf32>
    %23 = vector.shape_cast %22 : vector<8x8x32xf32> to vector<64x32xf32>
    %24 = vector.extract_strided_slice %9 {offsets = [2, 1, 0], sizes = [8, 8, 32], strides = [1, 1, 1]} : vector<10x10x32xf32> to vector<8x8x32xf32>
    %25 = vector.shape_cast %24 : vector<8x8x32xf32> to vector<64x32xf32>
    %26 = vector.extract_strided_slice %9 {offsets = [2, 2, 0], sizes = [8, 8, 32], strides = [1, 1, 1]} : vector<10x10x32xf32> to vector<8x8x32xf32>
    %27 = vector.shape_cast %26 : vector<8x8x32xf32> to vector<64x32xf32>
    %28 = tpu.concatenate %11, %13, %15, %17, %19, %21, %23, %25, %27 in 1 : vector<64x32xf32>, vector<64x32xf32>, vector<64x32xf32>, vector<64x32xf32>, vector<64x32xf32>, vector<64x32xf32>, vector<64x32xf32>, vector<64x32xf32>, vector<64x32xf32> -> vector<64x288xf32>
    %c0_2 = arith.constant 0 : index
    %c0_3 = arith.constant 0 : index
    %29 = vector.load %arg3[%c0_2, %c0_3] : memref<288x32xf32, #tpu.memory_space<vmem>>, vector<288x32xf32>
    %cst = arith.constant dense<0.000000e+00> : vector<64x32xf32>
    %30 = tpu.matmul %28, %29, %cst {dimension_numbers = #tpu.dot_dimension_numbers<[1], [0], [0], [1], [0, 0, 1, 1], [], []>} : vector<64x288xf32>, vector<288x32xf32>, vector<64x32xf32> -> vector<64x32xf32>
    %c0_4 = arith.constant 0 : index
    %c0_5 = arith.constant 0 : index
    %31 = vector.load %arg4[%c0_4, %c0_5] : memref<1x32xf32, #tpu.memory_space<vmem>>, vector<1x32xf32>
    %32 = vector.broadcast %31 : vector<1x32xf32> to vector<64x32xf32>
    %33 = arith.addf %30, %32 : vector<64x32xf32>
    %cst_6 = arith.constant 0.000000e+00 : f32
    %34 = vector.broadcast %cst_6 : f32 to vector<64x32xf32>
    %35 = arith.cmpf oge, %33, %34 : vector<64x32xf32>
    %cst_7 = arith.constant 2.000000e-01 : f32
    %36 = vector.broadcast %cst_7 : f32 to vector<64x32xf32>
    %37 = arith.mulf %36, %33 : vector<64x32xf32>
    %38 = arith.select %35, %33, %37 : vector<64x32xi1>, vector<64x32xf32>
    %39 = arith.mulf %38, %38 : vector<64x32xf32>
    %cst_8 = arith.constant dense<0.000000e+00> : vector<64xf32>
    %40 = vector.multi_reduction <add>, %39, %cst_8 [1] : vector<64x32xf32> to vector<64xf32>
    %41 = vector.shape_cast %40 : vector<64xf32> to vector<64x1xf32>
    %cst_9 = arith.constant 3.200000e+01 : f32
    %42 = vector.broadcast %cst_9 : f32 to vector<64x1xf32>
    %43 = arith.divf %41, %42 : vector<64x1xf32>
    %cst_10 = arith.constant 9.99999993E-9 : f32
    %44 = vector.broadcast %cst_10 : f32 to vector<64x1xf32>
    %45 = arith.addf %43, %44 : vector<64x1xf32>
    %46 = math.rsqrt %45 : vector<64x1xf32>
    %47 = vector.broadcast %46 : vector<64x1xf32> to vector<64x32xf32>
    %48 = arith.mulf %38, %47 : vector<64x32xf32>
    %49 = vector.shape_cast %48 : vector<64x32xf32> to vector<8x8x32xf32>
    %c0_11 = arith.constant 0 : index
    %c0_12 = arith.constant 0 : index
    %c0_13 = arith.constant 0 : index
    %c0_14 = arith.constant 0 : index
    %50 = vector.load %arg5[%c0_11, %c0_12, %c0_13, %c0_14] : memref<1x8x8x32xf32, #tpu.memory_space<vmem>>, vector<1x8x8x32xf32>
    %51 = vector.shape_cast %50 : vector<1x8x8x32xf32> to vector<8x8x32xf32>
    %52 = vector.shape_cast %49 : vector<8x8x32xf32> to vector<1x8x8x32xf32>
    tpu.vector_store %arg5[%c0_11, %c0_12, %c0_13, %c0_14], %52 {strides = array<i32>} : memref<1x8x8x32xf32, #tpu.memory_space<vmem>>, vector<1x8x8x32xf32>,
    return
  }
  func.func @transform_0(%arg0: i32, %arg1: i32) -> (i32, i32, i32, i32) {
    %c0_i32 = arith.constant 0 : i32
    %c0_i32_0 = arith.constant 0 : i32
    %c0_i32_1 = arith.constant 0 : i32
    %c0_i32_2 = arith.constant 0 : i32
    return %arg0, %c0_i32, %c0_i32_0, %c0_i32_1 : i32, i32, i32, i32
  }
  func.func @transform_1(%arg0: i32, %arg1: i32) -> (i32, i32) {
    %c0_i32 = arith.constant 0 : i32
    %c0_i32_0 = arith.constant 0 : i32
    %c0_i32_1 = arith.constant 0 : i32
    return %c0_i32, %c0_i32_0 : i32, i32
  }
  func.func @transform_2(%arg0: i32, %arg1: i32) -> (i32, i32) {
    %c0_i32 = arith.constant 0 : i32
    %c0_i32_0 = arith.constant 0 : i32
    %c0_i32_1 = arith.constant 0 : i32
    return %c0_i32, %c0_i32_0 : i32, i32
  }
  func.func @transform_3(%arg0: i32, %arg1: i32) -> (i32, i32, i32, i32) {
    %c0_i32 = arith.constant 0 : i32
    %c0_i32_0 = arith.constant 0 : i32
    %c0_i32_1 = arith.constant 0 : i32
    return %arg0, %arg1, %c0_i32, %c0_i32_0 : i32, i32, i32, i32
  }
}

module attributes {stable_mosaic.version = 11 : i64} {
  func.func @_mm_act_kernel(%arg0: i32, %arg1: memref<32x288xf32, #tpu.memory_space<vmem>>, %arg2: memref<288x32xf32, #tpu.memory_space<vmem>>, %arg3: memref<1x32xf32, #tpu.memory_space<vmem>>, %arg4: memref<32x32xf32, #tpu.memory_space<vmem>>) attributes {dimension_semantics = [#tpu.dimension_semantics<parallel>], iteration_bounds = array<i64: 1>, scalar_prefetch = 0 : i64, scratch_operands = 0 : i64, tpu.core_type = #tpu.core_type<tc>, window_params = [{transform_indices = @transform_0, window_bounds = array<i64: 32, 288>}, {pipeline_mode = #tpu.pipeline_mode<synchronous>, transform_indices = @transform_1, window_bounds = array<i64: 288, 32>}, {pipeline_mode = #tpu.pipeline_mode<synchronous>, transform_indices = @transform_2, window_bounds = array<i64: 1, 32>}, {transform_indices = @transform_3, window_bounds = array<i64: 32, 32>}]} {
    %c0 = arith.constant 0 : index
    %c0_0 = arith.constant 0 : index
    %0 = vector.load %arg1[%c0, %c0_0] : memref<32x288xf32, #tpu.memory_space<vmem>>, vector<32x288xf32>
    %c0_1 = arith.constant 0 : index
    %c0_2 = arith.constant 0 : index
    %1 = vector.load %arg2[%c0_1, %c0_2] : memref<288x32xf32, #tpu.memory_space<vmem>>, vector<288x32xf32>
    %cst = arith.constant dense<0.000000e+00> : vector<32x32xf32>
    %2 = tpu.matmul %0, %1, %cst {dimension_numbers = #tpu.dot_dimension_numbers<[1], [0], [0], [1], [0, 0, 1, 1], [], []>} : vector<32x288xf32>, vector<288x32xf32>, vector<32x32xf32> -> vector<32x32xf32>
    %c0_3 = arith.constant 0 : index
    %c0_4 = arith.constant 0 : index
    %3 = vector.load %arg3[%c0_3, %c0_4] : memref<1x32xf32, #tpu.memory_space<vmem>>, vector<1x32xf32>
    %4 = vector.broadcast %3 : vector<1x32xf32> to vector<32x32xf32>
    %5 = arith.addf %2, %4 : vector<32x32xf32>
    %cst_5 = arith.constant 0.000000e+00 : f32
    %6 = vector.broadcast %cst_5 : f32 to vector<32x32xf32>
    %7 = arith.cmpf oge, %5, %6 : vector<32x32xf32>
    %cst_6 = arith.constant 2.000000e-01 : f32
    %8 = vector.broadcast %cst_6 : f32 to vector<32x32xf32>
    %9 = arith.mulf %8, %5 : vector<32x32xf32>
    %10 = arith.select %7, %5, %9 : vector<32x32xi1>, vector<32x32xf32>
    %11 = arith.mulf %10, %10 : vector<32x32xf32>
    %cst_7 = arith.constant dense<0.000000e+00> : vector<32xf32>
    %12 = vector.multi_reduction <add>, %11, %cst_7 [1] : vector<32x32xf32> to vector<32xf32>
    %13 = vector.shape_cast %12 : vector<32xf32> to vector<32x1xf32>
    %cst_8 = arith.constant 3.200000e+01 : f32
    %14 = vector.broadcast %cst_8 : f32 to vector<32x1xf32>
    %15 = arith.divf %13, %14 : vector<32x1xf32>
    %cst_9 = arith.constant 9.99999993E-9 : f32
    %16 = vector.broadcast %cst_9 : f32 to vector<32x1xf32>
    %17 = arith.addf %15, %16 : vector<32x1xf32>
    %18 = math.rsqrt %17 : vector<32x1xf32>
    %19 = vector.broadcast %18 : vector<32x1xf32> to vector<32x32xf32>
    %20 = arith.mulf %10, %19 : vector<32x32xf32>
    %c0_10 = arith.constant 0 : index
    %c0_11 = arith.constant 0 : index
    %21 = vector.load %arg4[%c0_10, %c0_11] : memref<32x32xf32, #tpu.memory_space<vmem>>, vector<32x32xf32>
    tpu.vector_store %arg4[%c0_10, %c0_11], %20 {strides = array<i32>} : memref<32x32xf32, #tpu.memory_space<vmem>>, vector<32x32xf32>,
    return
  }
  func.func @transform_0(%arg0: i32) -> (i32, i32) {
    %c0_i32 = arith.constant 0 : i32
    %c0_i32_0 = arith.constant 0 : i32
    return %arg0, %c0_i32 : i32, i32
  }
  func.func @transform_1(%arg0: i32) -> (i32, i32) {
    %c0_i32 = arith.constant 0 : i32
    %c0_i32_0 = arith.constant 0 : i32
    %c0_i32_1 = arith.constant 0 : i32
    return %c0_i32, %c0_i32_0 : i32, i32
  }
  func.func @transform_2(%arg0: i32) -> (i32, i32) {
    %c0_i32 = arith.constant 0 : i32
    %c0_i32_0 = arith.constant 0 : i32
    %c0_i32_1 = arith.constant 0 : i32
    return %c0_i32, %c0_i32_0 : i32, i32
  }
  func.func @transform_3(%arg0: i32) -> (i32, i32) {
    %c0_i32 = arith.constant 0 : i32
    %c0_i32_0 = arith.constant 0 : i32
    return %arg0, %c0_i32 : i32, i32
  }
}

module attributes {stable_mosaic.version = 11 : i64} {
  func.func @_conv3x3_kernel(%arg0: i32, %arg1: i32, %arg2: memref<1x10x10x32xf32, #tpu.memory_space<vmem>>, %arg3: memref<288x32xf32, #tpu.memory_space<vmem>>, %arg4: memref<1x32xf32, #tpu.memory_space<vmem>>, %arg5: memref<1x8x8x32xf32, #tpu.memory_space<vmem>>) attributes {dimension_semantics = [#tpu.dimension_semantics<parallel>, #tpu.dimension_semantics<parallel>], iteration_bounds = array<i64: 2, 1>, scalar_prefetch = 0 : i64, scratch_operands = 0 : i64, tpu.core_type = #tpu.core_type<tc>, window_params = [{transform_indices = @transform_0, window_bounds = array<i64: 1, 10, 10, 32>}, {pipeline_mode = #tpu.pipeline_mode<synchronous>, transform_indices = @transform_1, window_bounds = array<i64: 288, 32>}, {pipeline_mode = #tpu.pipeline_mode<synchronous>, transform_indices = @transform_2, window_bounds = array<i64: 1, 32>}, {transform_indices = @transform_3, window_bounds = array<i64: 1, 8, 8, 32>}]} {
    %c8_i32 = arith.constant 8 : i32
    %0 = arith.muli %arg1, %c8_i32 : i32
    %1 = tpu.assume_multiple %0, 8 : i32
    %c0 = arith.constant 0 : index
    %2 = arith.index_cast %1 : i32 to index
    %c0_0 = arith.constant 0 : index
    %c0_1 = arith.constant 0 : index
    %3 = vector.load %arg2[%c0, %2, %c0_0, %c0_1] : memref<1x10x10x32xf32, #tpu.memory_space<vmem>>, vector<1x10x10x32xf32>
    %4 = vector.shape_cast %3 : vector<1x10x10x32xf32> to vector<10x10x32xf32>
    %5 = vector.extract_strided_slice %4 {offsets = [0, 0, 0], sizes = [8, 8, 32], strides = [1, 1, 1]} : vector<10x10x32xf32> to vector<8x8x32xf32>
    %6 = vector.shape_cast %5 : vector<8x8x32xf32> to vector<64x32xf32>
    %7 = vector.extract_strided_slice %4 {offsets = [0, 1, 0], sizes = [8, 8, 32], strides = [1, 1, 1]} : vector<10x10x32xf32> to vector<8x8x32xf32>
    %8 = vector.shape_cast %7 : vector<8x8x32xf32> to vector<64x32xf32>
    %9 = vector.extract_strided_slice %4 {offsets = [0, 2, 0], sizes = [8, 8, 32], strides = [1, 1, 1]} : vector<10x10x32xf32> to vector<8x8x32xf32>
    %10 = vector.shape_cast %9 : vector<8x8x32xf32> to vector<64x32xf32>
    %11 = vector.extract_strided_slice %4 {offsets = [1, 0, 0], sizes = [8, 8, 32], strides = [1, 1, 1]} : vector<10x10x32xf32> to vector<8x8x32xf32>
    %12 = vector.shape_cast %11 : vector<8x8x32xf32> to vector<64x32xf32>
    %13 = vector.extract_strided_slice %4 {offsets = [1, 1, 0], sizes = [8, 8, 32], strides = [1, 1, 1]} : vector<10x10x32xf32> to vector<8x8x32xf32>
    %14 = vector.shape_cast %13 : vector<8x8x32xf32> to vector<64x32xf32>
    %15 = vector.extract_strided_slice %4 {offsets = [1, 2, 0], sizes = [8, 8, 32], strides = [1, 1, 1]} : vector<10x10x32xf32> to vector<8x8x32xf32>
    %16 = vector.shape_cast %15 : vector<8x8x32xf32> to vector<64x32xf32>
    %17 = vector.extract_strided_slice %4 {offsets = [2, 0, 0], sizes = [8, 8, 32], strides = [1, 1, 1]} : vector<10x10x32xf32> to vector<8x8x32xf32>
    %18 = vector.shape_cast %17 : vector<8x8x32xf32> to vector<64x32xf32>
    %19 = vector.extract_strided_slice %4 {offsets = [2, 1, 0], sizes = [8, 8, 32], strides = [1, 1, 1]} : vector<10x10x32xf32> to vector<8x8x32xf32>
    %20 = vector.shape_cast %19 : vector<8x8x32xf32> to vector<64x32xf32>
    %21 = vector.extract_strided_slice %4 {offsets = [2, 2, 0], sizes = [8, 8, 32], strides = [1, 1, 1]} : vector<10x10x32xf32> to vector<8x8x32xf32>
    %22 = vector.shape_cast %21 : vector<8x8x32xf32> to vector<64x32xf32>
    %23 = tpu.concatenate %6, %8, %10, %12, %14, %16, %18, %20, %22 in 1 : vector<64x32xf32>, vector<64x32xf32>, vector<64x32xf32>, vector<64x32xf32>, vector<64x32xf32>, vector<64x32xf32>, vector<64x32xf32>, vector<64x32xf32>, vector<64x32xf32> -> vector<64x288xf32>
    %c0_2 = arith.constant 0 : index
    %c0_3 = arith.constant 0 : index
    %24 = vector.load %arg3[%c0_2, %c0_3] : memref<288x32xf32, #tpu.memory_space<vmem>>, vector<288x32xf32>
    %cst = arith.constant dense<0.000000e+00> : vector<64x32xf32>
    %25 = tpu.matmul %23, %24, %cst {dimension_numbers = #tpu.dot_dimension_numbers<[1], [0], [0], [1], [0, 0, 1, 1], [], []>} : vector<64x288xf32>, vector<288x32xf32>, vector<64x32xf32> -> vector<64x32xf32>
    %c0_4 = arith.constant 0 : index
    %c0_5 = arith.constant 0 : index
    %26 = vector.load %arg4[%c0_4, %c0_5] : memref<1x32xf32, #tpu.memory_space<vmem>>, vector<1x32xf32>
    %27 = vector.broadcast %26 : vector<1x32xf32> to vector<64x32xf32>
    %28 = arith.addf %25, %27 : vector<64x32xf32>
    %cst_6 = arith.constant 0.000000e+00 : f32
    %29 = vector.broadcast %cst_6 : f32 to vector<64x32xf32>
    %30 = arith.cmpf oge, %28, %29 : vector<64x32xf32>
    %cst_7 = arith.constant 2.000000e-01 : f32
    %31 = vector.broadcast %cst_7 : f32 to vector<64x32xf32>
    %32 = arith.mulf %31, %28 : vector<64x32xf32>
    %33 = arith.select %30, %28, %32 : vector<64x32xi1>, vector<64x32xf32>
    %34 = arith.mulf %33, %33 : vector<64x32xf32>
    %cst_8 = arith.constant dense<0.000000e+00> : vector<64xf32>
    %35 = vector.multi_reduction <add>, %34, %cst_8 [1] : vector<64x32xf32> to vector<64xf32>
    %36 = vector.shape_cast %35 : vector<64xf32> to vector<64x1xf32>
    %cst_9 = arith.constant 3.200000e+01 : f32
    %37 = vector.broadcast %cst_9 : f32 to vector<64x1xf32>
    %38 = arith.divf %36, %37 : vector<64x1xf32>
    %cst_10 = arith.constant 9.99999993E-9 : f32
    %39 = vector.broadcast %cst_10 : f32 to vector<64x1xf32>
    %40 = arith.addf %38, %39 : vector<64x1xf32>
    %41 = math.rsqrt %40 : vector<64x1xf32>
    %42 = vector.broadcast %41 : vector<64x1xf32> to vector<64x32xf32>
    %43 = arith.mulf %33, %42 : vector<64x32xf32>
    %44 = vector.shape_cast %43 : vector<64x32xf32> to vector<8x8x32xf32>
    %c0_11 = arith.constant 0 : index
    %c0_12 = arith.constant 0 : index
    %c0_13 = arith.constant 0 : index
    %c0_14 = arith.constant 0 : index
    %45 = vector.load %arg5[%c0_11, %c0_12, %c0_13, %c0_14] : memref<1x8x8x32xf32, #tpu.memory_space<vmem>>, vector<1x8x8x32xf32>
    %46 = vector.shape_cast %45 : vector<1x8x8x32xf32> to vector<8x8x32xf32>
    %47 = vector.shape_cast %44 : vector<8x8x32xf32> to vector<1x8x8x32xf32>
    tpu.vector_store %arg5[%c0_11, %c0_12, %c0_13, %c0_14], %47 {strides = array<i32>} : memref<1x8x8x32xf32, #tpu.memory_space<vmem>>, vector<1x8x8x32xf32>,
    return
  }
  func.func @transform_0(%arg0: i32, %arg1: i32) -> (i32, i32, i32, i32) {
    %c0_i32 = arith.constant 0 : i32
    %c0_i32_0 = arith.constant 0 : i32
    %c0_i32_1 = arith.constant 0 : i32
    %c0_i32_2 = arith.constant 0 : i32
    return %arg0, %c0_i32, %c0_i32_0, %c0_i32_1 : i32, i32, i32, i32
  }
  func.func @transform_1(%arg0: i32, %arg1: i32) -> (i32, i32) {
    %c0_i32 = arith.constant 0 : i32
    %c0_i32_0 = arith.constant 0 : i32
    %c0_i32_1 = arith.constant 0 : i32
    return %c0_i32, %c0_i32_0 : i32, i32
  }
  func.func @transform_2(%arg0: i32, %arg1: i32) -> (i32, i32) {
    %c0_i32 = arith.constant 0 : i32
    %c0_i32_0 = arith.constant 0 : i32
    %c0_i32_1 = arith.constant 0 : i32
    return %c0_i32, %c0_i32_0 : i32, i32
  }
  func.func @transform_3(%arg0: i32, %arg1: i32) -> (i32, i32, i32, i32) {
    %c0_i32 = arith.constant 0 : i32
    %c0_i32_0 = arith.constant 0 : i32
    %c0_i32_1 = arith.constant 0 : i32
    return %arg0, %arg1, %c0_i32, %c0_i32_0 : i32, i32, i32, i32
  }
}

module attributes {stable_mosaic.version = 11 : i64} {
  func.func @_conv3x3_kernel(%arg0: i32, %arg1: i32, %arg2: memref<1x10x18x32xf32, #tpu.memory_space<vmem>>, %arg3: memref<288x32xf32, #tpu.memory_space<vmem>>, %arg4: memref<1x32xf32, #tpu.memory_space<vmem>>, %arg5: memref<1x16x16x32xf32, #tpu.memory_space<vmem>>) attributes {dimension_semantics = [#tpu.dimension_semantics<parallel>, #tpu.dimension_semantics<parallel>], iteration_bounds = array<i64: 2, 1>, scalar_prefetch = 0 : i64, scratch_operands = 0 : i64, tpu.core_type = #tpu.core_type<tc>, window_params = [{transform_indices = @transform_0, window_bounds = array<i64: 1, 10, 18, 32>}, {pipeline_mode = #tpu.pipeline_mode<synchronous>, transform_indices = @transform_1, window_bounds = array<i64: 288, 32>}, {pipeline_mode = #tpu.pipeline_mode<synchronous>, transform_indices = @transform_2, window_bounds = array<i64: 1, 32>}, {transform_indices = @transform_3, window_bounds = array<i64: 1, 16, 16, 32>}]} {
    %c8_i32 = arith.constant 8 : i32
    %0 = arith.muli %arg1, %c8_i32 : i32
    %1 = tpu.assume_multiple %0, 8 : i32
    %c0 = arith.constant 0 : index
    %2 = arith.index_cast %1 : i32 to index
    %c0_0 = arith.constant 0 : index
    %c0_1 = arith.constant 0 : index
    %3 = vector.load %arg2[%c0, %2, %c0_0, %c0_1] : memref<1x10x18x32xf32, #tpu.memory_space<vmem>>, vector<1x10x18x32xf32>
    %4 = vector.shape_cast %3 : vector<1x10x18x32xf32> to vector<10x18x32xf32>
    %5 = vector.shape_cast %4 : vector<10x18x32xf32> to vector<10x1x18x32xf32>
    %6 = vector.shape_cast %5 : vector<10x1x18x32xf32> to vector<10x1x18x32xf32>
    %7 = vector.broadcast %6 : vector<10x1x18x32xf32> to vector<10x2x18x32xf32>
    %8 = vector.shape_cast %7 : vector<10x2x18x32xf32> to vector<20x18x32xf32>
    %9 = vector.extract_strided_slice %8 {offsets = [1, 0, 0], sizes = [18, 18, 32], strides = [1, 1, 1]} : vector<20x18x32xf32> to vector<18x18x32xf32>
    %10 = vector.extract_strided_slice %9 {offsets = [0, 0, 0], sizes = [16, 16, 32], strides = [1, 1, 1]} : vector<18x18x32xf32> to vector<16x16x32xf32>
    %11 = vector.shape_cast %10 : vector<16x16x32xf32> to vector<256x32xf32>
    %12 = vector.extract_strided_slice %9 {offsets = [0, 1, 0], sizes = [16, 16, 32], strides = [1, 1, 1]} : vector<18x18x32xf32> to vector<16x16x32xf32>
    %13 = vector.shape_cast %12 : vector<16x16x32xf32> to vector<256x32xf32>
    %14 = vector.extract_strided_slice %9 {offsets = [0, 2, 0], sizes = [16, 16, 32], strides = [1, 1, 1]} : vector<18x18x32xf32> to vector<16x16x32xf32>
    %15 = vector.shape_cast %14 : vector<16x16x32xf32> to vector<256x32xf32>
    %16 = vector.extract_strided_slice %9 {offsets = [1, 0, 0], sizes = [16, 16, 32], strides = [1, 1, 1]} : vector<18x18x32xf32> to vector<16x16x32xf32>
    %17 = vector.shape_cast %16 : vector<16x16x32xf32> to vector<256x32xf32>
    %18 = vector.extract_strided_slice %9 {offsets = [1, 1, 0], sizes = [16, 16, 32], strides = [1, 1, 1]} : vector<18x18x32xf32> to vector<16x16x32xf32>
    %19 = vector.shape_cast %18 : vector<16x16x32xf32> to vector<256x32xf32>
    %20 = vector.extract_strided_slice %9 {offsets = [1, 2, 0], sizes = [16, 16, 32], strides = [1, 1, 1]} : vector<18x18x32xf32> to vector<16x16x32xf32>
    %21 = vector.shape_cast %20 : vector<16x16x32xf32> to vector<256x32xf32>
    %22 = vector.extract_strided_slice %9 {offsets = [2, 0, 0], sizes = [16, 16, 32], strides = [1, 1, 1]} : vector<18x18x32xf32> to vector<16x16x32xf32>
    %23 = vector.shape_cast %22 : vector<16x16x32xf32> to vector<256x32xf32>
    %24 = vector.extract_strided_slice %9 {offsets = [2, 1, 0], sizes = [16, 16, 32], strides = [1, 1, 1]} : vector<18x18x32xf32> to vector<16x16x32xf32>
    %25 = vector.shape_cast %24 : vector<16x16x32xf32> to vector<256x32xf32>
    %26 = vector.extract_strided_slice %9 {offsets = [2, 2, 0], sizes = [16, 16, 32], strides = [1, 1, 1]} : vector<18x18x32xf32> to vector<16x16x32xf32>
    %27 = vector.shape_cast %26 : vector<16x16x32xf32> to vector<256x32xf32>
    %28 = tpu.concatenate %11, %13, %15, %17, %19, %21, %23, %25, %27 in 1 : vector<256x32xf32>, vector<256x32xf32>, vector<256x32xf32>, vector<256x32xf32>, vector<256x32xf32>, vector<256x32xf32>, vector<256x32xf32>, vector<256x32xf32>, vector<256x32xf32> -> vector<256x288xf32>
    %c0_2 = arith.constant 0 : index
    %c0_3 = arith.constant 0 : index
    %29 = vector.load %arg3[%c0_2, %c0_3] : memref<288x32xf32, #tpu.memory_space<vmem>>, vector<288x32xf32>
    %cst = arith.constant dense<0.000000e+00> : vector<256x32xf32>
    %30 = tpu.matmul %28, %29, %cst {dimension_numbers = #tpu.dot_dimension_numbers<[1], [0], [0], [1], [0, 0, 1, 1], [], []>} : vector<256x288xf32>, vector<288x32xf32>, vector<256x32xf32> -> vector<256x32xf32>
    %c0_4 = arith.constant 0 : index
    %c0_5 = arith.constant 0 : index
    %31 = vector.load %arg4[%c0_4, %c0_5] : memref<1x32xf32, #tpu.memory_space<vmem>>, vector<1x32xf32>
    %32 = vector.broadcast %31 : vector<1x32xf32> to vector<256x32xf32>
    %33 = arith.addf %30, %32 : vector<256x32xf32>
    %cst_6 = arith.constant 0.000000e+00 : f32
    %34 = vector.broadcast %cst_6 : f32 to vector<256x32xf32>
    %35 = arith.cmpf oge, %33, %34 : vector<256x32xf32>
    %cst_7 = arith.constant 2.000000e-01 : f32
    %36 = vector.broadcast %cst_7 : f32 to vector<256x32xf32>
    %37 = arith.mulf %36, %33 : vector<256x32xf32>
    %38 = arith.select %35, %33, %37 : vector<256x32xi1>, vector<256x32xf32>
    %39 = arith.mulf %38, %38 : vector<256x32xf32>
    %cst_8 = arith.constant dense<0.000000e+00> : vector<256xf32>
    %40 = vector.multi_reduction <add>, %39, %cst_8 [1] : vector<256x32xf32> to vector<256xf32>
    %41 = vector.shape_cast %40 : vector<256xf32> to vector<256x1xf32>
    %cst_9 = arith.constant 3.200000e+01 : f32
    %42 = vector.broadcast %cst_9 : f32 to vector<256x1xf32>
    %43 = arith.divf %41, %42 : vector<256x1xf32>
    %cst_10 = arith.constant 9.99999993E-9 : f32
    %44 = vector.broadcast %cst_10 : f32 to vector<256x1xf32>
    %45 = arith.addf %43, %44 : vector<256x1xf32>
    %46 = math.rsqrt %45 : vector<256x1xf32>
    %47 = vector.broadcast %46 : vector<256x1xf32> to vector<256x32xf32>
    %48 = arith.mulf %38, %47 : vector<256x32xf32>
    %49 = vector.shape_cast %48 : vector<256x32xf32> to vector<16x16x32xf32>
    %c0_11 = arith.constant 0 : index
    %c0_12 = arith.constant 0 : index
    %c0_13 = arith.constant 0 : index
    %c0_14 = arith.constant 0 : index
    %50 = vector.load %arg5[%c0_11, %c0_12, %c0_13, %c0_14] : memref<1x16x16x32xf32, #tpu.memory_space<vmem>>, vector<1x16x16x32xf32>
    %51 = vector.shape_cast %50 : vector<1x16x16x32xf32> to vector<16x16x32xf32>
    %52 = vector.shape_cast %49 : vector<16x16x32xf32> to vector<1x16x16x32xf32>
    tpu.vector_store %arg5[%c0_11, %c0_12, %c0_13, %c0_14], %52 {strides = array<i32>} : memref<1x16x16x32xf32, #tpu.memory_space<vmem>>, vector<1x16x16x32xf32>,
    return
  }
  func.func @transform_0(%arg0: i32, %arg1: i32) -> (i32, i32, i32, i32) {
    %c0_i32 = arith.constant 0 : i32
    %c0_i32_0 = arith.constant 0 : i32
    %c0_i32_1 = arith.constant 0 : i32
    %c0_i32_2 = arith.constant 0 : i32
    return %arg0, %c0_i32, %c0_i32_0, %c0_i32_1 : i32, i32, i32, i32
  }
  func.func @transform_1(%arg0: i32, %arg1: i32) -> (i32, i32) {
    %c0_i32 = arith.constant 0 : i32
    %c0_i32_0 = arith.constant 0 : i32
    %c0_i32_1 = arith.constant 0 : i32
    return %c0_i32, %c0_i32_0 : i32, i32
  }
  func.func @transform_2(%arg0: i32, %arg1: i32) -> (i32, i32) {
    %c0_i32 = arith.constant 0 : i32
    %c0_i32_0 = arith.constant 0 : i32
    %c0_i32_1 = arith.constant 0 : i32
    return %c0_i32, %c0_i32_0 : i32, i32
  }
  func.func @transform_3(%arg0: i32, %arg1: i32) -> (i32, i32, i32, i32) {
    %c0_i32 = arith.constant 0 : i32
    %c0_i32_0 = arith.constant 0 : i32
    %c0_i32_1 = arith.constant 0 : i32
    return %arg0, %arg1, %c0_i32, %c0_i32_0 : i32, i32, i32, i32
  }
}

module attributes {stable_mosaic.version = 11 : i64} {
  func.func @_rgb_blend_tanh_kernel(%arg0: i32, %arg1: i32, %arg2: memref<1xf32, #tpu.memory_space<smem>>, %arg3: memref<1x16x16x32xf32, #tpu.memory_space<vmem>>, %arg4: memref<1x8x16x32xf32, #tpu.memory_space<vmem>>, %arg5: memref<64x3xf32, #tpu.memory_space<vmem>>, %arg6: memref<1x3xf32, #tpu.memory_space<vmem>>, %arg7: memref<1x3xf32, #tpu.memory_space<vmem>>, %arg8: memref<1x16x16x3xf32, #tpu.memory_space<vmem>>) attributes {dimension_semantics = [#tpu.dimension_semantics<parallel>, #tpu.dimension_semantics<parallel>], iteration_bounds = array<i64: 2, 1>, scalar_prefetch = 0 : i64, scratch_operands = 0 : i64, tpu.core_type = #tpu.core_type<tc>, window_params = [{transform_indices = @transform_0, window_bounds = array<i64: 1>}, {transform_indices = @transform_1, window_bounds = array<i64: 1, 16, 16, 32>}, {transform_indices = @transform_2, window_bounds = array<i64: 1, 8, 16, 32>}, {pipeline_mode = #tpu.pipeline_mode<synchronous>, transform_indices = @transform_3, window_bounds = array<i64: 64, 3>}, {pipeline_mode = #tpu.pipeline_mode<synchronous>, transform_indices = @transform_4, window_bounds = array<i64: 1, 3>}, {pipeline_mode = #tpu.pipeline_mode<synchronous>, transform_indices = @transform_5, window_bounds = array<i64: 1, 3>}, {transform_indices = @transform_6, window_bounds = array<i64: 1, 16, 16, 3>}]} {
    %c0 = arith.constant 0 : index
    %0 = memref.load %arg2[%c0] : memref<1xf32, #tpu.memory_space<smem>>
    %c0_0 = arith.constant 0 : index
    %c0_1 = arith.constant 0 : index
    %c0_2 = arith.constant 0 : index
    %c0_3 = arith.constant 0 : index
    %1 = vector.load %arg3[%c0_0, %c0_1, %c0_2, %c0_3] : memref<1x16x16x32xf32, #tpu.memory_space<vmem>>, vector<1x16x16x32xf32>
    %2 = vector.shape_cast %1 : vector<1x16x16x32xf32> to vector<16x16x32xf32>
    %3 = vector.shape_cast %2 : vector<16x16x32xf32> to vector<256x32xf32>
    %c0_4 = arith.constant 0 : index
    %c0_5 = arith.constant 0 : index
    %c0_6 = arith.constant 0 : index
    %c0_7 = arith.constant 0 : index
    %4 = vector.load %arg4[%c0_4, %c0_5, %c0_6, %c0_7] : memref<1x8x16x32xf32, #tpu.memory_space<vmem>>, vector<1x8x16x32xf32>
    %5 = vector.shape_cast %4 : vector<1x8x16x32xf32> to vector<8x16x32xf32>
    %6 = vector.shape_cast %5 : vector<8x16x32xf32> to vector<8x1x16x32xf32>
    %7 = vector.shape_cast %6 : vector<8x1x16x32xf32> to vector<8x1x16x32xf32>
    %8 = vector.broadcast %7 : vector<8x1x16x32xf32> to vector<8x2x16x32xf32>
    %9 = vector.shape_cast %8 : vector<8x2x16x32xf32> to vector<16x16x32xf32>
    %10 = vector.shape_cast %9 : vector<16x16x32xf32> to vector<256x32xf32>
    %11 = vector.broadcast %0 : f32 to vector<256x32xf32>
    %12 = arith.mulf %11, %3 : vector<256x32xf32>
    %cst = arith.constant 1.000000e+00 : f32
    %13 = arith.subf %cst, %0 : f32
    %14 = vector.broadcast %13 : f32 to vector<256x32xf32>
    %15 = arith.mulf %14, %10 : vector<256x32xf32>
    %16 = tpu.concatenate %12, %15 in 1 : vector<256x32xf32>, vector<256x32xf32> -> vector<256x64xf32>
    %c0_8 = arith.constant 0 : index
    %c0_9 = arith.constant 0 : index
    %17 = vector.load %arg5[%c0_8, %c0_9] : memref<64x3xf32, #tpu.memory_space<vmem>>, vector<64x3xf32>
    %cst_10 = arith.constant dense<0.000000e+00> : vector<256x3xf32>
    %18 = tpu.matmul %16, %17, %cst_10 {dimension_numbers = #tpu.dot_dimension_numbers<[1], [0], [0], [1], [0, 0, 1, 1], [], []>} : vector<256x64xf32>, vector<64x3xf32>, vector<256x3xf32> -> vector<256x3xf32>
    %c0_11 = arith.constant 0 : index
    %c0_12 = arith.constant 0 : index
    %19 = vector.load %arg6[%c0_11, %c0_12] : memref<1x3xf32, #tpu.memory_space<vmem>>, vector<1x3xf32>
    %20 = vector.broadcast %0 : f32 to vector<1x3xf32>
    %21 = arith.mulf %20, %19 : vector<1x3xf32>
    %cst_13 = arith.constant 1.000000e+00 : f32
    %22 = arith.subf %cst_13, %0 : f32
    %c0_14 = arith.constant 0 : index
    %c0_15 = arith.constant 0 : index
    %23 = vector.load %arg7[%c0_14, %c0_15] : memref<1x3xf32, #tpu.memory_space<vmem>>, vector<1x3xf32>
    %24 = vector.broadcast %22 : f32 to vector<1x3xf32>
    %25 = arith.mulf %24, %23 : vector<1x3xf32>
    %26 = arith.addf %21, %25 : vector<1x3xf32>
    %27 = vector.broadcast %26 : vector<1x3xf32> to vector<256x3xf32>
    %28 = arith.addf %18, %27 : vector<256x3xf32>
    %29 = math.tanh %28 : vector<256x3xf32>
    %30 = vector.shape_cast %29 : vector<256x3xf32> to vector<16x16x3xf32>
    %c0_16 = arith.constant 0 : index
    %c0_17 = arith.constant 0 : index
    %c0_18 = arith.constant 0 : index
    %c0_19 = arith.constant 0 : index
    %31 = vector.load %arg8[%c0_16, %c0_17, %c0_18, %c0_19] : memref<1x16x16x3xf32, #tpu.memory_space<vmem>>, vector<1x16x16x3xf32>
    %32 = vector.shape_cast %31 : vector<1x16x16x3xf32> to vector<16x16x3xf32>
    %33 = vector.shape_cast %30 : vector<16x16x3xf32> to vector<1x16x16x3xf32>
    tpu.vector_store %arg8[%c0_16, %c0_17, %c0_18, %c0_19], %33 {strides = array<i32>} : memref<1x16x16x3xf32, #tpu.memory_space<vmem>>, vector<1x16x16x3xf32>,
    return
  }
  func.func @transform_0(%arg0: i32, %arg1: i32) -> i32 {
    %c0_i32 = arith.constant 0 : i32
    %c0_i32_0 = arith.constant 0 : i32
    return %c0_i32 : i32
  }
  func.func @transform_1(%arg0: i32, %arg1: i32) -> (i32, i32, i32, i32) {
    %c0_i32 = arith.constant 0 : i32
    %c0_i32_0 = arith.constant 0 : i32
    %c0_i32_1 = arith.constant 0 : i32
    return %arg0, %arg1, %c0_i32, %c0_i32_0 : i32, i32, i32, i32
  }
  func.func @transform_2(%arg0: i32, %arg1: i32) -> (i32, i32, i32, i32) {
    %c0_i32 = arith.constant 0 : i32
    %c0_i32_0 = arith.constant 0 : i32
    %c0_i32_1 = arith.constant 0 : i32
    return %arg0, %arg1, %c0_i32, %c0_i32_0 : i32, i32, i32, i32
  }
  func.func @transform_3(%arg0: i32, %arg1: i32) -> (i32, i32) {
    %c0_i32 = arith.constant 0 : i32
    %c0_i32_0 = arith.constant 0 : i32
    %c0_i32_1 = arith.constant 0 : i32
    return %c0_i32, %c0_i32_0 : i32, i32
  }
  func.func @transform_4(%arg0: i32, %arg1: i32) -> (i32, i32) {
    %c0_i32 = arith.constant 0 : i32
    %c0_i32_0 = arith.constant 0 : i32
    %c0_i32_1 = arith.constant 0 : i32
    return %c0_i32, %c0_i32_0 : i32, i32
  }
  func.func @transform_5(%arg0: i32, %arg1: i32) -> (i32, i32) {
    %c0_i32 = arith.constant 0 : i32
    %c0_i32_0 = arith.constant 0 : i32
    %c0_i32_1 = arith.constant 0 : i32
    return %c0_i32, %c0_i32_0 : i32, i32
  }
  func.func @transform_6(%arg0: i32, %arg1: i32) -> (i32, i32, i32, i32) {
    %c0_i32 = arith.constant 0 : i32
    %c0_i32_0 = arith.constant 0 : i32
    %c0_i32_1 = arith.constant 0 : i32
    return %arg0, %arg1, %c0_i32, %c0_i32_0 : i32, i32, i32, i32
  }
}

module attributes {stable_mosaic.version = 11 : i64} {
  func.func @_conv3x3_kernel(%arg0: i32, %arg1: i32, %arg2: memref<1x18x18x32xf32, #tpu.memory_space<vmem>>, %arg3: memref<288x32xf32, #tpu.memory_space<vmem>>, %arg4: memref<1x32xf32, #tpu.memory_space<vmem>>, %arg5: memref<1x16x16x32xf32, #tpu.memory_space<vmem>>) attributes {dimension_semantics = [#tpu.dimension_semantics<parallel>, #tpu.dimension_semantics<parallel>], iteration_bounds = array<i64: 2, 1>, scalar_prefetch = 0 : i64, scratch_operands = 0 : i64, tpu.core_type = #tpu.core_type<tc>, window_params = [{transform_indices = @transform_0, window_bounds = array<i64: 1, 18, 18, 32>}, {pipeline_mode = #tpu.pipeline_mode<synchronous>, transform_indices = @transform_1, window_bounds = array<i64: 288, 32>}, {pipeline_mode = #tpu.pipeline_mode<synchronous>, transform_indices = @transform_2, window_bounds = array<i64: 1, 32>}, {transform_indices = @transform_3, window_bounds = array<i64: 1, 16, 16, 32>}]} {
    %c16_i32 = arith.constant 16 : i32
    %0 = arith.muli %arg1, %c16_i32 : i32
    %1 = tpu.assume_multiple %0, 16 : i32
    %c0 = arith.constant 0 : index
    %2 = arith.index_cast %1 : i32 to index
    %c0_0 = arith.constant 0 : index
    %c0_1 = arith.constant 0 : index
    %3 = vector.load %arg2[%c0, %2, %c0_0, %c0_1] : memref<1x18x18x32xf32, #tpu.memory_space<vmem>>, vector<1x18x18x32xf32>
    %4 = vector.shape_cast %3 : vector<1x18x18x32xf32> to vector<18x18x32xf32>
    %5 = vector.extract_strided_slice %4 {offsets = [0, 0, 0], sizes = [16, 16, 32], strides = [1, 1, 1]} : vector<18x18x32xf32> to vector<16x16x32xf32>
    %6 = vector.shape_cast %5 : vector<16x16x32xf32> to vector<256x32xf32>
    %7 = vector.extract_strided_slice %4 {offsets = [0, 1, 0], sizes = [16, 16, 32], strides = [1, 1, 1]} : vector<18x18x32xf32> to vector<16x16x32xf32>
    %8 = vector.shape_cast %7 : vector<16x16x32xf32> to vector<256x32xf32>
    %9 = vector.extract_strided_slice %4 {offsets = [0, 2, 0], sizes = [16, 16, 32], strides = [1, 1, 1]} : vector<18x18x32xf32> to vector<16x16x32xf32>
    %10 = vector.shape_cast %9 : vector<16x16x32xf32> to vector<256x32xf32>
    %11 = vector.extract_strided_slice %4 {offsets = [1, 0, 0], sizes = [16, 16, 32], strides = [1, 1, 1]} : vector<18x18x32xf32> to vector<16x16x32xf32>
    %12 = vector.shape_cast %11 : vector<16x16x32xf32> to vector<256x32xf32>
    %13 = vector.extract_strided_slice %4 {offsets = [1, 1, 0], sizes = [16, 16, 32], strides = [1, 1, 1]} : vector<18x18x32xf32> to vector<16x16x32xf32>
    %14 = vector.shape_cast %13 : vector<16x16x32xf32> to vector<256x32xf32>
    %15 = vector.extract_strided_slice %4 {offsets = [1, 2, 0], sizes = [16, 16, 32], strides = [1, 1, 1]} : vector<18x18x32xf32> to vector<16x16x32xf32>
    %16 = vector.shape_cast %15 : vector<16x16x32xf32> to vector<256x32xf32>
    %17 = vector.extract_strided_slice %4 {offsets = [2, 0, 0], sizes = [16, 16, 32], strides = [1, 1, 1]} : vector<18x18x32xf32> to vector<16x16x32xf32>
    %18 = vector.shape_cast %17 : vector<16x16x32xf32> to vector<256x32xf32>
    %19 = vector.extract_strided_slice %4 {offsets = [2, 1, 0], sizes = [16, 16, 32], strides = [1, 1, 1]} : vector<18x18x32xf32> to vector<16x16x32xf32>
    %20 = vector.shape_cast %19 : vector<16x16x32xf32> to vector<256x32xf32>
    %21 = vector.extract_strided_slice %4 {offsets = [2, 2, 0], sizes = [16, 16, 32], strides = [1, 1, 1]} : vector<18x18x32xf32> to vector<16x16x32xf32>
    %22 = vector.shape_cast %21 : vector<16x16x32xf32> to vector<256x32xf32>
    %23 = tpu.concatenate %6, %8, %10, %12, %14, %16, %18, %20, %22 in 1 : vector<256x32xf32>, vector<256x32xf32>, vector<256x32xf32>, vector<256x32xf32>, vector<256x32xf32>, vector<256x32xf32>, vector<256x32xf32>, vector<256x32xf32>, vector<256x32xf32> -> vector<256x288xf32>
    %c0_2 = arith.constant 0 : index
    %c0_3 = arith.constant 0 : index
    %24 = vector.load %arg3[%c0_2, %c0_3] : memref<288x32xf32, #tpu.memory_space<vmem>>, vector<288x32xf32>
    %cst = arith.constant dense<0.000000e+00> : vector<256x32xf32>
    %25 = tpu.matmul %23, %24, %cst {dimension_numbers = #tpu.dot_dimension_numbers<[1], [0], [0], [1], [0, 0, 1, 1], [], []>} : vector<256x288xf32>, vector<288x32xf32>, vector<256x32xf32> -> vector<256x32xf32>
    %c0_4 = arith.constant 0 : index
    %c0_5 = arith.constant 0 : index
    %26 = vector.load %arg4[%c0_4, %c0_5] : memref<1x32xf32, #tpu.memory_space<vmem>>, vector<1x32xf32>
    %27 = vector.broadcast %26 : vector<1x32xf32> to vector<256x32xf32>
    %28 = arith.addf %25, %27 : vector<256x32xf32>
    %cst_6 = arith.constant 0.000000e+00 : f32
    %29 = vector.broadcast %cst_6 : f32 to vector<256x32xf32>
    %30 = arith.cmpf oge, %28, %29 : vector<256x32xf32>
    %cst_7 = arith.constant 2.000000e-01 : f32
    %31 = vector.broadcast %cst_7 : f32 to vector<256x32xf32>
    %32 = arith.mulf %31, %28 : vector<256x32xf32>
    %33 = arith.select %30, %28, %32 : vector<256x32xi1>, vector<256x32xf32>
    %34 = arith.mulf %33, %33 : vector<256x32xf32>
    %cst_8 = arith.constant dense<0.000000e+00> : vector<256xf32>
    %35 = vector.multi_reduction <add>, %34, %cst_8 [1] : vector<256x32xf32> to vector<256xf32>
    %36 = vector.shape_cast %35 : vector<256xf32> to vector<256x1xf32>
    %cst_9 = arith.constant 3.200000e+01 : f32
    %37 = vector.broadcast %cst_9 : f32 to vector<256x1xf32>
    %38 = arith.divf %36, %37 : vector<256x1xf32>
    %cst_10 = arith.constant 9.99999993E-9 : f32
    %39 = vector.broadcast %cst_10 : f32 to vector<256x1xf32>
    %40 = arith.addf %38, %39 : vector<256x1xf32>
    %41 = math.rsqrt %40 : vector<256x1xf32>
    %42 = vector.broadcast %41 : vector<256x1xf32> to vector<256x32xf32>
    %43 = arith.mulf %33, %42 : vector<256x32xf32>
    %44 = vector.shape_cast %43 : vector<256x32xf32> to vector<16x16x32xf32>
    %c0_11 = arith.constant 0 : index
    %c0_12 = arith.constant 0 : index
    %c0_13 = arith.constant 0 : index
    %c0_14 = arith.constant 0 : index
    %45 = vector.load %arg5[%c0_11, %c0_12, %c0_13, %c0_14] : memref<1x16x16x32xf32, #tpu.memory_space<vmem>>, vector<1x16x16x32xf32>
    %46 = vector.shape_cast %45 : vector<1x16x16x32xf32> to vector<16x16x32xf32>
    %47 = vector.shape_cast %44 : vector<16x16x32xf32> to vector<1x16x16x32xf32>
    tpu.vector_store %arg5[%c0_11, %c0_12, %c0_13, %c0_14], %47 {strides = array<i32>} : memref<1x16x16x32xf32, #tpu.memory_space<vmem>>, vector<1x16x16x32xf32>,
    return
  }
  func.func @transform_0(%arg0: i32, %arg1: i32) -> (i32, i32, i32, i32) {
    %c0_i32 = arith.constant 0 : i32
    %c0_i32_0 = arith.constant 0 : i32
    %c0_i32_1 = arith.constant 0 : i32
    %c0_i32_2 = arith.constant 0 : i32
    return %arg0, %c0_i32, %c0_i32_0, %c0_i32_1 : i32, i32, i32, i32
  }
  func.func @transform_1(%arg0: i32, %arg1: i32) -> (i32, i32) {
    %c0_i32 = arith.constant 0 : i32
    %c0_i32_0 = arith.constant 0 : i32
    %c0_i32_1 = arith.constant 0 : i32
    return %c0_i32, %c0_i32_0 : i32, i32
  }
  func.func @transform_2(%arg0: i32, %arg1: i32) -> (i32, i32) {
    %c0_i32 = arith.constant 0 : i32
    %c0_i32_0 = arith.constant 0 : i32
    %c0_i32_1 = arith.constant 0 : i32
    return %c0_i32, %c0_i32_0 : i32, i32
  }
  func.func @transform_3(%arg0: i32, %arg1: i32) -> (i32, i32, i32, i32) {
    %c0_i32 = arith.constant 0 : i32
    %c0_i32_0 = arith.constant 0 : i32
    %c0_i32_1 = arith.constant 0 : i32
    return %arg0, %arg1, %c0_i32, %c0_i32_0 : i32, i32, i32, i32
  }
}

</mosaic_0001>

<bundles_post_ra>
// kernel: generator_forward.8
= control target key start
LH: loop header
LB: loop body
LE: loop exit
PB: predicated region body
PF: predicated region fallthrough
CT: control target
= control target key end

     0   :  { %vm69_vm0 = vcmask 261120   ;;  %s615_s1 = inlined_call_operand.vmem [shape: f32[288,32], index: 1, kind: input, shape index: {}]   ;;  %s616_s0 = inlined_call_operand.vmem [shape: f32[32,288], index: 0, kind: input, shape index: {}]   ;;  %s617_s2 = inlined_call_operand.vmem [shape: f32[1,32], index: 2, kind: input, shape index: {}]   ;;  %s618_s3 = inlined_call_operand.vmem [shape: f32[32,32], index: 3, kind: output, shape index: {}]  }
   0x1   :  { %v42_v0 = vld [vmem:[%s615_s1 + $0x80] sm:$0xff]  ;;  %v43_v1 = vld [vmem:[%s615_s1 + $0x88] sm:$0xff]  ;;  %v44_v5 = vld [vmem:[%s615_s1 + $0x90] sm:$0xff] }
   0x2   :  { %v26_v2 = vld [vmem:[%s615_s1] sm:$0xff]  ;;  %v376_v3 = vpack.c.bf16 %v43_v1, %v42_v0  ;;  %v27_v4 = vld [vmem:[%s615_s1 + $0x8] sm:$0xff]  ;;  %v45_v6 = vld [vmem:[%s615_s1 + $0x98] sm:$0xff] }
   0x3   :  { %v378_v7 = vpack.c.bf16 %v27_v4, %v26_v2  ;;  %v380_v8 = vpack.c.bf16 %v45_v6, %v44_v5  ;;  %v28_v9 = vld [vmem:[%s615_s1 + $0x10] sm:$0xff]  ;;  %v29_v10 = vld [vmem:[%s615_s1 + $0x18] sm:$0xff]  ;;  %v46_v11 = vld [vmem:[%s615_s1 + $0xa0] sm:$0xff] }
   0x4   :  { %377 = vmatprep.subr.bf16.mxu0 %v376_v3  ;;  %v47_v12 = vld [vmem:[%s615_s1 + $0xa8] sm:$0xff]  ;;  %v382_v13 = vpack.c.bf16 %v29_v10, %v28_v9  ;;  %v30_v15 = vld [vmem:[%s615_s1 + $0x20] sm:$0xff]  ;;  %v48_v17 = vld [vmem:[%s615_s1 + $0xb0] sm:$0xff] }
   0x5   :  { %379 = vmatpush3.bf16.msra.mxu0 %v378_v7  ;;  %v384_v14 = vpack.c.bf16 %v47_v12, %v46_v11  ;;  %v31_v16 = vld [vmem:[%s615_s1 + $0x28] sm:$0xff]  ;;  %v49_v18 = vld [vmem:[%s615_s1 + $0xb8] sm:$0xff]  ;;  %v32_v21 = vld [vmem:[%s615_s1 + $0x30] sm:$0xff] }
   0x6   :  { %381 = vmatprep.subr.bf16.mxu0 %v380_v8  ;;  %v386_v19 = vpack.c.bf16 %v31_v16, %v30_v15  ;;  %v388_v20 = vpack.c.bf16 %v49_v18, %v48_v17  ;;  %v33_v22 = vld [vmem:[%s615_s1 + $0x38] sm:$0xff]  ;;  %v50_v23 = vld [vmem:[%s615_s1 + $0xc0] sm:$0xff]  ;;  %v51_v24 = vld [vmem:[%s615_s1 + $0xc8] sm:$0xff] }
   0x7   :  { %v58_v25 = vld [vmem:[%s615_s1 + $0x100] sm:$0xff]  ;;  %v59_v26 = vld [vmem:[%s615_s1 + $0x108] sm:$0xff]  ;;  %v390_v29 = vpack.c.bf16 %v33_v22, %v32_v21  ;;  %v60_v30 = vld [vmem:[%s615_s1 + $0x110] sm:$0xff]  ;;  %v392_v32 = vpack.c.bf16 %v51_v24, %v50_v23 }
   0x8   :  { %v408_v27 = vpack.c.bf16 %v59_v26, %v58_v25  ;;  %v15_v28 = vld [vmem:[%s616_s0 + $0x8] sm:$0xff]  ;;  %v61_v31 = vld [vmem:[%s615_s1 + $0x118] sm:$0xff]  ;;  %v34_v33 = vld [vmem:[%s615_s1 + $0x40] sm:$0xff] }
   0x9   :  { %383 = vmatpush3.bf16.msra.mxu0 %v382_v13  ;;  %146 = vmatprep.mubr.f32.mxu0 %v15_v28  ;;  %v35_v34 = vld [vmem:[%s615_s1 + $0x48] sm:$0xff]  ;;  %v412_v35 = vpack.c.bf16 %v61_v31, %v60_v30  ;;  %v16_v36 = vld [vmem:[%s616_s0 + $0x10] sm:$0xff]  ;;  %v53_v38 = vld [vmem:[%s615_s1 + $0xd8] sm:$0xff] }
   0xa   :  { %385 = vmatprep.subr.bf16.mxu0 %v384_v14  ;;  %409 = vmatprep.subr.bf16.mxu1 %v408_v27  ;;  %v52_v37 = vld [vmem:[%s615_s1 + $0xd0] sm:$0xff]  ;;  %v394_v39 = vpack.c.bf16 %v35_v34, %v34_v33  ;;  %v37_v42 = vld [vmem:[%s615_s1 + $0x58] sm:$0xff]  ;;  %v54_v43 = vld [vmem:[%s615_s1 + $0xe0] sm:$0xff] }
   0xb   :  { %411 = vmatpush3.bf16.msra.mxu1 %v408_v27  ;;  %370 = vmatprep.mubr.msk.f32.mxu1 %vm69_vm0, %v16_v36  ;;  %v396_v40 = vpack.c.bf16 %v53_v38, %v52_v37  ;;  %v36_v41 = vld [vmem:[%s615_s1 + $0x50] sm:$0xff]  ;;  %v55_v44 = vld [vmem:[%s615_s1 + $0xe8] sm:$0xff]  ;;  %v22_v46 = vld [vmem:[%s616_s0 + $0x40] sm:$0xff] }
   0xc   :  { %413 = vmatprep.subr.bf16.mxu1 %v412_v35  ;;  %v19_v45 = vld [vmem:[%s616_s0 + $0x28] sm:$0xff]  ;;  %v398_v47 = vpack.c.bf16 %v37_v42, %v36_v41  ;;  %v400_v48 = vpack.c.bf16 %v55_v44, %v54_v43  ;;  %v38_v49 = vld [vmem:[%s615_s1 + $0x60] sm:$0xff]  ;;  %v56_v51 = vld [vmem:[%s615_s1 + $0xf0] sm:$0xff] }
   0xd   :  { %387 = vmatpush3.bf16.msra.mxu0 %v386_v19  ;;  %v39_v50 = vld [vmem:[%s615_s1 + $0x68] sm:$0xff]  ;;  %v57_v52 = vld [vmem:[%s615_s1 + $0xf8] sm:$0xff]  ;;  %v40_v56 = vld [vmem:[%s615_s1 + $0x70] sm:$0xff] }
   0xe   :  { %389 = vmatprep.subr.bf16.mxu0 %v388_v20  ;;  %v25_v53 = vld [vmem:[%s616_s0 + $0x58] sm:$0xff]  ;;  %v402_v54 = vpack.c.bf16 %v39_v50, %v38_v49  ;;  %v404_v55 = vpack.c.bf16 %v57_v52, %v56_v51  ;;  %v14_v59 = vld [vmem:[%s616_s0] sm:$0xff]  ;;  %v20_v63 = vld [vmem:[%s616_s0 + $0x30] sm:$0xff] }
   0xf   :  { %415 = vmatpush3.bf16.msra.mxu1 %v412_v35  ;;  %v41_v57 = vld [vmem:[%s615_s1 + $0x78] sm:$0xff]  ;;  %v18_v60 = vld [vmem:[%s616_s0 + $0x20] sm:$0xff]  ;;  %v24_v0 = vld [vmem:[%s616_s0 + $0x50] sm:$0xff] }
  0x10   :  { %v406_v58 = vpack.c.bf16 %v41_v57, %v40_v56  ;;  %v17_v61 = vld [vmem:[%s616_s0 + $0x18] sm:$0xff]  ;;  %v23_v1 = vld [vmem:[%s616_s0 + $0x48] sm:$0xff]  ;;  %v305_v8 = vld [vmem:[%s617_s2] ss:$0 sm:$0xff] }
  0x11   :  { %391 = vmatpush3.bf16.msra.mxu0 %v390_v29  ;;  %v21_v62 = vld [vmem:[%s616_s0 + $0x38] sm:$0xff] }
  0x12   :  { %393 = vmatprep.subr.bf16.mxu0 %v392_v32  ;;  %371 = vmatmul.mubr.msk.f32.vlgmr.msra.gmra.mrb[0].mxu1 %vm69_vm0, %v19_v45 }
  0x13   :  { %373 = vmatprep.mubr.msk.f32.mxu1 %vm69_vm0, %v22_v46 }
  0x15   :  { %395 = vmatpush3.bf16.msra.mxu0 %v394_v39 }
  0x16   :  { %397 = vmatprep.subr.bf16.mxu0 %v396_v40  ;;  %374 = vmatmul.mubr.msk.f32.gmra.mrb[2].mxu1 %vm69_vm0, %v25_v53 }
  0x19   :  { %399 = vmatpush3.bf16.msra.mxu0 %v398_v47 }
  0x1a   :  { %401 = vmatprep.subr.bf16.mxu0 %v400_v48 }
  0x1d   :  { %403 = vmatpush3.bf16.msra.mxu0 %v402_v54 }
  0x1e   :  { %405 = vmatprep.subr.bf16.mxu0 %v404_v55 }
  0x21   :  { %407 = vmatpush3.bf16.msra.mxu0 %v406_v58 }
  0x24   :  { %147 = vmatmul.mubr.f32.vlgmr.msra.gmra.mrb[0].mxu0 %v14_v59 }
  0x25   :  { %151 = vmatprep.mubr.f32.mxu0 %v18_v60 }
  0x28   :  { %152 = vmatmul.mubr.f32.gmra.mrb[2].mxu0 %v17_v61 }
  0x29   :  { %156 = vmatprep.mubr.f32.mxu0 %v21_v62 }
  0x2c   :  { %157 = vmatmul.mubr.f32.gmra.mrb[4].mxu0 %v20_v63 }
  0x2d   :  { %161 = vmatprep.mubr.f32.mxu0 %v24_v0 }
  0x30   :  { %162 = vmatmul.mubr.f32.gmra.mrb[6].mxu0 %v23_v1 }
  0xe5   :  { %v372_v2 = vpop.f32.mrb[0].mxu1 }
  0xe6   :  { %v233_v3 = vpop.f32.mrb[1].mxu1 }
  0xe9   :  { %v375_v4 = vpop.f32.mrb[2].mxu1 }
  0xea   :  { %v243_v5 = vpop.f32.mrb[3].mxu1 }
  0xf7   :  { %v342_v6 = vpop.f32.mrb[0].mxu0 }
  0xf8   :  { %v343_v7 = vpop.f32.mrb[1].mxu0 }
  0xf9   :  { %v344_v9 = vadd.f32 %v343_v7, %v342_v6 }
  0xfb   :  { %v345_v10 = vpop.f32.mrb[2].mxu0  ;;  %v149_v11 = vadd.f32 %v344_v9, %v305_v8 }
  0xfc   :  { %v346_v12 = vpop.f32.mrb[3].mxu0 }
  0xfd   :  { %v347_v13 = vadd.f32 %v346_v12, %v345_v10  ;;  %v234_v14 = vadd.f32 %v233_v3, %v149_v11 }
  0xff   :  { %v154_v15 = vadd.f32 %v347_v13, %v305_v8  ;;  %v256_v16 = vmul.f32 0.2, %v234_v14  ;;  %v348_v17 = vpop.f32.mrb[4].mxu0  ;;  %vm252_vm1 = vcmp.ge.f32.partialorder %v234_v14, 0.0 }
 0x100   :  { %v349_v18 = vpop.f32.mrb[5].mxu0 }
 0x101   :  { %v239_v19 = vadd.f32 %v372_v2, %v154_v15  ;;  %v350_v20 = vadd.f32 %v349_v18, %v348_v17  ;;  %v260_v21 = vsel %vm252_vm1, %v234_v14, %v256_v16 }
 0x102   :  { %v264_v22 = vmul.f32 %v260_v21, %v260_v21 }
 0x103   :  { %v351_v23 = vpop.f32.mrb[6].mxu0  ;;  %v159_v24 = vadd.f32 %v350_v20, %v305_v8  ;;  %vm253_vm2 = vcmp.ge.f32.partialorder %v239_v19, 0.0  ;;  %v257_v25 = vmul.f32 0.2, %v239_v19 }
 0x104   :  { %v352_v26 = vpop.f32.mrb[7].mxu0  ;;  %v268_v27 = vsel %vm69_vm0, %v264_v22, 0.0 }
 0x105   :  { %v244_v28 = vadd.f32 %v243_v5, %v159_v24  ;;  %v353_v29 = vadd.f32 %v352_v26, %v351_v23  ;;  %269 = vadd.xlane.f32.xlu0 %v268_v27  ;;  %v261_v30 = vsel %vm253_vm2, %v239_v19, %v257_v25 }
 0x106   :  { %v265_v31 = vmul.f32 %v261_v30, %v261_v30 }
 0x107   :  { %v258_v32 = vmul.f32 0.2, %v244_v28  ;;  %v164_v33 = vadd.f32 %v353_v29, %v305_v8  ;;  %vm254_vm3 = vcmp.ge.f32.partialorder %v244_v28, 0.0 }
 0x108   :  { %v271_v34 = vsel %vm69_vm0, %v265_v31, 0.0 }
 0x109   :  { %v249_v35 = vadd.f32 %v375_v4, %v164_v33  ;;  %272 = vadd.xlane.f32.xlu0 %v271_v34  ;;  %v262_v36 = vsel %vm254_vm3, %v244_v28, %v258_v32 }
 0x10a   :  { %v266_v37 = vmul.f32 %v262_v36, %v262_v36 }
 0x10b   :  { %vm255_vm4 = vcmp.ge.f32.partialorder %v249_v35, 0.0  ;;  %v259_v38 = vmul.f32 0.2, %v249_v35 }
 0x10c   :  { %v274_v39 = vsel %vm69_vm0, %v266_v37, 0.0 }
 0x10d   :  { %275 = vadd.xlane.f32.xlu1 %v274_v39  ;;  %v263_v40 = vsel %vm255_vm4, %v249_v35, %v259_v38 }
 0x10e   :  { %v267_v41 = vmul.f32 %v263_v40, %v263_v40 }
 0x110   :  { %v277_v42 = vsel %vm69_vm0, %v267_v41, 0.0 }
 0x111   :  { %278 = vadd.xlane.f32.xlu1 %v277_v42 }
 0x192   :  { %v270_v43 = vpop.xlane.xlu0 %269 }
 0x193   :  { %v281_v44 = vmul.f32 0.03125, %v270_v43 }
 0x195   :  { %v285_v45 = vadd.f32 1e-08, %v281_v44 }
 0x196   :  { %v273_v46 = vpop.xlane.xlu0 %272 }
 0x197   :  { %416 = vrsqrt.f32 %v285_v45  ;;  %v282_v47 = vmul.f32 0.03125, %v273_v46 }
 0x199   :  { %v286_v48 = vadd.f32 1e-08, %v282_v47 }
 0x19a   :  { %v276_v49 = vpop.xlane.xlu1 %275 }
 0x19b   :  { %418 = vrsqrt.f32 %v286_v48  ;;  %v283_v50 = vmul.f32 0.03125, %v276_v49 }
 0x19d   :  { %v287_v51 = vadd.f32 1e-08, %v283_v50 }
 0x19e   :  { %v279_v52 = vpop.xlane.xlu1 %278 }
 0x19f   :  { %420 = vrsqrt.f32 %v287_v51  ;;  %v284_v53 = vmul.f32 0.03125, %v279_v52 }
 0x1a1   :  { %v417_v54 = vpop.eup %416  ;;  %v288_v55 = vadd.f32 1e-08, %v284_v53 }
 0x1a2   :  { %v293_v56 = vmul.f32 %v417_v54, %v260_v21 }
 0x1a3   :  { %422 = vrsqrt.f32 %v288_v55 }
 0x1a4   :  { %297 = vst.msk [vmem:[%s618_s3] sm:$0xff] %vm69_vm0, %v293_v56 }
 0x1a5   :  { %v419_v57 = vpop.eup %418 }
 0x1a6   :  { %v294_v58 = vmul.f32 %v419_v57, %v261_v30 }
 0x1a8   :  { %298 = vst.msk [vmem:[%s618_s3 + $0x8] sm:$0xff] %vm69_vm0, %v294_v58 }
 0x1a9   :  { %v421_v59 = vpop.eup %420 }
 0x1aa   :  { %v295_v60 = vmul.f32 %v421_v59, %v262_v36 }
 0x1ac   :  { %299 = vst.msk [vmem:[%s618_s3 + $0x10] sm:$0xff] %vm69_vm0, %v295_v60 }
 0x1ad   :  { %v423_v61 = vpop.eup %422 }
 0x1ae   :  { %v296_v62 = vmul.f32 %v423_v61, %v263_v40 }
 0x1b0   :  { %300 = vst.msk [vmem:[%s618_s3 + $0x18] sm:$0xff] %vm69_vm0, %v296_v62 }

// kernel: generator_forward.9
= control target key start
LH: loop header
LB: loop body
LE: loop exit
PB: predicated region body
PF: predicated region fallthrough
CT: control target
= control target key end

     0   :  { %s1146_s12 = smov 0   ;;  %s1148_s13 = smov 0   ;;  %s1557_s0 = inlined_call_operand.vmem [shape: f32[2,6,10,32], index: 0, kind: input, shape index: {}]   ;;  %s1558_s1 = inlined_call_operand.vmem [shape: f32[288,32], index: 1, kind: input, shape index: {}]   ;;  %s1559_s2 = inlined_call_operand.vmem [shape: f32[1,32], index: 2, kind: input, shape index: {}]   ;;  %s1560_s3 = inlined_call_operand.vmem [shape: f32[2,8,8,32], index: 3, kind: output, shape index: {}]  }
   0x1   :  { %s1150_s14 = smov 0  }
   0x2 LB: > { %s25_s15 = sadd.s32 1, %s1117_s13  ;;  %p835_p0 = scmp.ge.s32.totalorder %s1121_s14, 1  ;;  %s1121_s14 = sphi %s1150_s14, %s13_s14   ;;  %s1117_s13 = sphi %s1148_s13, %s1562_s13   ;;  %s1113_s12 = sphi %s1146_s12, %s1561_s12  }
   0x3   : > { %p27_p1 = scmp.ge.s32.totalorder %s25_s15, 2  ;;  %p151_p2 = scmp.lt.s32.totalorder %s1121_s14, 3 }
   0x5   : > { %s1564_s15 = smov (%p27_p1, %s25_s15), 0  ;;  %p152_p3 = pnand %p835_p0, %p151_p2 }
   0x6   : > { %p179_p4 = scmp.lt.s32.totalorder (!%p152_p3), %s1113_s12, 1  ;;  %v404_v0 = vld [vmem:[%s1558_s1 + $0x80] sm:$0xff] (!%p152_p3)  ;;  %v405_v1 = vld [vmem:[%s1558_s1 + $0x88] sm:$0xff] (!%p152_p3)  ;;  %v406_v5 = vld [vmem:[%s1558_s1 + $0x90] sm:$0xff] (!%p152_p3)  ;;  %vm219_vm0 = vcmask (!%p152_p3), 1046528   ;;  %vm235_vm1 = vcmask (!%p152_p3), 1045504  }
   0x7   : > { %155 = sbr.rel (%p152_p3) target bundleno = 569 (0x239), region = 32  ;;  %v939_v2 = vpack.c.bf16 (!%p152_p3), %v405_v1, %v404_v0  ;;  %v388_v3 = vld [vmem:[%s1558_s1] sm:$0xff] (!%p152_p3)  ;;  %v389_v4 = vld [vmem:[%s1558_s1 + $0x8] sm:$0xff] (!%p152_p3)  ;;  %v407_v7 = vld [vmem:[%s1558_s1 + $0x98] sm:$0xff] (!%p152_p3)  ;;  %s1123_s10 = smov (!%p152_p3), 64   ;;  %vm347_vm2 = vcmask (!%p152_p3), 261120  }
   0x8   : > { %v941_v6 = vpack.c.bf16 (!%p152_p3), %v389_v4, %v388_v3  ;;  %v390_v8 = vld [vmem:[%s1558_s1 + $0x10] sm:$0xff] (!%p152_p3)  ;;  %v391_v9 = vld [vmem:[%s1558_s1 + $0x18] sm:$0xff] (!%p152_p3)  ;;  %v943_v10 = vpack.c.bf16 (!%p152_p3), %v407_v7, %v406_v5  ;;  %v408_v11 = vld [vmem:[%s1558_s1 + $0xa0] sm:$0xff] (!%p152_p3)  ;;  %s1124_s11 = smov (!%p152_p3), 32   ;;  %s1125_s16 = smov (!%p152_p3), 96   ;;  %vm359_vm3 = vcmask (!%p152_p3), 785408  }
   0x9   : > { %940 = vmatprep.subr.bf16.mxu0 (!%p152_p3), %v939_v2  ;;  %v409_v12 = vld [vmem:[%s1558_s1 + $0xa8] sm:$0xff] (!%p152_p3)  ;;  %979 = vmatprep.subr.bf16.mxu1 (!%p152_p3), %v939_v2  ;;  %v945_v13 = vpack.c.bf16 (!%p152_p3), %v391_v9, %v390_v8  ;;  %v392_v14 = vld [vmem:[%s1558_s1 + $0x20] sm:$0xff] (!%p152_p3)  ;;  %v410_v16 = vld [vmem:[%s1558_s1 + $0xb0] sm:$0xff] (!%p152_p3)  ;;  %vm353_vm4 = vcmask (!%p152_p3), 523264  }
   0xa   : > { %942 = vmatpush3.bf16.msra.mxu0 (!%p152_p3), %v941_v6  ;;  %v393_v15 = vld [vmem:[%s1558_s1 + $0x28] sm:$0xff] (!%p152_p3)  ;;  %987 = vmatpush3.bf16.msra.mxu1 (!%p152_p3), %v941_v6  ;;  %v947_v17 = vpack.c.bf16 (!%p152_p3), %v409_v12, %v408_v11  ;;  %v411_v18 = vld [vmem:[%s1558_s1 + $0xb8] sm:$0xff] (!%p152_p3)  ;;  %v394_v19 = vld [vmem:[%s1558_s1 + $0x30] sm:$0xff] (!%p152_p3) }
   0xb   : > { %944 = vmatprep.subr.bf16.mxu0 (!%p152_p3), %v943_v10  ;;  %v395_v20 = vld [vmem:[%s1558_s1 + $0x38] sm:$0xff] (!%p152_p3)  ;;  %980 = vmatprep.subr.bf16.mxu1 (!%p152_p3), %v943_v10  ;;  %v949_v24 = vpack.c.bf16 (!%p152_p3), %v393_v15, %v392_v14  ;;  %v951_v30 = vpack.c.bf16 (!%p152_p3), %v411_v18, %v410_v16  ;;  %v412_v32 = vld [vmem:[%s1558_s1 + $0xc0] sm:$0xff] (!%p152_p3)  ;;  %v413_v33 = vld [vmem:[%s1558_s1 + $0xc8] sm:$0xff] (!%p152_p3) }
   0xc   : > { %v953_v31 = vpack.c.bf16 (!%p152_p3), %v395_v20, %v394_v19  ;;  %v396_v39 = vld [vmem:[%s1558_s1 + $0x40] sm:$0xff] (!%p152_p3)  ;;  %v397_v40 = vld [vmem:[%s1558_s1 + $0x48] sm:$0xff] (!%p152_p3)  ;;  %v955_v59 = vpack.c.bf16 (!%p152_p3), %v413_v33, %v412_v32  ;;  %v414_v10 = vld [vmem:[%s1558_s1 + $0xd0] sm:$0xff] (!%p152_p3) }
   0xd   : > { %v957_v63 = vpack.c.bf16 (!%p152_p3), %v397_v40, %v396_v39  ;;  %v398_v14 = vld [vmem:[%s1558_s1 + $0x50] sm:$0xff] (!%p152_p3)  ;;  %v399_v15 = vld [vmem:[%s1558_s1 + $0x58] sm:$0xff] (!%p152_p3)  ;;  %v416_v16 = vld [vmem:[%s1558_s1 + $0xe0] sm:$0xff] (!%p152_p3) }
   0xe   : > { %s1566_s12 = smov (!%p179_p4, %s1113_s12), 1  ;;  %946 = vmatpush3.bf16.msra.mxu0 %v945_v13  ;;  %988 = vmatpush3.bf16.msra.mxu1 %v945_v13  ;;  %v415_v13 = vld [vmem:[%s1558_s1 + $0xd8] sm:$0xff]  ;;  %v418_v32 = vld [vmem:[%s1558_s1 + $0xf0] sm:$0xff] }
   0xf   : > { %s995_s9 = smul.u32 96, %s1566_s12  ;;  %948 = vmatprep.subr.bf16.mxu0 %v947_v17  ;;  %981 = vmatprep.subr.bf16.mxu1 %v947_v17  ;;  %v417_v17 = vld [vmem:[%s1558_s1 + $0xe8] sm:$0xff]  ;;  %v419_v33 = vld [vmem:[%s1558_s1 + $0xf8] sm:$0xff]  ;;  %v402_v39 = vld [vmem:[%s1558_s1 + $0x70] sm:$0xff] }
  0x10   : > { %v403_v40 = vld [vmem:[%s1558_s1 + $0x78] sm:$0xff] }
  0x11   : > { %s1218_s28 = scalar_lea.vmem %s1557_s0, %s995_s9 }
  0x12   : > { %v1221_v21 = vld [vmem:[%s1218_s28 + $0x20] sm:$0xff]  ;;  %v198_v26 = vld [vmem:[%s1218_s28 + $0x8] sm:$0x3]  ;;  %v1233_v27 = vld [vmem:[%s1218_s28 + $0x10] sm:$0xff]  ;;  %950 = vmatpush3.bf16.msra.mxu0 %v949_v24  ;;  %989 = vmatpush3.bf16.msra.mxu1 %v949_v24 }
  0x13   : > { %v1224_v22 = vld [vmem:[%s1218_s28 + $0x40] sm:$0xff]  ;;  %v200_v28 = vld [vmem:[%s1218_s28 + $0x18] sm:$0x3]  ;;  %v221_v34 = vrot.slane %v198_v26, 1  ;;  %v237_v36 = vrot.slane %v198_v26, 2  ;;  %v239_v37 = vrot.slane %v1233_v27, 2  ;;  %952 = vmatprep.subr.bf16.mxu0 %v951_v30  ;;  %982 = vmatprep.subr.bf16.mxu1 %v951_v30  ;;  %v959_v26 = vpack.c.bf16 %v415_v13, %v414_v10 }
  0x14   : > { %v1227_v23 = vld [vmem:[%s1218_s28] sm:$0xff]  ;;  %v1023_v25 = vpack.i.bf16 %v1224_v22, %v1221_v21  ;;  %v224_v35 = vrot.slane %v200_v28, 1  ;;  %v206_v38 = vld [vmem:[%s1218_s28 + $0x48] sm:$0x3]  ;;  %v240_v41 = vrot.slane %v200_v28, 2  ;;  %v223_v42 = vrot.slane %v1233_v27, 1 }
  0x15   : > { %v220_v29 = vrot.slane %v1227_v23, 1  ;;  %v236_v43 = vrot.slane %v1227_v23, 2  ;;  %v248_v44 = vrot.slane %v1224_v22, 2  ;;  %v202_v45 = vld [vmem:[%s1218_s28 + $0x28] sm:$0x3]  ;;  %v249_v47 = vrot.slane %v206_v38, 2 }
  0x16   : > { %1024 = vrot.lane.b32.xlu1 %v1023_v25, %s1123_s10  ;;  %v1258_v48 = vld [vmem:[%s1218_s28 + $0x30] sm:$0xff]  ;;  %v204_v49 = vld [vmem:[%s1218_s28 + $0x38] sm:$0x3]  ;;  %v242_v50 = vrot.slane %v1221_v21, 2  ;;  %v243_v51 = vrot.slane %v202_v45, 2  ;;  %v1263_v52 = vsel %vm235_vm1, %v239_v37, %v240_v41  ;;  %v1266_v53 = vsel %vm219_vm0, %v223_v42, %v224_v35  ;;  %954 = vmatpush3.bf16.msra.mxu0 %v953_v31  ;;  %v400_v30 = vld [vmem:[%s1558_s1 + $0x60] sm:$0xff] }
  0x17   : > { %v222_v46 = vsel %vm219_vm0, %v220_v29, %v221_v34  ;;  %v238_v54 = vsel %vm235_vm1, %v236_v43, %v237_v36  ;;  %v229_v55 = vrot.slane %v1258_v48, 1  ;;  %v1038_v57 = vpack.i.bf16 %v1233_v27, %v1266_v53  ;;  %v1291_v8 = vld [vmem:[%s1218_s28 + $0x50] sm:$0xff]  ;;  %v1294_v9 = vld [vmem:[%s1218_s28 + $0x58] sm:$0x3]  ;;  %990 = vmatpush3.bf16.msra.mxu1 %v953_v31  ;;  %956 = vmatprep.subr.bf16.mxu0 %v955_v59  ;;  %v401_v31 = vld [vmem:[%s1558_s1 + $0x68] sm:$0xff]  ;;  %s850_s28 = sshll.u32 %s1566_s12, 6 }
  0x18   : > { %v1028_v56 = vpack.i.bf16 %v222_v46, %v1263_v52  ;;  %v1274_v58 = vsel %vm235_vm1, %v248_v44, %v249_v47  ;;  %v1033_v60 = vpack.i.bf16 %v238_v54, %v1233_v27  ;;  %v230_v61 = vrot.slane %v204_v49, 1  ;;  %983 = vmatprep.subr.bf16.mxu1 %v955_v59  ;;  %v420_v42 = vld [vmem:[%s1558_s1 + $0x100] sm:$0xff]  ;;  %v421_v43 = vld [vmem:[%s1558_s1 + $0x108] sm:$0xff]  ;;  %s1522_s4 = scalar_lea.vmem %s1560_s3, %s850_s28 }
  0x19   : > { %v226_v62 = vrot.slane %v1221_v21, 1  ;;  %v1043_v0 = vpack.i.bf16 %v1266_v53, %v1274_v58  ;;  %v227_v1 = vrot.slane %v202_v45, 1  ;;  %v232_v2 = vrot.slane %v1224_v22, 1 }
  0x1a   : > { %1029 = vrot.lane.b32.xlu0 %v1028_v56, %s1124_s11  ;;  %1039 = vrot.lane.b32.xlu1 %v1038_v57, %s1125_s16  ;;  %v233_v3 = vrot.slane %v206_v38, 1  ;;  %v1284_v4 = vsel %vm219_vm0, %v229_v55, %v230_v61  ;;  %v1287_v5 = vsel %vm235_vm1, %v242_v50, %v243_v51  ;;  %v245_v6 = vrot.slane %v1258_v48, 2 }
  0x1b   : > { %v246_v7 = vrot.slane %v204_v49, 2  ;;  %v1300_v11 = vsel %vm219_vm0, %v226_v62, %v227_v1  ;;  %v1048_v18 = vpack.i.bf16 %v1287_v5, %v1284_v4  ;;  %v257_v20 = vrot.slane %v1291_v8, 1  ;;  %958 = vmatpush3.bf16.msra.mxu0 %v957_v63  ;;  %991 = vmatpush3.bf16.msra.mxu1 %v957_v63 }
  0x1c   : > { %v1303_v12 = vsel %vm219_vm0, %v232_v2, %v233_v3  ;;  %v258_v25 = vrot.slane %v1294_v9, 1  ;;  %v961_v28 = vpack.c.bf16 %v399_v15, %v398_v14  ;;  %v963_v29 = vpack.c.bf16 %v417_v17, %v416_v16  ;;  %960 = vmatprep.subr.bf16.mxu0 %v959_v26  ;;  %984 = vmatprep.subr.bf16.mxu1 %v959_v26 }
  0x1d   : > { %v1058_v19 = vpack.i.bf16 %v1303_v12, %v1300_v11  ;;  %v1328_v24 = vsel %vm235_vm1, %v245_v6, %v246_v7  ;;  %v1068_v35 = vpack.i.bf16 %v1300_v11, %v1303_v12  ;;  %v965_v37 = vpack.c.bf16 %v401_v31, %v400_v30 }
  0x1e   : > { %1034 = vrot.lane.b32.xlu0 %v1033_v60, %s1123_s10  ;;  %1044 = vrot.lane.b32.xlu1 %v1043_v0, %s1124_s11  ;;  %v1053_v34 = vpack.i.bf16 %v1328_v24, %v1263_v52  ;;  %v259_v36 = vsel %vm219_vm0, %v257_v20, %v258_v25  ;;  %v967_v38 = vpack.c.bf16 %v419_v33, %v418_v32  ;;  %v260_v49 = vrot.slane %v1291_v8, 2 }
  0x1f   : > { %962 = vmatpush3.bf16.msra.mxu0 %v961_v28  ;;  %992 = vmatpush3.bf16.msra.mxu1 %v961_v28  ;;  %v1063_v41 = vpack.i.bf16 %v259_v36, %v1224_v22  ;;  %v969_v44 = vpack.c.bf16 %v403_v40, %v402_v39  ;;  %v1365_v45 = vpack.c.bf16 %v421_v43, %v420_v42  ;;  %v261_v50 = vrot.slane %v1294_v9, 2 }
  0x20   : > { %964 = vmatprep.subr.bf16.mxu0 %v963_v29  ;;  %985 = vmatprep.subr.bf16.mxu1 %v963_v29  ;;  %v1073_v46 = vpack.i.bf16 %v1274_v58, %v1291_v8  ;;  %v1078_v47 = vpack.i.bf16 %v1287_v5, %v1258_v48 }
  0x21   : > { %v1384_v51 = vsel %vm235_vm1, %v260_v49, %v261_v50 }
  0x22   : > { %1049 = vrot.lane.b32.xlu0 %v1048_v18, %s1124_s11  ;;  %1059 = vrot.lane.b32.xlu1 %v1058_v19, %s1125_s16 }
  0x23   : > { %966 = vmatpush3.bf16.msra.mxu0 %v965_v37  ;;  %993 = vmatpush3.bf16.msra.mxu1 %v965_v37  ;;  %v422_v37 = vld [vmem:[%s1558_s1 + $0x110] sm:$0xff] }
  0x24   : > { %968 = vmatprep.subr.bf16.mxu0 %v967_v38  ;;  %986 = vmatprep.subr.bf16.mxu1 %v967_v38 }
  0x26   : > { %1054 = vrot.lane.b32.xlu0 %v1053_v34, %s1123_s10  ;;  %1069 = vrot.lane.b32.xlu1 %v1068_v35, %s1124_s11 }
  0x27   : > { %970 = vmatpush3.bf16.msra.mxu0 %v969_v44  ;;  %994 = vmatpush3.bf16.msra.mxu1 %v969_v44 }
  0x28   : > { %972 = vmatprep.subr.bf16.mxu1 %v1365_v45 }
  0x2a   : > { %1064 = vrot.lane.b32.xlu0 %v1063_v41, %s1125_s16  ;;  %295 = vrot.lane.b32.xlu1 %v1221_v21, %s1125_s16 }
  0x2e   : > { %1074 = vrot.lane.b32.xlu0 %v1073_v46, %s1123_s10  ;;  %336 = vrot.lane.b32.xlu1 %v1284_v4, %s1125_s16 }
  0x32   : > { %1079 = vrot.lane.b32.xlu0 %v1078_v47, %s1123_s10  ;;  %297 = vrot.lane.b32.xlu1 %v1258_v48, %s1125_s16 }
  0x36   : > { %309 = vrot.lane.b32.xlu0 %v1328_v24, %s1124_s11 }
  0x88   : > { %v1388_v54 = vpop.permute.xlu1 %1024 }
  0x89   : > { %v1026_v3 = vunpack.i.l.bf16 %v1388_v54  ;;  %v1027_v13 = vunpack.i.h.bf16 %v1388_v54 }
  0x8c   : > { %v1030_v55 = vpop.permute.xlu0 %1029  ;;  %v1040_v56 = vpop.permute.xlu1 %1039 }
  0x8d   : > { %v1032_v57 = vunpack.i.h.bf16 %v1030_v55  ;;  %v1031_v59 = vunpack.i.l.bf16 %v1030_v55  ;;  %v1042_v60 = vunpack.i.h.bf16 %v1040_v56  ;;  %v1041_v61 = vunpack.i.l.bf16 %v1040_v56 }
  0x8f   : > { %v368_v6 = vsel %vm347_vm2, %v1266_v53, %v1031_v59  ;;  %v348_v7 = vsel %vm347_vm2, %v1227_v23, %v1032_v57 }
  0x90   : > { %v1035_v62 = vpop.permute.xlu0 %1034  ;;  %v1045_v63 = vpop.permute.xlu1 %1044  ;;  %v373_v20 = vsel %vm353_vm4, %v368_v6, %v1026_v3 }
  0x91   : > { %v1037_v0 = vunpack.i.h.bf16 %v1035_v62  ;;  %v1036_v1 = vunpack.i.l.bf16 %v1035_v62  ;;  %v1046_v2 = vunpack.i.l.bf16 %v1045_v63  ;;  %v1047_v14 = vunpack.i.h.bf16 %v1045_v63 }
  0x93   : > { %v372_v8 = vsel %vm353_vm4, %v368_v6, %v1036_v1  ;;  %v354_v9 = vsel %vm353_vm4, %v348_v7, %v1037_v0  ;;  %v371_v10 = vsel %vm347_vm2, %v1303_v12, %v1046_v2  ;;  %v349_v31 = vsel %vm347_vm2, %v1233_v27, %v1047_v14 }
  0x94   : > { %v1050_v15 = vpop.permute.xlu0 %1049  ;;  %v1400_v16 = vpop.permute.xlu1 %1059  ;;  %v380_v17 = vsel %vm359_vm3, %v372_v8, %v1041_v61  ;;  %v360_v53 = vsel %vm359_vm3, %v354_v9, %v1042_v60  ;;  %v378_v12 = vsel %vm353_vm4, %v371_v10, %v1027_v13 }
  0x95   : > { %v1052_v18 = vunpack.i.h.bf16 %v1050_v15  ;;  %v1062_v23 = vunpack.i.h.bf16 %v1400_v16  ;;  %v1061_v19 = vunpack.i.l.bf16 %v1400_v16  ;;  %505 = vmatprep.mubr.f32.mxu0 %v380_v17  ;;  %v1051_v32 = vunpack.i.l.bf16 %v1050_v15 }
  0x96   : > { %506 = vmatmul.mubr.f32.vlgmr.msra.gmra.mrb[0].mxu0 %v360_v53 }
  0x97   : > { %v381_v25 = vsel %vm359_vm3, %v373_v20, %v1061_v19  ;;  %v386_v26 = vsel %vm359_vm3, %v378_v12, %v1062_v23  ;;  %v369_v28 = vsel %vm347_vm2, %v1300_v11, %v1052_v18  ;;  %v423_v11 = vld [vmem:[%s1558_s1 + $0x118] sm:$0xff]  ;;  %v351_v43 = vsel %vm347_vm2, %v1258_v48, %v1051_v32 }
  0x98   : > { %v1055_v29 = vpop.permute.xlu0 %1054  ;;  %v1070_v30 = vpop.permute.xlu1 %1069  ;;  %510 = vmatprep.mubr.f32.mxu0 %v381_v25  ;;  %535 = vmatprep.mubr.f32.mxu1 %v386_v26  ;;  %v374_v35 = vsel %vm353_vm4, %v369_v28, %v1026_v3  ;;  %v975_v46 = vpack.c.bf16 %v423_v11, %v422_v37 }
  0x99   : > { %v1056_v33 = vunpack.i.l.bf16 %v1055_v29  ;;  %v1057_v34 = vunpack.i.h.bf16 %v1055_v29  ;;  %v1071_v38 = vunpack.i.l.bf16 %v1070_v30  ;;  %v382_v42 = vsel %vm359_vm3, %v374_v35, %v1061_v19 }
  0x9a   : > { %v1072_v59 = vunpack.i.h.bf16 %v1070_v30 }
  0x9b   : > { %v355_v36 = vsel %vm353_vm4, %v349_v31, %v1056_v33  ;;  %v357_v44 = vsel %vm353_vm4, %v351_v43, %v1057_v34  ;;  %v352_v55 = vsel %vm347_vm2, %v1224_v22, %v1071_v38 }
  0x9c   : > { %v1065_v39 = vpop.permute.xlu0 %1064  ;;  %v361_v40 = vsel %vm359_vm3, %v355_v36, %v1042_v60  ;;  %v296_v41 = vpop.permute.xlu1 %295 }
  0x9d   : > { %v1066_v27 = vunpack.i.l.bf16 %v1065_v39  ;;  %511 = vmatmul.mubr.f32.gmra.mrb[2].mxu0 %v361_v40  ;;  %v362_v50 = vsel %vm359_vm3, %v355_v36, %v296_v41  ;;  %v1067_v48 = vunpack.i.h.bf16 %v1065_v39 }
  0x9e   : > { %515 = vmatprep.mubr.f32.mxu0 %v382_v42 }
  0x9f   : > { %v366_v47 = vsel %vm359_vm3, %v357_v44, %v1066_v27 }
  0xa0   : > { %v1075_v49 = vpop.permute.xlu0 %1074  ;;  %536 = vmatmul.mubr.f32.vlgmr.msra.gmra.mrb[0].mxu1 %v366_v47  ;;  %v337_v22 = vpop.permute.xlu1 %336 }
  0xa1   : > { %v1077_v56 = vunpack.i.h.bf16 %v1075_v49  ;;  %v1076_v57 = vunpack.i.l.bf16 %v1075_v49  ;;  %516 = vmatmul.mubr.f32.gmra.mrb[4].mxu0 %v362_v50  ;;  %974 = vmatpush3.bf16.msra.mxu1 %v1365_v45  ;;  %v350_v45 = vsel %vm347_vm2, %v1221_v21, %v1072_v59 }
  0xa2   : > { %976 = vmatprep.subr.bf16.mxu1 %v975_v46 }
  0xa3   : > { %v379_v60 = vsel %vm353_vm4, %v371_v10, %v1076_v57  ;;  %v358_v61 = vsel %vm353_vm4, %v352_v55, %v1077_v56 }
  0xa4   : > { %v1080_v62 = vpop.permute.xlu0 %1079  ;;  %v387_v63 = vsel %vm359_vm3, %v379_v60, %v1067_v48  ;;  %v367_v0 = vsel %vm359_vm3, %v358_v61, %v1066_v27  ;;  %v298_v15 = vpop.permute.xlu1 %297 }
  0xa5   : > { %v1082_v1 = vunpack.i.h.bf16 %v1080_v62  ;;  %v1081_v2 = vunpack.i.l.bf16 %v1080_v62  ;;  %540 = vmatprep.mubr.f32.mxu1 %v387_v63  ;;  %978 = vmatpush3.bf16.msra.mxu1 %v975_v46 }
  0xa6   : > { %541 = vmatmul.mubr.f32.gmra.mrb[2].mxu1 %v367_v0 }
  0xa7   : > { %v375_v3 = vsel %vm353_vm4, %v369_v28, %v1081_v2  ;;  %927 = vmatprep.mubr.msk.f32.mxu1 %vm347_vm2, %v1263_v52  ;;  %v356_v6 = vsel %vm353_vm4, %v350_v45, %v1082_v1 }
  0xa8   : > { %v310_v7 = vpop.permute.xlu0 %309  ;;  %v383_v8 = vsel %vm359_vm3, %v375_v3, %v337_v22  ;;  %v363_v9 = vsel %vm359_vm3, %v356_v6, %v296_v41 }
  0xa9   : > { %v370_v10 = vsel %vm347_vm2, %v1284_v4, %v310_v7  ;;  %520 = vmatprep.mubr.f32.mxu0 %v383_v8  ;;  %v364_v4 = vsel %vm359_vm3, %v356_v6, %v298_v15 }
  0xaa   : > { %521 = vmatmul.mubr.f32.gmra.mrb[6].mxu0 %v363_v9  ;;  %928 = vmatmul.mubr.msk.f32.vlgmr.msra.gmra.mrb[4].mxu1 %vm347_vm2, %v1287_v5  ;;  %v376_v21 = vsel %vm353_vm4, %v370_v10, %v1081_v2  ;;  %v377_v52 = vsel %vm353_vm4, %v370_v10, %v1027_v13 }
  0xab   : > { %v384_v14 = vsel %vm359_vm3, %v376_v21, %v337_v22  ;;  %930 = vmatprep.mubr.msk.f32.mxu1 %vm347_vm2, %v1287_v5  ;;  %v385_v17 = vsel %vm359_vm3, %v377_v52, %v1062_v23  ;;  %v365_v5 = vsel %vm359_vm3, %v357_v44, %v298_v15 }
  0xac   : > { %525 = vmatprep.mubr.f32.mxu0 %v384_v14 }
  0xae   : > { %526 = vmatmul.mubr.f32.gmra.mrb[8].mxu0 %v364_v4  ;;  %931 = vmatmul.mubr.msk.f32.gmra.mrb[6].mxu1 %vm347_vm2, %v1328_v24 }
  0xaf   : > { %530 = vmatprep.mubr.f32.mxu0 %v385_v17  ;;  %933 = vmatprep.mubr.msk.f32.mxu1 %vm347_vm2, %v1328_v24 }
  0xb2   : > { %531 = vmatmul.mubr.f32.gmra.mrb[10].mxu0 %v365_v5  ;;  %934 = vmatmul.mubr.msk.f32.gmra.mrb[8].mxu1 %vm347_vm2, %v1274_v58 }
  0xb3   : > { %936 = vmatprep.mubr.msk.f32.mxu1 %vm347_vm2, %v1274_v58  ;;  %v839_v58 = vld [vmem:[%s1559_s2] ss:$0 sm:$0xff] }
  0xb6   : > { %937 = vmatmul.mubr.msk.f32.gmra.mrb[10].mxu1 %vm347_vm2, %v1384_v51 }
 0x169   : > { %v883_v54 = vpop.f32.mrb[0].mxu0 }
 0x16a   : > { %v884_v13 = vpop.f32.mrb[1].mxu0 }
 0x16b   : > { %v885_v16 = vadd.f32 %v884_v13, %v883_v54 }
 0x16d   : > { %v508_v33 = vadd.f32 %v885_v16, %v839_v58 }
 0x170   : > { %v886_v53 = vpop.f32.mrb[2].mxu0 }
 0x171   : > { %v887_v18 = vpop.f32.mrb[3].mxu0 }
 0x172   : > { %v888_v23 = vadd.f32 %v887_v18, %v886_v53 }
 0x173   : > { %v901_v19 = vpop.f32.mrb[0].mxu1 }
 0x174   : > { %v889_v24 = vpop.f32.mrb[4].mxu0  ;;  %v902_v20 = vpop.f32.mrb[1].mxu1  ;;  %v513_v51 = vadd.f32 %v888_v23, %v839_v58 }
 0x175   : > { %v903_v12 = vadd.f32 %v902_v20, %v901_v19  ;;  %v890_v25 = vpop.f32.mrb[5].mxu0 }
 0x176   : > { %v891_v26 = vadd.f32 %v890_v25, %v889_v24 }
 0x177   : > { %v538_v9 = vadd.f32 %v903_v12, %v839_v58 }
 0x178   : > { %v518_v42 = vadd.f32 %v891_v26, %v839_v58 }
 0x179   : > { %v904_v28 = vpop.f32.mrb[2].mxu1 }
 0x17a   : > { %v905_v29 = vpop.f32.mrb[3].mxu1 }
 0x17b   : > { %v906_v30 = vadd.f32 %v905_v29, %v904_v28 }
 0x17d   : > { %v892_v31 = vpop.f32.mrb[6].mxu0  ;;  %v929_v32 = vpop.f32.mrb[4].mxu1  ;;  %v543_v2 = vadd.f32 %v906_v30, %v839_v58 }
 0x17e   : > { %v618_v34 = vadd.f32 %v929_v32, %v513_v51  ;;  %v893_v35 = vpop.f32.mrb[7].mxu0  ;;  %v612_v36 = vpop.f32.mrb[5].mxu1 }
 0x17f   : > { %v894_v37 = vadd.f32 %v893_v35, %v892_v31  ;;  %v613_v11 = vadd.f32 %v612_v36, %v508_v33 }
 0x180   : > { %vm652_vm5 = vcmp.ge.f32.partialorder %v618_v34, 0.0  ;;  %v660_v38 = vmul.f32 0.2, %v618_v34 }
 0x181   : > { %vm651_vm6 = vcmp.ge.f32.partialorder %v613_v11, 0.0  ;;  %v659_v39 = vmul.f32 0.2, %v613_v11  ;;  %v895_v40 = vpop.f32.mrb[8].mxu0  ;;  %v523_v27 = vadd.f32 %v894_v37, %v839_v58  ;;  %v932_v41 = vpop.f32.mrb[6].mxu1 }
 0x182   : > { %v896_v43 = vpop.f32.mrb[9].mxu0  ;;  %v622_v44 = vpop.f32.mrb[7].mxu1  ;;  %v1477_v46 = vsel %vm652_vm5, %v618_v34, %v660_v38 }
 0x183   : > { %v628_v47 = vadd.f32 %v932_v41, %v523_v27  ;;  %v897_v49 = vadd.f32 %v896_v43, %v895_v40  ;;  %v623_v50 = vadd.f32 %v622_v44, %v518_v42  ;;  %v676_v55 = vmul.f32 %v1477_v46, %v1477_v46 }
 0x184   : > { %v1481_v56 = vsel %vm651_vm6, %v613_v11, %v659_v39 }
 0x185   : > { %v662_v57 = vmul.f32 0.2, %v628_v47  ;;  %vm653_vm7 = vcmp.ge.f32.partialorder %v623_v50, 0.0  ;;  %v661_v59 = vmul.f32 0.2, %v623_v50  ;;  %vm654_vm8 = vcmp.ge.f32.partialorder %v628_v47, 0.0 }
 0x186   : > { %v898_v48 = vpop.f32.mrb[10].mxu0  ;;  %v935_v60 = vpop.f32.mrb[8].mxu1  ;;  %v528_v61 = vadd.f32 %v897_v49, %v839_v58  ;;  %v686_v62 = vsel %vm347_vm2, %v676_v55, 0.0  ;;  %v675_v63 = vmul.f32 %v1481_v56, %v1481_v56 }
 0x187   : > { %v899_v0 = vpop.f32.mrb[11].mxu0  ;;  %v632_v1 = vpop.f32.mrb[9].mxu1  ;;  %687 = vadd.xlane.f32.xlu1 %v686_v62  ;;  %v1486_v22 = vsel %vm653_vm7, %v623_v50, %v661_v59  ;;  %v1492_v10 = vsel %vm654_vm8, %v628_v47, %v662_v57 }
 0x188   : > { %v900_v45 = vadd.f32 %v899_v0, %v898_v48  ;;  %v633_v3 = vadd.f32 %v632_v1, %v528_v61  ;;  %v683_v6 = vsel %vm347_vm2, %v675_v63, 0.0  ;;  %v677_v7 = vmul.f32 %v1486_v22, %v1486_v22 }
 0x189   : > { %684 = vadd.xlane.f32.xlu0 %v683_v6  ;;  %v938_v8 = vpop.f32.mrb[10].mxu1  ;;  %v678_v13 = vmul.f32 %v1492_v10, %v1492_v10 }
 0x18a   : > { %v533_v21 = vadd.f32 %v900_v45, %v839_v58  ;;  %vm655_vm9 = vcmp.ge.f32.partialorder %v633_v3, 0.0  ;;  %v663_v14 = vmul.f32 0.2, %v633_v3  ;;  %v648_v52 = vadd.f32 %v938_v8, %v543_v2  ;;  %v642_v15 = vpop.f32.mrb[11].mxu1 }
 0x18b   : > { %v643_v4 = vadd.f32 %v642_v15, %v538_v9  ;;  %v689_v17 = vsel %vm347_vm2, %v677_v7, 0.0  ;;  %v692_v20 = vsel %vm347_vm2, %v678_v13, 0.0 }
 0x18c   : > { %v638_v5 = vadd.f32 %v935_v60, %v533_v21  ;;  %v1495_v54 = vsel %vm655_vm9, %v633_v3, %v663_v14  ;;  %v666_v16 = vmul.f32 0.2, %v648_v52  ;;  %vm658_vm11 = vcmp.ge.f32.partialorder %v648_v52, 0.0 }
 0x18d   : > { %vm657_vm10 = vcmp.ge.f32.partialorder %v643_v4, 0.0  ;;  %v665_v53 = vmul.f32 0.2, %v643_v4  ;;  %690 = vadd.xlane.f32.xlu0 %v689_v17  ;;  %v679_v18 = vmul.f32 %v1495_v54, %v1495_v54 }
 0x18e   : > { %vm656_vm12 = vcmp.ge.f32.partialorder %v638_v5, 0.0  ;;  %v664_v23 = vmul.f32 0.2, %v638_v5  ;;  %v1511_v28 = vsel %vm658_vm11, %v648_v52, %v666_v16 }
 0x18f   : > { %v695_v19 = vsel %vm347_vm2, %v679_v18, 0.0  ;;  %v1502_v24 = vsel %vm657_vm10, %v643_v4, %v665_v53  ;;  %v682_v30 = vmul.f32 %v1511_v28, %v1511_v28 }
 0x190   : > { %696 = vadd.xlane.f32.xlu1 %v695_v19  ;;  %v681_v12 = vmul.f32 %v1502_v24, %v1502_v24  ;;  %v1507_v25 = vsel %vm656_vm12, %v638_v5, %v664_v23 }
 0x191   : > { %693 = vadd.xlane.f32.xlu0 %v692_v20  ;;  %v680_v26 = vmul.f32 %v1507_v25, %v1507_v25  ;;  %v704_v51 = vsel %vm347_vm2, %v682_v30, 0.0 }
 0x192   : > { %v701_v29 = vsel %vm347_vm2, %v681_v12, 0.0 }
 0x193   : > { %v698_v58 = vsel %vm347_vm2, %v680_v26, 0.0 }
 0x194   : > { %702 = vadd.xlane.f32.xlu1 %v701_v29 }
 0x195   : > { %699 = vadd.xlane.f32.xlu0 %v698_v58 }
 0x199   : > { %705 = vadd.xlane.f32.xlu0 %v704_v51 }
 0x214   : > { %v688_v31 = vpop.xlane.xlu1 %687 }
 0x215   : > { %v709_v32 = vmul.f32 0.03125, %v688_v31 }
 0x216   : > { %v685_v33 = vpop.xlane.xlu0 %684 }
 0x217   : > { %v717_v34 = vadd.f32 1e-08, %v709_v32  ;;  %v708_v35 = vmul.f32 0.03125, %v685_v33 }
 0x219   : > { %1083 = vrsqrt.f32 %v717_v34  ;;  %v716_v36 = vadd.f32 1e-08, %v708_v35 }
 0x21a   : > { %v691_v37 = vpop.xlane.xlu0 %690 }
 0x21b   : > { %1085 = vrsqrt.f32 %v716_v36  ;;  %v710_v11 = vmul.f32 0.03125, %v691_v37 }
 0x21d   : > { %v718_v38 = vadd.f32 1e-08, %v710_v11  ;;  %v697_v39 = vpop.xlane.xlu1 %696 }
 0x21e   : > { %v712_v40 = vmul.f32 0.03125, %v697_v39  ;;  %v694_v27 = vpop.xlane.xlu0 %693 }
 0x21f   : > { %1087 = vrsqrt.f32 %v718_v38  ;;  %v711_v41 = vmul.f32 0.03125, %v694_v27 }
 0x220   : > { %v720_v42 = vadd.f32 1e-08, %v712_v40 }
 0x221   : > { %v719_v43 = vadd.f32 1e-08, %v711_v41  ;;  %v703_v44 = vpop.xlane.xlu1 %702 }
 0x222   : > { %1089 = vrsqrt.f32 %v720_v42  ;;  %v714_v47 = vmul.f32 0.03125, %v703_v44  ;;  %v700_v49 = vpop.xlane.xlu0 %699 }
 0x223   : > { %v1084_v50 = vpop.eup %1083  ;;  %1091 = vrsqrt.f32 %v719_v43  ;;  %v713_v55 = vmul.f32 0.03125, %v700_v49 }
 0x224   : > { %v733_v57 = vmul.f32 %v1084_v50, %v1477_v46  ;;  %v722_v59 = vadd.f32 1e-08, %v714_v47 }
 0x225   : > { %v1086_v48 = vpop.eup %1085  ;;  %v721_v60 = vadd.f32 1e-08, %v713_v55 }
 0x226   : > { %741 = vst.msk [vmem:[%s1522_s4 + $0x8] sm:$0xff] %vm347_vm2, %v733_v57  ;;  %v732_v61 = vmul.f32 %v1086_v48, %v1481_v56  ;;  %1093 = vrsqrt.f32 %v722_v59  ;;  %v706_v62 = vpop.xlane.xlu0 %705 }
 0x227   : > { %1095 = vrsqrt.f32 %v721_v60  ;;  %v715_v63 = vmul.f32 0.03125, %v706_v62 }
 0x228   : > { %740 = vst.msk [vmem:[%s1522_s4] sm:$0xff] %vm347_vm2, %v732_v61 }
 0x229   : > { %v1088_v0 = vpop.eup %1087  ;;  %v723_v46 = vadd.f32 1e-08, %v715_v63 }
 0x22a   : > { %v734_v1 = vmul.f32 %v1088_v0, %v1486_v22 }
 0x22b   : > { %1097 = vrsqrt.f32 %v723_v46 }
 0x22c   : > { %v1090_v2 = vpop.eup %1089  ;;  %742 = vst.msk [vmem:[%s1522_s4 + $0x10] sm:$0xff] %vm347_vm2, %v734_v1 }
 0x22d   : > { %v1092_v45 = vpop.eup %1091  ;;  %v736_v56 = vmul.f32 %v1090_v2, %v1495_v54 }
 0x22e   : > { %v735_v3 = vmul.f32 %v1092_v45, %v1492_v10 }
 0x22f   : > { %744 = vst.msk [vmem:[%s1522_s4 + $0x20] sm:$0xff] %vm347_vm2, %v736_v56 }
 0x230   : > { %v1094_v6 = vpop.eup %1093  ;;  %743 = vst.msk [vmem:[%s1522_s4 + $0x18] sm:$0xff] %vm347_vm2, %v735_v3 }
 0x231   : > { %v1096_v7 = vpop.eup %1095  ;;  %v738_v8 = vmul.f32 %v1094_v6, %v1502_v24 }
 0x232   : > { %v737_v22 = vmul.f32 %v1096_v7, %v1507_v25 }
 0x233   : > { %746 = vst.msk [vmem:[%s1522_s4 + $0x30] sm:$0xff] %vm347_vm2, %v738_v8 }
 0x234   : > { %745 = vst.msk [vmem:[%s1522_s4 + $0x28] sm:$0xff] %vm347_vm2, %v737_v22 }
 0x235   : > { %v1098_v9 = vpop.eup %1097 }
 0x236   : > { %v739_v21 = vmul.f32 %v1098_v9, %v1511_v28 }
 0x238   : > { %747 = vst.msk [vmem:[%s1522_s4 + $0x38] sm:$0xff] %vm347_vm2, %v739_v21 }
 0x239 PF: > { %s13_s14 = sadd.s32 1, %s1121_s14   ;;  %s1561_s12 = smov %s1117_s13 }
 0x23a   : > { %p10_p5 = scmp.ge.s32.totalorder %s13_s14, 4   ;;  %s1562_s13 = smov %s1564_s15 }
 0x23c   :  { %12 = sbr.rel (!%p10_p5) target bundleno = 2 (0x2), region = 63 }

// kernel: generator_forward.7
= control target key start
LH: loop header
LB: loop body
LE: loop exit
PB: predicated region body
PF: predicated region fallthrough
CT: control target
= control target key end

     0   :  { %v779_v3 = vmov 0.0   ;;  %vm59_vm0 = vcmask 261120   ;;  %vm436_vm5 = vcmask 130048   ;;  %s1097_s1 = inlined_call_operand.vmem [shape: f32[32,512], index: 1, kind: input, shape index: {}]   ;;  %s1098_s3 = inlined_call_operand.vmem [shape: f32[512,16], index: 3, kind: input, shape index: {}]   ;;  %s1099_s0 = inlined_call_operand.vmem [shape: f32[2,32], index: 0, kind: input, shape index: {}]   ;;  %s1100_s2 = inlined_call_operand.vmem [shape: f32[1,512], index: 2, kind: input, shape index: {}]   ;;  %s1101_s4 = inlined_call_operand.vmem [shape: f32[16,512], index: 4, kind: input, shape index: {}]   ;;  %s1102_s5 = inlined_call_operand.vmem [shape: f32[2,512], index: 5, kind: output, shape index: {}]  }
   0x1   :  { %v22_v0 = vld [vmem:[%s1097_s1 + $0x8] sm:$0xff]  ;;  %v24_v2 = vld [vmem:[%s1097_s1 + $0x18] sm:$0xff]  ;;  %127 = vmatprep.mubr.f32.mxu0 %v779_v3  ;;  %198 = vmatprep.mubr.f32.mxu1 %v779_v3  ;;  %v21_v6 = vld [vmem:[%s1097_s1] sm:$0xff] }
   0x2   :  { %v26_v1 = vld [vmem:[%s1097_s1 + $0x28] sm:$0xff]  ;;  %v28_v5 = vld [vmem:[%s1097_s1 + $0x38] sm:$0xff]  ;;  %v25_v7 = vld [vmem:[%s1097_s1 + $0x20] sm:$0xff] }
   0x3   :  { %v687_v4 = vpack.c.bf16 %v26_v1, %v22_v0  ;;  %v695_v8 = vpack.c.bf16 %v28_v5, %v24_v2  ;;  %v689_v9 = vpack.c.bf16 %v25_v7, %v21_v6  ;;  %v23_v10 = vld [vmem:[%s1097_s1 + $0x10] sm:$0xff]  ;;  %v30_v12 = vld [vmem:[%s1097_s1 + $0x48] sm:$0xff]  ;;  %v32_v15 = vld [vmem:[%s1097_s1 + $0x58] sm:$0xff] }
   0x4   :  { %v27_v11 = vld [vmem:[%s1097_s1 + $0x30] sm:$0xff]  ;;  %v34_v14 = vld [vmem:[%s1097_s1 + $0x68] sm:$0xff]  ;;  %v36_v16 = vld [vmem:[%s1097_s1 + $0x78] sm:$0xff] }
   0x5   :  { %688 = vmatprep.subr.bf16.mxu0 %v687_v4  ;;  %v697_v13 = vpack.c.bf16 %v27_v11, %v23_v10  ;;  %696 = vmatprep.subr.bf16.mxu1 %v695_v8  ;;  %v691_v17 = vpack.c.bf16 %v34_v14, %v30_v12  ;;  %v699_v18 = vpack.c.bf16 %v36_v16, %v32_v15  ;;  %v29_v19 = vld [vmem:[%s1097_s1 + $0x40] sm:$0xff]  ;;  %v31_v21 = vld [vmem:[%s1097_s1 + $0x50] sm:$0xff]  ;;  %v238_v27 = vld [vmem:[%s1098_s3 + $0x88] sm:$0xff] }
   0x6   :  { %690 = vmatpush1.bf16.msra.mxu0 %v689_v9  ;;  %v33_v20 = vld [vmem:[%s1097_s1 + $0x60] sm:$0xff]  ;;  %v35_v23 = vld [vmem:[%s1097_s1 + $0x70] sm:$0xff]  ;;  %v270_v29 = vld [vmem:[%s1098_s3 + $0x188] sm:$0xff] }
   0x7   :  { %698 = vmatpush1.bf16.msra.mxu1 %v697_v13  ;;  %v693_v22 = vpack.c.bf16 %v33_v20, %v29_v19  ;;  %v237_v24 = vld [vmem:[%s1098_s3 + $0x80] sm:$0xff]  ;;  %692 = vmatprep.subr.bf16.mxu0 %v691_v17  ;;  %v701_v25 = vpack.c.bf16 %v35_v23, %v31_v21  ;;  %v222_v33 = vld [vmem:[%s1098_s3 + $0x8] sm:$0xff]  ;;  %v239_v37 = vld [vmem:[%s1098_s3 + $0x90] sm:$0xff] }
   0x8   :  { %700 = vmatprep.subr.bf16.mxu1 %v699_v18  ;;  %v20_v26 = vld [vmem:[%s1099_s0] sm:$0x3]  ;;  %v703_v30 = vpack.c.bf16 %v238_v27, %v237_v24  ;;  %v254_v36 = vld [vmem:[%s1098_s3 + $0x108] sm:$0xff]  ;;  %v240_v38 = vld [vmem:[%s1098_s3 + $0x98] sm:$0xff] }
   0x9   :  { %v269_v28 = vld [vmem:[%s1098_s3 + $0x180] sm:$0xff]  ;;  %v707_v40 = vpack.c.bf16 %v240_v38, %v239_v37  ;;  %v271_v41 = vld [vmem:[%s1098_s3 + $0x190] sm:$0xff]  ;;  %v272_v42 = vld [vmem:[%s1098_s3 + $0x198] sm:$0xff] }
   0xa   :  { %v735_v31 = vpack.c.bf16 %v270_v29, %v269_v28  ;;  %v221_v32 = vld [vmem:[%s1098_s3] sm:$0xff]  ;;  %694 = vmatpush1.bf16.msra.mxu0 %v693_v22  ;;  %v223_v43 = vld [vmem:[%s1098_s3 + $0x10] sm:$0xff]  ;;  %v739_v44 = vpack.c.bf16 %v272_v42, %v271_v41  ;;  %v224_v45 = vld [vmem:[%s1098_s3 + $0x18] sm:$0xff] }
   0xb   :  { %v253_v34 = vld [vmem:[%s1098_s3 + $0x100] sm:$0xff]  ;;  %v705_v35 = vpack.c.bf16 %v222_v33, %v221_v32  ;;  %702 = vmatpush1.bf16.msra.mxu1 %v701_v25  ;;  %704 = vmatprep.subr.bf16.mxu0 %v703_v30  ;;  %v255_v46 = vld [vmem:[%s1098_s3 + $0x110] sm:$0xff]  ;;  %v256_v47 = vld [vmem:[%s1098_s3 + $0x118] sm:$0xff]  ;;  %v709_v51 = vpack.c.bf16 %v224_v45, %v223_v43 }
   0xc   :  { %v737_v39 = vpack.c.bf16 %v254_v36, %v253_v34  ;;  %736 = vmatprep.subr.bf16.mxu1 %v735_v31  ;;  %v241_v48 = vld [vmem:[%s1098_s3 + $0xa0] sm:$0xff]  ;;  %v242_v49 = vld [vmem:[%s1098_s3 + $0xa8] sm:$0xff]  ;;  %v741_v53 = vpack.c.bf16 %v256_v47, %v255_v46  ;;  %v243_v60 = vld [vmem:[%s1098_s3 + $0xb0] sm:$0xff] }
   0xd   :  { %613 = vmatmul.mubr.msk.f32.vlgmr.msra.gmra.mrb[0].mxu0 %vm59_vm0, %v20_v26  ;;  %v273_v50 = vld [vmem:[%s1098_s3 + $0x1a0] sm:$0xff]  ;;  %v274_v52 = vld [vmem:[%s1098_s3 + $0x1a8] sm:$0xff]  ;;  %v711_v54 = vpack.c.bf16 %v242_v49, %v241_v48  ;;  %v244_v61 = vld [vmem:[%s1098_s3 + $0xb8] sm:$0xff] }
   0xe   :  { %614 = vmatmul.mubr.msk.f32.vlgmr.msra.gmra.mrb[0].mxu1 %vm59_vm0, %v20_v26  ;;  %706 = vmatpush3.bf16.msra.mxu0 %v705_v35  ;;  %v225_v55 = vld [vmem:[%s1098_s3 + $0x20] sm:$0xff]  ;;  %v226_v56 = vld [vmem:[%s1098_s3 + $0x28] sm:$0xff]  ;;  %v743_v58 = vpack.c.bf16 %v274_v52, %v273_v50  ;;  %v275_v62 = vld [vmem:[%s1098_s3 + $0x1b0] sm:$0xff]  ;;  %v715_v2 = vpack.c.bf16 %v244_v61, %v243_v60 }
   0xf   :  { %738 = vmatpush3.bf16.msra.mxu1 %v737_v39  ;;  %708 = vmatprep.subr.bf16.mxu0 %v707_v40  ;;  %v257_v57 = vld [vmem:[%s1098_s3 + $0x120] sm:$0xff]  ;;  %v258_v59 = vld [vmem:[%s1098_s3 + $0x128] sm:$0xff]  ;;  %v276_v63 = vld [vmem:[%s1098_s3 + $0x1b8] sm:$0xff]  ;;  %v713_v0 = vpack.c.bf16 %v226_v56, %v225_v55 }
  0x10   :  { %740 = vmatprep.subr.bf16.mxu1 %v739_v44  ;;  %v745_v1 = vpack.c.bf16 %v258_v59, %v257_v57  ;;  %v227_v4 = vld [vmem:[%s1098_s3 + $0x30] sm:$0xff]  ;;  %v228_v5 = vld [vmem:[%s1098_s3 + $0x38] sm:$0xff]  ;;  %v747_v7 = vpack.c.bf16 %v276_v63, %v275_v62  ;;  %v245_v9 = vld [vmem:[%s1098_s3 + $0xc0] sm:$0xff]  ;;  %v39_v59 = vlaneseq }
  0x11   :  { %v259_v6 = vld [vmem:[%s1098_s3 + $0x130] sm:$0xff]  ;;  %v260_v8 = vld [vmem:[%s1098_s3 + $0x138] sm:$0xff]  ;;  %v246_v10 = vld [vmem:[%s1098_s3 + $0xc8] sm:$0xff]  ;;  %v717_v13 = vpack.c.bf16 %v228_v5, %v227_v4 }
  0x12   :  { %710 = vmatpush3.bf16.msra.mxu0 %v709_v51  ;;  %v277_v11 = vld [vmem:[%s1098_s3 + $0x1c0] sm:$0xff]  ;;  %v278_v12 = vld [vmem:[%s1098_s3 + $0x1c8] sm:$0xff]  ;;  %v749_v14 = vpack.c.bf16 %v260_v8, %v259_v6  ;;  %v719_v15 = vpack.c.bf16 %v246_v10, %v245_v9  ;;  %v247_v21 = vld [vmem:[%s1098_s3 + $0xd0] sm:$0xff]  ;;  %v1058_v60 = vshrl.u32 %v39_v59, 7 }
  0x13   :  { %742 = vmatpush3.bf16.msra.mxu1 %v741_v53  ;;  %712 = vmatprep.subr.bf16.mxu0 %v711_v54  ;;  %v229_v16 = vld [vmem:[%s1098_s3 + $0x40] sm:$0xff]  ;;  %v230_v17 = vld [vmem:[%s1098_s3 + $0x48] sm:$0xff]  ;;  %v751_v19 = vpack.c.bf16 %v278_v12, %v277_v11  ;;  %v248_v22 = vld [vmem:[%s1098_s3 + $0xd8] sm:$0xff] }
  0x14   :  { %744 = vmatprep.subr.bf16.mxu1 %v743_v58  ;;  %v261_v18 = vld [vmem:[%s1098_s3 + $0x140] sm:$0xff]  ;;  %v262_v20 = vld [vmem:[%s1098_s3 + $0x148] sm:$0xff]  ;;  %v279_v23 = vld [vmem:[%s1098_s3 + $0x1d0] sm:$0xff]  ;;  %v721_v25 = vpack.c.bf16 %v230_v17, %v229_v16  ;;  %v723_v27 = vpack.c.bf16 %v248_v22, %v247_v21  ;;  %v41_v61 = vsub.s32 0, %v1058_v60  ;;  %v49_v63 = vsub.s32 2, %v1058_v60 }
  0x15   :  { %v280_v24 = vld [vmem:[%s1098_s3 + $0x1d8] sm:$0xff]  ;;  %v753_v26 = vpack.c.bf16 %v262_v20, %v261_v18  ;;  %v231_v28 = vld [vmem:[%s1098_s3 + $0x50] sm:$0xff]  ;;  %v249_v35 = vld [vmem:[%s1098_s3 + $0xe0] sm:$0xff] }
  0x16   :  { %714 = vmatpush3.bf16.msra.mxu0 %v713_v0  ;;  %v232_v29 = vld [vmem:[%s1098_s3 + $0x58] sm:$0xff]  ;;  %v755_v30 = vpack.c.bf16 %v280_v24, %v279_v23  ;;  %v263_v31 = vld [vmem:[%s1098_s3 + $0x150] sm:$0xff]  ;;  %v250_v36 = vld [vmem:[%s1098_s3 + $0xe8] sm:$0xff]  ;;  %v45_v0 = vsub.s32 1, %v1058_v60 }
  0x17   :  { %746 = vmatpush3.bf16.msra.mxu1 %v745_v1  ;;  %716 = vmatprep.subr.bf16.mxu0 %v715_v2  ;;  %v264_v32 = vld [vmem:[%s1098_s3 + $0x158] sm:$0xff]  ;;  %v725_v33 = vpack.c.bf16 %v232_v29, %v231_v28  ;;  %v281_v37 = vld [vmem:[%s1098_s3 + $0x1e0] sm:$0xff]  ;;  %v727_v38 = vpack.c.bf16 %v250_v36, %v249_v35  ;;  %v282_v39 = vld [vmem:[%s1098_s3 + $0x1e8] sm:$0xff]  ;;  %v53_v1 = vsub.s32 3, %v1058_v60 }
  0x18   :  { %748 = vmatprep.subr.bf16.mxu1 %v747_v7  ;;  %v757_v34 = vpack.c.bf16 %v264_v32, %v263_v31  ;;  %v233_v40 = vld [vmem:[%s1098_s3 + $0x60] sm:$0xff]  ;;  %v234_v41 = vld [vmem:[%s1098_s3 + $0x68] sm:$0xff]  ;;  %v759_v42 = vpack.c.bf16 %v282_v39, %v281_v37  ;;  %v251_v47 = vld [vmem:[%s1098_s3 + $0xf0] sm:$0xff] }
  0x19   :  { %v729_v43 = vpack.c.bf16 %v234_v41, %v233_v40  ;;  %v265_v44 = vld [vmem:[%s1098_s3 + $0x160] sm:$0xff]  ;;  %v266_v45 = vld [vmem:[%s1098_s3 + $0x168] sm:$0xff]  ;;  %v252_v48 = vld [vmem:[%s1098_s3 + $0xf8] sm:$0xff] }
  0x1a   :  { %718 = vmatpush3.bf16.msra.mxu0 %v717_v13  ;;  %v761_v46 = vpack.c.bf16 %v266_v45, %v265_v44  ;;  %v283_v49 = vld [vmem:[%s1098_s3 + $0x1f0] sm:$0xff]  ;;  %v731_v50 = vpack.c.bf16 %v252_v48, %v251_v47  ;;  %v284_v51 = vld [vmem:[%s1098_s3 + $0x1f8] sm:$0xff]  ;;  %v37_v62 = vld [vmem:[%s1100_s2] sm:$0xf]  ;;  %v780_v48 = vmov 1983009808  }
  0x1b   :  { %750 = vmatpush3.bf16.msra.mxu1 %v749_v14  ;;  %720 = vmatprep.subr.bf16.mxu0 %v719_v15  ;;  %v235_v52 = vld [vmem:[%s1098_s3 + $0x70] sm:$0xff]  ;;  %v236_v53 = vld [vmem:[%s1098_s3 + $0x78] sm:$0xff]  ;;  %v763_v54 = vpack.c.bf16 %v284_v51, %v283_v49  ;;  %v42_v2 = vrot.slane %v37_v62, %v41_v61  ;;  %v50_v4 = vrot.slane %v37_v62, %v49_v63  ;;  %v433_v28 = vld [vmem:[%s1101_s4 + $0x28] sm:$0xff]  ;;  %v593_v49 = vunpack.c.l.s4 %v780_v48 }
  0x1c   :  { %752 = vmatprep.subr.bf16.mxu1 %v751_v19  ;;  %v733_v55 = vpack.c.bf16 %v236_v53, %v235_v52  ;;  %v267_v56 = vld [vmem:[%s1098_s3 + $0x170] sm:$0xff]  ;;  %v268_v57 = vld [vmem:[%s1098_s3 + $0x178] sm:$0xff]  ;;  %v46_v5 = vrot.slane %v37_v62, %v45_v0  ;;  %v54_v6 = vrot.slane %v37_v62, %v53_v1  ;;  %v432_v32 = vld [vmem:[%s1101_s4 + $0x20] sm:$0xff] }
  0x1d   :  { %v765_v58 = vpack.c.bf16 %v268_v57, %v267_v56  ;;  %v431_v29 = vld [vmem:[%s1101_s4 + $0x18] sm:$0xff]  ;;  %v430_v35 = vld [vmem:[%s1101_s4 + $0x10] sm:$0xff] }
  0x1e   :  { %722 = vmatpush3.bf16.msra.mxu0 %v721_v25  ;;  %v435_v31 = vld [vmem:[%s1101_s4 + $0x38] sm:$0xff]  ;;  %v434_v36 = vld [vmem:[%s1101_s4 + $0x30] sm:$0xff] }
  0x1f   :  { %754 = vmatpush3.bf16.msra.mxu1 %v753_v26  ;;  %724 = vmatprep.subr.bf16.mxu0 %v723_v27  ;;  %v429_v27 = vld [vmem:[%s1101_s4 + $0x8] sm:$0xff]  ;;  %v773_v37 = vpack.c.bf16 %v434_v36, %v430_v35 }
  0x20   :  { %756 = vmatprep.subr.bf16.mxu1 %v755_v30  ;;  %v767_v30 = vpack.c.bf16 %v433_v28, %v429_v27 }
  0x22   :  { %726 = vmatpush3.bf16.msra.mxu0 %v725_v33  ;;  %v771_v33 = vpack.c.bf16 %v435_v31, %v431_v29 }
  0x23   :  { %758 = vmatpush3.bf16.msra.mxu1 %v757_v34  ;;  %728 = vmatprep.subr.bf16.mxu0 %v727_v38 }
  0x24   :  { %760 = vmatprep.subr.bf16.mxu1 %v759_v42 }
  0x26   :  { %730 = vmatpush3.bf16.msra.mxu0 %v729_v43 }
  0x27   :  { %762 = vmatpush3.bf16.msra.mxu1 %v761_v46  ;;  %732 = vmatprep.subr.bf16.mxu0 %v731_v50  ;;  %v594_v50 = vunpack.c.0.s8 %v593_v49 }
  0x28   :  { %764 = vmatprep.subr.bf16.mxu1 %v763_v54 }
  0x2a   :  { %734 = vmatpush3.bf16.msra.mxu0 %v733_v55 }
  0x2b   :  { %766 = vmatpush3.bf16.msra.mxu1 %v765_v58  ;;  %768 = vmatprep.subr.bf16.mxu0 %v767_v30  ;;  %v597_v58 = vsub.s32 %v594_v50, %v1058_v60 }
  0x2c   :  { %772 = vmatprep.subr.bf16.mxu1 %v771_v33 }
  0xe0   :  { %v129_v7 = vpop.f32.mrb[0].mxu0 }
  0xe1   :  { %v130_v8 = vadd.f32 %v129_v7, %v42_v2  ;;  %v200_v9 = vpop.f32.mrb[0].mxu1  ;;  %v131_v10 = vpop.f32.mrb[1].mxu0 }
  0xe2   :  { %v201_v11 = vadd.f32 %v200_v9, %v50_v4  ;;  %v132_v12 = vadd.f32 %v131_v10, %v46_v5  ;;  %v202_v13 = vpop.f32.mrb[1].mxu1 }
  0xe3   :  { %vm205_vm1 = vcmp.ge.f32.partialorder %v130_v8, 0.0  ;;  %v209_v14 = vmul.f32 0.2, %v130_v8  ;;  %v203_v15 = vadd.f32 %v202_v13, %v54_v6 }
  0xe4   :  { %vm207_vm2 = vcmp.ge.f32.partialorder %v201_v11, 0.0  ;;  %v211_v16 = vmul.f32 0.2, %v201_v11  ;;  %vm206_vm3 = vcmp.ge.f32.partialorder %v132_v12, 0.0  ;;  %v210_v17 = vmul.f32 0.2, %v132_v12 }
  0xe5   :  { %v213_v18 = vsel %vm205_vm1, %v130_v8, %v209_v14  ;;  %vm208_vm4 = vcmp.ge.f32.partialorder %v203_v15, 0.0  ;;  %v212_v19 = vmul.f32 0.2, %v203_v15 }
  0xe6   :  { %v215_v20 = vsel %vm207_vm2, %v201_v11, %v211_v16  ;;  %v214_v21 = vsel %vm206_vm3, %v132_v12, %v210_v17  ;;  %v217_v24 = vmul.f32 %v213_v18, %v213_v18 }
  0xe7   :  { %v218_v22 = vmul.f32 %v214_v21, %v214_v21  ;;  %v216_v23 = vsel %vm208_vm4, %v203_v15, %v212_v19  ;;  %v219_v26 = vmul.f32 %v215_v20, %v215_v20 }
  0xe8   :  { %v220_v25 = vmul.f32 %v216_v23, %v216_v23 }
  0xe9   :  { %349 = vmatprep.mubr.f32.mxu0 %v218_v22 }
  0xea   :  { %419 = vmatprep.mubr.f32.mxu1 %v220_v25  ;;  %350 = vmatmul.mubr.f32.vlgmr.msra.gmra.mrb[2].mxu0 %v217_v24 }
  0xeb   :  { %420 = vmatmul.mubr.f32.vlgmr.msra.gmra.mrb[2].mxu1 %v219_v26  ;;  %504 = vmatprep.mubr.f32.mxu0 %v779_v3 }
  0xec   :  { %575 = vmatprep.mubr.f32.mxu1 %v779_v3  ;;  %v428_v3 = vld [vmem:[%s1101_s4] sm:$0xff]  ;;  %774 = vmatpush1.bf16.msra.mxu1 %v773_v37 }
  0xed   :  { %v769_v34 = vpack.c.bf16 %v432_v32, %v428_v3 }
  0xef   :  { %770 = vmatpush1.bf16.msra.mxu0 %v769_v34 }
 0x1bd   :  { %v649_v38 = vpop.f32.mrb[2].mxu0 }
 0x1be   :  { %v684_v39 = vpop.f32.mrb[2].mxu1  ;;  %v650_v40 = vpop.f32.mrb[3].mxu0 }
 0x1bf   :  { %v651_v41 = vadd.f32 %v650_v40, %v649_v38  ;;  %v685_v42 = vpop.f32.mrb[3].mxu1 }
 0x1c0   :  { %v686_v43 = vadd.f32 %v685_v42, %v684_v39 }
 0x1c2   :  { %v422_v44 = vadd.f32 %v686_v43, %v651_v41 }
 0x1c4   :  { %v425_v45 = vmul.f32 0.03125, %v422_v44 }
 0x1c6   :  { %v426_v46 = vadd.f32 1e-08, %v425_v45 }
 0x1c8   :  { %777 = vrsqrt.f32 %v426_v46 }
 0x1d2   :  { %v778_v47 = vpop.eup %777 }
 0x1d3   :  { %615 = vmatmul.mubr.msk.f32.vlgmr.msra.gmra.mrb[4].mxu0 %vm436_vm5, %v778_v47  ;;  %616 = vmatmul.mubr.msk.f32.vlgmr.msra.gmra.mrb[4].mxu1 %vm436_vm5, %v778_v47 }
 0x2a6   :  { %v506_v51 = vpop.f32.mrb[4].mxu0  ;;  %v577_v52 = vpop.f32.mrb[4].mxu1 }
 0x2a7   :  { %v582_v53 = vmul.f32 %v506_v51, %v213_v18  ;;  %v584_v54 = vmul.f32 %v577_v52, %v215_v20  ;;  %v508_v55 = vpop.f32.mrb[5].mxu0  ;;  %v579_v56 = vpop.f32.mrb[5].mxu1 }
 0x2a8   :  { %v583_v57 = vmul.f32 %v508_v55, %v214_v21  ;;  %v585_v59 = vmul.f32 %v579_v56, %v216_v23 }
 0x2aa   :  { %v590_v61 = vcombine.low %v582_v53, %v583_v57  ;;  %v591_v62 = vcombine.low %v584_v54, %v585_v59 }
 0x2ac   :  { %v598_v63 = vrot.slane %v590_v61, %v597_v58  ;;  %v605_v0 = vrot.slane %v591_v62, %v597_v58 }
 0x2ae   :  { %v606_v1 = vcombine.low %v598_v63, %v605_v0 }
 0x2b0   :  { %608 = vst [vmem:[%s1102_s5] sm:$0xff] %v606_v1 }

// kernel: generator_forward.10
= control target key start
LH: loop header
LB: loop body
LE: loop exit
PB: predicated region body
PF: predicated region fallthrough
CT: control target
= control target key end

     0   :  { %s1326_s12 = smov 0   ;;  %s1328_s13 = smov 0   ;;  %s1820_s0 = inlined_call_operand.vmem [shape: f32[2,10,10,32], index: 0, kind: input, shape index: {}]   ;;  %s1821_s1 = inlined_call_operand.vmem [shape: f32[288,32], index: 1, kind: input, shape index: {}]   ;;  %s1822_s2 = inlined_call_operand.vmem [shape: f32[1,32], index: 2, kind: input, shape index: {}]   ;;  %s1823_s3 = inlined_call_operand.vmem [shape: f32[2,8,8,32], index: 3, kind: output, shape index: {}]  }
   0x1   :  { %s1330_s14 = smov 0  }
   0x2 LB: > { %s25_s15 = sadd.s32 1, %s1297_s13  ;;  %p955_p0 = scmp.ge.s32.totalorder %s1301_s14, 1  ;;  %s1301_s14 = sphi %s1330_s14, %s13_s14   ;;  %s1297_s13 = sphi %s1328_s13, %s1825_s13   ;;  %s1293_s12 = sphi %s1326_s12, %s1824_s12  }
   0x3   : > { %p27_p1 = scmp.ge.s32.totalorder %s25_s15, 2  ;;  %p151_p2 = scmp.lt.s32.totalorder %s1301_s14, 3 }
   0x5   : > { %s1827_s15 = smov (%p27_p1, %s25_s15), 0  ;;  %p152_p3 = pnand %p955_p0, %p151_p2 }
   0x6   : > { %p179_p4 = scmp.lt.s32.totalorder (!%p152_p3), %s1293_s12, 1  ;;  %v518_v0 = vld [vmem:[%s1821_s1 + $0x80] sm:$0xff] (!%p152_p3)  ;;  %v519_v1 = vld [vmem:[%s1821_s1 + $0x88] sm:$0xff] (!%p152_p3)  ;;  %v520_v5 = vld [vmem:[%s1821_s1 + $0x90] sm:$0xff] (!%p152_p3)  ;;  %vm233_vm0 = vcmask (!%p152_p3), 1046528   ;;  %vm258_vm1 = vcmask (!%p152_p3), 1045504  }
   0x7   : > { %155 = sbr.rel (%p152_p3) target bundleno = 579 (0x243), region = 32  ;;  %v1059_v2 = vpack.c.bf16 (!%p152_p3), %v519_v1, %v518_v0  ;;  %v502_v3 = vld [vmem:[%s1821_s1] sm:$0xff] (!%p152_p3)  ;;  %v503_v4 = vld [vmem:[%s1821_s1 + $0x8] sm:$0xff] (!%p152_p3)  ;;  %v521_v7 = vld [vmem:[%s1821_s1 + $0x98] sm:$0xff] (!%p152_p3)  ;;  %s1303_s10 = smov (!%p152_p3), 64   ;;  %vm451_vm2 = vcmask (!%p152_p3), 261120  }
   0x8   : > { %v1061_v6 = vpack.c.bf16 (!%p152_p3), %v503_v4, %v502_v3  ;;  %v504_v8 = vld [vmem:[%s1821_s1 + $0x10] sm:$0xff] (!%p152_p3)  ;;  %v505_v9 = vld [vmem:[%s1821_s1 + $0x18] sm:$0xff] (!%p152_p3)  ;;  %v1063_v10 = vpack.c.bf16 (!%p152_p3), %v521_v7, %v520_v5  ;;  %v522_v11 = vld [vmem:[%s1821_s1 + $0xa0] sm:$0xff] (!%p152_p3)  ;;  %s1305_s16 = smov (!%p152_p3), 96   ;;  %vm460_vm3 = vcmask (!%p152_p3), 523264   ;;  %vm469_vm4 = vcmask (!%p152_p3), 785408  }
   0x9   : > { %1060 = vmatprep.subr.bf16.mxu0 (!%p152_p3), %v1059_v2  ;;  %v523_v12 = vld [vmem:[%s1821_s1 + $0xa8] sm:$0xff] (!%p152_p3)  ;;  %v506_v13 = vld [vmem:[%s1821_s1 + $0x20] sm:$0xff] (!%p152_p3)  ;;  %1099 = vmatprep.subr.bf16.mxu1 (!%p152_p3), %v1059_v2  ;;  %v1065_v14 = vpack.c.bf16 (!%p152_p3), %v505_v9, %v504_v8  ;;  %v524_v16 = vld [vmem:[%s1821_s1 + $0xb0] sm:$0xff] (!%p152_p3) }
   0xa   : > { %1062 = vmatpush3.bf16.msra.mxu0 (!%p152_p3), %v1061_v6  ;;  %v507_v15 = vld [vmem:[%s1821_s1 + $0x28] sm:$0xff] (!%p152_p3)  ;;  %1107 = vmatpush3.bf16.msra.mxu1 (!%p152_p3), %v1061_v6  ;;  %v525_v17 = vld [vmem:[%s1821_s1 + $0xb8] sm:$0xff] (!%p152_p3)  ;;  %v1067_v18 = vpack.c.bf16 (!%p152_p3), %v523_v12, %v522_v11  ;;  %v508_v19 = vld [vmem:[%s1821_s1 + $0x30] sm:$0xff] (!%p152_p3) }
   0xb   : > { %1064 = vmatprep.subr.bf16.mxu0 (!%p152_p3), %v1063_v10  ;;  %v509_v20 = vld [vmem:[%s1821_s1 + $0x38] sm:$0xff] (!%p152_p3)  ;;  %1100 = vmatprep.subr.bf16.mxu1 (!%p152_p3), %v1063_v10  ;;  %v526_v21 = vld [vmem:[%s1821_s1 + $0xc0] sm:$0xff] (!%p152_p3)  ;;  %v527_v22 = vld [vmem:[%s1821_s1 + $0xc8] sm:$0xff] (!%p152_p3)  ;;  %v1069_v32 = vpack.c.bf16 (!%p152_p3), %v507_v15, %v506_v13  ;;  %v1071_v38 = vpack.c.bf16 (!%p152_p3), %v525_v17, %v524_v16 }
   0xc   : > { %v510_v23 = vld [vmem:[%s1821_s1 + $0x40] sm:$0xff] (!%p152_p3)  ;;  %v511_v24 = vld [vmem:[%s1821_s1 + $0x48] sm:$0xff] (!%p152_p3)  ;;  %v1073_v39 = vpack.c.bf16 (!%p152_p3), %v509_v20, %v508_v19  ;;  %v1075_v44 = vpack.c.bf16 (!%p152_p3), %v527_v22, %v526_v21 }
   0xd   : > { %v1077_v45 = vpack.c.bf16 (!%p152_p3), %v511_v24, %v510_v23 }
   0xe   : > { %s1829_s12 = smov (!%p179_p4, %s1293_s12), 1  ;;  %1066 = vmatpush3.bf16.msra.mxu0 %v1065_v14  ;;  %1108 = vmatpush3.bf16.msra.mxu1 %v1065_v14 }
   0xf   : > { %s1115_s11 = smul.u32 160, %s1829_s12  ;;  %1068 = vmatprep.subr.bf16.mxu0 %v1067_v18  ;;  %1101 = vmatprep.subr.bf16.mxu1 %v1067_v18  ;;  %s970_s28 = sshll.u32 %s1829_s12, 6 }
  0x10   : > { %s1786_s5 = scalar_lea.vmem %s1823_s3, %s970_s28 }
  0x11   : > { %s1401_s30 = scalar_lea.vmem %s1820_s0, %s1115_s11  ;;  %s1304_s11 = smov 32  }
  0x12   : > { %v1413_v25 = vld [vmem:[%s1401_s30 + $0x30] sm:$0xff]  ;;  %v1416_v26 = vld [vmem:[%s1401_s30 + $0x80] sm:$0xff]  ;;  %v200_v29 = vld [vmem:[%s1401_s30 + $0x18] sm:$0x3]  ;;  %1070 = vmatpush3.bf16.msra.mxu0 %v1069_v32  ;;  %1109 = vmatpush3.bf16.msra.mxu1 %v1069_v32 }
  0x13   : > { %v1419_v27 = vld [vmem:[%s1401_s30 + $0x10] sm:$0xff]  ;;  %v1423_v28 = vpack.i.bf16 %v1416_v26, %v1413_v25  ;;  %v1427_v30 = vld [vmem:[%s1401_s30 + $0x60] sm:$0xff]  ;;  %v1431_v33 = vld [vmem:[%s1401_s30 + $0x68] sm:$0x3]  ;;  %v238_v34 = vrot.slane %v200_v29, 1  ;;  %v263_v35 = vrot.slane %v200_v29, 2  ;;  %1072 = vmatprep.subr.bf16.mxu0 %v1071_v38  ;;  %1102 = vmatprep.subr.bf16.mxu1 %v1071_v38 }
  0x14   : > { %v262_v31 = vrot.slane %v1419_v27, 2  ;;  %v1434_v36 = vld [vmem:[%s1401_s30] sm:$0xff]  ;;  %v198_v40 = vld [vmem:[%s1401_s30 + $0x8] sm:$0x3]  ;;  %v277_v47 = vrot.slane %v1427_v30, 2  ;;  %v1450_v50 = vld [vmem:[%s1401_s30 + $0x70] sm:$0xff] }
  0x15   : > { %v1437_v37 = vld [vmem:[%s1401_s30 + $0x20] sm:$0xff]  ;;  %1144 = vrot.lane.b32.xlu1 %v1423_v28, %s1303_s10  ;;  %v234_v41 = vrot.slane %v1434_v36, 1  ;;  %v202_v42 = vld [vmem:[%s1401_s30 + $0x28] sm:$0x3]  ;;  %v235_v48 = vrot.slane %v198_v40, 1  ;;  %v260_v49 = vrot.slane %v198_v40, 2 }
  0x16   : > { %v240_v43 = vrot.slane %v1437_v37, 1  ;;  %v1446_v46 = vsel %vm258_vm1, %v262_v31, %v263_v35  ;;  %v1453_v51 = vld [vmem:[%s1401_s30 + $0x78] sm:$0x3]  ;;  %v278_v52 = vrot.slane %v1431_v33, 2  ;;  %v241_v53 = vrot.slane %v202_v42, 1  ;;  %1074 = vmatpush3.bf16.msra.mxu0 %v1073_v39  ;;  %1110 = vmatpush3.bf16.msra.mxu1 %v1073_v39  ;;  %v1519_v29 = vld [vmem:[%s1401_s30 + $0x40] sm:$0xff] }
  0x17   : > { %v259_v54 = vrot.slane %v1434_v36, 2  ;;  %v265_v55 = vrot.slane %v1437_v37, 2  ;;  %v236_v56 = vsel %vm233_vm0, %v234_v41, %v235_v48  ;;  %v266_v57 = vrot.slane %v202_v42, 2  ;;  %v204_v0 = vld [vmem:[%s1401_s30 + $0x38] sm:$0x3]  ;;  %1076 = vmatprep.subr.bf16.mxu0 %v1075_v44  ;;  %1103 = vmatprep.subr.bf16.mxu1 %v1075_v44  ;;  %v1522_v31 = vld [vmem:[%s1401_s30 + $0x90] sm:$0xff] }
  0x18   : > { %v280_v58 = vrot.slane %v1450_v50, 2  ;;  %v281_v59 = vrot.slane %v1453_v51, 2  ;;  %v1148_v60 = vpack.i.bf16 %v236_v56, %v1446_v46  ;;  %v1463_v61 = vsel %vm233_vm0, %v240_v43, %v241_v53  ;;  %v214_v1 = vld [vmem:[%s1401_s30 + $0x88] sm:$0x3]  ;;  %v528_v35 = vld [vmem:[%s1821_s1 + $0xd0] sm:$0xff]  ;;  %v529_v38 = vld [vmem:[%s1821_s1 + $0xd8] sm:$0xff] }
  0x19   : > { %v261_v62 = vsel %vm258_vm1, %v259_v54, %v260_v49  ;;  %v237_v63 = vrot.slane %v1419_v27, 1  ;;  %v1158_v2 = vpack.i.bf16 %v1419_v27, %v1463_v61  ;;  %v1473_v4 = vsel %vm258_vm1, %v265_v55, %v266_v57  ;;  %v206_v32 = vld [vmem:[%s1401_s30 + $0x48] sm:$0x3]  ;;  %v512_v42 = vld [vmem:[%s1821_s1 + $0x50] sm:$0xff]  ;;  %v513_v43 = vld [vmem:[%s1821_s1 + $0x58] sm:$0xff] }
  0x1a   : > { %v1153_v3 = vpack.i.bf16 %v261_v62, %v1437_v37  ;;  %v1476_v5 = vsel %vm258_vm1, %v280_v58, %v281_v59  ;;  %1149 = vrot.lane.b32.xlu0 %v1148_v60, %s1304_s11  ;;  %v252_v8 = vrot.slane %v1427_v30, 1  ;;  %v253_v9 = vrot.slane %v1431_v33, 1  ;;  %1078 = vmatpush3.bf16.msra.mxu0 %v1077_v45  ;;  %v1526_v33 = vld [vmem:[%s1401_s30 + $0x98] sm:$0x3]  ;;  %v530_v48 = vld [vmem:[%s1821_s1 + $0xe0] sm:$0xff]  ;;  %v531_v49 = vld [vmem:[%s1821_s1 + $0xe8] sm:$0xff] }
  0x1b   : > { %v1481_v6 = vpack.i.bf16 %v1476_v5, %v1473_v4  ;;  %v1484_v7 = vsel %vm233_vm0, %v237_v63, %v238_v34  ;;  %1159 = vrot.lane.b32.xlu1 %v1158_v2, %s1305_s16  ;;  %v243_v10 = vrot.slane %v1413_v25, 1  ;;  %v244_v11 = vrot.slane %v204_v0, 1  ;;  %1111 = vmatpush3.bf16.msra.mxu1 %v1077_v45  ;;  %v515_v53 = vld [vmem:[%s1821_s1 + $0x68] sm:$0xff]  ;;  %v532_v56 = vld [vmem:[%s1821_s1 + $0xf0] sm:$0xff]  ;;  %v533_v57 = vld [vmem:[%s1821_s1 + $0xf8] sm:$0xff] }
  0x1c   : > { %v285_v12 = vrot.slane %v1416_v26, 1  ;;  %v286_v13 = vrot.slane %v214_v1, 1  ;;  %v1492_v14 = vsel %vm233_vm0, %v252_v8, %v253_v9  ;;  %v268_v15 = vrot.slane %v1413_v25, 2  ;;  %v1584_v2 = vld [vmem:[%s1401_s30 + $0x50] sm:$0xff]  ;;  %v208_v8 = vld [vmem:[%s1401_s30 + $0x58] sm:$0x3] }
  0x1d   : > { %v269_v16 = vrot.slane %v204_v0, 2  ;;  %v296_v17 = vrot.slane %v1416_v26, 2  ;;  %v1497_v18 = vsel %vm233_vm0, %v243_v10, %v244_v11  ;;  %v297_v20 = vrot.slane %v214_v1, 2  ;;  %v516_v10 = vld [vmem:[%s1821_s1 + $0x70] sm:$0xff]  ;;  %v517_v11 = vld [vmem:[%s1821_s1 + $0x78] sm:$0xff] }
  0x1e   : > { %v1500_v19 = vsel %vm233_vm0, %v285_v12, %v286_v13  ;;  %1154 = vrot.lane.b32.xlu0 %v1153_v3, %s1303_s10  ;;  %v1168_v21 = vpack.i.bf16 %v1492_v14, %v1484_v7  ;;  %v1506_v22 = vsel %vm258_vm1, %v277_v47, %v278_v52  ;;  %v255_v40 = vrot.slane %v1450_v50, 1  ;;  %v514_v52 = vld [vmem:[%s1821_s1 + $0x60] sm:$0xff] }
  0x1f   : > { %1164 = vrot.lane.b32.xlu1 %v1481_v6, %s1304_s11  ;;  %v1178_v23 = vpack.i.bf16 %v1500_v19, %v1497_v18  ;;  %v1513_v24 = vsel %vm258_vm1, %v268_v15, %v269_v16  ;;  %v1516_v26 = vsel %vm258_vm1, %v296_v17, %v297_v20  ;;  %v1173_v34 = vpack.i.bf16 %v1506_v22, %v1446_v46  ;;  %v534_v15 = vld [vmem:[%s1821_s1 + $0x100] sm:$0xff]  ;;  %v535_v16 = vld [vmem:[%s1821_s1 + $0x108] sm:$0xff] }
  0x20   : > { %v1188_v39 = vpack.i.bf16 %v1516_v26, %v1513_v24  ;;  %v256_v41 = vrot.slane %v1453_v51, 1  ;;  %v301_v44 = vrot.slane %v1522_v31, 1  ;;  %v246_v45 = vrot.slane %v1519_v29, 1 }
  0x21   : > { %v247_v46 = vrot.slane %v206_v32, 1  ;;  %v302_v47 = vrot.slane %v1526_v33, 1  ;;  %v1079_v51 = vpack.c.bf16 %v529_v38, %v528_v35  ;;  %v1183_v54 = vpack.i.bf16 %v1450_v50, %v1437_v37 }
  0x22   : > { %1169 = vrot.lane.b32.xlu0 %v1168_v21, %s1304_s11  ;;  %v1081_v55 = vpack.c.bf16 %v513_v43, %v512_v42  ;;  %v1198_v58 = vpack.i.bf16 %v1522_v31, %v1519_v29  ;;  %v1576_v59 = vsel %vm233_vm0, %v255_v40, %v256_v41  ;;  %v271_v60 = vrot.slane %v1519_v29, 2 }
  0x23   : > { %1179 = vrot.lane.b32.xlu1 %v1178_v23, %s1305_s16  ;;  %1080 = vmatprep.subr.bf16.mxu0 %v1079_v51  ;;  %v1083_v62 = vpack.c.bf16 %v531_v49, %v530_v48  ;;  %v1580_v63 = vsel %vm233_vm0, %v246_v45, %v247_v46  ;;  %v303_v0 = vsel %vm233_vm0, %v301_v44, %v302_v47  ;;  %v272_v1 = vrot.slane %v206_v32, 2 }
  0x24   : > { %1082 = vmatpush3.bf16.msra.mxu0 %v1081_v55  ;;  %v1085_v3 = vpack.c.bf16 %v515_v53, %v514_v52  ;;  %1104 = vmatprep.subr.bf16.mxu1 %v1079_v51  ;;  %v1087_v9 = vpack.c.bf16 %v533_v57, %v532_v56  ;;  %v1193_v12 = vpack.i.bf16 %v1576_v59, %v1463_v61  ;;  %v249_v20 = vrot.slane %v1584_v2, 1 }
  0x25   : > { %1084 = vmatprep.subr.bf16.mxu0 %v1083_v62  ;;  %1112 = vmatpush3.bf16.msra.mxu1 %v1081_v55  ;;  %v1208_v13 = vpack.i.bf16 %v303_v0, %v1580_v63  ;;  %v1605_v17 = vsel %vm258_vm1, %v271_v60, %v272_v1  ;;  %v250_v21 = vrot.slane %v208_v8, 1  ;;  %v1089_v23 = vpack.c.bf16 %v517_v11, %v516_v10 }
  0x26   : > { %1174 = vrot.lane.b32.xlu0 %v1173_v34, %s1303_s10  ;;  %1105 = vmatprep.subr.bf16.mxu1 %v1083_v62  ;;  %v1609_v32 = vpack.c.bf16 %v535_v16, %v534_v15  ;;  %v1218_v34 = vpack.i.bf16 %v1497_v18, %v1605_v17  ;;  %v275_v40 = vrot.slane %v208_v8, 2  ;;  %v1223_v41 = vpack.i.bf16 %v1513_v24, %v1584_v2 }
  0x27   : > { %1189 = vrot.lane.b32.xlu1 %v1188_v39, %s1304_s11  ;;  %v1615_v35 = vsel %vm233_vm0, %v249_v20, %v250_v21  ;;  %v274_v39 = vrot.slane %v1584_v2, 2  ;;  %v1238_v42 = vpack.i.bf16 %v1605_v17, %v1427_v30  ;;  %v304_v43 = vrot.slane %v1522_v31, 2 }
  0x28   : > { %1086 = vmatpush3.bf16.msra.mxu0 %v1085_v3  ;;  %v1228_v38 = vpack.i.bf16 %v1519_v29, %v1615_v35  ;;  %v305_v44 = vrot.slane %v1526_v33, 2  ;;  %v1248_v45 = vpack.i.bf16 %v1615_v35, %v1506_v22  ;;  %v1243_v31 = vpack.i.bf16 %v1584_v2, %v1492_v14 }
  0x29   : > { %1088 = vmatprep.subr.bf16.mxu0 %v1087_v9  ;;  %1113 = vmatpush3.bf16.msra.mxu1 %v1085_v3  ;;  %v1258_v33 = vpack.i.bf16 %v1427_v30, %v1576_v59 }
  0x2a   : > { %1184 = vrot.lane.b32.xlu0 %v1183_v54, %s1305_s16  ;;  %1106 = vmatprep.subr.bf16.mxu1 %v1087_v9  ;;  %v1643_v46 = vsel %vm258_vm1, %v304_v43, %v305_v44  ;;  %v536_v44 = vld [vmem:[%s1821_s1 + $0x110] sm:$0xff] }
  0x2b   : > { %1199 = vrot.lane.b32.xlu1 %v1198_v58, %s1303_s10 }
  0x2c   : > { %1090 = vmatpush3.bf16.msra.mxu0 %v1089_v23 }
  0x2d   : > { %1114 = vmatpush3.bf16.msra.mxu1 %v1089_v23 }
  0x2e   : > { %1194 = vrot.lane.b32.xlu0 %v1193_v12, %s1304_s11  ;;  %1092 = vmatprep.subr.bf16.mxu1 %v1609_v32 }
  0x2f   : > { %1209 = vrot.lane.b32.xlu1 %v1208_v13, %s1305_s16 }
  0x32   : > { %1204 = vrot.lane.b32.xlu0 %v1481_v6, %s1303_s10  ;;  %v1630_v6 = vsel %vm258_vm1, %v274_v39, %v275_v40 }
  0x33   : > { %1219 = vrot.lane.b32.xlu1 %v1218_v34, %s1304_s11  ;;  %v1253_v47 = vpack.i.bf16 %v1630_v6, %v1450_v50 }
  0x36   : > { %1214 = vrot.lane.b32.xlu0 %v1423_v28, %s1305_s16  ;;  %v1233_v28 = vpack.i.bf16 %v1580_v63, %v1630_v6 }
  0x37   : > { %1229 = vrot.lane.b32.xlu1 %v1228_v38, %s1305_s16 }
  0x3a   : > { %1224 = vrot.lane.b32.xlu0 %v1223_v41, %s1303_s10 }
  0x3b   : > { %1239 = vrot.lane.b32.xlu1 %v1238_v42, %s1303_s10 }
  0x3e   : > { %1234 = vrot.lane.b32.xlu0 %v1233_v28, %s1304_s11  ;;  %v537_v28 = vld [vmem:[%s1821_s1 + $0x118] sm:$0xff] }
  0x3f   : > { %1249 = vrot.lane.b32.xlu1 %v1248_v45, %s1304_s11 }
  0x42   : > { %1244 = vrot.lane.b32.xlu0 %v1243_v31, %s1305_s16 }
  0x43   : > { %1259 = vrot.lane.b32.xlu1 %v1258_v33, %s1305_s16 }
  0x46   : > { %1254 = vrot.lane.b32.xlu0 %v1253_v47, %s1303_s10 }
  0x87   : > { %v1145_v48 = vpop.permute.xlu1 %1144 }
  0x88   : > { %v1147_v16 = vunpack.i.h.bf16 %v1145_v48 }
  0x8c   : > { %v1150_v49 = vpop.permute.xlu0 %1149 }
  0x8d   : > { %v1160_v51 = vpop.permute.xlu1 %1159  ;;  %v1152_v52 = vunpack.i.h.bf16 %v1150_v49  ;;  %v1151_v53 = vunpack.i.l.bf16 %v1150_v49 }
  0x8e   : > { %v1162_v54 = vunpack.i.h.bf16 %v1160_v51  ;;  %v1161_v55 = vunpack.i.l.bf16 %v1160_v51 }
  0x8f   : > { %v478_v1 = vsel %vm451_vm2, %v1484_v7, %v1151_v53  ;;  %v452_v3 = vsel %vm451_vm2, %v1434_v36, %v1152_v52  ;;  %v1146_v7 = vunpack.i.l.bf16 %v1145_v48 }
  0x90   : > { %v1155_v56 = vpop.permute.xlu0 %1154 }
  0x91   : > { %v1157_v57 = vunpack.i.h.bf16 %v1155_v56  ;;  %v1156_v58 = vunpack.i.l.bf16 %v1155_v56  ;;  %v1165_v60 = vpop.permute.xlu1 %1164 }
  0x92   : > { %v1167_v62 = vunpack.i.h.bf16 %v1165_v60  ;;  %v1166_v0 = vunpack.i.l.bf16 %v1165_v60 }
  0x93   : > { %v486_v8 = vsel %vm460_vm3, %v478_v1, %v1156_v58  ;;  %v461_v9 = vsel %vm460_vm3, %v452_v3, %v1157_v57 }
  0x94   : > { %v1170_v10 = vpop.permute.xlu0 %1169  ;;  %v494_v11 = vsel %vm469_vm4, %v486_v8, %v1161_v55  ;;  %v470_v12 = vsel %vm469_vm4, %v461_v9, %v1162_v54  ;;  %v479_v13 = vsel %vm451_vm2, %v1463_v61, %v1166_v0  ;;  %v484_v15 = vsel %vm451_vm2, %v1576_v59, %v1167_v62 }
  0x95   : > { %v1180_v20 = vpop.permute.xlu1 %1179  ;;  %625 = vmatprep.mubr.f32.mxu0 %v494_v11  ;;  %v487_v23 = vsel %vm460_vm3, %v479_v13, %v1146_v7  ;;  %v492_v34 = vsel %vm460_vm3, %v484_v15, %v1147_v16  ;;  %v1172_v61 = vunpack.i.h.bf16 %v1170_v10  ;;  %v1171_v41 = vunpack.i.l.bf16 %v1170_v10 }
  0x96   : > { %v1182_v36 = vunpack.i.h.bf16 %v1180_v20  ;;  %v1181_v21 = vunpack.i.l.bf16 %v1180_v20  ;;  %626 = vmatmul.mubr.f32.vlgmr.msra.gmra.mrb[0].mxu0 %v470_v12  ;;  %v1095_v55 = vpack.c.bf16 %v537_v28, %v536_v44 }
  0x97   : > { %v453_v51 = vsel %vm451_vm2, %v1419_v27, %v1171_v41  ;;  %v458_v52 = vsel %vm451_vm2, %v1427_v30, %v1172_v61 }
  0x98   : > { %v1175_v38 = vpop.permute.xlu0 %1174  ;;  %v495_v39 = vsel %vm469_vm4, %v487_v23, %v1181_v21  ;;  %v500_v40 = vsel %vm469_vm4, %v492_v34, %v1182_v36 }
  0x99   : > { %v1190_v42 = vpop.permute.xlu1 %1189  ;;  %630 = vmatprep.mubr.f32.mxu0 %v495_v39  ;;  %655 = vmatprep.mubr.f32.mxu1 %v500_v40  ;;  %v1177_v59 = vunpack.i.h.bf16 %v1175_v38  ;;  %v1176_v43 = vunpack.i.l.bf16 %v1175_v38 }
  0x9a   : > { %v1192_v45 = vunpack.i.h.bf16 %v1190_v42  ;;  %v1191_v31 = vunpack.i.l.bf16 %v1190_v42 }
  0x9b   : > { %v462_v53 = vsel %vm460_vm3, %v453_v51, %v1176_v43  ;;  %v467_v54 = vsel %vm460_vm3, %v458_v52, %v1177_v59 }
  0x9c   : > { %v1185_v33 = vpop.permute.xlu0 %1184  ;;  %v480_v27 = vsel %vm451_vm2, %v1497_v18, %v1191_v31  ;;  %v485_v30 = vsel %vm451_vm2, %v1500_v19, %v1192_v45 }
  0x9d   : > { %v1187_v47 = vunpack.i.h.bf16 %v1185_v33  ;;  %v1186_v48 = vunpack.i.l.bf16 %v1185_v33  ;;  %v1200_v49 = vpop.permute.xlu1 %1199 }
  0x9e   : > { %v1202_v56 = vunpack.i.h.bf16 %v1200_v49  ;;  %v1201_v57 = vunpack.i.l.bf16 %v1200_v49 }
  0x9f   : > { %v471_v58 = vsel %vm469_vm4, %v462_v53, %v1186_v48  ;;  %v476_v60 = vsel %vm469_vm4, %v467_v54, %v1187_v47 }
  0xa0   : > { %v1195_v62 = vpop.permute.xlu0 %1194  ;;  %631 = vmatmul.mubr.f32.gmra.mrb[2].mxu0 %v471_v58  ;;  %656 = vmatmul.mubr.f32.vlgmr.msra.gmra.mrb[0].mxu1 %v476_v60  ;;  %v488_v8 = vsel %vm460_vm3, %v480_v27, %v1201_v57  ;;  %v493_v9 = vsel %vm460_vm3, %v485_v30, %v1202_v56 }
  0xa1   : > { %v1210_v0 = vpop.permute.xlu1 %1209  ;;  %1094 = vmatpush3.bf16.msra.mxu1 %v1609_v32  ;;  %v1197_v13 = vunpack.i.h.bf16 %v1195_v62  ;;  %v1196_v18 = vunpack.i.l.bf16 %v1195_v62 }
  0xa2   : > { %v1212_v1 = vunpack.i.h.bf16 %v1210_v0  ;;  %v1211_v3 = vunpack.i.l.bf16 %v1210_v0  ;;  %1096 = vmatprep.subr.bf16.mxu1 %v1095_v55 }
  0xa3   : > { %v454_v36 = vsel %vm451_vm2, %v1437_v37, %v1196_v18  ;;  %v459_v21 = vsel %vm451_vm2, %v1450_v50, %v1197_v13 }
  0xa4   : > { %v1205_v10 = vpop.permute.xlu0 %1204  ;;  %v496_v11 = vsel %vm469_vm4, %v488_v8, %v1211_v3  ;;  %v501_v12 = vsel %vm469_vm4, %v493_v9, %v1212_v1 }
  0xa5   : > { %635 = vmatprep.mubr.f32.mxu0 %v496_v11  ;;  %660 = vmatprep.mubr.f32.mxu1 %v501_v12  ;;  %v1220_v19 = vpop.permute.xlu1 %1219  ;;  %v1207_v15 = vunpack.i.h.bf16 %v1205_v10  ;;  %v1206_v16 = vunpack.i.l.bf16 %v1205_v10 }
  0xa6   : > { %1098 = vmatpush3.bf16.msra.mxu1 %v1095_v55  ;;  %v1222_v34 = vunpack.i.h.bf16 %v1220_v19  ;;  %v1221_v38 = vunpack.i.l.bf16 %v1220_v19 }
  0xa7   : > { %v463_v39 = vsel %vm460_vm3, %v454_v36, %v1206_v16  ;;  %v468_v40 = vsel %vm460_vm3, %v459_v21, %v1207_v15 }
  0xa8   : > { %v1215_v32 = vpop.permute.xlu0 %1214  ;;  %v481_v28 = vsel %vm451_vm2, %v1580_v63, %v1221_v38  ;;  %v455_v45 = vsel %vm451_vm2, %v1413_v25, %v1222_v34 }
  0xa9   : > { %v1217_v7 = vunpack.i.h.bf16 %v1215_v32  ;;  %v1216_v20 = vunpack.i.l.bf16 %v1215_v32  ;;  %v1230_v23 = vpop.permute.xlu1 %1229 }
  0xaa   : > { %v1232_v59 = vunpack.i.h.bf16 %v1230_v23  ;;  %v1231_v43 = vunpack.i.l.bf16 %v1230_v23 }
  0xab   : > { %v472_v61 = vsel %vm469_vm4, %v463_v39, %v1216_v20  ;;  %v477_v41 = vsel %vm469_vm4, %v468_v40, %v1217_v7 }
  0xac   : > { %v1225_v42 = vpop.permute.xlu0 %1224  ;;  %636 = vmatmul.mubr.f32.gmra.mrb[4].mxu0 %v472_v61  ;;  %661 = vmatmul.mubr.f32.gmra.mrb[2].mxu1 %v477_v41 }
  0xad   : > { %v1227_v37 = vunpack.i.h.bf16 %v1225_v42  ;;  %v1226_v44 = vunpack.i.l.bf16 %v1225_v42  ;;  %1047 = vmatprep.mubr.msk.f32.mxu1 %vm451_vm2, %v1473_v4  ;;  %v1240_v50 = vpop.permute.xlu1 %1239 }
  0xae   : > { %v1242_v25 = vunpack.i.h.bf16 %v1240_v50  ;;  %v1241_v52 = vunpack.i.l.bf16 %v1240_v50 }
  0xaf   : > { %v489_v31 = vsel %vm460_vm3, %v481_v28, %v1226_v44  ;;  %v464_v33 = vsel %vm460_vm3, %v455_v45, %v1227_v37 }
  0xb0   : > { %v1235_v47 = vpop.permute.xlu0 %1234  ;;  %1048 = vmatmul.mubr.msk.f32.vlgmr.msra.gmra.mrb[4].mxu1 %vm451_vm2, %v1513_v24  ;;  %v497_v48 = vsel %vm469_vm4, %v489_v31, %v1231_v43  ;;  %v473_v49 = vsel %vm469_vm4, %v464_v33, %v1232_v59 }
  0xb1   : > { %v1237_v4 = vunpack.i.h.bf16 %v1235_v47  ;;  %v1236_v51 = vunpack.i.l.bf16 %v1235_v47  ;;  %640 = vmatprep.mubr.f32.mxu0 %v497_v48  ;;  %1050 = vmatprep.mubr.msk.f32.mxu1 %vm451_vm2, %v1605_v17  ;;  %v1250_v63 = vpop.permute.xlu1 %1249 }
  0xb2   : > { %641 = vmatmul.mubr.f32.gmra.mrb[6].mxu0 %v473_v49  ;;  %v1252_v57 = vunpack.i.h.bf16 %v1250_v63  ;;  %v1251_v58 = vunpack.i.l.bf16 %v1250_v63 }
  0xb3   : > { %v482_v53 = vsel %vm451_vm2, %v1615_v35, %v1236_v51  ;;  %v456_v24 = vsel %vm451_vm2, %v1519_v29, %v1237_v4 }
  0xb4   : > { %v1245_v54 = vpop.permute.xlu0 %1244  ;;  %1051 = vmatmul.mubr.msk.f32.gmra.mrb[6].mxu1 %vm451_vm2, %v1630_v6  ;;  %v490_v60 = vsel %vm460_vm3, %v482_v53, %v1241_v52  ;;  %v465_v62 = vsel %vm460_vm3, %v456_v24, %v1242_v25  ;;  %v483_v1 = vsel %vm451_vm2, %v1492_v14, %v1251_v58  ;;  %v457_v3 = vsel %vm451_vm2, %v1584_v2, %v1252_v57 }
  0xb5   : > { %v1247_v55 = vunpack.i.h.bf16 %v1245_v54  ;;  %v1246_v56 = vunpack.i.l.bf16 %v1245_v54  ;;  %1053 = vmatprep.mubr.msk.f32.mxu1 %vm451_vm2, %v1506_v22  ;;  %v1260_v17 = vpop.permute.xlu1 %1259 }
  0xb6   : > { %v1262_v6 = vunpack.i.h.bf16 %v1260_v17  ;;  %v1261_v30 = vunpack.i.l.bf16 %v1260_v17 }
  0xb7   : > { %v498_v35 = vsel %vm469_vm4, %v490_v60, %v1246_v56  ;;  %v474_v29 = vsel %vm469_vm4, %v465_v62, %v1247_v55 }
  0xb8   : > { %v1255_v27 = vpop.permute.xlu0 %1254  ;;  %645 = vmatprep.mubr.f32.mxu0 %v498_v35  ;;  %1054 = vmatmul.mubr.msk.f32.gmra.mrb[8].mxu1 %vm451_vm2, %v1476_v5 }
  0xb9   : > { %v1257_v0 = vunpack.i.h.bf16 %v1255_v27  ;;  %v1256_v22 = vunpack.i.l.bf16 %v1255_v27  ;;  %646 = vmatmul.mubr.f32.gmra.mrb[8].mxu0 %v474_v29  ;;  %1056 = vmatprep.mubr.msk.f32.mxu1 %vm451_vm2, %v1516_v26 }
  0xbb   : > { %v491_v8 = vsel %vm460_vm3, %v483_v1, %v1256_v22  ;;  %v466_v9 = vsel %vm460_vm3, %v457_v3, %v1257_v0 }
  0xbc   : > { %1057 = vmatmul.mubr.msk.f32.gmra.mrb[10].mxu1 %vm451_vm2, %v1643_v46  ;;  %v499_v5 = vsel %vm469_vm4, %v491_v8, %v1261_v30  ;;  %v475_v10 = vsel %vm469_vm4, %v466_v9, %v1262_v6  ;;  %v959_v46 = vld [vmem:[%s1822_s2] ss:$0 sm:$0xff] }
  0xbd   : > { %650 = vmatprep.mubr.f32.mxu0 %v499_v5 }
  0xbe   : > { %651 = vmatmul.mubr.f32.gmra.mrb[10].mxu0 %v475_v10 }
 0x169   : > { %v1003_v26 = vpop.f32.mrb[0].mxu0 }
 0x16a   : > { %v1004_v11 = vpop.f32.mrb[1].mxu0 }
 0x16b   : > { %v1005_v12 = vadd.f32 %v1004_v11, %v1003_v26 }
 0x16d   : > { %v628_v38 = vadd.f32 %v1005_v12, %v959_v46 }
 0x173   : > { %v1006_v14 = vpop.f32.mrb[2].mxu0  ;;  %v1021_v13 = vpop.f32.mrb[0].mxu1 }
 0x174   : > { %v1007_v18 = vpop.f32.mrb[3].mxu0  ;;  %v1022_v2 = vpop.f32.mrb[1].mxu1 }
 0x175   : > { %v1008_v19 = vadd.f32 %v1007_v18, %v1006_v14  ;;  %v1023_v15 = vadd.f32 %v1022_v2, %v1021_v13 }
 0x177   : > { %v633_v23 = vadd.f32 %v1008_v19, %v959_v46  ;;  %v658_v62 = vadd.f32 %v1023_v15, %v959_v46 }
 0x17f   : > { %v1009_v16 = vpop.f32.mrb[4].mxu0  ;;  %v1024_v32 = vpop.f32.mrb[2].mxu1 }
 0x180   : > { %v1010_v7 = vpop.f32.mrb[5].mxu0  ;;  %v1025_v20 = vpop.f32.mrb[3].mxu1 }
 0x181   : > { %v1011_v36 = vadd.f32 %v1010_v7, %v1009_v16  ;;  %v1026_v21 = vadd.f32 %v1025_v20, %v1024_v32 }
 0x183   : > { %v1049_v34 = vpop.f32.mrb[4].mxu1  ;;  %v638_v50 = vadd.f32 %v1011_v36, %v959_v46  ;;  %v663_v57 = vadd.f32 %v1026_v21, %v959_v46 }
 0x184   : > { %v738_v39 = vadd.f32 %v1049_v34, %v633_v23  ;;  %v732_v40 = vpop.f32.mrb[5].mxu1 }
 0x185   : > { %v733_v61 = vadd.f32 %v732_v40, %v628_v38  ;;  %v1012_v41 = vpop.f32.mrb[6].mxu0 }
 0x186   : > { %vm772_vm5 = vcmp.ge.f32.partialorder %v738_v39, 0.0  ;;  %v780_v42 = vmul.f32 0.2, %v738_v39  ;;  %v1013_v59 = vpop.f32.mrb[7].mxu0 }
 0x187   : > { %vm771_vm6 = vcmp.ge.f32.partialorder %v733_v61, 0.0  ;;  %v779_v43 = vmul.f32 0.2, %v733_v61  ;;  %v1014_v37 = vadd.f32 %v1013_v59, %v1012_v41  ;;  %v1052_v44 = vpop.f32.mrb[6].mxu1 }
 0x188   : > { %v742_v28 = vpop.f32.mrb[7].mxu1  ;;  %v1746_v45 = vsel %vm772_vm5, %v738_v39, %v780_v42 }
 0x189   : > { %v643_v31 = vadd.f32 %v1014_v37, %v959_v46  ;;  %v743_v33 = vadd.f32 %v742_v28, %v638_v50  ;;  %v796_v47 = vmul.f32 %v1746_v45, %v1746_v45  ;;  %v1750_v48 = vsel %vm771_vm6, %v733_v61, %v779_v43 }
 0x18a   : > { %v795_v49 = vmul.f32 %v1750_v48, %v1750_v48 }
 0x18b   : > { %v748_v4 = vadd.f32 %v1052_v44, %v643_v31  ;;  %vm773_vm7 = vcmp.ge.f32.partialorder %v743_v33, 0.0  ;;  %v781_v51 = vmul.f32 0.2, %v743_v33  ;;  %v806_v63 = vsel %vm451_vm2, %v796_v47, 0.0  ;;  %v1055_v25 = vpop.f32.mrb[8].mxu1 }
 0x18c   : > { %v1015_v52 = vpop.f32.mrb[8].mxu0  ;;  %807 = vadd.xlane.f32.xlu1 %v806_v63  ;;  %v803_v53 = vsel %vm451_vm2, %v795_v49, 0.0  ;;  %v752_v24 = vpop.f32.mrb[9].mxu1 }
 0x18d   : > { %vm774_vm8 = vcmp.ge.f32.partialorder %v748_v4, 0.0  ;;  %v782_v54 = vmul.f32 0.2, %v748_v4  ;;  %v1016_v55 = vpop.f32.mrb[9].mxu0  ;;  %804 = vadd.xlane.f32.xlu0 %v803_v53  ;;  %v1756_v56 = vsel %vm773_vm7, %v743_v33, %v781_v51 }
 0x18e   : > { %v1017_v17 = vadd.f32 %v1016_v55, %v1015_v52  ;;  %v797_v58 = vmul.f32 %v1756_v56, %v1756_v56 }
 0x18f   : > { %v1058_v60 = vpop.f32.mrb[10].mxu1  ;;  %v1760_v35 = vsel %vm774_vm8, %v748_v4, %v782_v54 }
 0x190   : > { %v648_v29 = vadd.f32 %v1017_v17, %v959_v46  ;;  %v768_v27 = vadd.f32 %v1058_v60, %v663_v57  ;;  %v762_v6 = vpop.f32.mrb[11].mxu1  ;;  %v809_v30 = vsel %vm451_vm2, %v797_v58, 0.0  ;;  %v798_v0 = vmul.f32 %v1760_v35, %v1760_v35 }
 0x191   : > { %v763_v22 = vadd.f32 %v762_v6, %v658_v62  ;;  %v1018_v1 = vpop.f32.mrb[10].mxu0  ;;  %810 = vadd.xlane.f32.xlu0 %v809_v30 }
 0x192   : > { %v753_v3 = vadd.f32 %v752_v24, %v648_v29  ;;  %v1019_v8 = vpop.f32.mrb[11].mxu0  ;;  %v812_v26 = vsel %vm451_vm2, %v798_v0, 0.0  ;;  %v786_v13 = vmul.f32 0.2, %v768_v27  ;;  %vm778_vm11 = vcmp.ge.f32.partialorder %v768_v27, 0.0 }
 0x193   : > { %vm777_vm9 = vcmp.ge.f32.partialorder %v763_v22, 0.0  ;;  %v785_v9 = vmul.f32 0.2, %v763_v22  ;;  %v1020_v5 = vadd.f32 %v1019_v8, %v1018_v1 }
 0x194   : > { %vm775_vm10 = vcmp.ge.f32.partialorder %v753_v3, 0.0  ;;  %v783_v10 = vmul.f32 0.2, %v753_v3  ;;  %v1775_v7 = vsel %vm778_vm11, %v768_v27, %v786_v13 }
 0x195   : > { %v653_v11 = vadd.f32 %v1020_v5, %v959_v46  ;;  %813 = vadd.xlane.f32.xlu0 %v812_v26  ;;  %v1768_v14 = vsel %vm777_vm9, %v763_v22, %v785_v9  ;;  %v802_v21 = vmul.f32 %v1775_v7, %v1775_v7 }
 0x196   : > { %v1766_v12 = vsel %vm775_vm10, %v753_v3, %v783_v10  ;;  %v801_v15 = vmul.f32 %v1768_v14, %v1768_v14 }
 0x197   : > { %v758_v18 = vadd.f32 %v1055_v25, %v653_v11  ;;  %v799_v2 = vmul.f32 %v1766_v12, %v1766_v12  ;;  %v824_v23 = vsel %vm451_vm2, %v802_v21, 0.0 }
 0x198   : > { %v821_v46 = vsel %vm451_vm2, %v801_v15, 0.0 }
 0x199   : > { %v815_v19 = vsel %vm451_vm2, %v799_v2, 0.0  ;;  %vm776_vm12 = vcmp.ge.f32.partialorder %v758_v18, 0.0  ;;  %v784_v16 = vmul.f32 0.2, %v758_v18 }
 0x19a   : > { %816 = vadd.xlane.f32.xlu1 %v815_v19 }
 0x19b   : > { %v792_v32 = vsel %vm776_vm12, %v758_v18, %v784_v16 }
 0x19c   : > { %v800_v20 = vmul.f32 %v792_v32, %v792_v32 }
 0x19e   : > { %822 = vadd.xlane.f32.xlu1 %v821_v46  ;;  %v818_v36 = vsel %vm451_vm2, %v800_v20, 0.0 }
 0x19f   : > { %819 = vadd.xlane.f32.xlu0 %v818_v36 }
 0x1a3   : > { %825 = vadd.xlane.f32.xlu0 %v824_v23 }
 0x219   : > { %v808_v34 = vpop.xlane.xlu1 %807 }
 0x21a   : > { %v829_v38 = vmul.f32 0.03125, %v808_v34  ;;  %v805_v39 = vpop.xlane.xlu0 %804 }
 0x21b   : > { %v828_v40 = vmul.f32 0.03125, %v805_v39 }
 0x21c   : > { %v837_v61 = vadd.f32 1e-08, %v829_v38 }
 0x21d   : > { %v836_v41 = vadd.f32 1e-08, %v828_v40 }
 0x21e   : > { %1263 = vrsqrt.f32 %v837_v61  ;;  %v811_v42 = vpop.xlane.xlu0 %810 }
 0x21f   : > { %1265 = vrsqrt.f32 %v836_v41  ;;  %v830_v59 = vmul.f32 0.03125, %v811_v42 }
 0x221   : > { %v838_v43 = vadd.f32 1e-08, %v830_v59 }
 0x222   : > { %v814_v37 = vpop.xlane.xlu0 %813 }
 0x223   : > { %1267 = vrsqrt.f32 %v838_v43  ;;  %v831_v44 = vmul.f32 0.03125, %v814_v37 }
 0x225   : > { %v839_v50 = vadd.f32 1e-08, %v831_v44 }
 0x227   : > { %1269 = vrsqrt.f32 %v839_v50  ;;  %v817_v28 = vpop.xlane.xlu1 %816 }
 0x228   : > { %v1264_v31 = vpop.eup %1263  ;;  %v832_v33 = vmul.f32 0.03125, %v817_v28 }
 0x229   : > { %v1266_v47 = vpop.eup %1265  ;;  %v853_v49 = vmul.f32 %v1264_v31, %v1746_v45 }
 0x22a   : > { %v852_v4 = vmul.f32 %v1266_v47, %v1750_v48  ;;  %v840_v51 = vadd.f32 1e-08, %v832_v33 }
 0x22b   : > { %861 = vst.msk [vmem:[%s1786_s5 + $0x8] sm:$0xff] %vm451_vm2, %v853_v49  ;;  %v823_v63 = vpop.xlane.xlu1 %822 }
 0x22c   : > { %860 = vst.msk [vmem:[%s1786_s5] sm:$0xff] %vm451_vm2, %v852_v4  ;;  %1271 = vrsqrt.f32 %v840_v51  ;;  %v834_v25 = vmul.f32 0.03125, %v823_v63  ;;  %v820_v52 = vpop.xlane.xlu0 %819 }
 0x22d   : > { %v1268_v53 = vpop.eup %1267  ;;  %v833_v24 = vmul.f32 0.03125, %v820_v52 }
 0x22e   : > { %v854_v54 = vmul.f32 %v1268_v53, %v1756_v56  ;;  %v842_v55 = vadd.f32 1e-08, %v834_v25 }
 0x22f   : > { %v841_v17 = vadd.f32 1e-08, %v833_v24 }
 0x230   : > { %862 = vst.msk [vmem:[%s1786_s5 + $0x10] sm:$0xff] %vm451_vm2, %v854_v54  ;;  %1273 = vrsqrt.f32 %v842_v55  ;;  %v826_v45 = vpop.xlane.xlu0 %825 }
 0x231   : > { %v1270_v48 = vpop.eup %1269  ;;  %1275 = vrsqrt.f32 %v841_v17  ;;  %v835_v57 = vmul.f32 0.03125, %v826_v45 }
 0x232   : > { %v855_v58 = vmul.f32 %v1270_v48, %v1760_v35 }
 0x233   : > { %v843_v60 = vadd.f32 1e-08, %v835_v57 }
 0x234   : > { %863 = vst.msk [vmem:[%s1786_s5 + $0x18] sm:$0xff] %vm451_vm2, %v855_v58 }
 0x235   : > { %1277 = vrsqrt.f32 %v843_v60 }
 0x236   : > { %v1272_v62 = vpop.eup %1271 }
 0x237   : > { %v856_v56 = vmul.f32 %v1272_v62, %v1766_v12 }
 0x239   : > { %864 = vst.msk [vmem:[%s1786_s5 + $0x20] sm:$0xff] %vm451_vm2, %v856_v56 }
 0x23a   : > { %v1274_v29 = vpop.eup %1273 }
 0x23b   : > { %v1276_v27 = vpop.eup %1275  ;;  %v858_v6 = vmul.f32 %v1274_v29, %v1768_v14 }
 0x23c   : > { %v857_v30 = vmul.f32 %v1276_v27, %v792_v32 }
 0x23d   : > { %866 = vst.msk [vmem:[%s1786_s5 + $0x30] sm:$0xff] %vm451_vm2, %v858_v6 }
 0x23e   : > { %865 = vst.msk [vmem:[%s1786_s5 + $0x28] sm:$0xff] %vm451_vm2, %v857_v30 }
 0x23f   : > { %v1278_v0 = vpop.eup %1277 }
 0x240   : > { %v859_v35 = vmul.f32 %v1278_v0, %v1775_v7 }
 0x242   : > { %867 = vst.msk [vmem:[%s1786_s5 + $0x38] sm:$0xff] %vm451_vm2, %v859_v35 }
 0x243 PF: > { %s13_s14 = sadd.s32 1, %s1301_s14   ;;  %s1824_s12 = smov %s1297_s13 }
 0x244   : > { %p10_p5 = scmp.ge.s32.totalorder %s13_s14, 4   ;;  %s1825_s13 = smov %s1827_s15 }
 0x246   :  { %12 = sbr.rel (!%p10_p5) target bundleno = 2 (0x2), region = 63 }

// kernel: generator_forward.13
= control target key start
LH: loop header
LB: loop body
LE: loop exit
PB: predicated region body
PF: predicated region fallthrough
CT: control target
= control target key end

     0   :  { %s1384_s23 = smov 0   ;;  %s1386_s24 = smov 0   ;;  %s1859_s0 = inlined_call_operand.<no memory space> [shape: f32[1], index: 0, kind: input, shape index: {}]   ;;  %s1860_s1 = inlined_call_operand.vmem [shape: f32[2,16,16,32], index: 1, kind: input, shape index: {}]   ;;  %s1861_s2 = inlined_call_operand.vmem [shape: f32[2,8,16,32], index: 2, kind: input, shape index: {}]   ;;  %s1862_s3 = inlined_call_operand.vmem [shape: f32[64,3], index: 3, kind: input, shape index: {}]   ;;  %s1863_s4 = inlined_call_operand.vmem [shape: f32[1,3], index: 4, kind: input, shape index: {}]   ;;  %s1864_s5 = inlined_call_operand.vmem [shape: f32[1,3], index: 5, kind: input, shape index: {}]   ;;  %s1865_s6 = inlined_call_operand.vmem [shape: f32[2,16,16,3], index: 6, kind: output, shape index: {}]  }
   0x1   :  { %11 = sst [smem:[#allocation2]] %s1859_s0  ;;  %s1388_s25 = smov 0  }
   0x2 LB: > { %s29_s0 = sadd.s32 1, %s1339_s24  ;;  %p1060_p0 = scmp.ge.s32.totalorder %s1343_s25, 1  ;;  %s1343_s25 = sphi %s1388_s25, %s17_s25   ;;  %s1339_s24 = sphi %s1386_s24, %s1867_s24   ;;  %s1335_s23 = sphi %s1384_s23, %s1866_s23  }
   0x3   : > { %p31_p1 = scmp.ge.s32.totalorder %s29_s0, 2  ;;  %p253_p2 = scmp.lt.s32.totalorder %s1343_s25, 3 }
   0x5   : > { %s1869_s0 = smov (%p31_p1, %s29_s0), 0  ;;  %p254_p3 = pnand %p1060_p0, %p253_p2 }
   0x6   : > { %p304_p4 = scmp.lt.s32.totalorder (!%p254_p3), %s1335_s23, 1  ;;  %s1402_s26 = sld [smem:[#allocation2]] (!%p254_p3)  ;;  %v533_v0 = vld [vmem:[%s1862_s3] sm:$0xff] (!%p254_p3)  ;;  %v534_v1 = vld [vmem:[%s1862_s3 + $0x8] sm:$0xff] (!%p254_p3)  ;;  %v535_v2 = vld [vmem:[%s1862_s3 + $0x10] sm:$0xff] (!%p254_p3)  ;;  %vm500_vm0 = vcmask (!%p254_p3), 261120  }
   0x7   : > { %257 = sbr.rel (%p254_p3) target bundleno = 397 (0x18d), region = 44  ;;  %v1208_v3 = vpack.c.bf16 (!%p254_p3), %v534_v1, %v533_v0  ;;  %v536_v4 = vld [vmem:[%s1862_s3 + $0x18] sm:$0xff] (!%p254_p3)  ;;  %v537_v6 = vld [vmem:[%s1862_s3 + $0x20] sm:$0xff] (!%p254_p3)  ;;  %v538_v7 = vld [vmem:[%s1862_s3 + $0x28] sm:$0xff] (!%p254_p3)  ;;  %s1345_s11 = smov (!%p254_p3), 32   ;;  %vm552_vm1 = vcmask (!%p254_p3), 523264  }
   0x8   : > { %v1212_v5 = vpack.c.bf16 (!%p254_p3), %v536_v4, %v535_v2  ;;  %v541_v8 = vld [vmem:[%s1863_s4] sm:$0x1] (!%p254_p3)  ;;  %v1216_v13 = vpack.c.bf16 (!%p254_p3), %v538_v7, %v537_v6  ;;  %v539_v15 = vld [vmem:[%s1862_s3 + $0x30] sm:$0xff] (!%p254_p3)  ;;  %v540_v16 = vld [vmem:[%s1862_s3 + $0x38] sm:$0xff] (!%p254_p3)  ;;  %vm906_vm2 = vcmask (!%p254_p3), 23552  }
   0x9   : > { %1209 = vmatprep.subr.bf16.mxu0 (!%p254_p3), %v1208_v3  ;;  %1224 = vmatprep.subr.bf16.mxu1 (!%p254_p3), %v1208_v3  ;;  %v543_v11 = vld [vmem:[%s1864_s5] sm:$0x1] (!%p254_p3)  ;;  %v1468_v27 = vpack.c.bf16 (!%p254_p3), %v540_v16, %v539_v15 }
   0xa   : > { %1211 = vmatpush3.bf16.msra.mxu0 (!%p254_p3), %v1208_v3  ;;  %1228 = vmatpush3.bf16.msra.mxu1 (!%p254_p3), %v1208_v3 }
   0xb   : > { %1213 = vmatprep.subr.bf16.mxu0 (!%p254_p3), %v1212_v5  ;;  %1225 = vmatprep.subr.bf16.mxu1 (!%p254_p3), %v1212_v5 }
   0xc   : > { %v1436_v10 = vstv (!%p254_p3), %s1402_s26  ;;  %s418_s22 = ssub.f32 (!%p254_p3), 1.0, %s1402_s26 }
   0xd   : > { %v542_v14 = vmul.f32 (!%p254_p3), %v541_v8, %v1436_v10 }
   0xe   : > { %s1871_s23 = smov (!%p304_p4, %s1335_s23), 1  ;;  %v1450_v17 = vstv %s418_s22  ;;  %1215 = vmatpush3.bf16.msra.mxu0 %v1212_v5  ;;  %1229 = vmatpush3.bf16.msra.mxu1 %v1212_v5 }
   0xf   : > { %s1102_s15 = sshll.u32 %s1871_s23, 7  ;;  %s1101_s21 = sshll.u32 %s1871_s23, 8  ;;  %v544_v21 = vmul.f32 %v543_v11, %v1450_v17  ;;  %1217 = vmatprep.subr.bf16.mxu0 %v1216_v13  ;;  %1226 = vmatprep.subr.bf16.mxu1 %v1216_v13 }
  0x10   : > { %s1431_s20 = scalar_lea.vmem %s1861_s2, %s1102_s15  ;;  %s1457_s10 = scalar_lea.vmem %s1860_s1, %s1101_s21 }
  0x11   : > { %v369_v9 = vld [vmem:[%s1431_s20] sm:$0xff]  ;;  %v370_v12 = vld [vmem:[%s1431_s20 + $0x8] sm:$0xff]  ;;  %v371_v23 = vld [vmem:[%s1431_s20 + $0x10] sm:$0xff]  ;;  %v1470_v28 = vadd.f32 %v544_v21, %v542_v14  ;;  %s1760_s14 = scalar_lea.vmem %s1865_s6, %s1101_s21 }
  0x12   : > { %v377_v18 = vld [vmem:[%s1431_s20 + $0x40] sm:$0xff]  ;;  %v378_v19 = vld [vmem:[%s1431_s20 + $0x48] sm:$0xff]  ;;  %v420_v20 = vmul.f32 %v1450_v17, %v369_v9  ;;  %v421_v22 = vmul.f32 %v1450_v17, %v370_v12  ;;  %v379_v24 = vld [vmem:[%s1431_s20 + $0x50] sm:$0xff]  ;;  %v422_v35 = vmul.f32 %v1450_v17, %v371_v23  ;;  %1219 = vmatpush3.bf16.msra.mxu0 %v1216_v13  ;;  %1230 = vmatpush3.bf16.msra.mxu1 %v1216_v13 }
  0x13   : > { %v372_v25 = vld [vmem:[%s1431_s20 + $0x18] sm:$0xff]  ;;  %v428_v29 = vmul.f32 %v1450_v17, %v377_v18  ;;  %v429_v30 = vmul.f32 %v1450_v17, %v378_v19  ;;  %v339_v31 = vld [vmem:[%s1457_s10 + $0x10] sm:$0xff]  ;;  %v338_v32 = vld [vmem:[%s1457_s10 + $0x8] sm:$0xff]  ;;  %v430_v36 = vmul.f32 %v1450_v17, %v379_v24  ;;  %1221 = vmatprep.subr.bf16.mxu0 %v1468_v27  ;;  %1227 = vmatprep.subr.bf16.mxu1 %v1468_v27 }
  0x14   : > { %v380_v26 = vld [vmem:[%s1431_s20 + $0x58] sm:$0xff]  ;;  %452 = vrot.lane.b32.xlu0 %v420_v20, %s1345_s11  ;;  %454 = vrot.lane.b32.xlu1 %v421_v22, %s1345_s11  ;;  %v337_v34 = vld [vmem:[%s1457_s10] sm:$0xff]  ;;  %v1483_v37 = vmul.f32 %v1450_v17, %v372_v25  ;;  %v1493_v42 = vmul.f32 %v1436_v10, %v339_v31  ;;  %v1496_v43 = vmul.f32 %v1436_v10, %v338_v32 }
  0x15   : > { %v340_v33 = vld [vmem:[%s1457_s10 + $0x18] sm:$0xff]  ;;  %v1486_v38 = vmul.f32 %v1450_v17, %v380_v26  ;;  %v355_v39 = vld [vmem:[%s1457_s10 + $0x90] sm:$0xff]  ;;  %v354_v40 = vld [vmem:[%s1457_s10 + $0x88] sm:$0xff]  ;;  %v1507_v48 = vmul.f32 %v1436_v10, %v337_v34 }
  0x16   : > { %v356_v41 = vld [vmem:[%s1457_s10 + $0x98] sm:$0xff]  ;;  %v1499_v44 = vmul.f32 %v1436_v10, %v340_v33  ;;  %v353_v45 = vld [vmem:[%s1457_s10 + $0x80] sm:$0xff]  ;;  %v343_v47 = vld [vmem:[%s1457_s10 + $0x30] sm:$0xff]  ;;  %v1510_v49 = vmul.f32 %v1436_v10, %v355_v39  ;;  %v1513_v50 = vmul.f32 %v1436_v10, %v354_v40  ;;  %1223 = vmatpush3.bf16.msra.mxu0 %v1468_v27  ;;  %1231 = vmatpush3.bf16.msra.mxu1 %v1468_v27 }
  0x17   : > { %v341_v46 = vld [vmem:[%s1457_s10 + $0x20] sm:$0xff]  ;;  %v359_v52 = vld [vmem:[%s1457_s10 + $0xb0] sm:$0xff]  ;;  %v1518_v53 = vmul.f32 %v1436_v10, %v356_v41  ;;  %v1521_v54 = vmul.f32 %v1436_v10, %v353_v45  ;;  %v1527_v56 = vmul.f32 %v1436_v10, %v343_v47  ;;  %v342_v57 = vld [vmem:[%s1457_s10 + $0x28] sm:$0xff] }
  0x18   : > { %468 = vrot.lane.b32.xlu0 %v428_v29, %s1345_s11  ;;  %470 = vrot.lane.b32.xlu1 %v429_v30, %s1345_s11  ;;  %v357_v51 = vld [vmem:[%s1457_s10 + $0xa0] sm:$0xff]  ;;  %v1524_v55 = vmul.f32 %v1436_v10, %v341_v46  ;;  %v344_v58 = vld [vmem:[%s1457_s10 + $0x38] sm:$0xff]  ;;  %v1538_v61 = vmul.f32 %v1436_v10, %v359_v52  ;;  %v1541_v62 = vmul.f32 %v1436_v10, %v342_v57 }
  0x19   : > { %v358_v59 = vld [vmem:[%s1457_s10 + $0xa8] sm:$0xff]  ;;  %v1535_v60 = vmul.f32 %v1436_v10, %v357_v51  ;;  %v360_v63 = vld [vmem:[%s1457_s10 + $0xb8] sm:$0xff]  ;;  %v345_v0 = vld [vmem:[%s1457_s10 + $0x40] sm:$0xff]  ;;  %v1549_v4 = vmul.f32 %v1436_v10, %v344_v58 }
  0x1a   : > { %v347_v1 = vld [vmem:[%s1457_s10 + $0x50] sm:$0xff]  ;;  %v373_v2 = vld [vmem:[%s1431_s20 + $0x20] sm:$0xff]  ;;  %v1552_v5 = vmul.f32 %v1436_v10, %v358_v59  ;;  %v1555_v6 = vmul.f32 %v1436_v10, %v360_v63  ;;  %v1558_v7 = vmul.f32 %v1436_v10, %v345_v0  ;;  %v346_v11 = vld [vmem:[%s1457_s10 + $0x48] sm:$0xff] }
  0x1b   : > { %v381_v3 = vld [vmem:[%s1431_s20 + $0x60] sm:$0xff]  ;;  %v363_v9 = vld [vmem:[%s1457_s10 + $0xd0] sm:$0xff]  ;;  %v1566_v12 = vmul.f32 %v1436_v10, %v347_v1  ;;  %v348_v15 = vld [vmem:[%s1457_s10 + $0x58] sm:$0xff]  ;;  %v1578_v18 = vmul.f32 %v1436_v10, %v346_v11  ;;  %v424_v33 = vmul.f32 %v1450_v17, %v373_v2 }
  0x1c   : > { %v361_v8 = vld [vmem:[%s1457_s10 + $0xc0] sm:$0xff]  ;;  %456 = vrot.lane.b32.xlu0 %v422_v35, %s1345_s11  ;;  %472 = vrot.lane.b32.xlu1 %v430_v36, %s1345_s11  ;;  %v1572_v14 = vmul.f32 %v1436_v10, %v363_v9  ;;  %v362_v16 = vld [vmem:[%s1457_s10 + $0xc8] sm:$0xff]  ;;  %v1581_v19 = vmul.f32 %v1436_v10, %v348_v15  ;;  %v432_v34 = vmul.f32 %v1450_v17, %v381_v3 }
  0x1d   : > { %v1569_v13 = vmul.f32 %v1436_v10, %v361_v8  ;;  %v364_v20 = vld [vmem:[%s1457_s10 + $0xd8] sm:$0xff]  ;;  %v1585_v21 = vmul.f32 %v1436_v10, %v362_v16  ;;  %v349_v22 = vld [vmem:[%s1457_s10 + $0x60] sm:$0xff]  ;;  %v351_v23 = vld [vmem:[%s1457_s10 + $0x70] sm:$0xff] }
  0x1e   : > { %v1590_v24 = vmul.f32 %v1436_v10, %v364_v20  ;;  %v1593_v25 = vmul.f32 %v1436_v10, %v349_v22  ;;  %v1596_v26 = vmul.f32 %v1436_v10, %v351_v23  ;;  %v365_v27 = vld [vmem:[%s1457_s10 + $0xe0] sm:$0xff]  ;;  %v367_v29 = vld [vmem:[%s1457_s10 + $0xf0] sm:$0xff]  ;;  %v374_v30 = vld [vmem:[%s1431_s20 + $0x28] sm:$0xff] }
  0x1f   : > { %v1602_v31 = vmul.f32 %v1436_v10, %v365_v27  ;;  %v1605_v32 = vmul.f32 %v1436_v10, %v367_v29  ;;  %v382_v35 = vld [vmem:[%s1431_s20 + $0x68] sm:$0xff]  ;;  %v352_v39 = vld [vmem:[%s1457_s10 + $0x78] sm:$0xff]  ;;  %v425_v47 = vmul.f32 %v1450_v17, %v374_v30  ;;  %v375_v52 = vld [vmem:[%s1431_s20 + $0x30] sm:$0xff] }
  0x20   : > { %458 = vrot.lane.b32.xlu0 %v1483_v37, %s1345_s11  ;;  %474 = vrot.lane.b32.xlu1 %v1486_v38, %s1345_s11  ;;  %v350_v36 = vld [vmem:[%s1457_s10 + $0x68] sm:$0xff]  ;;  %v368_v45 = vld [vmem:[%s1457_s10 + $0xf8] sm:$0xff]  ;;  %v1622_v37 = vmul.f32 %v1436_v10, %v352_v39  ;;  %v433_v51 = vmul.f32 %v1450_v17, %v382_v35  ;;  %v426_v58 = vmul.f32 %v1450_v17, %v375_v52 }
  0x21   : > { %v1617_v40 = vmul.f32 %v1436_v10, %v350_v36  ;;  %v366_v41 = vld [vmem:[%s1457_s10 + $0xe8] sm:$0xff]  ;;  %v1628_v46 = vmul.f32 %v1436_v10, %v368_v45  ;;  %v383_v57 = vld [vmem:[%s1431_s20 + $0x70] sm:$0xff]  ;;  %v384_v63 = vld [vmem:[%s1431_s20 + $0x78] sm:$0xff] }
  0x22   : > { %v1625_v38 = vmul.f32 %v1436_v10, %v366_v41  ;;  %v434_v59 = vmul.f32 %v1450_v17, %v383_v57  ;;  %v376_v10 = vld [vmem:[%s1431_s20 + $0x38] sm:$0xff]  ;;  %v435_v1 = vmul.f32 %v1450_v17, %v384_v63 }
  0x23   : > { %v427_v0 = vmul.f32 %v1450_v17, %v376_v10 }
  0x24   : > { %460 = vrot.lane.b32.xlu0 %v424_v33, %s1345_s11  ;;  %476 = vrot.lane.b32.xlu1 %v432_v34, %s1345_s11 }
  0x28   : > { %462 = vrot.lane.b32.xlu0 %v425_v47, %s1345_s11  ;;  %478 = vrot.lane.b32.xlu1 %v433_v51, %s1345_s11 }
  0x2c   : > { %464 = vrot.lane.b32.xlu0 %v426_v58, %s1345_s11  ;;  %480 = vrot.lane.b32.xlu1 %v434_v59, %s1345_s11 }
  0x30   : > { %466 = vrot.lane.b32.xlu0 %v427_v0, %s1345_s11  ;;  %482 = vrot.lane.b32.xlu1 %v435_v1, %s1345_s11 }
  0x86   : > { %v453_v2 = vpop.permute.xlu0 %452  ;;  %v455_v3 = vpop.permute.xlu1 %454 }
  0x87   : > { %v502_v8 = vsel %vm500_vm0, %v1496_v43, %v455_v3  ;;  %v501_v9 = vsel %vm500_vm0, %v1507_v48, %v453_v2  ;;  %v503_v11 = vsel %vm500_vm0, %v1493_v42, %v453_v2  ;;  %v504_v48 = vsel %vm500_vm0, %v1499_v44, %v455_v3 }
  0x88   : > { %1160 = vmatprep.mubr.msk.f32.mxu0 %vm552_vm1, %v501_v9 }
  0x89   : > { %1161 = vmatmul.mubr.msk.f32.vlgmr.msra.gmra.mrb[0].mxu0 %vm552_vm1, %v502_v8 }
  0x8a   : > { %v469_v17 = vpop.permute.xlu0 %468  ;;  %1163 = vmatprep.mubr.msk.f32.mxu0 %vm552_vm1, %v503_v11  ;;  %v471_v15 = vpop.permute.xlu1 %470 }
  0x8b   : > { %v518_v16 = vsel %vm500_vm0, %v1513_v50, %v471_v15  ;;  %v517_v43 = vsel %vm500_vm0, %v1521_v54, %v469_v17  ;;  %v519_v42 = vsel %vm500_vm0, %v1510_v49, %v469_v17  ;;  %v520_v44 = vsel %vm500_vm0, %v1518_v53, %v471_v15 }
  0x8c   : > { %1184 = vmatprep.mubr.msk.f32.mxu1 %vm552_vm1, %v517_v43 }
  0x8d   : > { %1164 = vmatmul.mubr.msk.f32.gmra.mrb[2].mxu0 %vm552_vm1, %v504_v48  ;;  %1185 = vmatmul.mubr.msk.f32.vlgmr.msra.gmra.mrb[0].mxu1 %vm552_vm1, %v518_v16 }
  0x8e   : > { %v457_v20 = vpop.permute.xlu0 %456  ;;  %1187 = vmatprep.mubr.msk.f32.mxu1 %vm552_vm1, %v519_v42  ;;  %v473_v22 = vpop.permute.xlu1 %472 }
  0x8f   : > { %v505_v50 = vsel %vm500_vm0, %v1524_v55, %v457_v20  ;;  %v521_v54 = vsel %vm500_vm0, %v1535_v60, %v473_v22  ;;  %v507_v60 = vsel %vm500_vm0, %v1527_v56, %v457_v20  ;;  %v523_v53 = vsel %vm500_vm0, %v1538_v61, %v473_v22 }
  0x90   : > { %1166 = vmatprep.mubr.msk.f32.mxu0 %vm552_vm1, %v505_v50 }
  0x91   : > { %1188 = vmatmul.mubr.msk.f32.gmra.mrb[2].mxu1 %vm552_vm1, %v520_v44 }
  0x92   : > { %v459_v49 = vpop.permute.xlu0 %458  ;;  %1190 = vmatprep.mubr.msk.f32.mxu1 %vm552_vm1, %v521_v54  ;;  %v475_v23 = vpop.permute.xlu1 %474 }
  0x93   : > { %v506_v27 = vsel %vm500_vm0, %v1541_v62, %v459_v49  ;;  %v522_v55 = vsel %vm500_vm0, %v1552_v5, %v475_v23  ;;  %v508_v62 = vsel %vm500_vm0, %v1549_v4, %v459_v49  ;;  %v524_v61 = vsel %vm500_vm0, %v1555_v6, %v475_v23 }
  0x94   : > { %1167 = vmatmul.mubr.msk.f32.gmra.mrb[4].mxu0 %vm552_vm1, %v506_v27 }
  0x95   : > { %1169 = vmatprep.mubr.msk.f32.mxu0 %vm552_vm1, %v507_v60  ;;  %1191 = vmatmul.mubr.msk.f32.gmra.mrb[4].mxu1 %vm552_vm1, %v522_v55 }
  0x96   : > { %v461_v29 = vpop.permute.xlu0 %460  ;;  %1193 = vmatprep.mubr.msk.f32.mxu1 %vm552_vm1, %v523_v53  ;;  %v477_v30 = vpop.permute.xlu1 %476 }
  0x97   : > { %v509_v5 = vsel %vm500_vm0, %v1558_v7, %v461_v29  ;;  %v525_v56 = vsel %vm500_vm0, %v1569_v13, %v477_v30  ;;  %v511_v13 = vsel %vm500_vm0, %v1566_v12, %v461_v29  ;;  %v527_v6 = vsel %vm500_vm0, %v1572_v14, %v477_v30 }
  0x98   : > { %1170 = vmatmul.mubr.msk.f32.gmra.mrb[6].mxu0 %vm552_vm1, %v508_v62 }
  0x99   : > { %1172 = vmatprep.mubr.msk.f32.mxu0 %vm552_vm1, %v509_v5  ;;  %1194 = vmatmul.mubr.msk.f32.gmra.mrb[6].mxu1 %vm552_vm1, %v524_v61 }
  0x9a   : > { %v463_v33 = vpop.permute.xlu0 %462  ;;  %1196 = vmatprep.mubr.msk.f32.mxu1 %vm552_vm1, %v525_v56  ;;  %v479_v34 = vpop.permute.xlu1 %478 }
  0x9b   : > { %v510_v4 = vsel %vm500_vm0, %v1578_v18, %v463_v33  ;;  %v526_v7 = vsel %vm500_vm0, %v1585_v21, %v479_v34  ;;  %v512_v18 = vsel %vm500_vm0, %v1581_v19, %v463_v33  ;;  %v528_v14 = vsel %vm500_vm0, %v1590_v24, %v479_v34 }
  0x9c   : > { %1173 = vmatmul.mubr.msk.f32.gmra.mrb[8].mxu0 %vm552_vm1, %v510_v4 }
  0x9d   : > { %1175 = vmatprep.mubr.msk.f32.mxu0 %vm552_vm1, %v511_v13  ;;  %1197 = vmatmul.mubr.msk.f32.gmra.mrb[8].mxu1 %vm552_vm1, %v526_v7 }
  0x9e   : > { %v465_v35 = vpop.permute.xlu0 %464  ;;  %1199 = vmatprep.mubr.msk.f32.mxu1 %vm552_vm1, %v527_v6  ;;  %v481_v36 = vpop.permute.xlu1 %480 }
  0x9f   : > { %v513_v21 = vsel %vm500_vm0, %v1593_v25, %v465_v35  ;;  %v529_v12 = vsel %vm500_vm0, %v1602_v31, %v481_v36  ;;  %v515_v31 = vsel %vm500_vm0, %v1596_v26, %v465_v35  ;;  %v531_v24 = vsel %vm500_vm0, %v1605_v32, %v481_v36 }
  0xa0   : > { %1176 = vmatmul.mubr.msk.f32.gmra.mrb[10].mxu0 %vm552_vm1, %v512_v18  ;;  %v547_v26 = vlaneseq }
  0xa1   : > { %1178 = vmatprep.mubr.msk.f32.mxu0 %vm552_vm1, %v513_v21  ;;  %1200 = vmatmul.mubr.msk.f32.gmra.mrb[10].mxu1 %vm552_vm1, %v528_v14 }
  0xa2   : > { %v467_v39 = vpop.permute.xlu0 %466  ;;  %1202 = vmatprep.mubr.msk.f32.mxu1 %vm552_vm1, %v529_v12  ;;  %v483_v41 = vpop.permute.xlu1 %482 }
  0xa3   : > { %v514_v19 = vsel %vm500_vm0, %v1617_v40, %v467_v39  ;;  %v530_v25 = vsel %vm500_vm0, %v1625_v38, %v483_v41  ;;  %v516_v40 = vsel %vm500_vm0, %v1622_v37, %v467_v39  ;;  %v532_v45 = vsel %vm500_vm0, %v1628_v46, %v483_v41 }
  0xa4   : > { %1179 = vmatmul.mubr.msk.f32.gmra.mrb[12].mxu0 %vm552_vm1, %v514_v19  ;;  %v548_v38 = vshrl.u32 %v547_v26, 7 }
  0xa5   : > { %1181 = vmatprep.mubr.msk.f32.mxu0 %vm552_vm1, %v515_v31  ;;  %1203 = vmatmul.mubr.msk.f32.gmra.mrb[12].mxu1 %vm552_vm1, %v530_v25 }
  0xa6   : > { %1205 = vmatprep.mubr.msk.f32.mxu1 %vm552_vm1, %v531_v24  ;;  %v549_v47 = vsub.s32 0, %v548_v38 }
  0xa8   : > { %1182 = vmatmul.mubr.msk.f32.gmra.mrb[14].mxu0 %vm552_vm1, %v516_v40  ;;  %v1745_v32 = vrot.slane %v1470_v28, %v549_v47 }
  0xa9   : > { %1206 = vmatmul.mubr.msk.f32.gmra.mrb[14].mxu1 %vm552_vm1, %v532_v45 }
 0x15c   : > { %v1162_v51 = vpop.f32.mrb[0].mxu0 }
 0x15d   : > { %v721_v52 = vadd.f32 %v1162_v51, %v1745_v32  ;;  %v715_v57 = vpop.f32.mrb[1].mxu0 }
 0x15e   : > { %v716_v58 = vadd.f32 %v715_v57, %v1745_v32 }
 0x15f   : > { %1257 = vtanh.f32 %v721_v52 }
 0x160   : > { %1259 = vtanh.f32 %v716_v58  ;;  %v1165_v37 = vpop.f32.mrb[2].mxu0  ;;  %v1186_v46 = vpop.f32.mrb[0].mxu1 }
 0x161   : > { %v731_v59 = vadd.f32 %v1165_v37, %v1745_v32  ;;  %v801_v10 = vadd.f32 %v1186_v46, %v1745_v32  ;;  %v725_v63 = vpop.f32.mrb[3].mxu0  ;;  %v795_v0 = vpop.f32.mrb[1].mxu1 }
 0x162   : > { %v726_v28 = vadd.f32 %v725_v63, %v1745_v32  ;;  %v796_v1 = vadd.f32 %v795_v0, %v1745_v32 }
 0x163   : > { %1261 = vtanh.f32 %v731_v59 }
 0x164   : > { %1263 = vtanh.f32 %v801_v10  ;;  %v1189_v2 = vpop.f32.mrb[2].mxu1 }
 0x165   : > { %1265 = vtanh.f32 %v726_v28  ;;  %v811_v3 = vadd.f32 %v1189_v2, %v1745_v32  ;;  %v805_v8 = vpop.f32.mrb[3].mxu1 }
 0x166   : > { %1267 = vtanh.f32 %v796_v1  ;;  %v806_v9 = vadd.f32 %v805_v8, %v1745_v32 }
 0x167   : > { %1269 = vtanh.f32 %v811_v3  ;;  %v1168_v11 = vpop.f32.mrb[4].mxu0 }
 0x168   : > { %1271 = vtanh.f32 %v806_v9  ;;  %v741_v17 = vadd.f32 %v1168_v11, %v1745_v32  ;;  %v735_v15 = vpop.f32.mrb[5].mxu0  ;;  %v1192_v16 = vpop.f32.mrb[4].mxu1 }
 0x169   : > { %v1258_v43 = vpop.eup %1257  ;;  %v736_v48 = vadd.f32 %v735_v15, %v1745_v32  ;;  %v821_v42 = vadd.f32 %v1192_v16, %v1745_v32  ;;  %v815_v20 = vpop.f32.mrb[5].mxu1 }
 0x16a   : > { %v1260_v22 = vpop.eup %1259  ;;  %908 = vst.msk [vmem:[%s1760_s14 + $0x8] sm:$0xff] %vm906_vm2, %v1258_v43  ;;  %1273 = vtanh.f32 %v741_v17  ;;  %v816_v50 = vadd.f32 %v815_v20, %v1745_v32 }
 0x16b   : > { %907 = vst.msk [vmem:[%s1760_s14] sm:$0xff] %vm906_vm2, %v1260_v22  ;;  %1275 = vtanh.f32 %v736_v48  ;;  %v1171_v54 = vpop.f32.mrb[6].mxu0 }
 0x16c   : > { %1277 = vtanh.f32 %v821_v42  ;;  %v751_v44 = vadd.f32 %v1171_v54, %v1745_v32  ;;  %v745_v49 = vpop.f32.mrb[7].mxu0  ;;  %v1195_v23 = vpop.f32.mrb[6].mxu1 }
 0x16d   : > { %v1262_v27 = vpop.eup %1261  ;;  %1279 = vtanh.f32 %v816_v50  ;;  %v746_v55 = vadd.f32 %v745_v49, %v1745_v32  ;;  %v831_v60 = vadd.f32 %v1195_v23, %v1745_v32  ;;  %v825_v53 = vpop.f32.mrb[7].mxu1 }
 0x16e   : > { %v1264_v29 = vpop.eup %1263  ;;  %910 = vst.msk [vmem:[%s1760_s14 + $0x18] sm:$0xff] %vm906_vm2, %v1262_v27  ;;  %1281 = vtanh.f32 %v751_v44  ;;  %v826_v30 = vadd.f32 %v825_v53, %v1745_v32 }
 0x16f   : > { %v1266_v62 = vpop.eup %1265  ;;  %924 = vst.msk [vmem:[%s1760_s14 + $0x88] sm:$0xff] %vm906_vm2, %v1264_v29  ;;  %1283 = vtanh.f32 %v746_v55  ;;  %v1174_v5 = vpop.f32.mrb[8].mxu0 }
 0x170   : > { %v1268_v56 = vpop.eup %1267  ;;  %909 = vst.msk [vmem:[%s1760_s14 + $0x10] sm:$0xff] %vm906_vm2, %v1266_v62  ;;  %1285 = vtanh.f32 %v831_v60  ;;  %v761_v61 = vadd.f32 %v1174_v5, %v1745_v32  ;;  %v755_v33 = vpop.f32.mrb[9].mxu0 }
 0x171   : > { %v1198_v34 = vpop.f32.mrb[8].mxu1  ;;  %v1270_v4 = vpop.eup %1269  ;;  %923 = vst.msk [vmem:[%s1760_s14 + $0x80] sm:$0xff] %vm906_vm2, %v1268_v56  ;;  %1287 = vtanh.f32 %v826_v30  ;;  %v756_v7 = vadd.f32 %v755_v33, %v1745_v32 }
 0x172   : > { %v841_v13 = vadd.f32 %v1198_v34, %v1745_v32  ;;  %v835_v6 = vpop.f32.mrb[9].mxu1  ;;  %v1272_v35 = vpop.eup %1271  ;;  %926 = vst.msk [vmem:[%s1760_s14 + $0x98] sm:$0xff] %vm906_vm2, %v1270_v4  ;;  %1289 = vtanh.f32 %v761_v61 }
 0x173   : > { %v836_v36 = vadd.f32 %v835_v6, %v1745_v32  ;;  %925 = vst.msk [vmem:[%s1760_s14 + $0x90] sm:$0xff] %vm906_vm2, %v1272_v35  ;;  %1291 = vtanh.f32 %v756_v7  ;;  %v1177_v18 = vpop.f32.mrb[10].mxu0 }
 0x174   : > { %v1274_v21 = vpop.eup %1273  ;;  %1293 = vtanh.f32 %v841_v13  ;;  %v771_v12 = vadd.f32 %v1177_v18, %v1745_v32  ;;  %v765_v14 = vpop.f32.mrb[11].mxu0 }
 0x175   : > { %v1201_v39 = vpop.f32.mrb[10].mxu1  ;;  %v1276_v41 = vpop.eup %1275  ;;  %912 = vst.msk [vmem:[%s1760_s14 + $0x28] sm:$0xff] %vm906_vm2, %v1274_v21  ;;  %1295 = vtanh.f32 %v836_v36  ;;  %v766_v19 = vadd.f32 %v765_v14, %v1745_v32 }
 0x176   : > { %v851_v25 = vadd.f32 %v1201_v39, %v1745_v32  ;;  %v845_v31 = vpop.f32.mrb[11].mxu1  ;;  %v1278_v24 = vpop.eup %1277  ;;  %911 = vst.msk [vmem:[%s1760_s14 + $0x20] sm:$0xff] %vm906_vm2, %v1276_v41  ;;  %1297 = vtanh.f32 %v771_v12 }
 0x177   : > { %v846_v40 = vadd.f32 %v845_v31, %v1745_v32  ;;  %v1280_v45 = vpop.eup %1279  ;;  %928 = vst.msk [vmem:[%s1760_s14 + $0xa8] sm:$0xff] %vm906_vm2, %v1278_v24  ;;  %1299 = vtanh.f32 %v766_v19  ;;  %v1180_v26 = vpop.f32.mrb[12].mxu0 }
 0x178   : > { %v1282_v38 = vpop.eup %1281  ;;  %927 = vst.msk [vmem:[%s1760_s14 + $0xa0] sm:$0xff] %vm906_vm2, %v1280_v45  ;;  %1301 = vtanh.f32 %v851_v25  ;;  %v781_v47 = vadd.f32 %v1180_v26, %v1745_v32  ;;  %v775_v51 = vpop.f32.mrb[13].mxu0 }
 0x179   : > { %v1204_v52 = vpop.f32.mrb[12].mxu1  ;;  %v1284_v57 = vpop.eup %1283  ;;  %914 = vst.msk [vmem:[%s1760_s14 + $0x38] sm:$0xff] %vm906_vm2, %v1282_v38  ;;  %1303 = vtanh.f32 %v846_v40  ;;  %v776_v58 = vadd.f32 %v775_v51, %v1745_v32 }
 0x17a   : > { %v861_v37 = vadd.f32 %v1204_v52, %v1745_v32  ;;  %v855_v46 = vpop.f32.mrb[13].mxu1  ;;  %v1286_v59 = vpop.eup %1285  ;;  %913 = vst.msk [vmem:[%s1760_s14 + $0x30] sm:$0xff] %vm906_vm2, %v1284_v57  ;;  %1305 = vtanh.f32 %v781_v47 }
 0x17b   : > { %v856_v10 = vadd.f32 %v855_v46, %v1745_v32  ;;  %v1288_v63 = vpop.eup %1287  ;;  %930 = vst.msk [vmem:[%s1760_s14 + $0xb8] sm:$0xff] %vm906_vm2, %v1286_v59  ;;  %1307 = vtanh.f32 %v776_v58  ;;  %v1183_v0 = vpop.f32.mrb[14].mxu0 }
 0x17c   : > { %v1290_v28 = vpop.eup %1289  ;;  %929 = vst.msk [vmem:[%s1760_s14 + $0xb0] sm:$0xff] %vm906_vm2, %v1288_v63  ;;  %1309 = vtanh.f32 %v861_v37  ;;  %v791_v1 = vadd.f32 %v1183_v0, %v1745_v32  ;;  %v785_v2 = vpop.f32.mrb[15].mxu0 }
 0x17d   : > { %v1207_v3 = vpop.f32.mrb[14].mxu1  ;;  %v1292_v8 = vpop.eup %1291  ;;  %916 = vst.msk [vmem:[%s1760_s14 + $0x48] sm:$0xff] %vm906_vm2, %v1290_v28  ;;  %1311 = vtanh.f32 %v856_v10  ;;  %v786_v9 = vadd.f32 %v785_v2, %v1745_v32 }
 0x17e   : > { %v871_v11 = vadd.f32 %v1207_v3, %v1745_v32  ;;  %v865_v17 = vpop.f32.mrb[15].mxu1  ;;  %v1294_v15 = vpop.eup %1293  ;;  %915 = vst.msk [vmem:[%s1760_s14 + $0x40] sm:$0xff] %vm906_vm2, %v1292_v8  ;;  %1313 = vtanh.f32 %v791_v1 }
 0x17f   : > { %v866_v16 = vadd.f32 %v865_v17, %v1745_v32  ;;  %v1296_v43 = vpop.eup %1295  ;;  %932 = vst.msk [vmem:[%s1760_s14 + $0xc8] sm:$0xff] %vm906_vm2, %v1294_v15  ;;  %1315 = vtanh.f32 %v786_v9 }
 0x180   : > { %v1298_v48 = vpop.eup %1297  ;;  %931 = vst.msk [vmem:[%s1760_s14 + $0xc0] sm:$0xff] %vm906_vm2, %v1296_v43  ;;  %1317 = vtanh.f32 %v871_v11 }
 0x181   : > { %v1300_v42 = vpop.eup %1299  ;;  %918 = vst.msk [vmem:[%s1760_s14 + $0x58] sm:$0xff] %vm906_vm2, %v1298_v48  ;;  %1319 = vtanh.f32 %v866_v16 }
 0x182   : > { %v1302_v20 = vpop.eup %1301  ;;  %917 = vst.msk [vmem:[%s1760_s14 + $0x50] sm:$0xff] %vm906_vm2, %v1300_v42 }
 0x183   : > { %v1304_v32 = vpop.eup %1303  ;;  %934 = vst.msk [vmem:[%s1760_s14 + $0xd8] sm:$0xff] %vm906_vm2, %v1302_v20 }
 0x184   : > { %v1306_v22 = vpop.eup %1305  ;;  %933 = vst.msk [vmem:[%s1760_s14 + $0xd0] sm:$0xff] %vm906_vm2, %v1304_v32 }
 0x185   : > { %v1308_v50 = vpop.eup %1307  ;;  %920 = vst.msk [vmem:[%s1760_s14 + $0x68] sm:$0xff] %vm906_vm2, %v1306_v22 }
 0x186   : > { %v1310_v54 = vpop.eup %1309  ;;  %919 = vst.msk [vmem:[%s1760_s14 + $0x60] sm:$0xff] %vm906_vm2, %v1308_v50 }
 0x187   : > { %v1312_v44 = vpop.eup %1311  ;;  %936 = vst.msk [vmem:[%s1760_s14 + $0xe8] sm:$0xff] %vm906_vm2, %v1310_v54 }
 0x188   : > { %v1314_v49 = vpop.eup %1313  ;;  %935 = vst.msk [vmem:[%s1760_s14 + $0xe0] sm:$0xff] %vm906_vm2, %v1312_v44 }
 0x189   : > { %v1316_v23 = vpop.eup %1315  ;;  %922 = vst.msk [vmem:[%s1760_s14 + $0x78] sm:$0xff] %vm906_vm2, %v1314_v49 }
 0x18a   : > { %v1318_v27 = vpop.eup %1317  ;;  %921 = vst.msk [vmem:[%s1760_s14 + $0x70] sm:$0xff] %vm906_vm2, %v1316_v23 }
 0x18b   : > { %v1320_v55 = vpop.eup %1319  ;;  %938 = vst.msk [vmem:[%s1760_s14 + $0xf8] sm:$0xff] %vm906_vm2, %v1318_v27 }
 0x18c   : > { %937 = vst.msk [vmem:[%s1760_s14 + $0xf0] sm:$0xff] %vm906_vm2, %v1320_v55 }
 0x18d PF: > { %s17_s25 = sadd.s32 1, %s1343_s25   ;;  %s1866_s23 = smov %s1339_s24 }
 0x18e   : > { %p14_p5 = scmp.ge.s32.totalorder %s17_s25, 4   ;;  %s1867_s24 = smov %s1869_s0 }
 0x190   :  { %16 = sbr.rel (!%p14_p5) target bundleno = 2 (0x2), region = 77 }

// kernel: generator_forward.11
= control target key start
LH: loop header
LB: loop body
LE: loop exit
PB: predicated region body
PF: predicated region fallthrough
CT: control target
= control target key end

     0   :  { %s2457_s12 = smov 0   ;;  %s2459_s13 = smov 0   ;;  %s3752_s0 = inlined_call_operand.vmem [shape: f32[2,10,18,32], index: 0, kind: input, shape index: {}]   ;;  %s3753_s1 = inlined_call_operand.vmem [shape: f32[288,32], index: 1, kind: input, shape index: {}]   ;;  %s3754_s2 = inlined_call_operand.vmem [shape: f32[1,32], index: 2, kind: input, shape index: {}]   ;;  %s3755_s3 = inlined_call_operand.vmem [shape: f32[2,16,16,32], index: 3, kind: output, shape index: {}]  }
   0x1   :  { %s2461_s14 = smov 0  }
   0x2 LB: > { %s25_s15 = sadd.s32 1, %s2427_s13  ;;  %p1847_p0 = scmp.ge.s32.totalorder %s2431_s14, 1  ;;  %s2431_s14 = sphi %s2461_s14, %s13_s14   ;;  %s2427_s13 = sphi %s2459_s13, %s3798_s13   ;;  %s2423_s12 = sphi %s2457_s12, %s3797_s12  }
   0x3   : > { %p27_p1 = scmp.ge.s32.totalorder %s25_s15, 2  ;;  %p151_p2 = scmp.lt.s32.totalorder %s2431_s14, 3 }
   0x5   : > { %s3800_s15 = smov (%p27_p1, %s25_s15), 0  ;;  %p152_p3 = pnand %p1847_p0, %p151_p2 }
   0x7   : > { %155 = sbr.rel (%p152_p3) target bundleno = 662 (0x296), region = 32 }
   0xe   : > { %p180_p4 = scmp.lt.s32.totalorder %s2423_s12, 1  ;;  %v840_v0 = vld [vmem:[%s3753_s1] sm:$0xff]  ;;  %v2433_v1 = vmov 0.0|0.0   ;;  %v841_v2 = vld [vmem:[%s3753_s1 + $0x8] sm:$0xff]  ;;  %v842_v3 = vld [vmem:[%s3753_s1 + $0x10] sm:$0xff]  ;;  %vm302_vm0 = vcmask 1045504  }
   0xf   : > { %1979 = vmatprep.subr.bf16.mxu0 %v2433_v1  ;;  %2035 = vmatprep.subr.bf16.mxu1 %v2433_v1  ;;  %v843_v4 = vld [vmem:[%s3753_s1 + $0x18] sm:$0xff]  ;;  %v1980_v5 = vpack.c.bf16 %v841_v2, %v840_v0  ;;  %v844_v7 = vld [vmem:[%s3753_s1 + $0x20] sm:$0xff]  ;;  %v845_v8 = vld [vmem:[%s3753_s1 + $0x28] sm:$0xff]  ;;  %vm256_vm1 = vcmask 1046528   ;;  %s2434_s9 = smov 64   ;;  %s2435_s18 = smov 32  }
  0x10   : > { %s3802_s12 = smov (!%p180_p4, %s2423_s12), 1  ;;  %v1983_v6 = vpack.c.bf16 %v843_v4, %v842_v3  ;;  %v846_v9 = vld [vmem:[%s3753_s1 + $0x30] sm:$0xff]  ;;  %v847_v10 = vld [vmem:[%s3753_s1 + $0x38] sm:$0xff]  ;;  %v1986_v14 = vpack.c.bf16 %v845_v8, %v844_v7  ;;  %v848_v48 = vld [vmem:[%s3753_s1 + $0x40] sm:$0xff]  ;;  %s2436_s23 = smov 96   ;;  %vm689_vm2 = vcmask 261120  }
  0x11   : > { %s2067_s24 = smul.u32 240, %s3802_s12  ;;  %1981 = vmatpush1.bf16.msra.mxu0 %v1980_v5  ;;  %2051 = vmatpush1.bf16.msra.mxu1 %v1980_v5  ;;  %v1989_v27 = vpack.c.bf16 %v847_v10, %v846_v9  ;;  %v849_v49 = vld [vmem:[%s3753_s1 + $0x48] sm:$0xff]  ;;  %v850_v61 = vld [vmem:[%s3753_s1 + $0x50] sm:$0xff]  ;;  %v851_v62 = vld [vmem:[%s3753_s1 + $0x58] sm:$0xff]  ;;  %vm708_vm3 = vcmask 523264   ;;  %vm727_vm4 = vcmask 785408  }
  0x12   : > { %1982 = vmatprep.subr.bf16.mxu0 %v2433_v1  ;;  %2036 = vmatprep.subr.bf16.mxu1 %v2433_v1  ;;  %v1992_v59 = vpack.c.bf16 %v849_v49, %v848_v48  ;;  %v1995_v7 = vpack.c.bf16 %v851_v62, %v850_v61  ;;  %v852_v9 = vld [vmem:[%s3753_s1 + $0x60] sm:$0xff]  ;;  %v853_v10 = vld [vmem:[%s3753_s1 + $0x68] sm:$0xff]  ;;  %s1886_s6 = sshll.u32 %s3802_s12, 8 }
  0x13   : > { %s2503_s4 = scalar_lea.vmem %s3752_s0, %s2067_s24  ;;  %s3645_s10 = scalar_lea.vmem %s3755_s3, %s1886_s6 }
  0x14   : > { %v2512_v11 = vld [vmem:[%s2503_s4] sm:$0xff]  ;;  %v2515_v12 = vld [vmem:[%s2503_s4 + $0x8] sm:$0xff]  ;;  %v2518_v13 = vld [vmem:[%s2503_s4 + $0x18] sm:$0xff] }
  0x15   : > { %v303_v15 = vrot.slane %v2512_v11, 2  ;;  %v304_v16 = vrot.slane %v2515_v12, 2  ;;  %v2523_v17 = vld [vmem:[%s2503_s4 + $0x20] sm:$0xff]  ;;  %v257_v18 = vrot.slane %v2512_v11, 1  ;;  %v258_v19 = vrot.slane %v2515_v12, 1  ;;  %v2528_v20 = vld [vmem:[%s2503_s4 + $0x90] sm:$0xff]  ;;  %1984 = vmatpush1.bf16.msra.mxu0 %v1983_v6  ;;  %2052 = vmatpush1.bf16.msra.mxu1 %v1983_v6 }
  0x16   : > { %v308_v21 = vrot.slane %v2518_v13, 2  ;;  %v309_v22 = vrot.slane %v2523_v17, 2  ;;  %v2533_v23 = vld [vmem:[%s2503_s4 + $0x98] sm:$0xff]  ;;  %v2536_v24 = vld [vmem:[%s2503_s4 + $0xa8] sm:$0xff]  ;;  %v333_v25 = vrot.slane %v2528_v20, 2  ;;  %v2540_v26 = vld [vmem:[%s2503_s4 + $0xb0] sm:$0xff]  ;;  %1985 = vmatprep.subr.bf16.mxu0 %v2433_v1  ;;  %2037 = vmatprep.subr.bf16.mxu1 %v2433_v1 }
  0x17   : > { %v305_v28 = vsel %vm302_vm0, %v303_v15, %v304_v16  ;;  %v259_v29 = vsel %vm256_vm1, %v257_v18, %v258_v19  ;;  %v334_v30 = vrot.slane %v2533_v23, 2  ;;  %v287_v31 = vrot.slane %v2528_v20, 1  ;;  %v219_v36 = vld [vmem:[%s2503_s4 + $0xa0] sm:$0x3]  ;;  %v2560_v37 = vld [vmem:[%s2503_s4 + $0xb8] sm:$0x3] }
  0x18   : > { %v2106_v32 = vpack.i.bf16 %v305_v28, %v2518_v13  ;;  %v2554_v33 = vsel %vm302_vm0, %v308_v21, %v309_v22  ;;  %v288_v34 = vrot.slane %v2533_v23, 1  ;;  %v338_v35 = vrot.slane %v2536_v24, 2  ;;  %v201_v42 = vld [vmem:[%s2503_s4 + $0x10] sm:$0x3]  ;;  %v2572_v43 = vld [vmem:[%s2503_s4 + $0x28] sm:$0x3] }
  0x19   : > { %v2096_v38 = vpack.i.bf16 %v259_v29, %v2554_v33  ;;  %v2566_v39 = vsel %vm302_vm0, %v333_v25, %v334_v30  ;;  %v339_v40 = vrot.slane %v2540_v26, 2  ;;  %v292_v41 = vrot.slane %v2536_v24, 1  ;;  %1987 = vmatpush1.bf16.msra.mxu0 %v1986_v14  ;;  %2053 = vmatpush1.bf16.msra.mxu1 %v1986_v14  ;;  %v2707_v48 = vld [vmem:[%s2503_s4 + $0x70] sm:$0x3]  ;;  %v2732_v61 = vld [vmem:[%s2503_s4 + $0x80] sm:$0xff] }
  0x1a   : > { %2107 = vrot.lane.b32.xlu1 %v2106_v32, %s2434_s9  ;;  %v2111_v44 = vpack.i.bf16 %v2566_v39, %v2536_v24  ;;  %v2578_v45 = vsel %vm256_vm1, %v287_v31, %v288_v34  ;;  %v293_v46 = vrot.slane %v2540_v26, 1  ;;  %v262_v47 = vrot.slane %v2518_v13, 1  ;;  %1988 = vmatprep.subr.bf16.mxu0 %v2433_v1  ;;  %v2676_v32 = vld [vmem:[%s2503_s4 + $0x38] sm:$0xff]  ;;  %v2735_v62 = vld [vmem:[%s2503_s4 + $0x88] sm:$0x3] }
  0x1b   : > { %2097 = vrot.lane.b32.xlu0 %v2096_v38, %s2435_s18  ;;  %v2591_v50 = vsel %vm302_vm0, %v338_v35, %v339_v40  ;;  %v263_v51 = vrot.slane %v2523_v17, 1  ;;  %v290_v52 = vrot.slane %v219_v36, 1  ;;  %v341_v53 = vrot.slane %v2560_v37, 2  ;;  %2038 = vmatprep.subr.bf16.mxu1 %v2433_v1  ;;  %v2682_v35 = vld [vmem:[%s2503_s4 + $0xc8] sm:$0xff] }
  0x1c   : > { %v2101_v54 = vpack.i.bf16 %v2578_v45, %v2591_v50  ;;  %v2599_v55 = vsel %vm256_vm1, %v292_v41, %v293_v46  ;;  %v260_v56 = vrot.slane %v201_v42, 1  ;;  %v311_v57 = vrot.slane %v2572_v43, 2  ;;  %v857_v41 = vld [vmem:[%s3753_s1 + $0x88] sm:$0xff] }
  0x1d   : > { %v2603_v58 = vsel %vm256_vm1, %v262_v47, %v263_v51  ;;  %1990 = vmatpush1.bf16.msra.mxu0 %v1989_v27  ;;  %v2121_v60 = vpack.i.bf16 %v2536_v24, %v2599_v55  ;;  %v2618_v0 = vsel %vm256_vm1, %v288_v34, %v290_v52  ;;  %v2621_v2 = vsel %vm302_vm0, %v339_v40, %v341_v53  ;;  %v2679_v34 = vld [vmem:[%s2503_s4 + $0xc0] sm:$0xff]  ;;  %v2704_v47 = vld [vmem:[%s2503_s4 + $0x68] sm:$0xff] }
  0x1e   : > { %2112 = vrot.lane.b32.xlu1 %v2111_v44, %s2434_s9  ;;  %v2116_v63 = vpack.i.bf16 %v2518_v13, %v2603_v58  ;;  %3773 = vst [vmem:[#allocation2_spill] sm:$0xff] %v2618_v0  ;;  %3774 = vst [vmem:[#allocation3_spill] sm:$0xff] %v2621_v2  ;;  %v336_v3 = vrot.slane %v219_v36, 2  ;;  %2054 = vmatpush1.bf16.msra.mxu1 %v1989_v27  ;;  %v261_v4 = vsel %vm256_vm1, %v258_v19, %v260_v56  ;;  %v855_v27 = vld [vmem:[%s3753_s1 + $0x78] sm:$0xff]  ;;  %v856_v40 = vld [vmem:[%s3753_s1 + $0x80] sm:$0xff] }
  0x1f   : > { %2102 = vrot.lane.b32.xlu0 %v2101_v54, %s2435_s18  ;;  %v2627_v5 = vsel %vm302_vm0, %v309_v22, %v311_v57  ;;  %v306_v6 = vrot.slane %v201_v42, 2  ;;  %1991 = vmatprep.subr.bf16.mxu0 %v2433_v1  ;;  %v2131_v8 = vpack.i.bf16 %v2618_v0, %v2621_v2  ;;  %v295_v18 = vrot.slane %v2560_v37, 1  ;;  %v2723_v56 = vld [vmem:[%s2503_s4 + $0x40] sm:$0x3]  ;;  %v2726_v57 = vld [vmem:[%s2503_s4 + $0xd0] sm:$0x3] }
  0x20   : > { %2039 = vmatprep.subr.bf16.mxu1 %v2433_v1  ;;  %v2126_v14 = vpack.i.bf16 %v261_v4, %v2627_v5  ;;  %v2645_v15 = vsel %vm302_vm0, %v334_v30, %v336_v3  ;;  %v265_v21 = vrot.slane %v2572_v43, 1  ;;  %v1998_v22 = vpack.c.bf16 %v853_v10, %v852_v9  ;;  %v2670_v30 = vld [vmem:[%s2503_s4 + $0x30] sm:$0xff] }
  0x21   : > { %1993 = vmatpush1.bf16.msra.mxu0 %v1992_v59  ;;  %v307_v19 = vsel %vm302_vm0, %v304_v16, %v306_v6  ;;  %v2141_v25 = vpack.i.bf16 %v2645_v15, %v2540_v26  ;;  %v854_v16 = vld [vmem:[%s3753_s1 + $0x70] sm:$0xff]  ;;  %v2667_v29 = vsel %vm256_vm1, %v293_v46, %v295_v18  ;;  %v267_v38 = vrot.slane %v2670_v30, 1 }
  0x22   : > { %2122 = vrot.lane.b32.xlu1 %v2121_v60, %s2436_s23  ;;  %2055 = vmatpush1.bf16.msra.mxu1 %v1992_v59  ;;  %v2136_v28 = vpack.i.bf16 %v307_v19, %v2523_v17  ;;  %v2673_v31 = vsel %vm256_vm1, %v263_v51, %v265_v21  ;;  %v2001_v36 = vpack.c.bf16 %v855_v27, %v854_v16  ;;  %v268_v43 = vrot.slane %v2676_v32, 1  ;;  %v858_v10 = vld [vmem:[%s3753_s1 + $0x90] sm:$0xff]  ;;  %v860_v21 = vld [vmem:[%s3753_s1 + $0xa0] sm:$0xff] }
  0x23   : > { %2117 = vrot.lane.b32.xlu0 %v2116_v63, %s2436_s23  ;;  %1994 = vmatprep.subr.bf16.mxu0 %v2433_v1  ;;  %v2151_v37 = vpack.i.bf16 %v2540_v26, %v2667_v29  ;;  %v2146_v42 = vpack.i.bf16 %v2523_v17, %v2673_v31  ;;  %v297_v44 = vrot.slane %v2679_v34, 1  ;;  %v298_v46 = vrot.slane %v2682_v35, 1 }
  0x24   : > { %2040 = vmatprep.subr.bf16.mxu1 %v2433_v1  ;;  %v2004_v49 = vpack.c.bf16 %v857_v41, %v856_v40  ;;  %v2161_v51 = vpack.i.bf16 %v2554_v33, %v2670_v30  ;;  %v2156_v52 = vpack.i.bf16 %v2599_v55, %v2603_v58  ;;  %v2717_v53 = vsel %vm256_vm1, %v267_v38, %v268_v43 }
  0x25   : > { %1996 = vmatpush1.bf16.msra.mxu0 %v1995_v7  ;;  %v2720_v54 = vsel %vm256_vm1, %v297_v44, %v298_v46  ;;  %v278_v59 = vrot.slane %v2704_v47, 1  ;;  %v280_v60 = vrot.slane %v2707_v48, 1  ;;  %v2166_v4 = vpack.i.bf16 %v2591_v50, %v2679_v34  ;;  %v863_v44 = vld [vmem:[%s3753_s1 + $0xb8] sm:$0xff] }
  0x26   : > { %2132 = vrot.lane.b32.xlu1 %v2131_v8, %s2435_s18  ;;  %1997 = vmatprep.subr.bf16.mxu0 %v2433_v1  ;;  %v2740_v63 = vpack.i.bf16 %v2720_v54, %v2717_v53  ;;  %v270_v6 = vrot.slane %v2723_v56, 1  ;;  %v283_v8 = vrot.slane %v2732_v61, 1  ;;  %v285_v9 = vrot.slane %v2735_v62, 1 }
  0x27   : > { %2127 = vrot.lane.b32.xlu0 %v2126_v14, %s2435_s18  ;;  %2056 = vmatpush1.bf16.msra.mxu1 %v1995_v7  ;;  %v2745_v3 = vsel %vm256_vm1, %v278_v59, %v280_v60  ;;  %v300_v7 = vrot.slane %v2726_v57, 1  ;;  %v859_v14 = vld [vmem:[%s3753_s1 + $0x98] sm:$0xff]  ;;  %v2181_v18 = vpack.i.bf16 %v2627_v5, %v2676_v32  ;;  %v2176_v19 = vpack.i.bf16 %v2667_v29, %v2673_v31 }
  0x28   : > { %2041 = vmatprep.subr.bf16.mxu1 %v2433_v1  ;;  %v2784_v27 = vsel %vm256_vm1, %v283_v8, %v285_v9  ;;  %v343_v38 = vrot.slane %v2679_v34, 2  ;;  %v344_v40 = vrot.slane %v2682_v35, 2  ;;  %v346_v60 = vrot.slane %v2726_v57, 2  ;;  %v865_v57 = vld [vmem:[%s3753_s1 + $0xc8] sm:$0xff] }
  0x29   : > { %1999 = vmatpush1.bf16.msra.mxu0 %v1998_v22  ;;  %v2779_v16 = vsel %vm256_vm1, %v298_v46, %v300_v7  ;;  %v2186_v46 = vpack.i.bf16 %v2621_v2, %v2682_v35  ;;  %v2829_v9 = vld [vmem:[%s2503_s4 + $0x48] sm:$0xff] }
  0x2a   : > { %2142 = vrot.lane.b32.xlu1 %v2141_v25, %s2434_s9  ;;  %2000 = vmatprep.subr.bf16.mxu0 %v2433_v1  ;;  %v2776_v25 = vsel %vm256_vm1, %v268_v43, %v270_v6  ;;  %v862_v43 = vld [vmem:[%s3753_s1 + $0xb0] sm:$0xff]  ;;  %v2201_v6 = vpack.i.bf16 %v2679_v34, %v2670_v30 }
  0x2b   : > { %2137 = vrot.lane.b32.xlu0 %v2136_v28, %s2434_s9  ;;  %2057 = vmatpush1.bf16.msra.mxu1 %v1998_v22  ;;  %v861_v22 = vld [vmem:[%s3753_s1 + $0xa8] sm:$0xff]  ;;  %v2007_v28 = vpack.c.bf16 %v859_v14, %v858_v10  ;;  %v2836_v14 = vsel %vm302_vm0, %v344_v40, %v346_v60  ;;  %v868_v60 = vld [vmem:[%s3753_s1 + $0xe0] sm:$0xff] }
  0x2c   : > { %2042 = vmatprep.subr.bf16.mxu1 %v2433_v1  ;;  %v2010_v41 = vpack.c.bf16 %v861_v22, %v860_v21  ;;  %3776 = vst [vmem:[#allocation5_spill] sm:$0xff] %v2836_v14  ;;  %v2843_v21 = vld [vmem:[%s2503_s4 + $0xe0] sm:$0xff] }
  0x2d   : > { %2002 = vmatpush1.bf16.msra.mxu0 %v2001_v36 }
  0x2e   : > { %2152 = vrot.lane.b32.xlu1 %v2151_v37, %s2436_s23  ;;  %2003 = vmatprep.subr.bf16.mxu0 %v2433_v1  ;;  %v314_v37 = vrot.slane %v2676_v32, 2 }
  0x2f   : > { %2147 = vrot.lane.b32.xlu0 %v2146_v42, %s2436_s23  ;;  %2058 = vmatpush1.bf16.msra.mxu1 %v2001_v36  ;;  %v313_v36 = vrot.slane %v2670_v30, 2  ;;  %v2793_v42 = vpack.i.bf16 %v2779_v16, %v2776_v25 }
  0x30   : > { %2043 = vmatprep.subr.bf16.mxu1 %v2433_v1 }
  0x31   : > { %2005 = vmatpush1.bf16.msra.mxu0 %v2004_v49 }
  0x32   : > { %2162 = vrot.lane.b32.xlu1 %v2161_v51, %s2434_s9  ;;  %2006 = vmatprep.subr.bf16.mxu0 %v2433_v1  ;;  %v2810_v51 = vsel %vm302_vm0, %v343_v38, %v344_v40  ;;  %v867_v38 = vld [vmem:[%s3753_s1 + $0xd8] sm:$0xff] }
  0x33   : > { %2157 = vrot.lane.b32.xlu0 %v2156_v52, %s2435_s18  ;;  %2059 = vmatpush1.bf16.msra.mxu1 %v2004_v49  ;;  %v2807_v49 = vsel %vm302_vm0, %v313_v36, %v314_v37  ;;  %3775 = vst [vmem:[#allocation4_spill] sm:$0xff] %v2810_v51  ;;  %v316_v52 = vrot.slane %v2723_v56, 2  ;;  %v864_v56 = vld [vmem:[%s3753_s1 + $0xc0] sm:$0xff]  ;;  %v272_v36 = vrot.slane %v2829_v9, 1 }
  0x34   : > { %2044 = vmatprep.subr.bf16.mxu1 %v2433_v1  ;;  %v2196_v7 = vpack.i.bf16 %v2810_v51, %v2807_v49  ;;  %v2016_v22 = vpack.c.bf16 %v865_v57, %v864_v56  ;;  %v210_v57 = vld [vmem:[%s2503_s4 + $0x58] sm:$0x3] }
  0x35   : > { %2008 = vmatpush1.bf16.msra.mxu0 %v2007_v28  ;;  %v2833_v10 = vsel %vm302_vm0, %v314_v37, %v316_v52  ;;  %v866_v37 = vld [vmem:[%s3753_s1 + $0xd0] sm:$0xff]  ;;  %v2221_v52 = vpack.i.bf16 %v2807_v49, %v2829_v9 }
  0x36   : > { %2172 = vrot.lane.b32.xlu1 %v2740_v63, %s2436_s23  ;;  %2009 = vmatprep.subr.bf16.mxu0 %v2433_v1  ;;  %v2206_v40 = vpack.i.bf16 %v2836_v14, %v2833_v10 }
  0x37   : > { %2167 = vrot.lane.b32.xlu0 %v2166_v4, %s2434_s9  ;;  %2060 = vmatpush1.bf16.msra.mxu1 %v2007_v28  ;;  %v2013_v4 = vpack.c.bf16 %v863_v44, %v862_v43  ;;  %v2211_v28 = vpack.i.bf16 %v2682_v35, %v2676_v32  ;;  %v368_v44 = vrot.slane %v2843_v21, 1 }
  0x38   : > { %2045 = vmatprep.subr.bf16.mxu1 %v2433_v1 }
  0x39   : > { %2011 = vmatpush1.bf16.msra.mxu0 %v2010_v41 }
  0x3a   : > { %2182 = vrot.lane.b32.xlu1 %v2181_v18, %s2434_s9  ;;  %2012 = vmatprep.subr.bf16.mxu0 %v2433_v1  ;;  %v2839_v18 = vld [vmem:[%s2503_s4 + $0x50] sm:$0xff] }
  0x3b   : > { %2177 = vrot.lane.b32.xlu0 %v2176_v19, %s2435_s18  ;;  %2061 = vmatpush1.bf16.msra.mxu1 %v2010_v41  ;;  %v226_v19 = vld [vmem:[%s2503_s4 + $0xd8] sm:$0xff]  ;;  %v273_v41 = vrot.slane %v2839_v18, 1 }
  0x3c   : > { %2046 = vmatprep.subr.bf16.mxu1 %v2433_v1  ;;  %v367_v43 = vrot.slane %v226_v19, 1 }
  0x3d   : > { %2014 = vmatpush1.bf16.msra.mxu0 %v2013_v4 }
  0x3e   : > { %2192 = vrot.lane.b32.xlu1 %v2793_v42, %s2436_s23  ;;  %2015 = vmatprep.subr.bf16.mxu0 %v2433_v1  ;;  %v369_v56 = vsel %vm256_vm1, %v367_v43, %v368_v44 }
  0x3f   : > { %2187 = vrot.lane.b32.xlu0 %v2186_v46, %s2434_s9  ;;  %2062 = vmatpush1.bf16.msra.mxu1 %v2013_v4  ;;  %v2019_v46 = vpack.c.bf16 %v867_v38, %v866_v37  ;;  %v869_v4 = vld [vmem:[%s3753_s1 + $0xe8] sm:$0xff]  ;;  %v871_v37 = vld [vmem:[%s3753_s1 + $0xf8] sm:$0xff]  ;;  %v2226_v38 = vpack.i.bf16 %v2810_v51, %v226_v19 }
  0x40   : > { %2047 = vmatprep.subr.bf16.mxu1 %v2433_v1 }
  0x41   : > { %2017 = vmatpush1.bf16.msra.mxu0 %v2016_v22 }
  0x42   : > { %2202 = vrot.lane.b32.xlu1 %v2201_v6, %s2436_s23  ;;  %2018 = vmatprep.subr.bf16.mxu0 %v2433_v1  ;;  %v2874_v6 = vsel %vm256_vm1, %v272_v36, %v273_v41  ;;  %v870_v36 = vld [vmem:[%s3753_s1 + $0xf0] sm:$0xff] }
  0x43   : > { %2197 = vrot.lane.b32.xlu0 %v2196_v7, %s2435_s18  ;;  %2063 = vmatpush1.bf16.msra.mxu1 %v2016_v22  ;;  %v2880_v7 = vld [vmem:[%s2503_s4 + $0xe8] sm:$0x3]  ;;  %v2022_v22 = vpack.c.bf16 %v869_v4, %v868_v60  ;;  %v2025_v60 = vpack.c.bf16 %v871_v37, %v870_v36  ;;  %v321_v36 = vrot.slane %v210_v57, 2 }
  0x44   : > { %2048 = vmatprep.subr.bf16.mxu1 %v2433_v1  ;;  %3777 = vst [vmem:[#allocation6_spill] sm:$0xff] %v2880_v7  ;;  %v370_v43 = vrot.slane %v2880_v7, 1 }
  0x45   : > { %2020 = vmatpush1.bf16.msra.mxu0 %v2019_v46 }
  0x46   : > { %2212 = vrot.lane.b32.xlu1 %v2211_v28, %s2436_s23  ;;  %v2231_v28 = vpack.i.bf16 %v369_v56, %v2874_v6  ;;  %2021 = vmatprep.subr.bf16.mxu0 %v2433_v1  ;;  %v371_v56 = vsel %vm256_vm1, %v368_v44, %v370_v43 }
  0x47   : > { %2207 = vrot.lane.b32.xlu0 %v2206_v40, %s2435_s18  ;;  %2064 = vmatpush1.bf16.msra.mxu1 %v2019_v46  ;;  %v275_v40 = vrot.slane %v210_v57, 1  ;;  %v872_v46 = vld [vmem:[%s3753_s1 + $0x100] sm:$0xff] }
  0x48   : > { %2049 = vmatprep.subr.bf16.mxu1 %v2433_v1  ;;  %v2930_v57 = vld [vmem:[%s2503_s4 + $0x60] sm:$0xff] }
  0x49   : > { %2023 = vmatpush1.bf16.msra.mxu0 %v2022_v22  ;;  %v2910_v4 = vsel %vm256_vm1, %v273_v41, %v275_v40  ;;  %v2246_v41 = vpack.i.bf16 %v2836_v14, %v2843_v21  ;;  %v277_v21 = vrot.slane %v2930_v57, 1 }
  0x4a   : > { %2222 = vrot.lane.b32.xlu1 %v2221_v52, %s2434_s9  ;;  %v873_v52 = vld [vmem:[%s3753_s1 + $0x108] sm:$0xff]  ;;  %2024 = vmatprep.subr.bf16.mxu0 %v2433_v1  ;;  %v2251_v37 = vpack.i.bf16 %v371_v56, %v2910_v4  ;;  %v2266_v43 = vpack.i.bf16 %v2910_v4, %v2874_v6 }
  0x4b   : > { %2217 = vrot.lane.b32.xlu0 %v2740_v63, %s2435_s18  ;;  %2065 = vmatpush1.bf16.msra.mxu1 %v2022_v22  ;;  %v2241_v63 = vpack.i.bf16 %v2833_v10, %v2839_v18  ;;  %v2906_v19 = vpack.c.bf16 %v873_v52, %v872_v46  ;;  %v318_v22 = vrot.slane %v2829_v9, 2  ;;  %v2948_v46 = vsel %vm256_vm1, %v277_v21, %v278_v59 }
  0x4c   : > { %2050 = vmatprep.subr.bf16.mxu1 %v2433_v1  ;;  %v323_v52 = vrot.slane %v2930_v57, 2  ;;  %v329_v21 = vrot.slane %v2732_v61, 2 }
  0x4d   : > { %2026 = vmatpush1.bf16.msra.mxu0 %v2025_v60 }
  0x4e   : > { %2232 = vrot.lane.b32.xlu1 %v2231_v28, %s2436_s23  ;;  %v319_v28 = vrot.slane %v2839_v18, 2 }
  0x4f   : > { %2227 = vrot.lane.b32.xlu0 %v2226_v38, %s2434_s9  ;;  %2066 = vmatpush1.bf16.msra.mxu1 %v2025_v60  ;;  %v2261_v38 = vpack.i.bf16 %v2839_v18, %v2829_v9  ;;  %v324_v60 = vrot.slane %v2704_v47, 2 }
  0x50   : > { %2028 = vmatprep.subr.bf16.mxu1 %v2906_v19  ;;  %v2924_v1 = vsel %vm302_vm0, %v318_v22, %v319_v28  ;;  %v2927_v44 = vsel %vm302_vm0, %v319_v28, %v321_v36  ;;  %v2276_v22 = vpack.i.bf16 %v2745_v3, %v2948_v46  ;;  %v2966_v36 = vld [vmem:[%s2503_s4 + $0x78] sm:$0xff] }
  0x51   : > { %v2271_v40 = vpack.i.bf16 %v2924_v1, %v2930_v57  ;;  %v2281_v56 = vpack.i.bf16 %v2927_v44, %v2704_v47  ;;  %v2960_v28 = vsel %vm302_vm0, %v323_v52, %v324_v60 }
  0x52   : > { %2242 = vrot.lane.b32.xlu1 %v2241_v63, %s2434_s9  ;;  %v326_v63 = vrot.slane %v2707_v48, 2  ;;  %v2291_v48 = vpack.i.bf16 %v2704_v47, %v2930_v57  ;;  %v328_v47 = vrot.slane %v2966_v36, 2 }
  0x53   : > { %2237 = vrot.lane.b32.xlu0 %v2793_v42, %s2435_s18  ;;  %v2256_v42 = vpack.i.bf16 %v2927_v44, %v2924_v1 }
  0x54   : > { %v2963_v59 = vsel %vm302_vm0, %v324_v60, %v326_v63  ;;  %v2994_v60 = vsel %vm302_vm0, %v328_v47, %v329_v21 }
  0x56   : > { %2252 = vrot.lane.b32.xlu1 %v2251_v37, %s2436_s23  ;;  %v2286_v37 = vpack.i.bf16 %v2963_v59, %v2960_v28 }
  0x57   : > { %2247 = vrot.lane.b32.xlu0 %v2246_v41, %s2434_s9  ;;  %v282_v41 = vrot.slane %v2966_v36, 1 }
  0x5a   : > { %2262 = vrot.lane.b32.xlu1 %v2261_v38, %s2436_s23  ;;  %v2301_v38 = vpack.i.bf16 %v2960_v28, %v2966_v36 }
  0x5b   : > { %2257 = vrot.lane.b32.xlu0 %v2256_v42, %s2435_s18  ;;  %v2982_v42 = vsel %vm256_vm1, %v282_v41, %v283_v8 }
  0x5c   : > { %v2306_v52 = vpack.i.bf16 %v2784_v27, %v2982_v42 }
  0x5e   : > { %2272 = vrot.lane.b32.xlu1 %v2271_v40, %s2434_s9  ;;  %v331_v40 = vrot.slane %v2735_v62, 2  ;;  %v2321_v62 = vpack.i.bf16 %v2732_v61, %v2966_v36 }
  0x5f   : > { %2267 = vrot.lane.b32.xlu0 %v2266_v43, %s2435_s18  ;;  %v2311_v43 = vpack.i.bf16 %v2963_v59, %v2732_v61 }
  0x60   : > { %v2997_v8 = vsel %vm302_vm0, %v329_v21, %v331_v40 }
  0x61   : > { %v2316_v63 = vpack.i.bf16 %v2997_v8, %v2994_v60 }
  0x62   : > { %2282 = vrot.lane.b32.xlu1 %v2281_v56, %s2434_s9  ;;  %v2331_v56 = vpack.i.bf16 %v2994_v60, %v2528_v20 }
  0x63   : > { %2277 = vrot.lane.b32.xlu0 %v2276_v22, %s2436_s23 }
  0x66   : > { %2292 = vrot.lane.b32.xlu1 %v2291_v48, %s2436_s23 }
  0x67   : > { %2287 = vrot.lane.b32.xlu0 %v2286_v37, %s2435_s18 }
  0x6a   : > { %2302 = vrot.lane.b32.xlu1 %v2301_v38, %s2434_s9 }
  0x6b   : > { %2297 = vrot.lane.b32.xlu0 %v2276_v22, %s2435_s18  ;;  %v2336_v22 = vpack.i.bf16 %v2997_v8, %v2533_v23 }
  0x6e   : > { %2312 = vrot.lane.b32.xlu1 %v2311_v43, %s2434_s9 }
  0x6f   : > { %2307 = vrot.lane.b32.xlu0 %v2306_v52, %s2436_s23 }
  0x72   : > { %2322 = vrot.lane.b32.xlu1 %v2321_v62, %s2436_s23  ;;  %v874_v62 = vld [vmem:[%s3753_s1 + $0x110] sm:$0xff] }
  0x73   : > { %2317 = vrot.lane.b32.xlu0 %v2316_v63, %s2435_s18  ;;  %v875_v63 = vld [vmem:[%s3753_s1 + $0x118] sm:$0xff] }
  0x74   : > { %v2031_v2 = vpack.c.bf16 %v875_v63, %v874_v62 }
  0x76   : > { %2332 = vrot.lane.b32.xlu1 %v2331_v56, %s2434_s9 }
  0x77   : > { %2327 = vrot.lane.b32.xlu0 %v2306_v52, %s2435_s18 }
  0x7a   : > { %2337 = vrot.lane.b32.xlu1 %v2336_v22, %s2434_s9 }
  0x7b   : > { %655 = vrot.lane.b32.xlu0 %v2578_v45, %s2436_s23 }
  0x7e   : > { %553 = vrot.lane.b32.xlu1 %v2566_v39, %s2435_s18 }
  0x7f   : > { %657 = vrot.lane.b32.xlu0 %v2618_v0, %s2436_s23 }
  0x82   : > { %555 = vrot.lane.b32.xlu1 %v2645_v15, %s2435_s18 }
  0x83   : > { %505 = vrot.lane.b32.xlu0 %v2528_v20, %s2436_s23 }
  0x87   : > { %507 = vrot.lane.b32.xlu0 %v2533_v23, %s2436_s23 }
  0x8c   : > { %v2108_v61 = vpop.permute.xlu1 %2107 }
  0x8d   : > { %v2098_v48 = vpop.permute.xlu0 %2097  ;;  %v2110_v56 = vunpack.i.h.bf16 %v2108_v61  ;;  %v2109_v22 = vunpack.i.l.bf16 %v2108_v61 }
  0x8e   : > { %v2100_v37 = vunpack.i.h.bf16 %v2098_v48  ;;  %v2099_v41 = vunpack.i.l.bf16 %v2098_v48 }
  0x90   : > { %v3026_v38 = vpop.permute.xlu1 %2112  ;;  %v3040_v7 = vsel %vm689_vm2, %v2603_v58, %v2099_v41  ;;  %v690_v40 = vsel %vm689_vm2, %v2512_v11, %v2100_v37 }
  0x91   : > { %v2103_v47 = vpop.permute.xlu0 %2102  ;;  %v2115_v21 = vunpack.i.h.bf16 %v3026_v38 }
  0x92   : > { %v2105_v43 = vunpack.i.h.bf16 %v2103_v47  ;;  %v2104_v52 = vunpack.i.l.bf16 %v2103_v47 }
  0x94   : > { %v3036_v48 = vpop.permute.xlu1 %2122  ;;  %v3044_v47 = vsel %vm689_vm2, %v2599_v55, %v2104_v52  ;;  %v702_v14 = vsel %vm689_vm2, %v2528_v20, %v2105_v43  ;;  %v3778_v55 = vunpack.i.l.bf16 %v3026_v38  ;;  %v776_v20 = vsel %vm708_vm3, %v3040_v7, %v2109_v22 }
  0x95   : > { %v3765_v61 = vunpack.i.h.bf16 %v3036_v48  ;;  %v3764_v51 = vunpack.i.l.bf16 %v3036_v48  ;;  %v3052_v0 = vpop.permute.xlu0 %2117  ;;  %v3061_v11 = vsel %vm708_vm3, %v702_v14, %v2115_v21  ;;  %v709_v43 = vsel %vm708_vm3, %v690_v40, %v2110_v56 }
  0x96   : > { %v3766_v58 = vunpack.i.h.bf16 %v3052_v0  ;;  %v2119_v41 = vunpack.i.l.bf16 %v3052_v0  ;;  %v800_v52 = vsel %vm708_vm3, %v3044_v47, %v3778_v55  ;;  %3779 = vst [vmem:[#allocation7_spill] sm:$0xff] %v3061_v11 }
  0x97   : > { %v832_v37 = vsel %vm727_vm4, %v800_v52, %v3764_v51  ;;  %v752_v62 = vsel %vm727_vm4, %v3061_v11, %v3765_v61 }
  0x98   : > { %v2133_v63 = vpop.permute.xlu1 %2132  ;;  %v808_v55 = vsel %vm727_vm4, %v776_v20, %v2119_v41  ;;  %1103 = vmatprep.mubr.f32.mxu1 %v832_v37  ;;  %v728_v14 = vsel %vm727_vm4, %v709_v43, %v3766_v58 }
  0x99   : > { %v2128_v21 = vpop.permute.xlu0 %2127  ;;  %983 = vmatprep.mubr.f32.mxu0 %v808_v55  ;;  %1104 = vmatmul.mubr.f32.vlgmr.msra.gmra.mrb[0].mxu1 %v752_v62  ;;  %v2135_v40 = vunpack.i.h.bf16 %v2133_v63  ;;  %v2134_v56 = vunpack.i.l.bf16 %v2133_v63 }
  0x9a   : > { %984 = vmatmul.mubr.f32.vlgmr.msra.gmra.mrb[0].mxu0 %v728_v14  ;;  %2030 = vmatpush3.bf16.msra.mxu1 %v2906_v19  ;;  %v2130_v52 = vunpack.i.h.bf16 %v2128_v21  ;;  %v2129_v51 = vunpack.i.l.bf16 %v2128_v21 }
  0x9b   : > { %2032 = vmatprep.subr.bf16.mxu1 %v2031_v2  ;;  %v3084_v62 = vsel %vm689_vm2, %v2667_v29, %v2134_v56  ;;  %v703_v19 = vsel %vm689_vm2, %v2533_v23, %v2135_v40 }
  0x9c   : > { %v3078_v22 = vpop.permute.xlu1 %2142 }
  0x9d   : > { %3780 = vst [vmem:[#allocation8_spill] sm:$0xff] %v3078_v22  ;;  %v2138_v61 = vpop.permute.xlu0 %2137  ;;  %v2145_v41 = vunpack.i.h.bf16 %v3078_v22  ;;  %v3768_v20 = vunpack.i.l.bf16 %v3078_v22 }
  0x9e   : > { %2034 = vmatpush3.bf16.msra.mxu1 %v2031_v2  ;;  %v2140_v37 = vunpack.i.h.bf16 %v2138_v61  ;;  %v2139_v43 = vunpack.i.l.bf16 %v2138_v61  ;;  %v761_v2 = vsel %vm689_vm2, %v2673_v31, %v2129_v51  ;;  %v691_v61 = vsel %vm689_vm2, %v2515_v12, %v2130_v52 }
  0x9f   : > { %v801_v23 = vsel %vm708_vm3, %v3084_v62, %v3768_v20  ;;  %v3105_v40 = vsel %vm708_vm3, %v703_v19, %v2145_v41 }
  0xa0   : > { %v3088_v63 = vpop.permute.xlu1 %2152  ;;  %3781 = vst [vmem:[#allocation9_spill] sm:$0xff] %v3105_v40  ;;  %v777_v58 = vsel %vm708_vm3, %v761_v2, %v2139_v43  ;;  %v710_v12 = vsel %vm708_vm3, %v691_v61, %v2140_v37 }
  0xa1   : > { %v3769_v55 = vunpack.i.h.bf16 %v3088_v63  ;;  %v3767_v14 = vunpack.i.l.bf16 %v3088_v63  ;;  %v3092_v21 = vpop.permute.xlu0 %2147 }
  0xa2   : > { %v2150_v29 = vunpack.i.h.bf16 %v3092_v21  ;;  %v2149_v56 = vunpack.i.l.bf16 %v3092_v21 }
  0xa3   : > { %v833_v31 = vsel %vm727_vm4, %v801_v23, %v3767_v14  ;;  %v753_v51 = vsel %vm727_vm4, %v3105_v40, %v3769_v55 }
  0xa4   : > { %v3116_v52 = vpop.permute.xlu1 %2162  ;;  %v809_v21 = vsel %vm727_vm4, %v777_v58, %v2149_v56  ;;  %1108 = vmatprep.mubr.f32.mxu1 %v833_v31  ;;  %v729_v41 = vsel %vm727_vm4, %v710_v12, %v2150_v29 }
  0xa5   : > { %v2165_v43 = vunpack.i.h.bf16 %v3116_v52  ;;  %v2158_v19 = vpop.permute.xlu0 %2157  ;;  %988 = vmatprep.mubr.f32.mxu0 %v809_v21  ;;  %1109 = vmatmul.mubr.f32.gmra.mrb[2].mxu1 %v753_v51  ;;  %v2164_v23 = vunpack.i.l.bf16 %v3116_v52 }
  0xa6   : > { %v2159_v37 = vunpack.i.l.bf16 %v2158_v19  ;;  %989 = vmatmul.mubr.f32.gmra.mrb[2].mxu0 %v729_v41  ;;  %v2160_v61 = vunpack.i.h.bf16 %v2158_v19 }
  0xa7   : > { %v778_v51 = vsel %vm708_vm3, %v3040_v7, %v2164_v23 }
  0xa8   : > { %v3122_v14 = vpop.permute.xlu1 %2172  ;;  %v692_v20 = vsel %vm689_vm2, %v2518_v13, %v2159_v37  ;;  %v704_v41 = vsel %vm689_vm2, %v2536_v24, %v2160_v61  ;;  %v3782_v13 = vunpack.i.h.bf16 %v3052_v0  ;;  %v3783_v24 = vunpack.i.h.bf16 %v3036_v48 }
  0xa9   : > { %v2175_v58 = vunpack.i.h.bf16 %v3122_v14  ;;  %v2174_v56 = vunpack.i.l.bf16 %v3122_v14  ;;  %v2168_v31 = vpop.permute.xlu0 %2167  ;;  %v711_v12 = vsel %vm708_vm3, %v692_v20, %v2165_v43 }
  0xaa   : > { %v2170_v55 = vunpack.i.h.bf16 %v2168_v31  ;;  %v2169_v21 = vunpack.i.l.bf16 %v2168_v31  ;;  %v730_v14 = vsel %vm727_vm4, %v711_v12, %v3782_v13 }
  0xab   : > { %v810_v52 = vsel %vm727_vm4, %v778_v51, %v2174_v56 }
  0xac   : > { %v3134_v19 = vpop.permute.xlu1 %2182  ;;  %993 = vmatprep.mubr.f32.mxu0 %v810_v52  ;;  %v802_v20 = vsel %vm708_vm3, %v3044_v47, %v2169_v21  ;;  %v723_v43 = vsel %vm708_vm3, %v704_v41, %v2170_v55 }
  0xad   : > { %v2185_v37 = vunpack.i.h.bf16 %v3134_v19  ;;  %v2178_v7 = vpop.permute.xlu0 %2177  ;;  %994 = vmatmul.mubr.f32.gmra.mrb[4].mxu0 %v730_v14  ;;  %v834_v31 = vsel %vm727_vm4, %v802_v20, %v2175_v58  ;;  %v754_v61 = vsel %vm727_vm4, %v723_v43, %v3783_v24  ;;  %v2184_v51 = vunpack.i.l.bf16 %v3134_v19 }
  0xae   : > { %v2179_v0 = vunpack.i.l.bf16 %v2178_v7  ;;  %1113 = vmatprep.mubr.f32.mxu1 %v834_v31  ;;  %v2180_v52 = vunpack.i.h.bf16 %v2178_v7 }
  0xaf   : > { %1114 = vmatmul.mubr.f32.gmra.mrb[4].mxu1 %v754_v61  ;;  %v779_v22 = vsel %vm708_vm3, %v761_v2, %v2184_v51  ;;  %v3784_v2 = vunpack.i.h.bf16 %v3088_v63 }
  0xb0   : > { %v2193_v13 = vpop.permute.xlu1 %2192  ;;  %v693_v47 = vsel %vm689_vm2, %v2523_v17, %v2179_v0  ;;  %v705_v19 = vsel %vm689_vm2, %v2540_v26, %v2180_v52 }
  0xb1   : > { %v2195_v55 = vunpack.i.h.bf16 %v2193_v13  ;;  %v2194_v41 = vunpack.i.l.bf16 %v2193_v13  ;;  %v2188_v40 = vpop.permute.xlu0 %2187  ;;  %v712_v14 = vsel %vm708_vm3, %v693_v47, %v2185_v37 }
  0xb2   : > { %v2190_v20 = vunpack.i.h.bf16 %v2188_v40  ;;  %v2189_v11 = vunpack.i.l.bf16 %v2188_v40  ;;  %v731_v31 = vsel %vm727_vm4, %v712_v14, %v2150_v29 }
  0xb3   : > { %v811_v24 = vsel %vm727_vm4, %v779_v22, %v2194_v41 }
  0xb4   : > { %v3155_v7 = vpop.permute.xlu1 %2202  ;;  %998 = vmatprep.mubr.f32.mxu0 %v811_v24  ;;  %v803_v17 = vsel %vm708_vm3, %v3084_v62, %v2189_v11  ;;  %v724_v61 = vsel %vm708_vm3, %v705_v19, %v2190_v20 }
  0xb5   : > { %v2198_v37 = vpop.permute.xlu0 %2197  ;;  %999 = vmatmul.mubr.f32.gmra.mrb[6].mxu0 %v731_v31  ;;  %v835_v40 = vsel %vm727_vm4, %v803_v17, %v2195_v55  ;;  %v755_v22 = vsel %vm727_vm4, %v724_v61, %v3784_v2  ;;  %v2205_v52 = vunpack.i.h.bf16 %v3155_v7  ;;  %v2204_v29 = vunpack.i.l.bf16 %v3155_v7 }
  0xb6   : > { %v2200_v0 = vunpack.i.h.bf16 %v2198_v37  ;;  %v2199_v26 = vunpack.i.l.bf16 %v2198_v37  ;;  %1118 = vmatprep.mubr.f32.mxu1 %v835_v40 }
  0xb7   : > { %1119 = vmatmul.mubr.f32.gmra.mrb[6].mxu1 %v755_v22 }
  0xb8   : > { %v3167_v13 = vpop.permute.xlu1 %2212  ;;  %v762_v62 = vsel %vm689_vm2, %v2717_v53, %v2199_v26  ;;  %v774_v47 = vsel %vm689_vm2, %v2720_v54, %v2200_v0  ;;  %v732_v53 = vsel %vm727_vm4, %v711_v12, %v2204_v29  ;;  %v756_v54 = vsel %vm727_vm4, %v723_v43, %v2205_v52 }
  0xb9   : > { %v2208_v20 = vpop.permute.xlu0 %2207  ;;  %v780_v24 = vsel %vm708_vm3, %v762_v62, %v2164_v23  ;;  %v804_v19 = vsel %vm708_vm3, %v774_v47, %v2169_v21  ;;  %v2215_v40 = vunpack.i.h.bf16 %v3167_v13  ;;  %v2214_v2 = vunpack.i.l.bf16 %v3167_v13 }
  0xba   : > { %v2210_v31 = vunpack.i.h.bf16 %v2208_v20  ;;  %v2209_v17 = vunpack.i.l.bf16 %v2208_v20  ;;  %v812_v37 = vsel %vm727_vm4, %v780_v24, %v2174_v56  ;;  %v836_v7 = vsel %vm727_vm4, %v804_v19, %v2175_v58 }
  0xbb   : > { %1003 = vmatprep.mubr.f32.mxu0 %v812_v37  ;;  %1123 = vmatprep.mubr.f32.mxu1 %v836_v7 }
  0xbc   : > { %1004 = vmatmul.mubr.f32.gmra.mrb[8].mxu0 %v732_v53  ;;  %1124 = vmatmul.mubr.f32.gmra.mrb[8].mxu1 %v756_v54  ;;  %v3181_v23 = vpop.permute.xlu1 %2222  ;;  %v763_v21 = vsel %vm689_vm2, %v2776_v25, %v2209_v17  ;;  %v775_v58 = vsel %vm689_vm2, %v2779_v16, %v2210_v31  ;;  %v733_v25 = vsel %vm727_vm4, %v712_v14, %v2214_v2 }
  0xbd   : > { %v2225_v56 = vunpack.i.h.bf16 %v3181_v23  ;;  %v2218_v22 = vpop.permute.xlu0 %2217  ;;  %v781_v0 = vsel %vm708_vm3, %v763_v21, %v2184_v51  ;;  %v805_v26 = vsel %vm708_vm3, %v775_v58, %v2189_v11  ;;  %v2224_v12 = vunpack.i.l.bf16 %v3181_v23 }
  0xbe   : > { %v2219_v43 = vunpack.i.l.bf16 %v2218_v22  ;;  %v813_v20 = vsel %vm727_vm4, %v781_v0, %v2194_v41  ;;  %v837_v24 = vsel %vm727_vm4, %v805_v26, %v2195_v55  ;;  %v2220_v19 = vunpack.i.h.bf16 %v2218_v22 }
  0xbf   : > { %1008 = vmatprep.mubr.f32.mxu0 %v813_v20  ;;  %1128 = vmatprep.mubr.f32.mxu1 %v837_v24  ;;  %v757_v16 = vsel %vm727_vm4, %v724_v61, %v2215_v40  ;;  %v782_v14 = vsel %vm708_vm3, %v762_v62, %v2224_v12 }
  0xc0   : > { %1009 = vmatmul.mubr.f32.gmra.mrb[10].mxu0 %v733_v25  ;;  %1129 = vmatmul.mubr.f32.gmra.mrb[10].mxu1 %v757_v16  ;;  %v2233_v11 = vpop.permute.xlu1 %2232  ;;  %v694_v51 = vsel %vm689_vm2, %v2670_v30, %v2219_v43  ;;  %v706_v61 = vsel %vm689_vm2, %v2679_v34, %v2220_v19 }
  0xc1   : > { %v2235_v41 = vunpack.i.h.bf16 %v2233_v11  ;;  %v2234_v31 = vunpack.i.l.bf16 %v2233_v11  ;;  %v2228_v55 = vpop.permute.xlu0 %2227  ;;  %v713_v17 = vsel %vm708_vm3, %v694_v51, %v2225_v56 }
  0xc2   : > { %v2230_v37 = vunpack.i.h.bf16 %v2228_v55  ;;  %v2229_v7 = vunpack.i.l.bf16 %v2228_v55  ;;  %v734_v30 = vsel %vm727_vm4, %v713_v17, %v2204_v29 }
  0xc3   : > { %v814_v53 = vsel %vm727_vm4, %v782_v14, %v2234_v31 }
  0xc4   : > { %v2243_v54 = vpop.permute.xlu1 %2242  ;;  %1013 = vmatprep.mubr.f32.mxu0 %v814_v53  ;;  %v806_v22 = vsel %vm708_vm3, %v774_v47, %v2229_v7  ;;  %v725_v0 = vsel %vm708_vm3, %v706_v61, %v2230_v37 }
  0xc5   : > { %v2245_v56 = vunpack.i.h.bf16 %v2243_v54  ;;  %v2238_v26 = vpop.permute.xlu0 %2237  ;;  %1014 = vmatmul.mubr.f32.gmra.mrb[12].mxu0 %v734_v30  ;;  %v838_v43 = vsel %vm727_vm4, %v806_v22, %v2235_v41  ;;  %v758_v62 = vsel %vm727_vm4, %v725_v0, %v2205_v52  ;;  %v2244_v20 = vunpack.i.l.bf16 %v2243_v54 }
  0xc6   : > { %v2239_v24 = vunpack.i.l.bf16 %v2238_v26  ;;  %1133 = vmatprep.mubr.f32.mxu1 %v838_v43  ;;  %v2240_v25 = vunpack.i.h.bf16 %v2238_v26 }
  0xc7   : > { %1134 = vmatmul.mubr.f32.gmra.mrb[12].mxu1 %v758_v62  ;;  %v783_v41 = vsel %vm708_vm3, %v763_v21, %v2244_v20 }
  0xc8   : > { %v2253_v34 = vpop.permute.xlu1 %2252  ;;  %v695_v29 = vsel %vm689_vm2, %v2676_v32, %v2239_v24  ;;  %v707_v37 = vsel %vm689_vm2, %v2682_v35, %v2240_v25 }
  0xc9   : > { %v2255_v19 = vunpack.i.h.bf16 %v2253_v34  ;;  %v2254_v47 = vunpack.i.l.bf16 %v2253_v34  ;;  %v2248_v16 = vpop.permute.xlu0 %2247  ;;  %v714_v11 = vsel %vm708_vm3, %v695_v29, %v2245_v56 }
  0xca   : > { %v2250_v51 = vunpack.i.h.bf16 %v2248_v16  ;;  %v2249_v55 = vunpack.i.l.bf16 %v2248_v16  ;;  %v735_v32 = vsel %vm727_vm4, %v714_v11, %v2214_v2 }
  0xcb   : > { %v815_v52 = vsel %vm727_vm4, %v783_v41, %v2254_v47 }
  0xcc   : > { %v3220_v7 = vpop.permute.xlu1 %2262  ;;  %1018 = vmatprep.mubr.f32.mxu0 %v815_v52  ;;  %v807_v14 = vsel %vm708_vm3, %v775_v58, %v2249_v55  ;;  %v726_v53 = vsel %vm708_vm3, %v707_v37, %v2250_v51 }
  0xcd   : > { %v2258_v61 = vpop.permute.xlu0 %2257  ;;  %1019 = vmatmul.mubr.f32.gmra.mrb[14].mxu0 %v735_v32  ;;  %v839_v21 = vsel %vm727_vm4, %v807_v14, %v2255_v19  ;;  %v759_v54 = vsel %vm727_vm4, %v726_v53, %v2215_v40  ;;  %v2264_v22 = vunpack.i.l.bf16 %v3220_v7  ;;  %v2265_v62 = vunpack.i.h.bf16 %v3220_v7 }
  0xce   : > { %v2260_v35 = vunpack.i.h.bf16 %v2258_v61  ;;  %v2259_v30 = vunpack.i.l.bf16 %v2258_v61  ;;  %1138 = vmatprep.mubr.f32.mxu1 %v839_v21 }
  0xcf   : > { %1139 = vmatmul.mubr.f32.gmra.mrb[14].mxu1 %v759_v54 }
  0xd0   : > { %v2273_v0 = vpop.permute.xlu1 %2272  ;;  %1931 = vmatprep.mubr.msk.f32.mxu1 %vm689_vm2, %v2554_v33  ;;  %v764_v2 = vsel %vm689_vm2, %v2874_v6, %v2259_v30  ;;  %v765_v58 = vsel %vm689_vm2, %v2910_v4, %v2260_v35  ;;  %v736_v33 = vsel %vm727_vm4, %v713_v17, %v2264_v22 }
  0xd1   : > { %v2268_v56 = vpop.permute.xlu0 %2267  ;;  %v784_v13 = vsel %vm708_vm3, %v764_v2, %v2224_v12  ;;  %v785_v40 = vsel %vm708_vm3, %v765_v58, %v2244_v20  ;;  %v2274_v24 = vunpack.i.l.bf16 %v2273_v0  ;;  %v2275_v6 = vunpack.i.h.bf16 %v2273_v0 }
  0xd2   : > { %v2269_v26 = vunpack.i.l.bf16 %v2268_v56  ;;  %v816_v43 = vsel %vm727_vm4, %v784_v13, %v2234_v31  ;;  %v817_v23 = vsel %vm727_vm4, %v785_v40, %v2254_v47  ;;  %v2270_v12 = vunpack.i.h.bf16 %v2268_v56 }
  0xd3   : > { %1023 = vmatprep.mubr.f32.mxu0 %v816_v43  ;;  %1932 = vmatmul.mubr.msk.f32.vlgmr.msra.gmra.mrb[16].mxu1 %vm689_vm2, %v2627_v5  ;;  %v737_v5 = vsel %vm727_vm4, %v714_v11, %v2265_v62  ;;  %v786_v17 = vsel %vm708_vm3, %v764_v2, %v2274_v24 }
  0xd4   : > { %1024 = vmatmul.mubr.f32.gmra.mrb[16].mxu0 %v736_v33  ;;  %v2283_v4 = vpop.permute.xlu1 %2282  ;;  %1934 = vmatprep.mubr.msk.f32.mxu1 %vm689_vm2, %v2807_v49  ;;  %v696_v25 = vsel %vm689_vm2, %v2829_v9, %v2269_v26  ;;  %v697_v11 = vsel %vm689_vm2, %v2839_v18, %v2270_v12 }
  0xd5   : > { %v2284_v20 = vunpack.i.l.bf16 %v2283_v4  ;;  %v2278_v31 = vpop.permute.xlu0 %2277  ;;  %1028 = vmatprep.mubr.f32.mxu0 %v817_v23  ;;  %v2285_v29 = vunpack.i.h.bf16 %v2283_v4  ;;  %v715_v9 = vsel %vm708_vm3, %v696_v25, %v2275_v6 }
  0xd6   : > { %v2279_v34 = vunpack.i.l.bf16 %v2278_v31  ;;  %v2280_v19 = vunpack.i.h.bf16 %v2278_v31  ;;  %v738_v37 = vsel %vm727_vm4, %v715_v9, %v2264_v22 }
  0xd7   : > { %1935 = vmatmul.mubr.msk.f32.gmra.mrb[18].mxu1 %vm689_vm2, %v2833_v10  ;;  %v787_v55 = vsel %vm708_vm3, %v765_v58, %v2284_v20  ;;  %v716_v32 = vsel %vm708_vm3, %v697_v11, %v2285_v29 }
  0xd8   : > { %1029 = vmatmul.mubr.f32.gmra.mrb[18].mxu0 %v737_v5  ;;  %v3256_v47 = vpop.permute.xlu1 %2292  ;;  %v818_v16 = vsel %vm727_vm4, %v786_v17, %v2279_v34  ;;  %1937 = vmatprep.mubr.msk.f32.mxu1 %vm689_vm2, %v2807_v49  ;;  %v819_v49 = vsel %vm727_vm4, %v787_v55, %v2280_v19  ;;  %v739_v21 = vsel %vm727_vm4, %v716_v32, %v2265_v62 }
  0xd9   : > { %v2288_v51 = vpop.permute.xlu0 %2287  ;;  %1033 = vmatprep.mubr.f32.mxu0 %v818_v16  ;;  %v2294_v61 = vunpack.i.l.bf16 %v3256_v47  ;;  %v2295_v22 = vunpack.i.h.bf16 %v3256_v47 }
  0xda   : > { %v2290_v41 = vunpack.i.h.bf16 %v2288_v51  ;;  %v2289_v52 = vunpack.i.l.bf16 %v2288_v51 }
  0xdb   : > { %1938 = vmatmul.mubr.msk.f32.gmra.mrb[20].mxu1 %vm689_vm2, %v2833_v10  ;;  %v740_v2 = vsel %vm727_vm4, %v715_v9, %v2294_v61 }
  0xdc   : > { %1034 = vmatmul.mubr.f32.gmra.mrb[20].mxu0 %v738_v37  ;;  %v2303_v7 = vpop.permute.xlu1 %2302  ;;  %1940 = vmatprep.mubr.msk.f32.mxu1 %vm689_vm2, %v2924_v1  ;;  %v766_v14 = vsel %vm689_vm2, %v2948_v46, %v2289_v52  ;;  %v767_v10 = vsel %vm689_vm2, %v2745_v3, %v2290_v41 }
  0xdd   : > { %v2298_v18 = vpop.permute.xlu0 %2297  ;;  %1038 = vmatprep.mubr.f32.mxu0 %v819_v49  ;;  %v788_v53 = vsel %vm708_vm3, %v766_v14, %v2274_v24  ;;  %v789_v3 = vsel %vm708_vm3, %v767_v10, %v2284_v20  ;;  %v2304_v0 = vunpack.i.l.bf16 %v2303_v7  ;;  %v2305_v58 = vunpack.i.h.bf16 %v2303_v7  ;;  %v2405_v20 = vld [vmem:[%s2503_s4 + $0x68] sm:$0xff] }
  0xde   : > { %v820_v35 = vsel %vm727_vm4, %v788_v53, %v2279_v34  ;;  %v2299_v46 = vunpack.i.l.bf16 %v2298_v18  ;;  %v2300_v13 = vunpack.i.h.bf16 %v2298_v18  ;;  %v741_v24 = vsel %vm727_vm4, %v716_v32, %v2295_v22 }
  0xdf   : > { %1941 = vmatmul.mubr.msk.f32.gmra.mrb[22].mxu1 %vm689_vm2, %v2927_v44  ;;  %v790_v33 = vsel %vm708_vm3, %v766_v14, %v2304_v0 }
  0xe0   : > { %1039 = vmatmul.mubr.f32.gmra.mrb[22].mxu0 %v739_v21  ;;  %v2313_v54 = vpop.permute.xlu1 %2312  ;;  %1943 = vmatprep.mubr.msk.f32.mxu1 %vm689_vm2, %v2924_v1  ;;  %v821_v1 = vsel %vm727_vm4, %v789_v3, %v2280_v19  ;;  %v699_v31 = vsel %vm689_vm2, %v2405_v20, %v2300_v13  ;;  %v3790_v20 = vunpack.i.l.bf16 %v3036_v48 }
  0xe1   : > { %v3284_v30 = vpop.permute.xlu0 %2307  ;;  %1043 = vmatprep.mubr.f32.mxu0 %v820_v35  ;;  %v2314_v40 = vunpack.i.l.bf16 %v2313_v54  ;;  %v2315_v6 = vunpack.i.h.bf16 %v2313_v54 }
  0xe2   : > { %v2309_v56 = vunpack.i.l.bf16 %v3284_v30  ;;  %v2310_v4 = vunpack.i.h.bf16 %v3284_v30 }
  0xe3   : > { %1944 = vmatmul.mubr.msk.f32.gmra.mrb[24].mxu1 %vm689_vm2, %v2927_v44  ;;  %v698_v44 = vsel %vm689_vm2, %v2930_v57, %v2299_v46  ;;  %v791_v57 = vsel %vm708_vm3, %v767_v10, %v2314_v40  ;;  %v718_v19 = vsel %vm708_vm3, %v699_v31, %v2315_v6 }
  0xe4   : > { %1044 = vmatmul.mubr.f32.gmra.mrb[24].mxu0 %v740_v2  ;;  %1946 = vmatprep.mubr.msk.f32.mxu1 %vm689_vm2, %v2960_v28  ;;  %v3295_v26 = vpop.permute.xlu1 %2322  ;;  %v822_v23 = vsel %vm727_vm4, %v790_v33, %v2309_v56  ;;  %v717_v12 = vsel %vm708_vm3, %v698_v44, %v2305_v58  ;;  %v2407_v33 = vld [vmem:[%s2503_s4 + $0xd8] sm:$0xff] }
  0xe5   : > { %v2318_v43 = vpop.permute.xlu0 %2317  ;;  %1048 = vmatprep.mubr.f32.mxu0 %v821_v1  ;;  %v742_v17 = vsel %vm727_vm4, %v717_v12, %v2294_v61  ;;  %v2324_v16 = vunpack.i.l.bf16 %v3295_v26  ;;  %v2325_v52 = vunpack.i.h.bf16 %v3295_v26  ;;  %v372_v6 = vrot.slane %v2407_v33, 2 }
  0xe6   : > { %v2319_v62 = vunpack.i.l.bf16 %v2318_v43  ;;  %v2320_v25 = vunpack.i.h.bf16 %v2318_v43 }
  0xe7   : > { %1947 = vmatmul.mubr.msk.f32.gmra.mrb[26].mxu1 %vm689_vm2, %v2963_v59  ;;  %v744_v37 = vsel %vm727_vm4, %v717_v12, %v2324_v16  ;;  %v3789_v12 = vld [vmem:[#allocation5_spill] sm:$0xff] }
  0xe8   : > { %1049 = vmatmul.mubr.f32.gmra.mrb[26].mxu0 %v741_v24  ;;  %1949 = vmatprep.mubr.msk.f32.mxu1 %vm689_vm2, %v2960_v28  ;;  %v768_v34 = vsel %vm689_vm2, %v2982_v42, %v2319_v62  ;;  %v2333_v5 = vpop.permute.xlu1 %2332  ;;  %v823_v28 = vsel %vm727_vm4, %v791_v57, %v2310_v4  ;;  %v769_v42 = vsel %vm689_vm2, %v2784_v27, %v2320_v25  ;;  %v3787_v62 = vld [vmem:[#allocation4_spill] sm:$0xff]  ;;  %v3788_v24 = vunpack.i.l.bf16 %v3026_v38  ;;  %v3791_v38 = vld [vmem:[#allocation6_spill] sm:$0xff] }
  0xe9   : > { %1053 = vmatprep.mubr.f32.mxu0 %v822_v23  ;;  %v2328_v29 = vpop.permute.xlu0 %2327  ;;  %v792_v47 = vsel %vm708_vm3, %v768_v34, %v2304_v0  ;;  %v2334_v51 = vunpack.i.l.bf16 %v2333_v5  ;;  %v793_v41 = vsel %vm708_vm3, %v769_v42, %v2314_v40  ;;  %v2335_v7 = vunpack.i.h.bf16 %v2333_v5 }
  0xea   : > { %v824_v9 = vsel %vm727_vm4, %v792_v47, %v2309_v56  ;;  %v2329_v55 = vunpack.i.l.bf16 %v2328_v29  ;;  %v825_v49 = vsel %vm727_vm4, %v793_v41, %v2310_v4  ;;  %v3785_v56 = vld [vmem:[#allocation3_spill] sm:$0xff]  ;;  %v2408_v4 = vld [vmem:[%s2503_s4 + $0xe0] sm:$0xff]  ;;  %v375_v25 = vrot.slane %v3791_v38, 2 }
  0xeb   : > { %1950 = vmatmul.mubr.msk.f32.gmra.mrb[28].mxu1 %vm689_vm2, %v2963_v59  ;;  %v743_v59 = vsel %vm727_vm4, %v718_v19, %v2295_v22  ;;  %v794_v14 = vsel %vm708_vm3, %v768_v34, %v2334_v51  ;;  %v373_v23 = vrot.slane %v2408_v4, 2  ;;  %v3792_v34 = vld [vmem:[#allocation8_spill] sm:$0xff] }
  0xec   : > { %1054 = vmatmul.mubr.f32.gmra.mrb[28].mxu0 %v742_v17  ;;  %1952 = vmatprep.mubr.msk.f32.mxu1 %vm689_vm2, %v2994_v60  ;;  %v2338_v11 = vpop.permute.xlu1 %2337  ;;  %v700_v18 = vsel %vm689_vm2, %v2966_v36, %v2329_v55  ;;  %v2406_v36 = vld [vmem:[%s2503_s4 + $0x80] sm:$0xff]  ;;  %v3793_v5 = vunpack.i.l.bf16 %v3792_v34 }
  0xed   : > { %1058 = vmatprep.mubr.f32.mxu0 %v823_v28  ;;  %v656_v27 = vpop.permute.xlu0 %655  ;;  %v2339_v32 = vunpack.i.l.bf16 %v2338_v11  ;;  %v2340_v10 = vunpack.i.h.bf16 %v2338_v11  ;;  %v719_v54 = vsel %vm708_vm3, %v700_v18, %v2335_v7  ;;  %v3794_v28 = vld [vmem:[#allocation7_spill] sm:$0xff] }
  0xee   : > { %v826_v21 = vsel %vm727_vm4, %v794_v14, %v656_v27  ;;  %v746_v30 = vsel %vm727_vm4, %v719_v54, %v2324_v16  ;;  %v3796_v16 = vld [vmem:[#allocation9_spill] sm:$0xff] }
  0xef   : > { %1953 = vmatmul.mubr.msk.f32.gmra.mrb[30].mxu1 %vm689_vm2, %v2997_v8  ;;  %v795_v35 = vsel %vm708_vm3, %v769_v42, %v2339_v32  ;;  %v376_v42 = vsel %vm302_vm0, %v373_v23, %v375_v25 }
  0xf0   : > { %1059 = vmatmul.mubr.f32.gmra.mrb[30].mxu0 %v743_v59  ;;  %1955 = vmatprep.mubr.msk.f32.mxu1 %vm689_vm2, %v2994_v60  ;;  %v2330_v60 = vunpack.i.h.bf16 %v2328_v29  ;;  %v554_v53 = vpop.permute.xlu1 %553  ;;  %v374_v29 = vsel %vm302_vm0, %v372_v6, %v373_v23 }
  0xf1   : > { %1063 = vmatprep.mubr.f32.mxu0 %v824_v9  ;;  %v658_v61 = vpop.permute.xlu0 %657  ;;  %v770_v3 = vsel %vm689_vm2, %v2578_v45, %v554_v53  ;;  %v3786_v45 = vld [vmem:[#allocation2_spill] sm:$0xff] }
  0xf2   : > { %v701_v46 = vsel %vm689_vm2, %v2406_v36, %v2330_v60  ;;  %v827_v22 = vsel %vm727_vm4, %v795_v35, %v658_v61  ;;  %v796_v2 = vsel %vm708_vm3, %v770_v3, %v2334_v51 }
  0xf3   : > { %1956 = vmatmul.mubr.msk.f32.gmra.mrb[32].mxu1 %vm689_vm2, %v2997_v8  ;;  %v745_v8 = vsel %vm727_vm4, %v718_v19, %v2325_v52  ;;  %v828_v13 = vsel %vm727_vm4, %v796_v2, %v656_v27  ;;  %v3795_v19 = vunpack.i.l.bf16 %v3088_v63 }
  0xf4   : > { %1064 = vmatmul.mubr.f32.gmra.mrb[32].mxu0 %v744_v37  ;;  %1958 = vmatprep.mubr.msk.f32.mxu1 %vm689_vm2, %v2566_v39  ;;  %v556_v0 = vpop.permute.xlu1 %555 }
  0xf5   : > { %1068 = vmatprep.mubr.f32.mxu0 %v825_v49  ;;  %v506_v58 = vpop.permute.xlu0 %505  ;;  %v771_v1 = vsel %vm689_vm2, %v3786_v45, %v556_v0 }
  0xf6   : > { %v797_v40 = vsel %vm708_vm3, %v771_v1, %v2339_v32  ;;  %v748_v26 = vsel %vm727_vm4, %v719_v54, %v506_v58  ;;  %v799_v17 = vsel %vm708_vm3, %v771_v1, %v3793_v5  ;;  %v750_v48 = vsel %vm727_vm4, %v3794_v28, %v506_v58 }
  0xf7   : > { %1959 = vmatmul.mubr.msk.f32.gmra.mrb[34].mxu1 %vm689_vm2, %v2645_v15  ;;  %v829_v44 = vsel %vm727_vm4, %v797_v40, %v658_v61  ;;  %v831_v47 = vsel %vm727_vm4, %v799_v17, %v3795_v19 }
  0xf8   : > { %1069 = vmatmul.mubr.f32.gmra.mrb[34].mxu0 %v745_v8  ;;  %1961 = vmatprep.mubr.msk.f32.mxu1 %vm689_vm2, %v2566_v39  ;;  %v720_v39 = vsel %vm708_vm3, %v701_v46, %v2340_v10 }
  0xf9   : > { %1073 = vmatprep.mubr.f32.mxu0 %v826_v21  ;;  %v508_v43 = vpop.permute.xlu0 %507 }
  0xfa   : > { %v749_v57 = vsel %vm727_vm4, %v720_v39, %v508_v43  ;;  %v751_v59 = vsel %vm727_vm4, %v3796_v16, %v508_v43 }
  0xfb   : > { %1962 = vmatmul.mubr.msk.f32.gmra.mrb[36].mxu1 %vm689_vm2, %v2645_v15  ;;  %v747_v15 = vsel %vm727_vm4, %v720_v39, %v2325_v52 }
  0xfc   : > { %1074 = vmatmul.mubr.f32.gmra.mrb[36].mxu0 %v746_v30  ;;  %1964 = vmatprep.mubr.msk.f32.mxu1 %vm689_vm2, %v2591_v50 }
  0xfd   : > { %1078 = vmatprep.mubr.f32.mxu0 %v827_v22 }
  0xff   : > { %1965 = vmatmul.mubr.msk.f32.gmra.mrb[38].mxu1 %vm689_vm2, %v3785_v56 }
 0x100   : > { %1079 = vmatmul.mubr.f32.gmra.mrb[38].mxu0 %v747_v15  ;;  %1967 = vmatprep.mubr.msk.f32.mxu1 %vm689_vm2, %v2591_v50  ;;  %v798_v50 = vsel %vm708_vm3, %v770_v3, %v3788_v24 }
 0x101   : > { %1083 = vmatprep.mubr.f32.mxu0 %v828_v13  ;;  %v830_v31 = vsel %vm727_vm4, %v798_v50, %v3790_v20 }
 0x103   : > { %1968 = vmatmul.mubr.msk.f32.gmra.mrb[40].mxu1 %vm689_vm2, %v3785_v56  ;;  %v3425_v56 = vld [vmem:[%s3754_s2] ss:$0 sm:$0xff] }
 0x104   : > { %1084 = vmatmul.mubr.f32.gmra.mrb[40].mxu0 %v748_v26  ;;  %1970 = vmatprep.mubr.msk.f32.mxu1 %vm689_vm2, %v3787_v62 }
 0x105   : > { %1088 = vmatprep.mubr.f32.mxu0 %v829_v44 }
 0x107   : > { %1971 = vmatmul.mubr.msk.f32.gmra.mrb[42].mxu1 %vm689_vm2, %v3789_v12 }
 0x108   : > { %1089 = vmatmul.mubr.f32.gmra.mrb[42].mxu0 %v749_v57  ;;  %1973 = vmatprep.mubr.msk.f32.mxu1 %vm689_vm2, %v3787_v62 }
 0x109   : > { %1093 = vmatprep.mubr.f32.mxu0 %v830_v31 }
 0x10b   : > { %1974 = vmatmul.mubr.msk.f32.gmra.mrb[44].mxu1 %vm689_vm2, %v3789_v12 }
 0x10c   : > { %1094 = vmatmul.mubr.f32.gmra.mrb[44].mxu0 %v750_v48  ;;  %1976 = vmatprep.mubr.msk.f32.mxu1 %vm689_vm2, %v374_v29 }
 0x10d   : > { %1098 = vmatprep.mubr.f32.mxu0 %v831_v47 }
 0x10f   : > { %1977 = vmatmul.mubr.msk.f32.gmra.mrb[46].mxu1 %vm689_vm2, %v376_v42 }
 0x110   : > { %1099 = vmatmul.mubr.f32.gmra.mrb[46].mxu0 %v751_v59 }
 0x16c   : > { %v3406_v9 = vpop.f32.mrb[0].mxu1 }
 0x16d   : > { %v985_v51 = vpop.f32.mrb[0].mxu0  ;;  %v1107_v55 = vpop.f32.mrb[1].mxu1 }
 0x16e   : > { %v987_v11 = vpop.f32.mrb[1].mxu0  ;;  %v986_v1 = vadd.f32 %v3425_v56, %v985_v51 }
 0x178   : > { %v3408_v41 = vpop.f32.mrb[2].mxu1 }
 0x179   : > { %v990_v63 = vpop.f32.mrb[2].mxu0  ;;  %v1112_v27 = vpop.f32.mrb[3].mxu1 }
 0x17a   : > { %v992_v52 = vpop.f32.mrb[3].mxu0  ;;  %v991_v45 = vadd.f32 %v3425_v56, %v990_v63 }
 0x180   : > { %v995_v37 = vpop.f32.mrb[4].mxu0 }
 0x181   : > { %v997_v7 = vpop.f32.mrb[5].mxu0  ;;  %v996_v33 = vadd.f32 %v3425_v56, %v995_v37 }
 0x182   : > { %v3410_v49 = vpop.f32.mrb[4].mxu1 }
 0x183   : > { %v1117_v60 = vpop.f32.mrb[5].mxu1 }
 0x188   : > { %v1000_v32 = vpop.f32.mrb[6].mxu0 }
 0x189   : > { %v1002_v14 = vpop.f32.mrb[7].mxu0  ;;  %v1001_v24 = vadd.f32 %v3425_v56, %v1000_v32 }
 0x18a   : > { %v3412_v18 = vpop.f32.mrb[6].mxu1 }
 0x18b   : > { %v1122_v53 = vpop.f32.mrb[7].mxu1 }
 0x18f   : > { %v1005_v8 = vpop.f32.mrb[8].mxu0  ;;  %v3414_v10 = vpop.f32.mrb[8].mxu1 }
 0x190   : > { %v1007_v61 = vpop.f32.mrb[9].mxu0  ;;  %v1127_v21 = vpop.f32.mrb[9].mxu1  ;;  %v1006_v28 = vadd.f32 %v3425_v56, %v1005_v8 }
 0x193   : > { %v1010_v54 = vpop.f32.mrb[10].mxu0  ;;  %v3416_v35 = vpop.f32.mrb[10].mxu1 }
 0x194   : > { %v1012_v36 = vpop.f32.mrb[11].mxu0  ;;  %v1132_v46 = vpop.f32.mrb[11].mxu1  ;;  %v1011_v5 = vadd.f32 %v3425_v56, %v1010_v54 }
 0x198   : > { %v1015_v30 = vpop.f32.mrb[12].mxu0 }
 0x199   : > { %v1017_v3 = vpop.f32.mrb[13].mxu0  ;;  %v1016_v32 = vadd.f32 %v3425_v56, %v1015_v30 }
 0x19a   : > { %v3418_v22 = vpop.f32.mrb[12].mxu1 }
 0x19b   : > { %v1137_v39 = vpop.f32.mrb[13].mxu1 }
 0x1a0   : > { %v1020_v0 = vpop.f32.mrb[14].mxu0 }
 0x1a1   : > { %v1022_v2 = vpop.f32.mrb[15].mxu0  ;;  %v1021_v37 = vadd.f32 %v3425_v56, %v1020_v0 }
 0x1a2   : > { %v3420_v58 = vpop.f32.mrb[14].mxu1 }
 0x1a3   : > { %v1142_v15 = vpop.f32.mrb[15].mxu1 }
 0x1a6   : > { %v1933_v13 = vpop.f32.mrb[16].mxu1 }
 0x1a7   : > { %v1216_v40 = vadd.f32 %v1933_v13, %v991_v45  ;;  %v3429_v26 = vpop.f32.mrb[16].mxu0  ;;  %v1210_v43 = vpop.f32.mrb[17].mxu1 }
 0x1a8   : > { %v1211_v44 = vadd.f32 %v1210_v43, %v986_v1  ;;  %v1027_v62 = vpop.f32.mrb[17].mxu0  ;;  %v1026_v1 = vadd.f32 %v3425_v56, %v3429_v26 }
 0x1a9   : > { %vm1370_vm5 = vcmp.ge.f32.partialorder %v1216_v40, 0.0  ;;  %v1402_v50 = vmul.f32 0.2, %v1216_v40 }
 0x1aa   : > { %vm1369_vm6 = vcmp.ge.f32.partialorder %v1211_v44, 0.0  ;;  %v1401_v6 = vmul.f32 0.2, %v1211_v44  ;;  %v1936_v4 = vpop.f32.mrb[18].mxu1 }
 0x1ab   : > { %v1226_v23 = vadd.f32 %v1936_v4, %v1001_v24  ;;  %v1030_v12 = vpop.f32.mrb[18].mxu0  ;;  %v1220_v57 = vpop.f32.mrb[19].mxu1  ;;  %v3433_v20 = vsel %vm1370_vm5, %v1216_v40, %v1402_v50 }
 0x1ac   : > { %v1221_v31 = vadd.f32 %v1220_v57, %v996_v33  ;;  %v1032_v38 = vpop.f32.mrb[19].mxu0  ;;  %v1466_v25 = vmul.f32 %v3433_v20, %v3433_v20  ;;  %v3437_v34 = vsel %vm1369_vm6, %v1211_v44, %v1401_v6  ;;  %v1031_v3 = vadd.f32 %v3425_v56, %v1030_v12 }
 0x1ad   : > { %vm1372_vm7 = vcmp.ge.f32.partialorder %v1226_v23, 0.0  ;;  %v1404_v17 = vmul.f32 0.2, %v1226_v23  ;;  %v1465_v29 = vmul.f32 %v3437_v34, %v3437_v34 }
 0x1ae   : > { %vm1371_vm8 = vcmp.ge.f32.partialorder %v1221_v31, 0.0  ;;  %v1403_v48 = vmul.f32 0.2, %v1221_v31  ;;  %v1939_v19 = vpop.f32.mrb[20].mxu1  ;;  %v1500_v47 = vsel %vm689_vm2, %v1466_v25, 0.0 }
 0x1af   : > { %v1236_v42 = vadd.f32 %v1939_v19, %v1011_v5  ;;  %v1035_v16 = vpop.f32.mrb[20].mxu0  ;;  %v1230_v59 = vpop.f32.mrb[21].mxu1  ;;  %1501 = vadd.xlane.f32.xlu0 %v1500_v47  ;;  %v1497_v51 = vsel %vm689_vm2, %v1465_v29, 0.0  ;;  %v3445_v55 = vsel %vm1372_vm7, %v1226_v23, %v1404_v17 }
 0x1b0   : > { %v1231_v11 = vadd.f32 %v1230_v59, %v1006_v28  ;;  %v1037_v63 = vpop.f32.mrb[21].mxu0  ;;  %1498 = vadd.xlane.f32.xlu1 %v1497_v51  ;;  %v3447_v27 = vsel %vm1371_vm8, %v1221_v31, %v1403_v48  ;;  %v1468_v52 = vmul.f32 %v3445_v55, %v3445_v55  ;;  %v1036_v38 = vadd.f32 %v3425_v56, %v1035_v16 }
 0x1b1   : > { %vm1374_vm9 = vcmp.ge.f32.partialorder %v1236_v42, 0.0  ;;  %v1406_v7 = vmul.f32 0.2, %v1236_v42  ;;  %v1467_v60 = vmul.f32 %v3447_v27, %v3447_v27 }
 0x1b2   : > { %vm1373_vm10 = vcmp.ge.f32.partialorder %v1231_v11, 0.0  ;;  %v1405_v14 = vmul.f32 0.2, %v1231_v11  ;;  %v1942_v53 = vpop.f32.mrb[22].mxu1  ;;  %v1506_v8 = vsel %vm689_vm2, %v1468_v52, 0.0 }
 0x1b3   : > { %v1246_v61 = vadd.f32 %v1942_v53, %v1021_v37  ;;  %v1040_v21 = vpop.f32.mrb[22].mxu0  ;;  %v1240_v54 = vpop.f32.mrb[23].mxu1  ;;  %v1503_v36 = vsel %vm689_vm2, %v1467_v60, 0.0  ;;  %v3457_v46 = vsel %vm1374_vm9, %v1236_v42, %v1406_v7 }
 0x1b4   : > { %v1241_v39 = vadd.f32 %v1240_v54, %v1016_v32  ;;  %v1042_v0 = vpop.f32.mrb[23].mxu0  ;;  %1504 = vadd.xlane.f32.xlu0 %v1503_v36  ;;  %1507 = vadd.xlane.f32.xlu1 %v1506_v8  ;;  %v3460_v2 = vsel %vm1373_vm10, %v1231_v11, %v1405_v14  ;;  %v1470_v45 = vmul.f32 %v3457_v46, %v3457_v46 }
 0x1b5   : > { %vm1376_vm11 = vcmp.ge.f32.partialorder %v1246_v61, 0.0  ;;  %v1408_v30 = vmul.f32 0.2, %v1246_v61  ;;  %v1469_v15 = vmul.f32 %v3460_v2, %v3460_v2  ;;  %v1041_v6 = vadd.f32 %v3425_v56, %v1040_v21 }
 0x1b6   : > { %vm1375_vm12 = vcmp.ge.f32.partialorder %v1241_v39, 0.0  ;;  %v1407_v13 = vmul.f32 0.2, %v1241_v39  ;;  %v1945_v40 = vpop.f32.mrb[24].mxu1  ;;  %v1512_v50 = vsel %vm689_vm2, %v1470_v45, 0.0 }
 0x1b7   : > { %v1256_v43 = vadd.f32 %v1945_v40, %v1031_v3  ;;  %v1045_v44 = vpop.f32.mrb[24].mxu0  ;;  %v1250_v62 = vpop.f32.mrb[25].mxu1  ;;  %v1509_v24 = vsel %vm689_vm2, %v1469_v15, 0.0  ;;  %v3470_v33 = vsel %vm1376_vm11, %v1246_v61, %v1408_v30 }
 0x1b8   : > { %v1251_v4 = vadd.f32 %v1250_v62, %v1026_v1  ;;  %v1047_v23 = vpop.f32.mrb[25].mxu0  ;;  %1510 = vadd.xlane.f32.xlu0 %v1509_v24  ;;  %1513 = vadd.xlane.f32.xlu1 %v1512_v50  ;;  %v3473_v12 = vsel %vm1375_vm12, %v1241_v39, %v1407_v13  ;;  %v1472_v31 = vmul.f32 %v3470_v33, %v3470_v33 }
 0x1b9   : > { %vm1378_vm13 = vcmp.ge.f32.partialorder %v1256_v43, 0.0  ;;  %v1410_v26 = vmul.f32 0.2, %v1256_v43  ;;  %v1471_v57 = vmul.f32 %v3473_v12, %v3473_v12  ;;  %v1046_v37 = vadd.f32 %v3425_v56, %v1045_v44 }
 0x1ba   : > { %vm1377_vm14 = vcmp.ge.f32.partialorder %v1251_v4, 0.0  ;;  %v1409_v25 = vmul.f32 0.2, %v1251_v4  ;;  %v1948_v5 = vpop.f32.mrb[26].mxu1  ;;  %v1518_v19 = vsel %vm689_vm2, %v1472_v31, 0.0 }
 0x1bb   : > { %v1266_v17 = vadd.f32 %v1948_v5, %v1041_v6  ;;  %v1050_v29 = vpop.f32.mrb[26].mxu0  ;;  %v1260_v28 = vpop.f32.mrb[27].mxu1  ;;  %v1515_v48 = vsel %vm689_vm2, %v1471_v57, 0.0  ;;  %v3482_v47 = vsel %vm1378_vm13, %v1256_v43, %v1410_v26 }
 0x1bc   : > { %v1051_v42 = vadd.f32 %v3425_v56, %v1050_v29  ;;  %v1261_v59 = vadd.f32 %v1260_v28, %v1036_v38  ;;  %v1052_v51 = vpop.f32.mrb[27].mxu0  ;;  %1516 = vadd.xlane.f32.xlu0 %v1515_v48  ;;  %1519 = vadd.xlane.f32.xlu1 %v1518_v19  ;;  %v3485_v11 = vsel %vm1377_vm14, %v1251_v4, %v1409_v25 }
 0x1bd   : > { %vm1380_vm15 = vcmp.ge.f32.partialorder %v1266_v17, 0.0  ;;  %v1412_v16 = vmul.f32 0.2, %v1266_v17  ;;  %v1473_v63 = vmul.f32 %v3485_v11, %v3485_v11  ;;  %v1474_v52 = vmul.f32 %v3482_v47, %v3482_v47 }
 0x1be   : > { %vm1379_vm0 = vcmp.ge.f32.partialorder %v1261_v59, 0.0  ;;  %v1411_v7 = vmul.f32 0.2, %v1261_v59  ;;  %v1951_v60 = vpop.f32.mrb[28].mxu1 }
 0x1bf   : > { %v1276_v32 = vadd.f32 %v1951_v60, %v1051_v42  ;;  %v1055_v14 = vpop.f32.mrb[28].mxu0  ;;  %v1270_v53 = vpop.f32.mrb[29].mxu1  ;;  %v1521_v8 = vsel %vm689_vm2, %v1473_v63, 0.0  ;;  %v1524_v61 = vsel %vm689_vm2, %v1474_v52, 0.0  ;;  %v3494_v21 = vsel %vm1380_vm15, %v1266_v17, %v1412_v16 }
 0x1c0   : > { %v1271_v54 = vadd.f32 %v1270_v53, %v1046_v37  ;;  %v1057_v36 = vpop.f32.mrb[29].mxu0  ;;  %1522 = vadd.xlane.f32.xlu0 %v1521_v8  ;;  %1525 = vadd.xlane.f32.xlu1 %v1524_v61  ;;  %v3496_v3 = vsel %vm1379_vm0, %v1261_v59, %v1411_v7  ;;  %v1476_v30 = vmul.f32 %v3494_v21, %v3494_v21 }
 0x1c1   : > { %vm1382_vm1 = vcmp.ge.f32.partialorder %v1276_v32, 0.0  ;;  %v1414_v39 = vmul.f32 0.2, %v1276_v32  ;;  %v1475_v0 = vmul.f32 %v3496_v3, %v3496_v3  ;;  %v1056_v15 = vadd.f32 %v3425_v56, %v1055_v14 }
 0x1c2   : > { %vm1381_vm3 = vcmp.ge.f32.partialorder %v1271_v54, 0.0  ;;  %v1413_v45 = vmul.f32 0.2, %v1271_v54  ;;  %v1954_v1 = vpop.f32.mrb[30].mxu1  ;;  %v1530_v44 = vsel %vm689_vm2, %v1476_v30, 0.0 }
 0x1c3   : > { %v1060_v13 = vpop.f32.mrb[30].mxu0  ;;  %v1280_v40 = vpop.f32.mrb[31].mxu1  ;;  %v1527_v43 = vsel %vm689_vm2, %v1475_v0, 0.0  ;;  %v3505_v62 = vsel %vm1382_vm1, %v1276_v32, %v1414_v39 }
 0x1c4   : > { %v1061_v24 = vadd.f32 %v3425_v56, %v1060_v13  ;;  %v1281_v50 = vadd.f32 %v1280_v40, %v1056_v15  ;;  %v1062_v6 = vpop.f32.mrb[31].mxu0  ;;  %1528 = vadd.xlane.f32.xlu0 %v1527_v43  ;;  %1531 = vadd.xlane.f32.xlu1 %v1530_v44  ;;  %v3508_v4 = vsel %vm1381_vm3, %v1271_v54, %v1413_v45 }
 0x1c5   : > { %v1477_v23 = vmul.f32 %v3508_v4, %v3508_v4  ;;  %v1478_v26 = vmul.f32 %v3505_v62, %v3505_v62 }
 0x1c6   : > { %v1286_v57 = vadd.f32 %v1954_v1, %v1061_v24  ;;  %vm1383_vm4 = vcmp.ge.f32.partialorder %v1281_v50, 0.0  ;;  %v1415_v31 = vmul.f32 0.2, %v1281_v50  ;;  %v1957_v38 = vpop.f32.mrb[32].mxu1 }
 0x1c7   : > { %v1065_v25 = vpop.f32.mrb[32].mxu0  ;;  %v1290_v5 = vpop.f32.mrb[33].mxu1  ;;  %v1533_v17 = vsel %vm689_vm2, %v1477_v23, 0.0  ;;  %v1536_v29 = vsel %vm689_vm2, %v1478_v26, 0.0 }
 0x1c8   : > { %v1416_v28 = vmul.f32 0.2, %v1286_v57  ;;  %v1066_v48 = vadd.f32 %v3425_v56, %v1065_v25  ;;  %v1067_v19 = vpop.f32.mrb[33].mxu0  ;;  %1534 = vadd.xlane.f32.xlu0 %v1533_v17  ;;  %1537 = vadd.xlane.f32.xlu1 %v1536_v29  ;;  %v3517_v42 = vsel %vm1383_vm4, %v1281_v50, %v1415_v31  ;;  %vm1384_vm5 = vcmp.ge.f32.partialorder %v1286_v57, 0.0 }
 0x1c9   : > { %v1479_v59 = vmul.f32 %v3517_v42, %v3517_v42  ;;  %v1111_v31 = vadd.f32 %v3425_v56, %v3408_v41  ;;  %v1106_v25 = vadd.f32 %v3425_v56, %v3406_v9 }
 0x1ca   : > { %v1291_v51 = vadd.f32 %v1290_v5, %v1066_v48  ;;  %v1960_v16 = vpop.f32.mrb[34].mxu1  ;;  %v3521_v63 = vsel %vm1384_vm5, %v1286_v57, %v1416_v28  ;;  %v1116_v28 = vadd.f32 %v3425_v56, %v3410_v49  ;;  %v1121_v48 = vadd.f32 %v3425_v56, %v3412_v18 }
 0x1cb   : > { %v1070_v52 = vpop.f32.mrb[34].mxu0  ;;  %v1300_v37 = vpop.f32.mrb[35].mxu1  ;;  %v1539_v7 = vsel %vm689_vm2, %v1479_v59, 0.0  ;;  %v1480_v60 = vmul.f32 %v3521_v63, %v3521_v63 }
 0x1cc   : > { %vm1385_vm6 = vcmp.ge.f32.partialorder %v1291_v51, 0.0  ;;  %v1417_v32 = vmul.f32 0.2, %v1291_v51  ;;  %v1071_v14 = vadd.f32 %v3425_v56, %v1070_v52  ;;  %v1072_v53 = vpop.f32.mrb[35].mxu0  ;;  %1540 = vadd.xlane.f32.xlu0 %v1539_v7  ;;  %v1126_v7 = vadd.f32 %v3425_v56, %v3414_v10 }
 0x1cd   : > { %v1542_v8 = vsel %vm689_vm2, %v1480_v60, 0.0 }
 0x1ce   : > { %v1296_v61 = vadd.f32 %v1957_v38, %v1071_v14  ;;  %1543 = vadd.xlane.f32.xlu1 %v1542_v8  ;;  %v3528_v54 = vpop.f32.mrb[36].mxu1  ;;  %v3530_v36 = vsel %vm1385_vm6, %v1291_v51, %v1417_v32  ;;  %v1131_v8 = vadd.f32 %v3425_v56, %v3416_v35 }
 0x1cf   : > { %v1075_v39 = vpop.f32.mrb[36].mxu0  ;;  %v1310_v0 = vpop.f32.mrb[37].mxu1  ;;  %v1481_v30 = vmul.f32 %v3530_v36, %v3530_v36 }
 0x1d0   : > { %v1418_v15 = vmul.f32 0.2, %v1296_v61  ;;  %v1076_v45 = vadd.f32 %v3425_v56, %v1075_v39  ;;  %v1077_v1 = vpop.f32.mrb[37].mxu0  ;;  %vm1386_vm7 = vcmp.ge.f32.partialorder %v1296_v61, 0.0 }
 0x1d1   : > { %v1545_v13 = vsel %vm689_vm2, %v1481_v30, 0.0 }
 0x1d2   : > { %v1301_v40 = vadd.f32 %v1300_v37, %v1076_v45  ;;  %1546 = vadd.xlane.f32.xlu0 %v1545_v13  ;;  %v3536_v43 = vpop.f32.mrb[38].mxu1  ;;  %v3538_v44 = vsel %vm1386_vm7, %v1296_v61, %v1418_v15 }
 0x1d3   : > { %v1080_v24 = vpop.f32.mrb[38].mxu0  ;;  %v3540_v50 = vpop.f32.mrb[39].mxu1  ;;  %v1482_v6 = vmul.f32 %v3538_v44, %v3538_v44 }
 0x1d4   : > { %v1419_v23 = vmul.f32 0.2, %v1301_v40  ;;  %v1081_v26 = vadd.f32 %v3425_v56, %v1080_v24  ;;  %v1082_v57 = vpop.f32.mrb[39].mxu0  ;;  %vm1387_vm8 = vcmp.ge.f32.partialorder %v1301_v40, 0.0 }
 0x1d5   : > { %v1548_v38 = vsel %vm689_vm2, %v1482_v6, 0.0 }
 0x1d6   : > { %v1306_v5 = vadd.f32 %v1960_v16, %v1081_v26  ;;  %v1969_v17 = vpop.f32.mrb[40].mxu1  ;;  %1549 = vadd.xlane.f32.xlu1 %v1548_v38  ;;  %v3550_v29 = vsel %vm1387_vm8, %v1301_v40, %v1419_v23  ;;  %v1136_v23 = vadd.f32 %v3425_v56, %v3418_v22 }
 0x1d7   : > { %v1336_v19 = vadd.f32 %v1969_v17, %v1111_v31  ;;  %v1085_v59 = vpop.f32.mrb[40].mxu0  ;;  %v1330_v51 = vpop.f32.mrb[41].mxu1  ;;  %v1483_v41 = vmul.f32 %v3550_v29, %v3550_v29 }
 0x1d8   : > { %v1420_v52 = vmul.f32 0.2, %v1306_v5  ;;  %v1086_v9 = vadd.f32 %v3425_v56, %v1085_v59  ;;  %v1331_v16 = vadd.f32 %v1330_v51, %v1106_v25  ;;  %v1087_v37 = vpop.f32.mrb[41].mxu0  ;;  %vm1388_vm9 = vcmp.ge.f32.partialorder %v1306_v5, 0.0 }
 0x1d9   : > { %vm1394_vm10 = vcmp.ge.f32.partialorder %v1336_v19, 0.0  ;;  %v1426_v49 = vmul.f32 0.2, %v1336_v19  ;;  %v1551_v60 = vsel %vm689_vm2, %v1483_v41, 0.0 }
 0x1da   : > { %v1311_v18 = vadd.f32 %v1310_v0, %v1086_v9  ;;  %vm1393_vm11 = vcmp.ge.f32.partialorder %v1331_v16, 0.0  ;;  %v1425_v32 = vmul.f32 0.2, %v1331_v16  ;;  %v1972_v14 = vpop.f32.mrb[42].mxu1  ;;  %1552 = vadd.xlane.f32.xlu0 %v1551_v60  ;;  %v3562_v53 = vsel %vm1388_vm9, %v1306_v5, %v1420_v52 }
 0x1db   : > { %v1346_v61 = vadd.f32 %v1972_v14, %v1121_v48  ;;  %v1090_v39 = vpop.f32.mrb[42].mxu0  ;;  %v1340_v30 = vpop.f32.mrb[43].mxu1  ;;  %v1484_v10 = vmul.f32 %v3562_v53, %v3562_v53  ;;  %v3568_v15 = vsel %vm1394_vm10, %v1336_v19, %v1426_v49  ;;  %v1141_v19 = vadd.f32 %v3425_v56, %v3420_v58 }
 0x1dc   : > { %v1421_v45 = vmul.f32 0.2, %v1311_v18  ;;  %v1091_v0 = vadd.f32 %v3425_v56, %v1090_v39  ;;  %v1341_v1 = vadd.f32 %v1340_v30, %v1116_v28  ;;  %v1092_v13 = vpop.f32.mrb[43].mxu0  ;;  %v3571_v40 = vsel %vm1393_vm11, %v1331_v16, %v1425_v32 }
 0x1dd   : > { %vm1396_vm12 = vcmp.ge.f32.partialorder %v1346_v61, 0.0  ;;  %v1428_v24 = vmul.f32 0.2, %v1346_v61  ;;  %v1554_v6 = vsel %vm689_vm2, %v1484_v10, 0.0  ;;  %v1489_v35 = vmul.f32 %v3571_v40, %v3571_v40 }
 0x1de   : > { %v1316_v26 = vadd.f32 %v3528_v54, %v1091_v0  ;;  %v1427_v57 = vmul.f32 0.2, %v1341_v1  ;;  %v1975_v31 = vpop.f32.mrb[44].mxu1  ;;  %1555 = vadd.xlane.f32.xlu1 %v1554_v6  ;;  %v1490_v38 = vmul.f32 %v3568_v15, %v3568_v15  ;;  %vm1389_vm13 = vcmp.ge.f32.partialorder %v1311_v18, 0.0 }
 0x1df   : > { %v1356_v25 = vadd.f32 %v1975_v31, %v1131_v8  ;;  %v1095_v5 = vpop.f32.mrb[44].mxu0  ;;  %v1350_v17 = vpop.f32.mrb[45].mxu1  ;;  %v1569_v28 = vsel %vm689_vm2, %v1489_v35, 0.0  ;;  %v3582_v48 = vsel %vm1396_vm12, %v1346_v61, %v1428_v24  ;;  %vm1395_vm14 = vcmp.ge.f32.partialorder %v1341_v1, 0.0 }
 0x1e0   : > { %v1096_v22 = vadd.f32 %v3425_v56, %v1095_v5  ;;  %v1351_v54 = vadd.f32 %v1350_v17, %v1126_v7  ;;  %v1097_v59 = vpop.f32.mrb[45].mxu0  ;;  %1570 = vadd.xlane.f32.xlu0 %v1569_v28  ;;  %v1422_v51 = vmul.f32 0.2, %v1316_v26  ;;  %v1572_v41 = vsel %vm689_vm2, %v1490_v38, 0.0 }
 0x1e1   : > { %v3588_v52 = vsel %vm1389_vm13, %v1311_v18, %v1421_v45  ;;  %v1492_v9 = vmul.f32 %v3582_v48, %v3582_v48  ;;  %vm1398_vm15 = vcmp.ge.f32.partialorder %v1356_v25, 0.0  ;;  %v1430_v16 = vmul.f32 0.2, %v1356_v25 }
 0x1e2   : > { %v1321_v37 = vadd.f32 %v3540_v50, %v1096_v22  ;;  %v1978_v49 = vpop.f32.mrb[46].mxu1  ;;  %1573 = vadd.xlane.f32.xlu1 %v1572_v41  ;;  %v1485_v58 = vmul.f32 %v3588_v52, %v3588_v52  ;;  %v1429_v7 = vmul.f32 0.2, %v1351_v54  ;;  %v3596_v8 = vsel %vm1395_vm14, %v1341_v1, %v1427_v57 }
 0x1e3   : > { %v1366_v60 = vadd.f32 %v1978_v49, %v1141_v19  ;;  %v1100_v32 = vpop.f32.mrb[46].mxu0  ;;  %v1360_v14 = vpop.f32.mrb[47].mxu1  ;;  %vm1390_vm0 = vcmp.ge.f32.partialorder %v1316_v26, 0.0  ;;  %vm1397_vm1 = vcmp.ge.f32.partialorder %v1351_v54, 0.0  ;;  %v1578_v10 = vsel %vm689_vm2, %v1492_v9, 0.0 }
 0x1e4   : > { %v1101_v18 = vadd.f32 %v3425_v56, %v1100_v32  ;;  %v1361_v61 = vadd.f32 %v1360_v14, %v1136_v23  ;;  %v1102_v39 = vpop.f32.mrb[47].mxu0  ;;  %v1557_v50 = vsel %vm689_vm2, %v1485_v58, 0.0  ;;  %v1423_v30 = vmul.f32 0.2, %v1321_v37 }
 0x1e5   : > { %1558 = vadd.xlane.f32.xlu0 %v1557_v50  ;;  %v1491_v45 = vmul.f32 %v3596_v8, %v3596_v8  ;;  %v3603_v0 = vsel %vm1390_vm0, %v1316_v26, %v1422_v51  ;;  %v3608_v56 = vsel %vm1397_vm1, %v1351_v54, %v1429_v7  ;;  %v3611_v24 = vsel %vm1398_vm15, %v1356_v25, %v1430_v16 }
 0x1e6   : > { %v1326_v1 = vadd.f32 %v3536_v43, %v1101_v18  ;;  %1579 = vadd.xlane.f32.xlu1 %v1578_v10  ;;  %v1486_v13 = vmul.f32 %v3603_v0, %v3603_v0  ;;  %vm1391_vm3 = vcmp.ge.f32.partialorder %v1321_v37, 0.0  ;;  %v1431_v35 = vmul.f32 0.2, %v1361_v61 }
 0x1e7   : > { %v1575_v23 = vsel %vm689_vm2, %v1491_v45, 0.0  ;;  %v1493_v26 = vmul.f32 %v3608_v56, %v3608_v56  ;;  %v1494_v57 = vmul.f32 %v3611_v24, %v3611_v24  ;;  %v3619_v31 = vsel %vm1391_vm3, %v1321_v37, %v1423_v30 }
 0x1e8   : > { %v1424_v6 = vmul.f32 0.2, %v1326_v1  ;;  %v1560_v43 = vsel %vm689_vm2, %v1486_v13, 0.0  ;;  %vm1392_vm4 = vcmp.ge.f32.partialorder %v1326_v1, 0.0  ;;  %v1432_v38 = vmul.f32 0.2, %v1366_v60 }
 0x1e9   : > { %1576 = vadd.xlane.f32.xlu0 %v1575_v23  ;;  %vm1399_vm5 = vcmp.ge.f32.partialorder %v1361_v61, 0.0  ;;  %vm1400_vm6 = vcmp.ge.f32.partialorder %v1366_v60, 0.0  ;;  %v1581_v5 = vsel %vm689_vm2, %v1493_v26, 0.0  ;;  %v1487_v17 = vmul.f32 %v3619_v31, %v3619_v31 }
 0x1ea   : > { %1561 = vadd.xlane.f32.xlu1 %v1560_v43  ;;  %v3621_v25 = vsel %vm1392_vm4, %v1326_v1, %v1424_v6  ;;  %v1584_v28 = vsel %vm689_vm2, %v1494_v57, 0.0  ;;  %v3629_v22 = vsel %vm1399_vm5, %v1361_v61, %v1431_v35  ;;  %v3631_v54 = vsel %vm1400_vm6, %v1366_v60, %v1432_v38 }
 0x1eb   : > { %v1488_v19 = vmul.f32 %v3621_v25, %v3621_v25  ;;  %v1563_v59 = vsel %vm689_vm2, %v1487_v17, 0.0  ;;  %v1495_v51 = vmul.f32 %v3629_v22, %v3629_v22  ;;  %v1496_v9 = vmul.f32 %v3631_v54, %v3631_v54 }
 0x1ed   : > { %1582 = vadd.xlane.f32.xlu0 %v1581_v5  ;;  %v1566_v41 = vsel %vm689_vm2, %v1488_v19, 0.0  ;;  %v1587_v16 = vsel %vm689_vm2, %v1495_v51, 0.0  ;;  %v1590_v37 = vsel %vm689_vm2, %v1496_v9, 0.0 }
 0x1ee   : > { %1585 = vadd.xlane.f32.xlu1 %v1584_v28 }
 0x1f1   : > { %1564 = vadd.xlane.f32.xlu0 %v1563_v59 }
 0x1f2   : > { %1567 = vadd.xlane.f32.xlu1 %v1566_v41 }
 0x1f5   : > { %1588 = vadd.xlane.f32.xlu0 %v1587_v16 }
 0x1f6   : > { %1591 = vadd.xlane.f32.xlu1 %v1590_v37 }
 0x23c   : > { %v1502_v49 = vpop.xlane.xlu0 %1501 }
 0x23d   : > { %v1595_v58 = vmul.f32 0.03125, %v1502_v49  ;;  %v1499_v7 = vpop.xlane.xlu1 %1498 }
 0x23e   : > { %v1594_v60 = vmul.f32 0.03125, %v1499_v7 }
 0x23f   : > { %v1627_v32 = vadd.f32 1e-08, %v1595_v58 }
 0x240   : > { %v1626_v14 = vadd.f32 1e-08, %v1594_v60 }
 0x241   : > { %2341 = vrsqrt.f32 %v1627_v32  ;;  %v1505_v18 = vpop.xlane.xlu0 %1504  ;;  %v1508_v61 = vpop.xlane.xlu1 %1507 }
 0x242   : > { %2343 = vrsqrt.f32 %v1626_v14  ;;  %v1596_v39 = vmul.f32 0.03125, %v1505_v18  ;;  %v1597_v50 = vmul.f32 0.03125, %v1508_v61 }
 0x244   : > { %v1628_v30 = vadd.f32 1e-08, %v1596_v39  ;;  %v1629_v10 = vadd.f32 1e-08, %v1597_v50 }
 0x245   : > { %v1511_v45 = vpop.xlane.xlu0 %1510  ;;  %v1514_v1 = vpop.xlane.xlu1 %1513 }
 0x246   : > { %2345 = vrsqrt.f32 %v1628_v30  ;;  %v1598_v13 = vmul.f32 0.03125, %v1511_v45  ;;  %v1599_v6 = vmul.f32 0.03125, %v1514_v1 }
 0x247   : > { %2347 = vrsqrt.f32 %v1629_v10 }
 0x248   : > { %v1630_v35 = vadd.f32 1e-08, %v1598_v13  ;;  %v1631_v23 = vadd.f32 1e-08, %v1599_v6 }
 0x249   : > { %v1517_v26 = vpop.xlane.xlu0 %1516  ;;  %v1520_v43 = vpop.xlane.xlu1 %1519 }
 0x24a   : > { %2349 = vrsqrt.f32 %v1630_v35  ;;  %v1600_v57 = vmul.f32 0.03125, %v1517_v26  ;;  %v1601_v38 = vmul.f32 0.03125, %v1520_v43 }
 0x24b   : > { %v2342_v5 = vpop.eup %2341  ;;  %2351 = vrsqrt.f32 %v1631_v23 }
 0x24c   : > { %v2344_v17 = vpop.eup %2343  ;;  %v1691_v28 = vmul.f32 %v2342_v5, %v3433_v20  ;;  %v1632_v19 = vadd.f32 1e-08, %v1600_v57  ;;  %v1633_v59 = vadd.f32 1e-08, %v1601_v38 }
 0x24d   : > { %v1690_v51 = vmul.f32 %v2344_v17, %v3437_v34  ;;  %v1523_v41 = vpop.xlane.xlu0 %1522  ;;  %v1526_v9 = vpop.xlane.xlu1 %1525 }
 0x24e   : > { %1723 = vst.msk [vmem:[%s3645_s10 + $0x8] sm:$0xff] %vm689_vm2, %v1691_v28  ;;  %2353 = vrsqrt.f32 %v1632_v19  ;;  %v1602_v16 = vmul.f32 0.03125, %v1523_v41  ;;  %v1603_v37 = vmul.f32 0.03125, %v1526_v9 }
 0x24f   : > { %1722 = vst.msk [vmem:[%s3645_s10] sm:$0xff] %vm689_vm2, %v1690_v51  ;;  %2355 = vrsqrt.f32 %v1633_v59 }
 0x250   : > { %v2346_v49 = vpop.eup %2345  ;;  %v1634_v58 = vadd.f32 1e-08, %v1602_v16  ;;  %v1635_v7 = vadd.f32 1e-08, %v1603_v37 }
 0x251   : > { %v2348_v20 = vpop.eup %2347  ;;  %v1692_v60 = vmul.f32 %v2346_v49, %v3447_v27  ;;  %v1529_v32 = vpop.xlane.xlu0 %1528 }
 0x252   : > { %v1532_v34 = vpop.xlane.xlu1 %1531  ;;  %v1693_v14 = vmul.f32 %v2348_v20, %v3445_v55  ;;  %2357 = vrsqrt.f32 %v1634_v58  ;;  %v1604_v18 = vmul.f32 0.03125, %v1529_v32 }
 0x253   : > { %v1605_v61 = vmul.f32 0.03125, %v1532_v34  ;;  %1724 = vst.msk [vmem:[%s3645_s10 + $0x10] sm:$0xff] %vm689_vm2, %v1692_v60  ;;  %2359 = vrsqrt.f32 %v1635_v7 }
 0x254   : > { %v2350_v39 = vpop.eup %2349  ;;  %1725 = vst.msk [vmem:[%s3645_s10 + $0x18] sm:$0xff] %vm689_vm2, %v1693_v14  ;;  %v1636_v50 = vadd.f32 1e-08, %v1604_v18 }
 0x255   : > { %v1637_v30 = vadd.f32 1e-08, %v1605_v61  ;;  %v2352_v10 = vpop.eup %2351  ;;  %v1694_v27 = vmul.f32 %v2350_v39, %v3460_v2  ;;  %v1535_v45 = vpop.xlane.xlu0 %1534 }
 0x256   : > { %v1538_v1 = vpop.xlane.xlu1 %1537  ;;  %v1695_v55 = vmul.f32 %v2352_v10, %v3457_v46  ;;  %2361 = vrsqrt.f32 %v1636_v50  ;;  %v1606_v13 = vmul.f32 0.03125, %v1535_v45 }
 0x257   : > { %v1607_v6 = vmul.f32 0.03125, %v1538_v1  ;;  %1726 = vst.msk [vmem:[%s3645_s10 + $0x20] sm:$0xff] %vm689_vm2, %v1694_v27  ;;  %2363 = vrsqrt.f32 %v1637_v30 }
 0x258   : > { %v2354_v35 = vpop.eup %2353  ;;  %1727 = vst.msk [vmem:[%s3645_s10 + $0x28] sm:$0xff] %vm689_vm2, %v1695_v55  ;;  %v1638_v23 = vadd.f32 1e-08, %v1606_v13 }
 0x259   : > { %v1639_v26 = vadd.f32 1e-08, %v1607_v6  ;;  %v2356_v43 = vpop.eup %2355  ;;  %v1696_v2 = vmul.f32 %v2354_v35, %v3473_v12  ;;  %v1541_v57 = vpop.xlane.xlu0 %1540 }
 0x25a   : > { %v1697_v46 = vmul.f32 %v2356_v43, %v3470_v33  ;;  %2365 = vrsqrt.f32 %v1638_v23  ;;  %v1608_v38 = vmul.f32 0.03125, %v1541_v57 }
 0x25b   : > { %1728 = vst.msk [vmem:[%s3645_s10 + $0x30] sm:$0xff] %vm689_vm2, %v1696_v2  ;;  %2367 = vrsqrt.f32 %v1639_v26  ;;  %v1544_v5 = vpop.xlane.xlu1 %1543 }
 0x25c   : > { %v2358_v17 = vpop.eup %2357  ;;  %1729 = vst.msk [vmem:[%s3645_s10 + $0x38] sm:$0xff] %vm689_vm2, %v1697_v46  ;;  %v1640_v28 = vadd.f32 1e-08, %v1608_v38  ;;  %v1609_v19 = vmul.f32 0.03125, %v1544_v5 }
 0x25d   : > { %v2360_v59 = vpop.eup %2359  ;;  %v1698_v12 = vmul.f32 %v2358_v17, %v3485_v11 }
 0x25e   : > { %v1699_v51 = vmul.f32 %v2360_v59, %v3482_v47  ;;  %2369 = vrsqrt.f32 %v1640_v28  ;;  %v1641_v33 = vadd.f32 1e-08, %v1609_v19 }
 0x25f   : > { %1730 = vst.msk [vmem:[%s3645_s10 + $0x40] sm:$0xff] %vm689_vm2, %v1698_v12  ;;  %v1547_v41 = vpop.xlane.xlu0 %1546 }
 0x260   : > { %v2362_v9 = vpop.eup %2361  ;;  %1731 = vst.msk [vmem:[%s3645_s10 + $0x48] sm:$0xff] %vm689_vm2, %v1699_v51  ;;  %2371 = vrsqrt.f32 %v1641_v33  ;;  %v1610_v16 = vmul.f32 0.03125, %v1547_v41 }
 0x261   : > { %v2364_v37 = vpop.eup %2363  ;;  %v1700_v49 = vmul.f32 %v2362_v9, %v3496_v3 }
 0x262   : > { %v1701_v11 = vmul.f32 %v2364_v37, %v3494_v21  ;;  %v1642_v58 = vadd.f32 1e-08, %v1610_v16 }
 0x263   : > { %1732 = vst.msk [vmem:[%s3645_s10 + $0x50] sm:$0xff] %vm689_vm2, %v1700_v49  ;;  %v1550_v47 = vpop.xlane.xlu1 %1549 }
 0x264   : > { %v2366_v7 = vpop.eup %2365  ;;  %1733 = vst.msk [vmem:[%s3645_s10 + $0x58] sm:$0xff] %vm689_vm2, %v1701_v11  ;;  %2373 = vrsqrt.f32 %v1642_v58  ;;  %v1611_v20 = vmul.f32 0.03125, %v1550_v47 }
 0x265   : > { %v2368_v60 = vpop.eup %2367  ;;  %v1702_v32 = vmul.f32 %v2366_v7, %v3508_v4 }
 0x266   : > { %v1703_v34 = vmul.f32 %v2368_v60, %v3505_v62  ;;  %v1643_v3 = vadd.f32 1e-08, %v1611_v20 }
 0x267   : > { %1734 = vst.msk [vmem:[%s3645_s10 + $0x60] sm:$0xff] %vm689_vm2, %v1702_v32  ;;  %v1553_v21 = vpop.xlane.xlu0 %1552 }
 0x268   : > { %v2370_v14 = vpop.eup %2369  ;;  %1735 = vst.msk [vmem:[%s3645_s10 + $0x68] sm:$0xff] %vm689_vm2, %v1703_v34  ;;  %2375 = vrsqrt.f32 %v1643_v3  ;;  %v1612_v18 = vmul.f32 0.03125, %v1553_v21 }
 0x269   : > { %v1704_v61 = vmul.f32 %v2370_v14, %v3517_v42 }
 0x26a   : > { %v2372_v39 = vpop.eup %2371  ;;  %v1644_v50 = vadd.f32 1e-08, %v1612_v18 }
 0x26b   : > { %1736 = vst.msk [vmem:[%s3645_s10 + $0x70] sm:$0xff] %vm689_vm2, %v1704_v61  ;;  %v1705_v4 = vmul.f32 %v2372_v39, %v3521_v63  ;;  %v1556_v62 = vpop.xlane.xlu1 %1555 }
 0x26c   : > { %2377 = vrsqrt.f32 %v1644_v50  ;;  %v1613_v30 = vmul.f32 0.03125, %v1556_v62 }
 0x26d   : > { %1737 = vst.msk [vmem:[%s3645_s10 + $0x78] sm:$0xff] %vm689_vm2, %v1705_v4  ;;  %v1571_v10 = vpop.xlane.xlu0 %1570 }
 0x26e   : > { %v2374_v27 = vpop.eup %2373  ;;  %v1645_v45 = vadd.f32 1e-08, %v1613_v30  ;;  %v1618_v1 = vmul.f32 0.03125, %v1571_v10 }
 0x26f   : > { %v1706_v55 = vmul.f32 %v2374_v27, %v3530_v36  ;;  %v1574_v42 = vpop.xlane.xlu1 %1573 }
 0x270   : > { %2379 = vrsqrt.f32 %v1645_v45  ;;  %v1650_v13 = vadd.f32 1e-08, %v1618_v1  ;;  %v1619_v6 = vmul.f32 0.03125, %v1574_v42 }
 0x271   : > { %1738 = vst.msk [vmem:[%s3645_s10 + $0x80] sm:$0xff] %vm689_vm2, %v1706_v55 }
 0x272   : > { %v2376_v35 = vpop.eup %2375  ;;  %2381 = vrsqrt.f32 %v1650_v13  ;;  %v1651_v63 = vadd.f32 1e-08, %v1619_v6  ;;  %v1559_v23 = vpop.xlane.xlu0 %1558 }
 0x273   : > { %v1707_v26 = vmul.f32 %v2376_v35, %v3538_v44  ;;  %v1614_v43 = vmul.f32 0.03125, %v1559_v23  ;;  %v1580_v2 = vpop.xlane.xlu1 %1579 }
 0x274   : > { %2383 = vrsqrt.f32 %v1651_v63  ;;  %v1621_v57 = vmul.f32 0.03125, %v1580_v2 }
 0x275   : > { %1739 = vst.msk [vmem:[%s3645_s10 + $0x88] sm:$0xff] %vm689_vm2, %v1707_v26  ;;  %v1646_v36 = vadd.f32 1e-08, %v1614_v43 }
 0x276   : > { %v2378_v46 = vpop.eup %2377  ;;  %v1653_v38 = vadd.f32 1e-08, %v1621_v57  ;;  %v1577_v5 = vpop.xlane.xlu0 %1576 }
 0x277   : > { %v1708_v17 = vmul.f32 %v2378_v46, %v3550_v29  ;;  %2385 = vrsqrt.f32 %v1646_v36  ;;  %v1620_v28 = vmul.f32 0.03125, %v1577_v5  ;;  %v1562_v19 = vpop.xlane.xlu1 %1561 }
 0x278   : > { %2387 = vrsqrt.f32 %v1653_v38  ;;  %v1615_v59 = vmul.f32 0.03125, %v1562_v19 }
 0x279   : > { %1740 = vst.msk [vmem:[%s3645_s10 + $0x90] sm:$0xff] %vm689_vm2, %v1708_v17  ;;  %v1652_v44 = vadd.f32 1e-08, %v1620_v28 }
 0x27a   : > { %v2380_v12 = vpop.eup %2379  ;;  %v1647_v51 = vadd.f32 1e-08, %v1615_v59  ;;  %v1583_v33 = vpop.xlane.xlu0 %1582 }
 0x27b   : > { %v1709_v41 = vmul.f32 %v2380_v12, %v3562_v53  ;;  %2389 = vrsqrt.f32 %v1652_v44  ;;  %v1622_v9 = vmul.f32 0.03125, %v1583_v33  ;;  %v1586_v16 = vpop.xlane.xlu1 %1585 }
 0x27c   : > { %v2382_v37 = vpop.eup %2381  ;;  %2391 = vrsqrt.f32 %v1647_v51  ;;  %v1623_v29 = vmul.f32 0.03125, %v1586_v16 }
 0x27d   : > { %1741 = vst.msk [vmem:[%s3645_s10 + $0x98] sm:$0xff] %vm689_vm2, %v1709_v41  ;;  %v1714_v49 = vmul.f32 %v2382_v37, %v3571_v40  ;;  %v1654_v11 = vadd.f32 1e-08, %v1622_v9 }
 0x27e   : > { %v2384_v58 = vpop.eup %2383  ;;  %v1655_v47 = vadd.f32 1e-08, %v1623_v29  ;;  %v1565_v7 = vpop.xlane.xlu0 %1564 }
 0x27f   : > { %1746 = vst.msk [vmem:[%s3645_s10 + $0xc0] sm:$0xff] %vm689_vm2, %v1714_v49  ;;  %v1715_v20 = vmul.f32 %v2384_v58, %v3568_v15  ;;  %2393 = vrsqrt.f32 %v1654_v11  ;;  %v1616_v53 = vmul.f32 0.03125, %v1565_v7  ;;  %v1568_v60 = vpop.xlane.xlu1 %1567 }
 0x280   : > { %2395 = vrsqrt.f32 %v1655_v47  ;;  %v1617_v32 = vmul.f32 0.03125, %v1568_v60 }
 0x281   : > { %v2386_v34 = vpop.eup %2385  ;;  %1747 = vst.msk [vmem:[%s3645_s10 + $0xc8] sm:$0xff] %vm689_vm2, %v1715_v20  ;;  %v1648_v3 = vadd.f32 1e-08, %v1616_v53 }
 0x282   : > { %v2388_v40 = vpop.eup %2387  ;;  %v1710_v21 = vmul.f32 %v2386_v34, %v3588_v52  ;;  %v1649_v14 = vadd.f32 1e-08, %v1617_v32  ;;  %v1589_v18 = vpop.xlane.xlu0 %1588 }
 0x283   : > { %v1717_v61 = vmul.f32 %v2388_v40, %v3582_v48  ;;  %2397 = vrsqrt.f32 %v1648_v3  ;;  %v1624_v15 = vmul.f32 0.03125, %v1589_v18  ;;  %v1592_v39 = vpop.xlane.xlu1 %1591 }
 0x284   : > { %1742 = vst.msk [vmem:[%s3645_s10 + $0xa0] sm:$0xff] %vm689_vm2, %v1710_v21  ;;  %2399 = vrsqrt.f32 %v1649_v14  ;;  %v1625_v50 = vmul.f32 0.03125, %v1592_v39 }
 0x285   : > { %v2390_v4 = vpop.eup %2389  ;;  %1749 = vst.msk [vmem:[%s3645_s10 + $0xd8] sm:$0xff] %vm689_vm2, %v1717_v61  ;;  %v1656_v62 = vadd.f32 1e-08, %v1624_v15 }
 0x286   : > { %v2392_v52 = vpop.eup %2391  ;;  %v1716_v30 = vmul.f32 %v2390_v4, %v3596_v8  ;;  %v1657_v10 = vadd.f32 1e-08, %v1625_v50 }
 0x287   : > { %v1711_v48 = vmul.f32 %v2392_v52, %v3603_v0  ;;  %2401 = vrsqrt.f32 %v1656_v62 }
 0x288   : > { %1748 = vst.msk [vmem:[%s3645_s10 + $0xd0] sm:$0xff] %vm689_vm2, %v1716_v30  ;;  %2403 = vrsqrt.f32 %v1657_v10 }
 0x289   : > { %v2394_v27 = vpop.eup %2393  ;;  %1743 = vst.msk [vmem:[%s3645_s10 + $0xa8] sm:$0xff] %vm689_vm2, %v1711_v48 }
 0x28a   : > { %v2396_v45 = vpop.eup %2395  ;;  %v1718_v1 = vmul.f32 %v2394_v27, %v3608_v56 }
 0x28b   : > { %v1719_v55 = vmul.f32 %v2396_v45, %v3611_v24 }
 0x28c   : > { %1750 = vst.msk [vmem:[%s3645_s10 + $0xe0] sm:$0xff] %vm689_vm2, %v1718_v1 }
 0x28d   : > { %v2398_v8 = vpop.eup %2397  ;;  %1751 = vst.msk [vmem:[%s3645_s10 + $0xe8] sm:$0xff] %vm689_vm2, %v1719_v55 }
 0x28e   : > { %v2400_v0 = vpop.eup %2399  ;;  %v1712_v42 = vmul.f32 %v2398_v8, %v3619_v31 }
 0x28f   : > { %v1713_v13 = vmul.f32 %v2400_v0, %v3621_v25 }
 0x290   : > { %1744 = vst.msk [vmem:[%s3645_s10 + $0xb0] sm:$0xff] %vm689_vm2, %v1712_v42 }
 0x291   : > { %v2402_v6 = vpop.eup %2401  ;;  %1745 = vst.msk [vmem:[%s3645_s10 + $0xb8] sm:$0xff] %vm689_vm2, %v1713_v13 }
 0x292   : > { %v2404_v35 = vpop.eup %2403  ;;  %v1720_v56 = vmul.f32 %v2402_v6, %v3629_v22 }
 0x293   : > { %v1721_v24 = vmul.f32 %v2404_v35, %v3631_v54 }
 0x294   : > { %1752 = vst.msk [vmem:[%s3645_s10 + $0xf0] sm:$0xff] %vm689_vm2, %v1720_v56 }
 0x295   : > { %1753 = vst.msk [vmem:[%s3645_s10 + $0xf8] sm:$0xff] %vm689_vm2, %v1721_v24 }
 0x296 PF: > { %s13_s14 = sadd.s32 1, %s2431_s14   ;;  %s3797_s12 = smov %s2427_s13 }
 0x297   : > { %p10_p5 = scmp.ge.s32.totalorder %s13_s14, 4   ;;  %s3798_s13 = smov %s3800_s15 }
 0x299   :  { %12 = sbr.rel (!%p10_p5) target bundleno = 2 (0x2), region = 63 }

// kernel: generator_forward.12
= control target key start
LH: loop header
LB: loop body
LE: loop exit
PB: predicated region body
PF: predicated region fallthrough
CT: control target
= control target key end

     0   :  { %s3202_s12 = smov 0   ;;  %s3204_s13 = smov 0   ;;  %s4901_s0 = inlined_call_operand.vmem [shape: f32[2,18,18,32], index: 0, kind: input, shape index: {}]   ;;  %s4902_s1 = inlined_call_operand.vmem [shape: f32[288,32], index: 1, kind: input, shape index: {}]   ;;  %s4903_s2 = inlined_call_operand.vmem [shape: f32[1,32], index: 2, kind: input, shape index: {}]   ;;  %s4904_s3 = inlined_call_operand.vmem [shape: f32[2,16,16,32], index: 3, kind: output, shape index: {}]  }
   0x1   :  { %s3206_s14 = smov 0  }
   0x2 LB: > { %s25_s15 = sadd.s32 1, %s3172_s13  ;;  %p2327_p0 = scmp.ge.s32.totalorder %s3176_s14, 1  ;;  %s3176_s14 = sphi %s3206_s14, %s13_s14   ;;  %s3172_s13 = sphi %s3204_s13, %s5019_s13   ;;  %s3168_s12 = sphi %s3202_s12, %s5018_s12  }
   0x3   : > { %p27_p1 = scmp.ge.s32.totalorder %s25_s15, 2  ;;  %p151_p2 = scmp.lt.s32.totalorder %s3176_s14, 3 }
   0x5   : > { %s5021_s15 = smov (%p27_p1, %s25_s15), 0  ;;  %p152_p3 = pnand %p2327_p0, %p151_p2 }
   0x7   : > { %155 = sbr.rel (%p152_p3) target bundleno = 721 (0x2d1), region = 32 }
   0xe   : > { %p180_p4 = scmp.lt.s32.totalorder %s3168_s12, 1  ;;  %v1292_v0 = vld [vmem:[%s4902_s1] sm:$0xff]  ;;  %v4916_v1 = vmov 0.0|0.0   ;;  %v1293_v2 = vld [vmem:[%s4902_s1 + $0x8] sm:$0xff]  ;;  %v1294_v3 = vld [vmem:[%s4902_s1 + $0x10] sm:$0xff]  ;;  %vm382_vm0 = vcmask 1045504  }
   0xf   : > { %2459 = vmatprep.subr.bf16.mxu0 %v4916_v1  ;;  %2515 = vmatprep.subr.bf16.mxu1 %v4916_v1  ;;  %v1295_v4 = vld [vmem:[%s4902_s1 + $0x18] sm:$0xff]  ;;  %v2460_v5 = vpack.c.bf16 %v1293_v2, %v1292_v0  ;;  %v1296_v7 = vld [vmem:[%s4902_s1 + $0x20] sm:$0xff]  ;;  %v1297_v8 = vld [vmem:[%s4902_s1 + $0x28] sm:$0xff]  ;;  %vm301_vm1 = vcmask 1046528   ;;  %s3179_s9 = smov 64   ;;  %s3180_s18 = smov 32  }
  0x10   : > { %s5023_s12 = smov (!%p180_p4, %s3168_s12), 1  ;;  %v2463_v6 = vpack.c.bf16 %v1295_v4, %v1294_v3  ;;  %v1298_v11 = vld [vmem:[%s4902_s1 + $0x30] sm:$0xff]  ;;  %v1299_v12 = vld [vmem:[%s4902_s1 + $0x38] sm:$0xff]  ;;  %v2466_v19 = vpack.c.bf16 %v1297_v8, %v1296_v7  ;;  %v1300_v50 = vld [vmem:[%s4902_s1 + $0x40] sm:$0xff]  ;;  %s3181_s23 = smov 96   ;;  %vm1097_vm2 = vcmask 261120  }
  0x11   : > { %s2547_s24 = smul.u32 432, %s5023_s12  ;;  %2461 = vmatpush1.bf16.msra.mxu0 %v2460_v5  ;;  %2531 = vmatpush1.bf16.msra.mxu1 %v2460_v5  ;;  %v2469_v45 = vpack.c.bf16 %v1299_v12, %v1298_v11  ;;  %v1301_v51 = vld [vmem:[%s4902_s1 + $0x48] sm:$0xff]  ;;  %v1302_v2 = vld [vmem:[%s4902_s1 + $0x50] sm:$0xff]  ;;  %v1303_v3 = vld [vmem:[%s4902_s1 + $0x58] sm:$0xff]  ;;  %vm1130_vm3 = vcmask 523264   ;;  %vm1163_vm4 = vcmask 785408  }
  0x12   : > { %2462 = vmatprep.subr.bf16.mxu0 %v4916_v1  ;;  %2516 = vmatprep.subr.bf16.mxu1 %v4916_v1  ;;  %v2472_v63 = vpack.c.bf16 %v1301_v51, %v1300_v50 }
  0x13   : > { %s3248_s4 = scalar_lea.vmem %s4901_s0, %s2547_s24 }
  0x14   : > { %v3251_v9 = vld [vmem:[%s3248_s4] sm:$0xff]  ;;  %v3254_v10 = vld [vmem:[%s3248_s4 + $0x8] sm:$0xff]  ;;  %v3263_v13 = vld [vmem:[%s3248_s4 + $0x30] sm:$0xff] }
  0x15   : > { %v383_v14 = vrot.slane %v3251_v9, 2  ;;  %v384_v15 = vrot.slane %v3254_v10, 2  ;;  %v3268_v16 = vld [vmem:[%s3248_s4 + $0x18] sm:$0xff]  ;;  %v3271_v17 = vld [vmem:[%s3248_s4 + $0x20] sm:$0xff]  ;;  %v302_v18 = vrot.slane %v3251_v9, 1  ;;  %2464 = vmatpush1.bf16.msra.mxu0 %v2463_v6  ;;  %2532 = vmatpush1.bf16.msra.mxu1 %v2463_v6  ;;  %v303_v22 = vrot.slane %v3254_v10, 1 }
  0x16   : > { %v388_v20 = vrot.slane %v3268_v16, 2  ;;  %v389_v21 = vrot.slane %v3271_v17, 2  ;;  %v3278_v23 = vld [vmem:[%s3248_s4 + $0x120] sm:$0xff]  ;;  %v3281_v24 = vld [vmem:[%s3248_s4 + $0x128] sm:$0xff]  ;;  %v3284_v25 = vld [vmem:[%s3248_s4 + $0x150] sm:$0xff]  ;;  %2465 = vmatprep.subr.bf16.mxu0 %v4916_v1  ;;  %2517 = vmatprep.subr.bf16.mxu1 %v4916_v1  ;;  %v312_v53 = vrot.slane %v3263_v13, 1 }
  0x17   : > { %v385_v26 = vsel %vm382_vm0, %v383_v14, %v384_v15  ;;  %v443_v27 = vrot.slane %v3278_v23, 2  ;;  %v444_v28 = vrot.slane %v3281_v24, 2  ;;  %v3294_v29 = vld [vmem:[%s3248_s4 + $0x138] sm:$0xff]  ;;  %v3297_v30 = vld [vmem:[%s3248_s4 + $0x140] sm:$0xff]  ;;  %v362_v31 = vrot.slane %v3278_v23, 1  ;;  %v1306_v10 = vld [vmem:[%s4902_s1 + $0x70] sm:$0xff] }
  0x18   : > { %v3301_v32 = vld [vmem:[%s3248_s4 + $0x158] sm:$0xff]  ;;  %v2586_v33 = vpack.i.bf16 %v385_v26, %v3263_v13  ;;  %v3307_v34 = vsel %vm382_vm0, %v388_v20, %v389_v21  ;;  %v304_v35 = vsel %vm301_vm1, %v302_v18, %v303_v22  ;;  %v363_v36 = vrot.slane %v3281_v24, 1  ;;  %v3317_v38 = vld [vmem:[%s3248_s4 + $0x130] sm:$0x3]  ;;  %v3320_v39 = vld [vmem:[%s3248_s4 + $0x148] sm:$0x3] }
  0x19   : > { %v3314_v37 = vld [vmem:[%s3248_s4 + $0x38] sm:$0xff]  ;;  %v2576_v40 = vpack.i.bf16 %v304_v35, %v3307_v34  ;;  %v3326_v41 = vsel %vm382_vm0, %v443_v27, %v444_v28  ;;  %v448_v42 = vrot.slane %v3294_v29, 2  ;;  %v201_v43 = vld [vmem:[%s3248_s4 + $0x10] sm:$0x3]  ;;  %v3331_v44 = vld [vmem:[%s3248_s4 + $0x28] sm:$0x3]  ;;  %2467 = vmatpush1.bf16.msra.mxu0 %v2466_v19  ;;  %2533 = vmatpush1.bf16.msra.mxu1 %v2466_v19  ;;  %v2475_v19 = vpack.c.bf16 %v1303_v3, %v1302_v2 }
  0x1a   : > { %4949 = vst [vmem:[#allocation2_spill] sm:$0xff] %v3326_v41  ;;  %2587 = vrot.lane.b32.xlu1 %v2586_v33, %s3179_s9  ;;  %v2591_v46 = vpack.i.bf16 %v3326_v41, %v3284_v25  ;;  %v3337_v47 = vsel %vm301_vm1, %v362_v31, %v363_v36  ;;  %v449_v48 = vrot.slane %v3297_v30, 2  ;;  %v372_v49 = vrot.slane %v3284_v25, 1  ;;  %2468 = vmatprep.subr.bf16.mxu0 %v4916_v1  ;;  %v3395_v14 = vld [vmem:[%s3248_s4 + $0x160] sm:$0x3]  ;;  %v3493_v2 = vld [vmem:[%s3248_s4 + $0x48] sm:$0xff] }
  0x1b   : > { %4950 = vst [vmem:[#allocation3_spill] sm:$0xff] %v3337_v47  ;;  %2577 = vrot.lane.b32.xlu0 %v2576_v40, %s3180_s18  ;;  %v373_v52 = vrot.slane %v3301_v32, 1  ;;  %v313_v54 = vrot.slane %v3314_v37, 1  ;;  %v365_v55 = vrot.slane %v3317_v38, 1  ;;  %2518 = vmatprep.subr.bf16.mxu1 %v4916_v1  ;;  %v451_v57 = vrot.slane %v3320_v39, 2  ;;  %v3496_v3 = vld [vmem:[%s3248_s4 + $0x50] sm:$0xff] }
  0x1c   : > { %v3355_v56 = vsel %vm382_vm0, %v448_v42, %v449_v48  ;;  %v305_v58 = vrot.slane %v201_v43, 1  ;;  %v391_v59 = vrot.slane %v3331_v44, 2  ;;  %v446_v7 = vrot.slane %v3317_v38, 2  ;;  %v3398_v18 = vld [vmem:[%s3248_s4 + $0x40] sm:$0x3] }
  0x1d   : > { %4951 = vst [vmem:[#allocation4_spill] sm:$0xff] %v3355_v56  ;;  %v2581_v60 = vpack.i.bf16 %v3337_v47, %v3355_v56  ;;  %v3362_v61 = vsel %vm301_vm1, %v372_v49, %v373_v52  ;;  %v3365_v62 = vsel %vm301_vm1, %v312_v53, %v313_v54  ;;  %2470 = vmatpush1.bf16.msra.mxu0 %v2469_v45  ;;  %v386_v12 = vrot.slane %v201_v43, 2 }
  0x1e   : > { %2592 = vrot.lane.b32.xlu1 %v2591_v46, %s3179_s9  ;;  %v2601_v0 = vpack.i.bf16 %v3294_v29, %v3362_v61  ;;  %v2596_v4 = vpack.i.bf16 %v3268_v16, %v3365_v62  ;;  %v3380_v5 = vsel %vm301_vm1, %v363_v36, %v365_v55  ;;  %v3383_v6 = vsel %vm382_vm0, %v449_v48, %v451_v57 }
  0x1f   : > { %2582 = vrot.lane.b32.xlu0 %v2581_v60, %s3180_s18  ;;  %4952 = vst [vmem:[#allocation5_spill] sm:$0xff] %v3380_v5  ;;  %4953 = vst [vmem:[#allocation6_spill] sm:$0xff] %v3383_v6  ;;  %2534 = vmatpush1.bf16.msra.mxu1 %v2469_v45  ;;  %v306_v8 = vsel %vm301_vm1, %v303_v22, %v305_v58  ;;  %v3392_v11 = vsel %vm382_vm0, %v389_v21, %v391_v59  ;;  %v1304_v21 = vld [vmem:[%s4902_s1 + $0x60] sm:$0xff]  ;;  %v1305_v22 = vld [vmem:[%s4902_s1 + $0x68] sm:$0xff]  ;;  %v375_v31 = vrot.slane %v3395_v14, 1 }
  0x20   : > { %2471 = vmatprep.subr.bf16.mxu0 %v4916_v1  ;;  %2519 = vmatprep.subr.bf16.mxu1 %v4916_v1  ;;  %v2611_v20 = vpack.i.bf16 %v3380_v5, %v3383_v6  ;;  %v2606_v26 = vpack.i.bf16 %v306_v8, %v3392_v11  ;;  %v3416_v27 = vsel %vm382_vm0, %v444_v28, %v446_v7  ;;  %v315_v33 = vrot.slane %v3398_v18, 1  ;;  %v3475_v59 = vld [vmem:[%s3248_s4 + $0x168] sm:$0xff]  ;;  %v3478_v60 = vld [vmem:[%s3248_s4 + $0x170] sm:$0xff] }
  0x21   : > { %2473 = vmatpush1.bf16.msra.mxu0 %v2472_v63  ;;  %4954 = vst [vmem:[#allocation7_spill] sm:$0xff] %v3416_v27  ;;  %v387_v35 = vsel %vm382_vm0, %v384_v15, %v386_v12  ;;  %v2478_v36 = vpack.c.bf16 %v1305_v22, %v1304_v21  ;;  %v2621_v28 = vpack.i.bf16 %v3416_v27, %v3301_v32  ;;  %v367_v38 = vrot.slane %v3294_v29, 1  ;;  %v1307_v15 = vld [vmem:[%s4902_s1 + $0x78] sm:$0xff]  ;;  %v3741_v27 = vld [vmem:[%s3248_s4 + $0xe8] sm:$0x3] }
  0x22   : > { %2602 = vrot.lane.b32.xlu1 %v2601_v0, %s3181_s23  ;;  %2474 = vmatprep.subr.bf16.mxu0 %v4916_v1  ;;  %v368_v40 = vrot.slane %v3297_v30, 1  ;;  %v453_v42 = vrot.slane %v3284_v25, 2  ;;  %v2616_v43 = vpack.i.bf16 %v387_v35, %v3314_v37  ;;  %v3441_v29 = vsel %vm301_vm1, %v373_v52, %v375_v31 }
  0x23   : > { %2597 = vrot.lane.b32.xlu0 %v2596_v4, %s3181_s23  ;;  %2535 = vmatpush1.bf16.msra.mxu1 %v2472_v63  ;;  %v3444_v45 = vsel %vm301_vm1, %v313_v54, %v315_v33  ;;  %v454_v46 = vrot.slane %v3301_v32, 2  ;;  %v307_v48 = vrot.slane %v3268_v16, 1  ;;  %v308_v49 = vrot.slane %v3271_v17, 1  ;;  %v1308_v16 = vld [vmem:[%s4902_s1 + $0x80] sm:$0xff]  ;;  %v1309_v54 = vld [vmem:[%s4902_s1 + $0x88] sm:$0xff] }
  0x24   : > { %2520 = vmatprep.subr.bf16.mxu1 %v4916_v1  ;;  %4955 = vst [vmem:[#allocation8_spill] sm:$0xff] %v3444_v45  ;;  %v393_v50 = vrot.slane %v3263_v13, 2  ;;  %v394_v51 = vrot.slane %v3314_v37, 2  ;;  %v2481_v52 = vpack.c.bf16 %v1307_v15, %v1306_v10  ;;  %v2631_v53 = vpack.i.bf16 %v3297_v30, %v3441_v29  ;;  %v3518_v33 = vld [vmem:[%s3248_s4 + $0x68] sm:$0xff]  ;;  %v3591_v30 = vld [vmem:[%s3248_s4 + $0x178] sm:$0x3] }
  0x25   : > { %2476 = vmatpush1.bf16.msra.mxu0 %v2475_v19  ;;  %v2626_v55 = vpack.i.bf16 %v3271_v17, %v3444_v45  ;;  %v3467_v57 = vsel %vm301_vm1, %v367_v38, %v368_v40  ;;  %v3472_v58 = vsel %vm382_vm0, %v453_v42, %v454_v46  ;;  %v3483_v63 = vsel %vm301_vm1, %v307_v48, %v308_v49 }
  0x26   : > { %2612 = vrot.lane.b32.xlu1 %v2611_v20, %s3180_s18  ;;  %2477 = vmatprep.subr.bf16.mxu0 %v4916_v1  ;;  %4956 = vst [vmem:[#allocation9_spill] sm:$0xff] %v3472_v58  ;;  %v3488_v0 = vsel %vm382_vm0, %v393_v50, %v394_v51  ;;  %v2484_v4 = vpack.c.bf16 %v1309_v54, %v1308_v16  ;;  %v377_v8 = vrot.slane %v3475_v59, 1  ;;  %v378_v12 = vrot.slane %v3478_v60, 1  ;;  %v3507_v20 = vld [vmem:[%s3248_s4 + $0x190] sm:$0x3] }
  0x27   : > { %2607 = vrot.lane.b32.xlu0 %v2606_v26, %s3180_s18  ;;  %2536 = vmatpush1.bf16.msra.mxu1 %v2475_v19  ;;  %4957 = vst [vmem:[#allocation10_spill] sm:$0xff] %v3488_v0  ;;  %v2641_v7 = vpack.i.bf16 %v3467_v57, %v3472_v58  ;;  %v3504_v19 = vld [vmem:[%s3248_s4 + $0x188] sm:$0xff]  ;;  %v2636_v21 = vpack.i.bf16 %v3483_v63, %v3488_v0  ;;  %v317_v22 = vrot.slane %v3493_v2, 1  ;;  %v318_v26 = vrot.slane %v3496_v3, 1 }
  0x28   : > { %2521 = vmatprep.subr.bf16.mxu1 %v4916_v1  ;;  %v4910_v31 = vrot.slane %v3504_v19, 1  ;;  %v469_v35 = vrot.slane %v3507_v20, 1  ;;  %v2651_v38 = vpack.i.bf16 %v3355_v56, %v3475_v59  ;;  %v3532_v42 = vsel %vm301_vm1, %v377_v8, %v378_v12  ;;  %v3578_v54 = vld [vmem:[%s3248_s4 + $0x88] sm:$0x3]  ;;  %v3738_v56 = vld [vmem:[%s3248_s4 + $0xe0] sm:$0xff] }
  0x29   : > { %2479 = vmatpush1.bf16.msra.mxu0 %v2478_v36  ;;  %v370_v10 = vrot.slane %v3320_v39, 1  ;;  %v456_v15 = vrot.slane %v3395_v14, 2  ;;  %v3546_v48 = vsel %vm301_vm1, %v317_v22, %v318_v26  ;;  %v396_v50 = vrot.slane %v3398_v18, 2 }
  0x2a   : > { %2622 = vrot.lane.b32.xlu1 %v2621_v28, %s3179_s9  ;;  %2480 = vmatprep.subr.bf16.mxu0 %v4916_v1  ;;  %v2646_v28 = vpack.i.bf16 %v3307_v34, %v3493_v2  ;;  %v3541_v34 = vsel %vm301_vm1, %v4910_v31, %v469_v35  ;;  %4959 = vst [vmem:[#allocation12_spill] sm:$0xff] %v3546_v48  ;;  %v4909_v39 = vrot.slane %v3518_v33, 1  ;;  %v380_v8 = vrot.slane %v3591_v30, 1 }
  0x2b   : > { %2617 = vrot.lane.b32.xlu0 %v2616_v43, %s3179_s9  ;;  %2537 = vmatpush1.bf16.msra.mxu1 %v2478_v36  ;;  %v3522_v36 = vld [vmem:[%s3248_s4 + $0x70] sm:$0x3]  ;;  %v310_v43 = vrot.slane %v3331_v44, 1  ;;  %4958 = vst [vmem:[#allocation11_spill] sm:$0xff] %v3541_v34  ;;  %v2661_v44 = vpack.i.bf16 %v3284_v25, %v3532_v42  ;;  %v3572_v16 = vsel %vm382_vm0, %v454_v46, %v456_v15  ;;  %v3575_v25 = vld [vmem:[%s3248_s4 + $0x80] sm:$0xff]  ;;  %v4969_v5 = vmov 0.0|0.0  }
  0x2c   : > { %2522 = vmatprep.subr.bf16.mxu1 %v4916_v1  ;;  %v325_v14 = vrot.slane %v3522_v36, 1  ;;  %4960 = vst [vmem:[#allocation13_spill] sm:$0xff] %v3572_v16  ;;  %v4906_v17 = vrot.slane %v3575_v25, 1 }
  0x2d   : > { %2482 = vmatpush1.bf16.msra.mxu0 %v2481_v52 }
  0x2e   : > { %2632 = vrot.lane.b32.xlu1 %v2631_v53, %s3181_s23  ;;  %2483 = vmatprep.subr.bf16.mxu0 %v4916_v1  ;;  %v3559_v18 = vsel %vm301_vm1, %v4909_v39, %v325_v14  ;;  %v3567_v53 = vsel %vm301_vm1, %v368_v40, %v370_v10  ;;  %v3594_v40 = vld [vmem:[%s3248_s4 + $0x58] sm:$0x3]  ;;  %v3627_v10 = vld [vmem:[%s3248_s4 + $0xa0] sm:$0x3]  ;;  %v458_v14 = vrot.slane %v3475_v59, 2 }
  0x2f   : > { %2627 = vrot.lane.b32.xlu0 %v2626_v55, %s3181_s23  ;;  %2538 = vmatpush1.bf16.msra.mxu1 %v2481_v52  ;;  %v2656_v52 = vpack.i.bf16 %v3263_v13, %v3546_v48  ;;  %v3583_v55 = vsel %vm301_vm1, %v308_v49, %v310_v43  ;;  %v3588_v13 = vsel %vm382_vm0, %v394_v51, %v396_v50  ;;  %v330_v49 = vrot.slane %v3578_v54, 1  ;;  %v1311_v51 = vld [vmem:[%s4902_s1 + $0x98] sm:$0xff] }
  0x30   : > { %2523 = vmatprep.subr.bf16.mxu1 %v4916_v1  ;;  %4961 = vst [vmem:[#allocation14_spill] sm:$0xff] %v3588_v13  ;;  %v2671_v46 = vpack.i.bf16 %v3567_v53, %v3572_v16  ;;  %v320_v22 = vrot.slane %v3594_v40, 1  ;;  %v2681_v43 = vpack.i.bf16 %v3383_v6, %v3478_v60  ;;  %v2676_v50 = vpack.i.bf16 %v3392_v11, %v3496_v3 }
  0x31   : > { %2485 = vmatpush1.bf16.msra.mxu0 %v2484_v4  ;;  %v3618_v35 = vsel %vm301_vm1, %v4906_v17, %v330_v49  ;;  %v3711_v17 = vld [vmem:[%s3248_s4 + $0xc8] sm:$0xff] }
  0x32   : > { %2642 = vrot.lane.b32.xlu1 %v2641_v7, %s3180_s18  ;;  %2486 = vmatprep.subr.bf16.mxu0 %v4916_v1  ;;  %v2666_v7 = vpack.i.bf16 %v3583_v55, %v3588_v13  ;;  %4962 = vst [vmem:[#allocation15_spill] sm:$0xff] %v3618_v35  ;;  %v3647_v11 = vsel %vm301_vm1, %v318_v26, %v320_v22  ;;  %v3665_v22 = vld [vmem:[%s3248_s4 + $0xb0] sm:$0xff] }
  0x33   : > { %2637 = vrot.lane.b32.xlu0 %v2636_v21, %s3180_s18  ;;  %2539 = vmatpush1.bf16.msra.mxu1 %v2484_v4  ;;  %v1310_v4 = vld [vmem:[%s4902_s1 + $0x90] sm:$0xff]  ;;  %v3612_v21 = vld [vmem:[%s3248_s4 + $0x98] sm:$0xff] }
  0x34   : > { %2524 = vmatprep.subr.bf16.mxu1 %v4916_v1  ;;  %v2487_v15 = vpack.c.bf16 %v1311_v51, %v1310_v4  ;;  %v335_v4 = vrot.slane %v3627_v10, 1  ;;  %v398_v51 = vrot.slane %v3493_v2, 2 }
  0x36   : > { %2652 = vrot.lane.b32.xlu1 %v2651_v38, %s3179_s9  ;;  %v1313_v38 = vld [vmem:[%s4902_s1 + $0xa8] sm:$0xff]  ;;  %2488 = vmatpush1.bf16.msra.mxu0 %v2487_v15 }
  0x37   : > { %2647 = vrot.lane.b32.xlu0 %v2646_v28, %s3179_s9  ;;  %v1312_v28 = vld [vmem:[%s4902_s1 + $0xa0] sm:$0xff]  ;;  %2540 = vmatpush1.bf16.msra.mxu1 %v2487_v15  ;;  %v2686_v15 = vpack.i.bf16 %v3314_v37, %v3647_v11 }
  0x38   : > { %v2490_v49 = vpack.c.bf16 %v1313_v38, %v1312_v28  ;;  %2489 = vmatprep.subr.bf16.mxu0 %v4916_v1  ;;  %2525 = vmatprep.subr.bf16.mxu1 %v4916_v1  ;;  %v3668_v28 = vld [vmem:[%s3248_s4 + $0xb8] sm:$0x3]  ;;  %v1316_v37 = vld [vmem:[%s4902_s1 + $0xc0] sm:$0xff] }
  0x3a   : > { %2662 = vrot.lane.b32.xlu1 %v2661_v44, %s3181_s23  ;;  %v4908_v44 = vrot.slane %v3478_v60, 2  ;;  %2491 = vmatpush1.bf16.msra.mxu0 %v2490_v49 }
  0x3b   : > { %2657 = vrot.lane.b32.xlu0 %v2656_v52, %s3181_s23  ;;  %v3640_v52 = vsel %vm301_vm1, %v378_v12, %v380_v8  ;;  %v1314_v12 = vld [vmem:[%s4902_s1 + $0xb0] sm:$0xff]  ;;  %v1315_v8 = vld [vmem:[%s4902_s1 + $0xb8] sm:$0xff]  ;;  %2541 = vmatpush1.bf16.msra.mxu1 %v2490_v49 }
  0x3c   : > { %v2691_v38 = vpack.i.bf16 %v3301_v32, %v3640_v52  ;;  %v3687_v32 = vld [vmem:[%s3248_s4 + $0x180] sm:$0xff]  ;;  %2492 = vmatprep.subr.bf16.mxu0 %v4916_v1  ;;  %2526 = vmatprep.subr.bf16.mxu1 %v4916_v1 }
  0x3e   : > { %2672 = vrot.lane.b32.xlu1 %v2671_v46, %s3180_s18  ;;  %v4905_v46 = vrot.slane %v3612_v21, 1 }
  0x3f   : > { %2667 = vrot.lane.b32.xlu0 %v2666_v7, %s3180_s18  ;;  %v4907_v7 = vrot.slane %v3496_v3, 2 }
  0x40   : > { %v3662_v26 = vsel %vm301_vm1, %v4905_v46, %v335_v4  ;;  %v3679_v4 = vsel %vm382_vm0, %v458_v14, %v4908_v44  ;;  %v2493_v46 = vpack.c.bf16 %v1315_v8, %v1314_v12  ;;  %v4911_v14 = vrot.slane %v3665_v22, 1  ;;  %v3699_v8 = vld [vmem:[%s3248_s4 + $0x60] sm:$0xff] }
  0x41   : > { %4963 = vst [vmem:[#allocation16_spill] sm:$0xff] %v3662_v26  ;;  %4964 = vst [vmem:[#allocation17_spill] sm:$0xff] %v3679_v4  ;;  %v340_v12 = vrot.slane %v3668_v28, 1  ;;  %v2701_v49 = vpack.i.bf16 %v3362_v61, %v3679_v4  ;;  %v322_v31 = vrot.slane %v3699_v8, 1 }
  0x42   : > { %2682 = vrot.lane.b32.xlu1 %v2681_v43, %s3179_s9  ;;  %v3684_v43 = vsel %vm382_vm0, %v398_v51, %v4907_v7  ;;  %v3714_v7 = vld [vmem:[%s3248_s4 + $0xd0] sm:$0x3]  ;;  %2494 = vmatpush1.bf16.msra.mxu0 %v2493_v46 }
  0x43   : > { %2677 = vrot.lane.b32.xlu0 %v2676_v50, %s3179_s9  ;;  %v1317_v50 = vld [vmem:[%s4902_s1 + $0xc8] sm:$0xff]  ;;  %v3708_v51 = vsel %vm301_vm1, %v4911_v14, %v340_v12  ;;  %v2696_v44 = vpack.i.bf16 %v3365_v62, %v3684_v43  ;;  %2542 = vmatpush1.bf16.msra.mxu1 %v2493_v46  ;;  %v1318_v12 = vld [vmem:[%s4902_s1 + $0xd0] sm:$0xff]  ;;  %v345_v6 = vrot.slane %v3714_v7, 1  ;;  %v2711_v46 = vpack.i.bf16 %v3472_v58, %v3687_v32 }
  0x44   : > { %v2496_v39 = vpack.c.bf16 %v1317_v50, %v1316_v37  ;;  %2495 = vmatprep.subr.bf16.mxu0 %v4916_v1  ;;  %2527 = vmatprep.subr.bf16.mxu1 %v4916_v1  ;;  %v2706_v37 = vpack.i.bf16 %v3488_v0, %v3699_v8  ;;  %v461_v50 = vrot.slane %v3591_v30, 2  ;;  %v4965_v1 = vrot.slane %v3504_v19, 1 }
  0x45   : > { %v4967_v58 = vrot.slane %v3711_v17, 1  ;;  %v4968_v30 = vrot.slane %v3518_v33, 1 }
  0x46   : > { %2692 = vrot.lane.b32.xlu1 %v2691_v38, %s3181_s23  ;;  %v466_v38 = vrot.slane %v3687_v32, 1  ;;  %2497 = vmatpush1.bf16.msra.mxu0 %v2496_v39 }
  0x47   : > { %2687 = vrot.lane.b32.xlu0 %v2686_v15, %s3181_s23  ;;  %v1319_v15 = vld [vmem:[%s4902_s1 + $0xd8] sm:$0xff]  ;;  %v3752_v0 = vsel %vm301_vm1, %v4967_v58, %v345_v6  ;;  %v3757_v41 = vsel %vm301_vm1, %v322_v31, %v4968_v30  ;;  %2543 = vmatpush1.bf16.msra.mxu1 %v2496_v39  ;;  %v4924_v6 = vrot.slane %v3738_v56, 1  ;;  %v350_v58 = vrot.slane %v3741_v27, 1 }
  0x48   : > { %v3747_v14 = vsel %vm301_vm1, %v466_v38, %v4965_v1  ;;  %2498 = vmatprep.subr.bf16.mxu0 %v4969_v5  ;;  %v1320_v1 = vld [vmem:[%s4902_s1 + $0xe0] sm:$0xff]  ;;  %v1321_v38 = vld [vmem:[%s4902_s1 + $0xe8] sm:$0xff]  ;;  %2528 = vmatprep.subr.bf16.mxu1 %v4969_v5  ;;  %v4970_v39 = vrot.slane %v3478_v60, 2  ;;  %v2716_v30 = vpack.i.bf16 %v3493_v2, %v3757_v41  ;;  %v1323_v2 = vld [vmem:[%s4902_s1 + $0xf8] sm:$0xff] }
  0x49   : > { %4966 = vst [vmem:[#allocation18_spill] sm:$0xff] %v3747_v14  ;;  %v2721_v31 = vpack.i.bf16 %v3475_v59, %v3747_v14  ;;  %v3790_v59 = vsel %vm301_vm1, %v4924_v6, %v350_v58  ;;  %v3814_v58 = vld [vmem:[%s3248_s4 + $0x118] sm:$0x3] }
  0x4a   : > { %2702 = vrot.lane.b32.xlu1 %v2701_v49, %s3180_s18  ;;  %v2499_v49 = vpack.c.bf16 %v1319_v15, %v1318_v12  ;;  %v3779_v12 = vld [vmem:[%s3248_s4 + $0xf8] sm:$0xff]  ;;  %v3782_v15 = vld [vmem:[%s3248_s4 + $0x100] sm:$0x3]  ;;  %v360_v47 = vrot.slane %v3814_v58, 1 }
  0x4b   : > { %2697 = vrot.lane.b32.xlu0 %v2696_v44, %s3180_s18  ;;  %v401_v44 = vrot.slane %v3594_v40, 2  ;;  %v3776_v40 = vsel %vm382_vm0, %v4970_v39, %v461_v50  ;;  %v4972_v50 = vrot.slane %v3496_v3, 2 }
  0x4c   : > { %4971 = vst [vmem:[#allocation19_spill] sm:$0xff] %v3776_v40  ;;  %2500 = vmatpush1.bf16.msra.mxu0 %v2499_v49  ;;  %2544 = vmatpush1.bf16.msra.mxu1 %v2499_v49  ;;  %v2731_v49 = vpack.i.bf16 %v3441_v29, %v3776_v40 }
  0x4d   : > { %v3795_v39 = vsel %vm382_vm0, %v4972_v50, %v401_v44  ;;  %2501 = vmatprep.subr.bf16.mxu0 %v4969_v5  ;;  %2529 = vmatprep.subr.bf16.mxu1 %v4969_v5  ;;  %v3811_v44 = vld [vmem:[%s3248_s4 + $0x110] sm:$0xff] }
  0x4e   : > { %2712 = vrot.lane.b32.xlu1 %v2711_v46, %s3179_s9  ;;  %v2502_v46 = vpack.c.bf16 %v1321_v38, %v1320_v1  ;;  %4973 = vst [vmem:[#allocation20_spill] sm:$0xff] %v3795_v39  ;;  %v4928_v1 = vrot.slane %v3779_v12, 1  ;;  %v355_v38 = vrot.slane %v3782_v15, 1  ;;  %v2726_v50 = vpack.i.bf16 %v3444_v45, %v3795_v39  ;;  %v214_v45 = vld [vmem:[%s3248_s4 + $0x78] sm:$0xff] }
  0x4f   : > { %2707 = vrot.lane.b32.xlu0 %v2706_v37, %s3179_s9  ;;  %v1322_v37 = vld [vmem:[%s4902_s1 + $0xf0] sm:$0xff] }
  0x50   : > { %2503 = vmatpush1.bf16.msra.mxu0 %v2502_v46  ;;  %v2505_v6 = vpack.c.bf16 %v1323_v2, %v1322_v37  ;;  %v3822_v14 = vsel %vm301_vm1, %v4928_v1, %v355_v38  ;;  %2545 = vmatpush1.bf16.msra.mxu1 %v2502_v46  ;;  %v2736_v46 = vpack.i.bf16 %v3588_v13, %v3518_v33  ;;  %v503_v37 = vrot.slane %v3687_v32, 2  ;;  %v251_v13 = vld [vmem:[%s3248_s4 + $0x1a0] sm:$0xff] }
  0x51   : > { %2504 = vmatprep.subr.bf16.mxu0 %v4969_v5  ;;  %2530 = vmatprep.subr.bf16.mxu1 %v4969_v5  ;;  %v504_v5 = vrot.slane %v3504_v19, 2  ;;  %v403_v38 = vrot.slane %v3699_v8, 2  ;;  %v2746_v1 = vpack.i.bf16 %v3496_v3, %v3559_v18 }
  0x52   : > { %2722 = vrot.lane.b32.xlu1 %v2721_v31, %s3181_s23  ;;  %v4930_v31 = vrot.slane %v3811_v44, 1 }
  0x53   : > { %2717 = vrot.lane.b32.xlu0 %v2716_v30, %s3181_s23  ;;  %v2741_v30 = vpack.i.bf16 %v3572_v16, %v3504_v19  ;;  %v3850_v16 = vsel %vm382_vm0, %v503_v37, %v504_v5 }
  0x54   : > { %2506 = vmatpush1.bf16.msra.mxu0 %v2505_v6  ;;  %v3839_v2 = vsel %vm301_vm1, %v4930_v31, %v360_v47  ;;  %2546 = vmatpush1.bf16.msra.mxu1 %v2505_v6  ;;  %4974 = vst [vmem:[#allocation21_spill] sm:$0xff] %v3850_v16  ;;  %v250_v31 = vld [vmem:[%s3248_s4 + $0x198] sm:$0xff]  ;;  %v2761_v6 = vpack.i.bf16 %v3532_v42, %v3850_v16  ;;  %v506_v16 = vrot.slane %v3507_v20, 2  ;;  %v1324_v20 = vld [vmem:[%s4902_s1 + $0x100] sm:$0xff] }
  0x55   : > { %v511_v3 = vrot.slane %v250_v31, 1  ;;  %v2771_v37 = vpack.i.bf16 %v3679_v4, %v250_v31 }
  0x56   : > { %2732 = vrot.lane.b32.xlu1 %v2731_v49, %s3180_s18  ;;  %v404_v49 = vrot.slane %v3518_v33, 2 }
  0x57   : > { %2727 = vrot.lane.b32.xlu0 %v2726_v50, %s3180_s18  ;;  %v2751_v50 = vpack.i.bf16 %v3478_v60, %v3541_v34 }
  0x58   : > { %v3853_v47 = vsel %vm382_vm0, %v403_v38, %v404_v49  ;;  %v2766_v38 = vpack.i.bf16 %v3684_v43, %v214_v45 }
  0x59   : > { %4975 = vst [vmem:[#allocation22_spill] sm:$0xff] %v3853_v47  ;;  %v2756_v60 = vpack.i.bf16 %v3546_v48, %v3853_v47  ;;  %v406_v48 = vrot.slane %v3522_v36, 2  ;;  %v1325_v36 = vld [vmem:[%s4902_s1 + $0x108] sm:$0xff] }
  0x5a   : > { %2742 = vrot.lane.b32.xlu1 %v2741_v30, %s3179_s9  ;;  %v512_v30 = vrot.slane %v251_v13, 1 }
  0x5b   : > { %2737 = vrot.lane.b32.xlu0 %v2736_v46, %s3179_s9  ;;  %v327_v46 = vrot.slane %v214_v45, 1 }
  0x5e   : > { %2752 = vrot.lane.b32.xlu1 %v2751_v50, %s3181_s23  ;;  %v513_v50 = vsel %vm301_vm1, %v511_v3, %v512_v30  ;;  %v3891_v3 = vsel %vm382_vm0, %v404_v49, %v406_v48  ;;  %v2801_v48 = vpack.i.bf16 %v3776_v40, %v251_v13  ;;  %v2796_v49 = vpack.i.bf16 %v3795_v39, %v3575_v25 }
  0x5f   : > { %2747 = vrot.lane.b32.xlu0 %v2746_v1, %s3181_s23  ;;  %v4976_v1 = vrot.slane %v3575_v25, 1  ;;  %4978 = vst [vmem:[#allocation24_spill] sm:$0xff] %v3891_v3  ;;  %v2806_v13 = vpack.i.bf16 %v3518_v33, %v3618_v35  ;;  %v4981_v33 = vrot.slane %v3612_v21, 1 }
  0x61   : > { %v3873_v34 = vsel %vm301_vm1, %v327_v46, %v4976_v1  ;;  %v3894_v46 = vpack.c.bf16 %v1325_v36, %v1324_v20  ;;  %v217_v1 = vld [vmem:[%s3248_s4 + $0x90] sm:$0xff] }
  0x62   : > { %2762 = vrot.lane.b32.xlu1 %v2761_v6, %s3180_s18  ;;  %v2781_v6 = vpack.i.bf16 %v3687_v32, %v513_v50  ;;  %v2776_v31 = vpack.i.bf16 %v3699_v8, %v3873_v34  ;;  %v252_v32 = vld [vmem:[%s3248_s4 + $0x1a8] sm:$0x3]  ;;  %v2786_v8 = vpack.i.bf16 %v3647_v11, %v3891_v3  ;;  %v409_v50 = vrot.slane %v3575_v25, 2 }
  0x63   : > { %2757 = vrot.lane.b32.xlu0 %v2756_v60, %s3180_s18  ;;  %v3882_v60 = vsel %vm382_vm0, %v504_v5, %v506_v16  ;;  %2508 = vmatprep.subr.bf16.mxu1 %v3894_v46  ;;  %v514_v5 = vrot.slane %v252_v32, 1  ;;  %v2821_v36 = vpack.i.bf16 %v3853_v47, %v217_v1 }
  0x64   : > { %4977 = vst [vmem:[#allocation23_spill] sm:$0xff] %v3882_v60  ;;  %v2791_v16 = vpack.i.bf16 %v3640_v52, %v3882_v60 }
  0x66   : > { %2772 = vrot.lane.b32.xlu1 %v2771_v37, %s3179_s9  ;;  %v515_v37 = vsel %vm301_vm1, %v512_v30, %v514_v5  ;;  %v332_v30 = vrot.slane %v217_v1, 1  ;;  %v413_v5 = vrot.slane %v217_v1, 2 }
  0x67   : > { %2767 = vrot.lane.b32.xlu0 %v2766_v38, %s3179_s9  ;;  %v408_v38 = vrot.slane %v214_v45, 2 }
  0x69   : > { %v3918_v20 = vsel %vm382_vm0, %v408_v38, %v409_v50  ;;  %v2836_v38 = vpack.i.bf16 %v3891_v3, %v3612_v21 }
  0x6a   : > { %2782 = vrot.lane.b32.xlu1 %v2781_v6, %s3181_s23  ;;  %v2811_v6 = vpack.i.bf16 %v3504_v19, %v515_v37  ;;  %4979 = vst [vmem:[#allocation25_spill] sm:$0xff] %v3918_v20  ;;  %v2816_v19 = vpack.i.bf16 %v3757_v41, %v3918_v20  ;;  %v2841_v37 = vpack.i.bf16 %v3575_v25, %v3662_v26 }
  0x6b   : > { %2777 = vrot.lane.b32.xlu0 %v2776_v31, %s3181_s23  ;;  %v411_v31 = vrot.slane %v3578_v54, 2  ;;  %v3931_v54 = vsel %vm301_vm1, %v332_v30, %v4981_v33 }
  0x6c   : > { %4982 = vst [vmem:[#allocation27_spill] sm:$0xff] %v3931_v54 }
  0x6d   : > { %v3926_v32 = vsel %vm382_vm0, %v409_v50, %v411_v31  ;;  %v416_v50 = vrot.slane %v3627_v10, 2  ;;  %v4985_v10 = vrot.slane %v3665_v22, 1 }
  0x6e   : > { %2792 = vrot.lane.b32.xlu1 %v2791_v16, %s3180_s18  ;;  %4980 = vst [vmem:[#allocation26_spill] sm:$0xff] %v3926_v32  ;;  %v2831_v16 = vpack.i.bf16 %v3559_v18, %v3926_v32 }
  0x6f   : > { %2787 = vrot.lane.b32.xlu0 %v2786_v8, %s3180_s18  ;;  %v2826_v8 = vpack.i.bf16 %v214_v45, %v3931_v54 }
  0x72   : > { %2802 = vrot.lane.b32.xlu1 %v2801_v48, %s3179_s9  ;;  %v414_v48 = vrot.slane %v3612_v21, 2 }
  0x73   : > { %2797 = vrot.lane.b32.xlu0 %v2796_v49, %s3179_s9  ;;  %v3940_v49 = vld [vmem:[%s3248_s4 + $0xa8] sm:$0xff] }
  0x74   : > { %v3950_v45 = vsel %vm382_vm0, %v413_v5, %v414_v48  ;;  %v3960_v31 = vsel %vm382_vm0, %v414_v48, %v416_v50  ;;  %v418_v33 = vrot.slane %v3940_v49, 2  ;;  %v2871_v5 = vpack.i.bf16 %v3612_v21, %v3708_v51 }
  0x75   : > { %4983 = vst [vmem:[#allocation28_spill] sm:$0xff] %v3950_v45  ;;  %v2846_v25 = vpack.i.bf16 %v3873_v34, %v3950_v45  ;;  %4984 = vst [vmem:[#allocation29_spill] sm:$0xff] %v3960_v31  ;;  %v421_v48 = vrot.slane %v3668_v28, 2 }
  0x76   : > { %2812 = vrot.lane.b32.xlu1 %v2811_v6, %s3181_s23  ;;  %v337_v6 = vrot.slane %v3940_v49, 1 }
  0x77   : > { %2807 = vrot.lane.b32.xlu0 %v2806_v13, %s3181_s23  ;;  %v2851_v13 = vpack.i.bf16 %v3918_v20, %v3940_v49 }
  0x78   : > { %v3965_v30 = vsel %vm301_vm1, %v337_v6, %v4985_v10 }
  0x7a   : > { %2822 = vrot.lane.b32.xlu1 %v2821_v36, %s3179_s9  ;;  %v2861_v36 = vpack.i.bf16 %v3618_v35, %v3960_v31  ;;  %v426_v35 = vrot.slane %v3714_v7, 2 }
  0x7b   : > { %2817 = vrot.lane.b32.xlu0 %v2816_v19, %s3180_s18  ;;  %v2856_v19 = vpack.i.bf16 %v217_v1, %v3965_v30 }
  0x7e   : > { %2832 = vrot.lane.b32.xlu1 %v2831_v16, %s3180_s18  ;;  %v419_v16 = vrot.slane %v3665_v22, 2 }
  0x7f   : > { %2827 = vrot.lane.b32.xlu0 %v2826_v8, %s3181_s23  ;;  %v3975_v8 = vld [vmem:[%s3248_s4 + $0xc0] sm:$0xff] }
  0x80   : > { %v3985_v1 = vsel %vm382_vm0, %v418_v33, %v419_v16  ;;  %v342_v50 = vrot.slane %v3975_v8, 1  ;;  %v2881_v21 = vpack.i.bf16 %v3950_v45, %v3975_v8  ;;  %v3992_v28 = vsel %vm382_vm0, %v419_v16, %v421_v48 }
  0x81   : > { %v2891_v48 = vpack.i.bf16 %v3662_v26, %v3992_v28  ;;  %v423_v60 = vrot.slane %v3975_v8, 2 }
  0x82   : > { %2842 = vrot.lane.b32.xlu1 %v2841_v37, %s3181_s23  ;;  %v2866_v37 = vpack.i.bf16 %v3926_v32, %v3665_v22 }
  0x83   : > { %2837 = vrot.lane.b32.xlu0 %v2836_v38, %s3179_s9 }
  0x86   : > { %2852 = vrot.lane.b32.xlu1 %v2851_v13, %s3179_s9  ;;  %v2876_v13 = vpack.i.bf16 %v3931_v54, %v3985_v1 }
  0x87   : > { %2847 = vrot.lane.b32.xlu0 %v2846_v25, %s3180_s18 }
  0x8a   : > { %2862 = vrot.lane.b32.xlu1 %v2861_v36, %s3180_s18 }
  0x8b   : > { %2857 = vrot.lane.b32.xlu0 %v2856_v19, %s3181_s23  ;;  %v4986_v19 = vrot.slane %v3711_v17, 1 }
  0x8c   : > { %v2588_v38 = vpop.permute.xlu1 %2587 }
  0x8d   : > { %v2578_v6 = vpop.permute.xlu0 %2577  ;;  %v4000_v33 = vsel %vm301_vm1, %v342_v50, %v4986_v19  ;;  %v2590_v50 = vunpack.i.h.bf16 %v2588_v38  ;;  %v2589_v19 = vunpack.i.l.bf16 %v2588_v38 }
  0x8e   : > { %2872 = vrot.lane.b32.xlu1 %v2871_v5, %s3181_s23  ;;  %v2580_v25 = vunpack.i.h.bf16 %v2578_v6  ;;  %v2579_v10 = vunpack.i.l.bf16 %v2578_v6  ;;  %v4003_v5 = vld [vmem:[%s3248_s4 + $0xd8] sm:$0xff]  ;;  %v424_v6 = vrot.slane %v3711_v17, 2  ;;  %v2886_v26 = vpack.i.bf16 %v3940_v49, %v4000_v33 }
  0x8f   : > { %2867 = vrot.lane.b32.xlu0 %v2866_v37, %s3179_s9  ;;  %v2896_v37 = vpack.i.bf16 %v3960_v31, %v3711_v17  ;;  %v347_v54 = vrot.slane %v4003_v5, 1  ;;  %v2901_v49 = vpack.i.bf16 %v3665_v22, %v3752_v0 }
  0x90   : > { %v2593_v36 = vpop.permute.xlu1 %2592  ;;  %v1196_v20 = vsel %vm1097_vm2, %v3483_v63, %v2579_v10  ;;  %v1326_v63 = vld [vmem:[%s4902_s1 + $0x110] sm:$0xff] }
  0x91   : > { %v2583_v16 = vpop.permute.xlu0 %2582  ;;  %v2595_v40 = vunpack.i.h.bf16 %v2593_v36  ;;  %v2594_v4 = vunpack.i.l.bf16 %v2593_v36  ;;  %v1228_v7 = vsel %vm1130_vm3, %v1196_v20, %v2589_v19 }
  0x92   : > { %v2585_v45 = vunpack.i.h.bf16 %v2583_v16  ;;  %v2584_v32 = vunpack.i.l.bf16 %v2583_v16  ;;  %2882 = vrot.lane.b32.xlu1 %v2881_v21, %s3179_s9  ;;  %v1098_v16 = vsel %vm1097_vm2, %v3251_v9, %v2580_v25 }
  0x93   : > { %2877 = vrot.lane.b32.xlu0 %v2876_v13, %s3180_s18 }
  0x94   : > { %v2603_v31 = vpop.permute.xlu1 %2602  ;;  %v1220_v36 = vsel %vm1097_vm2, %v3467_v57, %v2584_v32  ;;  %v1122_v38 = vsel %vm1097_vm2, %v3278_v23, %v2585_v45  ;;  %v1327_v32 = vld [vmem:[%s4902_s1 + $0x118] sm:$0xff] }
  0x95   : > { %v2605_v21 = vunpack.i.h.bf16 %v2603_v31  ;;  %v2604_v13 = vunpack.i.l.bf16 %v2603_v31  ;;  %v2598_v3 = vpop.permute.xlu0 %2597  ;;  %v1252_v23 = vsel %vm1130_vm3, %v1220_v36, %v2594_v4  ;;  %v1155_v45 = vsel %vm1130_vm3, %v1122_v38, %v2595_v40 }
  0x96   : > { %v2600_v9 = vunpack.i.h.bf16 %v2598_v3  ;;  %v2599_v25 = vunpack.i.l.bf16 %v2598_v3  ;;  %2892 = vrot.lane.b32.xlu1 %v2891_v48, %s3180_s18  ;;  %v1131_v31 = vsel %vm1130_vm3, %v1098_v16, %v2590_v50  ;;  %v4044_v4 = vsel %vm382_vm0, %v423_v60, %v424_v6 }
  0x97   : > { %2887 = vrot.lane.b32.xlu0 %v2886_v26, %s3181_s23  ;;  %v1284_v22 = vsel %vm1163_vm4, %v1252_v23, %v2604_v13  ;;  %v1188_v10 = vsel %vm1163_vm4, %v1155_v45, %v2605_v21  ;;  %v2511_v40 = vpack.c.bf16 %v1327_v32, %v1326_v63  ;;  %v2911_v26 = vpack.i.bf16 %v3985_v1, %v4003_v5 }
  0x98   : > { %v2613_v47 = vpop.permute.xlu1 %2612  ;;  %v1260_v39 = vsel %vm1163_vm4, %v1228_v7, %v2599_v25  ;;  %1583 = vmatprep.mubr.f32.mxu1 %v1284_v22  ;;  %v1164_v3 = vsel %vm1163_vm4, %v1131_v31, %v2600_v9  ;;  %v2906_v20 = vpack.i.bf16 %v3965_v30, %v4044_v4  ;;  %v4053_v50 = vsel %vm382_vm0, %v424_v6, %v426_v35 }
  0x99   : > { %v2608_v48 = vpop.permute.xlu0 %2607  ;;  %1463 = vmatprep.mubr.f32.mxu0 %v1260_v39  ;;  %1584 = vmatmul.mubr.f32.vlgmr.msra.gmra.mrb[0].mxu1 %v1188_v10  ;;  %v2615_v60 = vunpack.i.h.bf16 %v2613_v47  ;;  %v2614_v19 = vunpack.i.l.bf16 %v2613_v47  ;;  %v4987_v36 = vrot.slane %v3738_v56, 1  ;;  %v2926_v13 = vpack.i.bf16 %v3992_v28, %v3738_v56 }
  0x9a   : > { %1464 = vmatmul.mubr.f32.vlgmr.msra.gmra.mrb[0].mxu0 %v1164_v3  ;;  %2902 = vrot.lane.b32.xlu1 %v2901_v49, %s3181_s23  ;;  %v2610_v38 = vunpack.i.h.bf16 %v2608_v48  ;;  %v2609_v21 = vunpack.i.l.bf16 %v2608_v48  ;;  %v2921_v47 = vpack.i.bf16 %v3708_v51, %v4053_v50  ;;  %v429_v32 = vrot.slane %v3738_v56, 2  ;;  %v3120_v3 = vld [vmem:[%s3248_s4 + $0x8] sm:$0xff]  ;;  %v4083_v48 = vld [vmem:[%s3248_s4 + $0xf0] sm:$0xff] }
  0x9b   : > { %2897 = vrot.lane.b32.xlu0 %v2896_v37, %s3179_s9  ;;  %2510 = vmatpush3.bf16.msra.mxu1 %v3894_v46  ;;  %v4059_v16 = vsel %vm301_vm1, %v347_v54, %v4987_v36  ;;  %v428_v46 = vrot.slane %v4003_v5, 2  ;;  %v1221_v25 = vsel %vm1097_vm2, %v3567_v53, %v2614_v19  ;;  %v1123_v23 = vsel %vm1097_vm2, %v3281_v24, %v2615_v60 }
  0x9c   : > { %v2623_v39 = vpop.permute.xlu1 %2622  ;;  %2512 = vmatprep.subr.bf16.mxu1 %v2511_v40  ;;  %v2916_v63 = vpack.i.bf16 %v3975_v8, %v4059_v16  ;;  %v2931_v45 = vpack.i.bf16 %v3711_v17, %v3790_v59  ;;  %v431_v7 = vrot.slane %v3741_v27, 2  ;;  %v1197_v8 = vsel %vm1097_vm2, %v3583_v55, %v2609_v21 }
  0x9d   : > { %v2618_v37 = vpop.permute.xlu0 %2617  ;;  %v2625_v49 = vunpack.i.h.bf16 %v2623_v39  ;;  %v2624_v35 = vunpack.i.l.bf16 %v2623_v39  ;;  %v4096_v21 = vsel %vm382_vm0, %v428_v46, %v429_v32 }
  0x9e   : > { %2912 = vrot.lane.b32.xlu1 %v2911_v26, %s3179_s9  ;;  %v2620_v6 = vunpack.i.h.bf16 %v2618_v37  ;;  %v2619_v54 = vunpack.i.l.bf16 %v2618_v37  ;;  %v352_v37 = vrot.slane %v4083_v48, 1 }
  0x9f   : > { %2907 = vrot.lane.b32.xlu0 %v2906_v20, %s3180_s18  ;;  %2514 = vmatpush3.bf16.msra.mxu1 %v2511_v40  ;;  %v1099_v40 = vsel %vm1097_vm2, %v3120_v3, %v2610_v38  ;;  %v1253_v24 = vsel %vm1130_vm3, %v1221_v25, %v2624_v35  ;;  %v1156_v17 = vsel %vm1130_vm3, %v1123_v23, %v2625_v49 }
  0xa0   : > { %v2633_v9 = vpop.permute.xlu1 %2632  ;;  %v1229_v27 = vsel %vm1130_vm3, %v1197_v8, %v2619_v54  ;;  %v1132_v55 = vsel %vm1130_vm3, %v1099_v40, %v2620_v6  ;;  %v2941_v35 = vpack.i.bf16 %v4044_v4, %v4083_v48  ;;  %v4106_v6 = vsel %vm382_vm0, %v429_v32, %v431_v7 }
  0xa1   : > { %v2635_v22 = vunpack.i.h.bf16 %v2633_v9  ;;  %v2634_v31 = vunpack.i.l.bf16 %v2633_v9  ;;  %v2628_v10 = vpop.permute.xlu0 %2627  ;;  %v4988_v9 = vrot.slane %v3779_v12, 1  ;;  %v2951_v32 = vpack.i.bf16 %v3752_v0, %v4106_v6 }
  0xa2   : > { %v2630_v26 = vunpack.i.h.bf16 %v2628_v10  ;;  %v2629_v20 = vunpack.i.l.bf16 %v2628_v10  ;;  %2922 = vrot.lane.b32.xlu1 %v2921_v47, %s3180_s18  ;;  %v2936_v47 = vpack.i.bf16 %v4000_v33, %v4096_v21  ;;  %v433_v7 = vrot.slane %v4083_v48, 2 }
  0xa3   : > { %2917 = vrot.lane.b32.xlu0 %v2916_v63, %s3181_s23  ;;  %v1285_v60 = vsel %vm1163_vm4, %v1253_v24, %v2634_v31  ;;  %v1189_v19 = vsel %vm1163_vm4, %v1156_v17, %v2635_v22  ;;  %v4111_v25 = vsel %vm301_vm1, %v352_v37, %v4988_v9  ;;  %v4126_v17 = vld [vmem:[%s3248_s4 + $0x138] sm:$0xff] }
  0xa4   : > { %v2643_v39 = vpop.permute.xlu1 %2642  ;;  %v1261_v36 = vsel %vm1163_vm4, %v1229_v27, %v2629_v20  ;;  %1588 = vmatprep.mubr.f32.mxu1 %v1285_v60  ;;  %v1165_v38 = vsel %vm1163_vm4, %v1132_v55, %v2630_v26  ;;  %v2946_v40 = vpack.i.bf16 %v4003_v5, %v4111_v25  ;;  %v434_v26 = vrot.slane %v3779_v12, 2 }
  0xa5   : > { %v2638_v49 = vpop.permute.xlu0 %2637  ;;  %1468 = vmatprep.mubr.f32.mxu0 %v1261_v36  ;;  %1589 = vmatmul.mubr.f32.gmra.mrb[2].mxu1 %v1189_v19  ;;  %v2645_v46 = vunpack.i.h.bf16 %v2643_v39  ;;  %v2644_v54 = vunpack.i.l.bf16 %v2643_v39  ;;  %v2961_v60 = vpack.i.bf16 %v3738_v56, %v3822_v14  ;;  %v436_v55 = vrot.slane %v3782_v15, 2 }
  0xa6   : > { %1469 = vmatmul.mubr.f32.gmra.mrb[2].mxu0 %v1165_v38  ;;  %2932 = vrot.lane.b32.xlu1 %v2931_v45, %s3181_s23  ;;  %v2640_v23 = vunpack.i.h.bf16 %v2638_v49  ;;  %v2639_v45 = vunpack.i.l.bf16 %v2638_v49  ;;  %v3122_v38 = vld [vmem:[%s3248_s4 + $0x18] sm:$0xff] }
  0xa7   : > { %2927 = vrot.lane.b32.xlu0 %v2926_v13, %s3179_s9  ;;  %v2956_v13 = vpack.i.bf16 %v4053_v50, %v3779_v12  ;;  %v1222_v24 = vsel %vm1097_vm2, %v3362_v61, %v2644_v54  ;;  %v1124_v27 = vsel %vm1097_vm2, %v4126_v17, %v2645_v46  ;;  %v4138_v61 = vld [vmem:[%s3248_s4 + $0x108] sm:$0xff] }
  0xa8   : > { %v2653_v63 = vpop.permute.xlu1 %2652  ;;  %v1198_v5 = vsel %vm1097_vm2, %v3365_v62, %v2639_v45  ;;  %v1100_v37 = vsel %vm1097_vm2, %v3122_v38, %v2640_v23  ;;  %v4151_v45 = vsel %vm382_vm0, %v433_v7, %v434_v26 }
  0xa9   : > { %v2648_v22 = vpop.permute.xlu0 %2647  ;;  %v2655_v31 = vunpack.i.h.bf16 %v2653_v63  ;;  %v2654_v10 = vunpack.i.l.bf16 %v2653_v63 }
  0xaa   : > { %2942 = vrot.lane.b32.xlu1 %v2941_v35, %s3179_s9  ;;  %v2650_v8 = vunpack.i.h.bf16 %v2648_v22  ;;  %v2649_v3 = vunpack.i.l.bf16 %v2648_v22  ;;  %v357_v22 = vrot.slane %v4138_v61, 1 }
  0xab   : > { %2937 = vrot.lane.b32.xlu0 %v2936_v47, %s3180_s18  ;;  %v1254_v47 = vsel %vm1130_vm3, %v1222_v24, %v2654_v10  ;;  %v1157_v56 = vsel %vm1130_vm3, %v1124_v27, %v2655_v31  ;;  %v2971_v10 = vpack.i.bf16 %v4096_v21, %v4138_v61 }
  0xac   : > { %v2663_v20 = vpop.permute.xlu1 %2662  ;;  %v1230_v15 = vsel %vm1130_vm3, %v1198_v5, %v2649_v3  ;;  %v1133_v62 = vsel %vm1130_vm3, %v1100_v37, %v2650_v8  ;;  %v4161_v8 = vsel %vm382_vm0, %v434_v26, %v436_v55  ;;  %v438_v55 = vrot.slane %v4138_v61, 2 }
  0xad   : > { %v2665_v19 = vunpack.i.h.bf16 %v2663_v20  ;;  %v2664_v39 = vunpack.i.l.bf16 %v2663_v20  ;;  %v2658_v36 = vpop.permute.xlu0 %2657  ;;  %v4989_v20 = vrot.slane %v3811_v44, 1  ;;  %v2981_v26 = vpack.i.bf16 %v3790_v59, %v4161_v8 }
  0xae   : > { %v2660_v49 = vunpack.i.h.bf16 %v2658_v36  ;;  %v2659_v35 = vunpack.i.l.bf16 %v2658_v36  ;;  %2952 = vrot.lane.b32.xlu1 %v2951_v32, %s3180_s18  ;;  %v2966_v32 = vpack.i.bf16 %v4059_v16, %v4151_v45 }
  0xaf   : > { %2947 = vrot.lane.b32.xlu0 %v2946_v40, %s3181_s23  ;;  %v1286_v46 = vsel %vm1163_vm4, %v1254_v47, %v2664_v39  ;;  %v1190_v54 = vsel %vm1163_vm4, %v1157_v56, %v2665_v19  ;;  %v4166_v24 = vsel %vm301_vm1, %v357_v22, %v4989_v20  ;;  %v4181_v56 = vld [vmem:[%s3248_s4 + $0x140] sm:$0xff] }
  0xb0   : > { %v2673_v63 = vpop.permute.xlu1 %2672  ;;  %v1262_v9 = vsel %vm1163_vm4, %v1230_v15, %v2659_v35  ;;  %1593 = vmatprep.mubr.f32.mxu1 %v1286_v46  ;;  %v1166_v23 = vsel %vm1163_vm4, %v1133_v62, %v2660_v49  ;;  %v2976_v37 = vpack.i.bf16 %v4083_v48, %v4166_v24  ;;  %v439_v49 = vrot.slane %v3811_v44, 2  ;;  %v4990_v48 = vld [vmem:[#allocation8_spill] sm:$0xff]  ;;  %v3124_v22 = vld [vmem:[%s3248_s4 + $0x20] sm:$0xff] }
  0xb1   : > { %v2668_v31 = vpop.permute.xlu0 %2667  ;;  %1473 = vmatprep.mubr.f32.mxu0 %v1262_v9  ;;  %1594 = vmatmul.mubr.f32.gmra.mrb[4].mxu1 %v1190_v54  ;;  %v2675_v7 = vunpack.i.h.bf16 %v2673_v63  ;;  %v2674_v3 = vunpack.i.l.bf16 %v2673_v63  ;;  %v2991_v46 = vpack.i.bf16 %v3779_v12, %v3839_v2  ;;  %v441_v62 = vrot.slane %v3814_v58, 2 }
  0xb2   : > { %1474 = vmatmul.mubr.f32.gmra.mrb[4].mxu0 %v1166_v23  ;;  %2962 = vrot.lane.b32.xlu1 %v2961_v60, %s3181_s23  ;;  %v2670_v27 = vunpack.i.h.bf16 %v2668_v31  ;;  %v2669_v60 = vunpack.i.l.bf16 %v2668_v31 }
  0xb3   : > { %2957 = vrot.lane.b32.xlu0 %v2956_v13, %s3179_s9  ;;  %v2986_v13 = vpack.i.bf16 %v4106_v6, %v3811_v44  ;;  %v1223_v47 = vsel %vm1097_vm2, %v3441_v29, %v2674_v3  ;;  %v1125_v15 = vsel %vm1097_vm2, %v4181_v56, %v2675_v7 }
  0xb4   : > { %v2683_v40 = vpop.permute.xlu1 %2682  ;;  %v1199_v23 = vsel %vm1097_vm2, %v4990_v48, %v2669_v60  ;;  %v1101_v31 = vsel %vm1097_vm2, %v3124_v22, %v2670_v27 }
  0xb5   : > { %v2678_v19 = vpop.permute.xlu0 %2677  ;;  %v2685_v39 = vunpack.i.h.bf16 %v2683_v40  ;;  %v2684_v36 = vunpack.i.l.bf16 %v2683_v40 }
  0xb6   : > { %2972 = vrot.lane.b32.xlu1 %v2971_v10, %s3179_s9  ;;  %v2680_v5 = vunpack.i.h.bf16 %v2678_v19  ;;  %v2679_v38 = vunpack.i.l.bf16 %v2678_v19  ;;  %v4203_v19 = vsel %vm382_vm0, %v438_v55, %v439_v49 }
  0xb7   : > { %2967 = vrot.lane.b32.xlu0 %v2966_v32, %s3180_s18  ;;  %v1255_v32 = vsel %vm1130_vm3, %v1223_v47, %v2684_v36  ;;  %v1158_v7 = vsel %vm1130_vm3, %v1125_v15, %v2685_v39  ;;  %v4207_v36 = vld [vmem:[%s3248_s4 + $0x120] sm:$0xff] }
  0xb8   : > { %v2693_v35 = vpop.permute.xlu1 %2692  ;;  %v1231_v12 = vsel %vm1130_vm3, %v1199_v23, %v2679_v38  ;;  %v1134_v3 = vsel %vm1130_vm3, %v1101_v31, %v2680_v5  ;;  %v2996_v5 = vpack.i.bf16 %v4111_v25, %v4203_v19  ;;  %v4215_v38 = vsel %vm382_vm0, %v439_v49, %v441_v62  ;;  %v4991_v49 = vld [vmem:[#allocation3_spill] sm:$0xff]  ;;  %v3126_v31 = vld [vmem:[%s3248_s4 + $0x150] sm:$0xff] }
  0xb9   : > { %v2695_v54 = vunpack.i.h.bf16 %v2693_v35  ;;  %v2694_v63 = vunpack.i.l.bf16 %v2693_v35  ;;  %v2688_v9 = vpop.permute.xlu0 %2687  ;;  %v3006_v62 = vpack.i.bf16 %v4138_v61, %v4991_v49 }
  0xba   : > { %v2690_v29 = vunpack.i.h.bf16 %v2688_v9  ;;  %v2689_v10 = vunpack.i.l.bf16 %v2688_v9  ;;  %2982 = vrot.lane.b32.xlu1 %v2981_v26, %s3180_s18  ;;  %v3001_v26 = vpack.i.bf16 %v4151_v45, %v4207_v36 }
  0xbb   : > { %2977 = vrot.lane.b32.xlu0 %v2976_v37, %s3181_s23  ;;  %v1287_v58 = vsel %vm1163_vm4, %v1255_v32, %v2694_v63  ;;  %v1191_v40 = vsel %vm1163_vm4, %v1158_v7, %v2695_v54  ;;  %v4992_v7 = vld [vmem:[#allocation5_spill] sm:$0xff] }
  0xbc   : > { %v2703_v20 = vpop.permute.xlu1 %2702  ;;  %v1263_v27 = vsel %vm1163_vm4, %v1231_v12, %v2689_v10  ;;  %1598 = vmatprep.mubr.f32.mxu1 %v1287_v58  ;;  %v1167_v60 = vsel %vm1163_vm4, %v1134_v3, %v2690_v29  ;;  %v4228_v10 = vld [vmem:[%s3248_s4 + $0x128] sm:$0xff]  ;;  %v3021_v12 = vpack.i.bf16 %v3811_v44, %v4992_v7 }
  0xbd   : > { %v2698_v39 = vpop.permute.xlu0 %2697  ;;  %1478 = vmatprep.mubr.f32.mxu0 %v1263_v27  ;;  %1599 = vmatmul.mubr.f32.gmra.mrb[6].mxu1 %v1191_v40  ;;  %v2705_v55 = vunpack.i.h.bf16 %v2703_v20  ;;  %v2704_v37 = vunpack.i.l.bf16 %v2703_v20  ;;  %v3016_v32 = vpack.i.bf16 %v4161_v8, %v4228_v10  ;;  %v4993_v20 = vld [vmem:[#allocation12_spill] sm:$0xff] }
  0xbe   : > { %1479 = vmatmul.mubr.f32.gmra.mrb[6].mxu0 %v1167_v60  ;;  %2992 = vrot.lane.b32.xlu1 %v2991_v46, %s3181_s23  ;;  %v2700_v47 = vunpack.i.h.bf16 %v2698_v39  ;;  %v2699_v15 = vunpack.i.l.bf16 %v2698_v39  ;;  %v3128_v27 = vld [vmem:[%s3248_s4 + $0x30] sm:$0xff] }
  0xbf   : > { %2987 = vrot.lane.b32.xlu0 %v2986_v13, %s3179_s9  ;;  %v3011_v13 = vpack.i.bf16 %v3822_v14, %v4215_v38  ;;  %v1224_v22 = vsel %vm1097_vm2, %v3532_v42, %v2704_v37  ;;  %v1126_v29 = vsel %vm1097_vm2, %v3126_v31, %v2705_v55 }
  0xc0   : > { %v2713_v35 = vpop.permute.xlu1 %2712  ;;  %v1200_v61 = vsel %vm1097_vm2, %v4993_v20, %v2699_v15  ;;  %v1102_v42 = vsel %vm1097_vm2, %v3128_v27, %v2700_v47  ;;  %v3036_v20 = vpack.i.bf16 %v4207_v36, %v3467_v57  ;;  %v3130_v57 = vld [vmem:[%s3248_s4 + $0x38] sm:$0xff] }
  0xc1   : > { %v2708_v46 = vpop.permute.xlu0 %2707  ;;  %v2715_v54 = vunpack.i.h.bf16 %v2713_v35  ;;  %v2714_v63 = vunpack.i.l.bf16 %v2713_v35 }
  0xc2   : > { %3002 = vrot.lane.b32.xlu1 %v3001_v26, %s3179_s9  ;;  %v2710_v9 = vunpack.i.h.bf16 %v2708_v46  ;;  %v2709_v48 = vunpack.i.l.bf16 %v2708_v46 }
  0xc3   : > { %2997 = vrot.lane.b32.xlu0 %v2996_v5, %s3180_s18  ;;  %v1256_v26 = vsel %vm1130_vm3, %v1224_v22, %v2714_v63  ;;  %v1159_v5 = vsel %vm1130_vm3, %v1126_v29, %v2715_v54  ;;  %v3031_v54 = vpack.i.bf16 %v4203_v19, %v4126_v17  ;;  %v4994_v63 = vld [vmem:[#allocation2_spill] sm:$0xff] }
  0xc4   : > { %v2723_v23 = vpop.permute.xlu1 %2722  ;;  %v1232_v44 = vsel %vm1130_vm3, %v1200_v61, %v2709_v48  ;;  %v1135_v37 = vsel %vm1130_vm3, %v1102_v42, %v2710_v9  ;;  %v3026_v9 = vpack.i.bf16 %v4166_v24, %v4994_v63  ;;  %v3129_v42 = vld [vmem:[%s3248_s4 + $0x158] sm:$0xff] }
  0xc5   : > { %v2725_v58 = vunpack.i.h.bf16 %v2723_v23  ;;  %v2724_v3 = vunpack.i.l.bf16 %v2723_v23  ;;  %v2718_v40 = vpop.permute.xlu0 %2717 }
  0xc6   : > { %v2720_v60 = vunpack.i.h.bf16 %v2718_v40  ;;  %v2719_v39 = vunpack.i.l.bf16 %v2718_v40  ;;  %3012 = vrot.lane.b32.xlu1 %v3011_v13, %s3180_s18 }
  0xc7   : > { %3007 = vrot.lane.b32.xlu0 %v3006_v62, %s3181_s23  ;;  %v1288_v55 = vsel %vm1163_vm4, %v1256_v26, %v2724_v3  ;;  %v1192_v35 = vsel %vm1163_vm4, %v1159_v5, %v2725_v58  ;;  %v3051_v26 = vpack.i.bf16 %v4228_v10, %v3567_v53 }
  0xc8   : > { %v2733_v15 = vpop.permute.xlu1 %2732  ;;  %v1264_v47 = vsel %vm1163_vm4, %v1232_v44, %v2719_v39  ;;  %1603 = vmatprep.mubr.f32.mxu1 %v1288_v55  ;;  %v1168_v46 = vsel %vm1163_vm4, %v1135_v37, %v2720_v60  ;;  %v3046_v39 = vpack.i.bf16 %v4215_v38, %v4181_v56 }
  0xc9   : > { %v2728_v13 = vpop.permute.xlu0 %2727  ;;  %1483 = vmatprep.mubr.f32.mxu0 %v1264_v47  ;;  %1604 = vmatmul.mubr.f32.gmra.mrb[8].mxu1 %v1192_v35  ;;  %v2735_v48 = vunpack.i.h.bf16 %v2733_v15  ;;  %v2734_v62 = vunpack.i.l.bf16 %v2733_v15 }
  0xca   : > { %1484 = vmatmul.mubr.f32.gmra.mrb[8].mxu0 %v1168_v46  ;;  %3022 = vrot.lane.b32.xlu1 %v3021_v12, %s3181_s23  ;;  %v2730_v22 = vunpack.i.h.bf16 %v2728_v13  ;;  %v2729_v31 = vunpack.i.l.bf16 %v2728_v13  ;;  %v4995_v12 = vld [vmem:[#allocation7_spill] sm:$0xff] }
  0xcb   : > { %3017 = vrot.lane.b32.xlu0 %v3016_v32, %s3179_s9  ;;  %v3041_v17 = vpack.i.bf16 %v3839_v2, %v4995_v12  ;;  %v1225_v27 = vsel %vm1097_vm2, %v3640_v52, %v2734_v62  ;;  %v1127_v60 = vsel %vm1097_vm2, %v3129_v42, %v2735_v48 }
  0xcc   : > { %v2743_v23 = vpop.permute.xlu1 %2742  ;;  %v1201_v37 = vsel %vm1097_vm2, %v3647_v11, %v2729_v31  ;;  %v1103_v36 = vsel %vm1097_vm2, %v3130_v57, %v2730_v22 }
  0xcd   : > { %v2738_v29 = vpop.permute.xlu0 %2737  ;;  %v2745_v58 = vunpack.i.h.bf16 %v2743_v23  ;;  %v2744_v3 = vunpack.i.l.bf16 %v2743_v23 }
  0xce   : > { %3032 = vrot.lane.b32.xlu1 %v3031_v54, %s3179_s9  ;;  %v2740_v40 = vunpack.i.h.bf16 %v2738_v29  ;;  %v2739_v32 = vunpack.i.l.bf16 %v2738_v29 }
  0xcf   : > { %3027 = vrot.lane.b32.xlu0 %v3026_v9, %s3180_s18  ;;  %v1257_v15 = vsel %vm1130_vm3, %v1225_v27, %v2744_v3  ;;  %v1160_v56 = vsel %vm1130_vm3, %v1127_v60, %v2745_v58  ;;  %v3131_v27 = vld [vmem:[%s3248_s4 + $0x168] sm:$0xff] }
  0xd0   : > { %v2753_v61 = vpop.permute.xlu1 %2752  ;;  %v1233_v53 = vsel %vm1130_vm3, %v1201_v37, %v2739_v32  ;;  %v1136_v47 = vsel %vm1130_vm3, %v1103_v36, %v2740_v40 }
  0xd1   : > { %v2755_v5 = vunpack.i.h.bf16 %v2753_v61  ;;  %v2754_v44 = vunpack.i.l.bf16 %v2753_v61  ;;  %v2748_v55 = vpop.permute.xlu0 %2747 }
  0xd2   : > { %v2750_v35 = vunpack.i.h.bf16 %v2748_v55  ;;  %v2749_v52 = vunpack.i.l.bf16 %v2748_v55  ;;  %3042 = vrot.lane.b32.xlu1 %v3041_v17, %s3180_s18  ;;  %s2366_s18 = sshll.u32 %s5023_s12, 8 }
  0xd3   : > { %3037 = vrot.lane.b32.xlu0 %v3036_v20, %s3181_s23  ;;  %v1289_v10 = vsel %vm1163_vm4, %v1257_v15, %v2754_v44  ;;  %v1193_v11 = vsel %vm1163_vm4, %v1160_v56, %v2755_v5  ;;  %v4996_v20 = vld [vmem:[#allocation18_spill] sm:$0xff]  ;;  %v3132_v44 = vld [vmem:[%s3248_s4 + $0x48] sm:$0xff]  ;;  %s4794_s10 = scalar_lea.vmem %s4904_s3, %s2366_s18 }
  0xd4   : > { %v2763_v46 = vpop.permute.xlu1 %2762  ;;  %v1265_v13 = vsel %vm1163_vm4, %v1233_v53, %v2749_v52  ;;  %1608 = vmatprep.mubr.f32.mxu1 %v1289_v10  ;;  %v1169_v54 = vsel %vm1163_vm4, %v1136_v47, %v2750_v35 }
  0xd5   : > { %v2758_v9 = vpop.permute.xlu0 %2757  ;;  %1488 = vmatprep.mubr.f32.mxu0 %v1265_v13  ;;  %1609 = vmatmul.mubr.f32.gmra.mrb[10].mxu1 %v1193_v11  ;;  %v2765_v48 = vunpack.i.h.bf16 %v2763_v46  ;;  %v2764_v62 = vunpack.i.l.bf16 %v2763_v46 }
  0xd6   : > { %1489 = vmatmul.mubr.f32.gmra.mrb[10].mxu0 %v1169_v54  ;;  %3052 = vrot.lane.b32.xlu1 %v3051_v26, %s3181_s23  ;;  %v2760_v22 = vunpack.i.h.bf16 %v2758_v9  ;;  %v2759_v31 = vunpack.i.l.bf16 %v2758_v9 }
  0xd7   : > { %3047 = vrot.lane.b32.xlu0 %v3046_v39, %s3179_s9  ;;  %v1226_v61 = vsel %vm1097_vm2, %v4996_v20, %v2764_v62  ;;  %v1128_v42 = vsel %vm1097_vm2, %v3131_v27, %v2765_v48 }
  0xd8   : > { %v2773_v23 = vpop.permute.xlu1 %2772  ;;  %v1202_v5 = vsel %vm1097_vm2, %v3757_v41, %v2759_v31  ;;  %v1104_v55 = vsel %vm1097_vm2, %v3132_v44, %v2760_v22 }
  0xd9   : > { %v2768_v29 = vpop.permute.xlu0 %2767  ;;  %v2775_v58 = vunpack.i.h.bf16 %v2773_v23  ;;  %v2774_v3 = vunpack.i.l.bf16 %v2773_v23 }
  0xda   : > { %v2770_v17 = vunpack.i.h.bf16 %v2768_v29  ;;  %v2769_v40 = vunpack.i.l.bf16 %v2768_v29 }
  0xdb   : > { %v1258_v36 = vsel %vm1130_vm3, %v1226_v61, %v2774_v3  ;;  %v1161_v35 = vsel %vm1130_vm3, %v1128_v42, %v2775_v58  ;;  %v4997_v3 = vld [vmem:[#allocation11_spill] sm:$0xff] }
  0xdc   : > { %v2783_v32 = vpop.permute.xlu1 %2782  ;;  %v1234_v52 = vsel %vm1130_vm3, %v1202_v5, %v2769_v40  ;;  %v1137_v56 = vsel %vm1130_vm3, %v1104_v55, %v2770_v17  ;;  %v3133_v40 = vld [vmem:[%s3248_s4 + $0x170] sm:$0xff] }
  0xdd   : > { %v2785_v60 = vunpack.i.h.bf16 %v2783_v32  ;;  %v2784_v39 = vunpack.i.l.bf16 %v2783_v32  ;;  %v2778_v26 = vpop.permute.xlu0 %2777 }
  0xde   : > { %v2780_v37 = vunpack.i.h.bf16 %v2778_v26  ;;  %v2779_v57 = vunpack.i.l.bf16 %v2778_v26 }
  0xdf   : > { %v1290_v15 = vsel %vm1163_vm4, %v1258_v36, %v2784_v39  ;;  %v1194_v53 = vsel %vm1163_vm4, %v1161_v35, %v2785_v60  ;;  %v3134_v60 = vld [vmem:[%s3248_s4 + $0x50] sm:$0xff] }
  0xe0   : > { %v2793_v10 = vpop.permute.xlu1 %2792  ;;  %v1266_v41 = vsel %vm1163_vm4, %v1234_v52, %v2779_v57  ;;  %1613 = vmatprep.mubr.f32.mxu1 %v1290_v15  ;;  %v1170_v47 = vsel %vm1163_vm4, %v1137_v56, %v2780_v37 }
  0xe1   : > { %v2788_v11 = vpop.permute.xlu0 %2787  ;;  %1493 = vmatprep.mubr.f32.mxu0 %v1266_v41  ;;  %1614 = vmatmul.mubr.f32.gmra.mrb[12].mxu1 %v1194_v53  ;;  %v2795_v46 = vunpack.i.h.bf16 %v2793_v10  ;;  %v2794_v13 = vunpack.i.l.bf16 %v2793_v10  ;;  %v4998_v41 = vld [vmem:[#allocation10_spill] sm:$0xff] }
  0xe2   : > { %1494 = vmatmul.mubr.f32.gmra.mrb[12].mxu0 %v1170_v47  ;;  %v2790_v9 = vunpack.i.h.bf16 %v2788_v11  ;;  %v2789_v48 = vunpack.i.l.bf16 %v2788_v11 }
  0xe3   : > { %v1227_v17 = vsel %vm1097_vm2, %v4997_v3, %v2794_v13  ;;  %v1129_v32 = vsel %vm1097_vm2, %v3133_v40, %v2795_v46 }
  0xe4   : > { %v2803_v54 = vpop.permute.xlu1 %2802  ;;  %v1203_v42 = vsel %vm1097_vm2, %v3559_v18, %v2789_v48  ;;  %v1105_v39 = vsel %vm1097_vm2, %v3134_v60, %v2790_v9  ;;  %v5001_v60 = vld [vmem:[#allocation22_spill] sm:$0xff] }
  0xe5   : > { %v2798_v62 = vpop.permute.xlu0 %2797  ;;  %v2805_v23 = vunpack.i.h.bf16 %v2803_v54  ;;  %v2804_v22 = vunpack.i.l.bf16 %v2803_v54  ;;  %v3135_v54 = vld [vmem:[%s3248_s4 + $0x60] sm:$0xff] }
  0xe6   : > { %v2800_v31 = vunpack.i.h.bf16 %v2798_v62  ;;  %v2799_v29 = vunpack.i.l.bf16 %v2798_v62  ;;  %v4999_v62 = vld [vmem:[#allocation14_spill] sm:$0xff] }
  0xe7   : > { %v1259_v44 = vsel %vm1130_vm3, %v1227_v17, %v2804_v22  ;;  %v1162_v55 = vsel %vm1130_vm3, %v1129_v32, %v2805_v23 }
  0xe8   : > { %v2813_v58 = vpop.permute.xlu1 %2812  ;;  %v1235_v37 = vsel %vm1130_vm3, %v1203_v42, %v2799_v29  ;;  %v1138_v36 = vsel %vm1130_vm3, %v1105_v39, %v2800_v31  ;;  %v5002_v39 = vld [vmem:[#allocation15_spill] sm:$0xff] }
  0xe9   : > { %v2815_v20 = vunpack.i.h.bf16 %v2813_v58  ;;  %v2814_v61 = vunpack.i.l.bf16 %v2813_v58  ;;  %v2808_v27 = vpop.permute.xlu0 %2807 }
  0xea   : > { %v2810_v26 = vunpack.i.h.bf16 %v2808_v27  ;;  %v2809_v5 = vunpack.i.l.bf16 %v2808_v27  ;;  %v5000_v27 = vld [vmem:[#allocation20_spill] sm:$0xff] }
  0xeb   : > { %v1291_v57 = vsel %vm1163_vm4, %v1259_v44, %v2814_v61  ;;  %v1195_v35 = vsel %vm1163_vm4, %v1162_v55, %v2815_v20 }
  0xec   : > { %v1267_v18 = vsel %vm1163_vm4, %v1235_v37, %v2809_v5  ;;  %1618 = vmatprep.mubr.f32.mxu1 %v1291_v57  ;;  %v2823_v52 = vpop.permute.xlu1 %2822  ;;  %v1171_v15 = vsel %vm1163_vm4, %v1138_v36, %v2810_v26  ;;  %v3136_v5 = vld [vmem:[%s3248_s4 + $0x68] sm:$0xff] }
  0xed   : > { %v2818_v56 = vpop.permute.xlu0 %2817  ;;  %1498 = vmatprep.mubr.f32.mxu0 %v1267_v18  ;;  %1619 = vmatmul.mubr.f32.gmra.mrb[14].mxu1 %v1195_v35  ;;  %v2825_v47 = vunpack.i.h.bf16 %v2823_v52  ;;  %v2824_v11 = vunpack.i.l.bf16 %v2823_v52  ;;  %v5003_v18 = vld [vmem:[#allocation24_spill] sm:$0xff] }
  0xee   : > { %v2820_v53 = vunpack.i.h.bf16 %v2818_v56  ;;  %v2819_v10 = vunpack.i.l.bf16 %v2818_v56  ;;  %1499 = vmatmul.mubr.f32.gmra.mrb[14].mxu0 %v1171_v15  ;;  %2411 = vmatprep.mubr.msk.f32.mxu1 %vm1097_vm2, %v4998_v41 }
  0xf0   : > { %v2833_v46 = vpop.permute.xlu1 %2832  ;;  %v1204_v13 = vsel %vm1097_vm2, %v3873_v34, %v2819_v10  ;;  %v1106_v9 = vsel %vm1097_vm2, %v3135_v54, %v2820_v53  ;;  %v5004_v53 = vld [vmem:[#allocation25_spill] sm:$0xff] }
  0xf1   : > { %v2828_v48 = vpop.permute.xlu0 %2827  ;;  %2412 = vmatmul.mubr.msk.f32.vlgmr.msra.gmra.mrb[16].mxu1 %vm1097_vm2, %v4999_v62  ;;  %v2835_v31 = vunpack.i.h.bf16 %v2833_v46  ;;  %v2834_v29 = vunpack.i.l.bf16 %v2833_v46  ;;  %v1236_v58 = vsel %vm1130_vm3, %v1204_v13, %v2824_v11  ;;  %v1139_v3 = vsel %vm1130_vm3, %v1106_v9, %v2825_v47  ;;  %v5005_v11 = vld [vmem:[#allocation27_spill] sm:$0xff]  ;;  %v3137_v13 = vld [vmem:[%s3248_s4 + $0x78] sm:$0xff] }
  0xf2   : > { %v2830_v23 = vunpack.i.h.bf16 %v2828_v48  ;;  %v2829_v22 = vunpack.i.l.bf16 %v2828_v48  ;;  %2414 = vmatprep.mubr.msk.f32.mxu1 %vm1097_vm2, %v3684_v43  ;;  %v5006_v48 = vld [vmem:[#allocation26_spill] sm:$0xff] }
  0xf3   : > { %v1205_v26 = vsel %vm1097_vm2, %v5002_v39, %v2834_v29  ;;  %v1107_v44 = vsel %vm1097_vm2, %v3136_v5, %v2835_v31 }
  0xf4   : > { %v1268_v34 = vsel %vm1163_vm4, %v1236_v58, %v2829_v22  ;;  %v2843_v17 = vpop.permute.xlu1 %2842  ;;  %v1172_v40 = vsel %vm1163_vm4, %v1139_v3, %v2830_v23  ;;  %v5007_v22 = vld [vmem:[#allocation28_spill] sm:$0xff] }
  0xf5   : > { %v2838_v32 = vpop.permute.xlu0 %2837  ;;  %1503 = vmatprep.mubr.f32.mxu0 %v1268_v34  ;;  %v2845_v20 = vunpack.i.h.bf16 %v2843_v17  ;;  %v2844_v61 = vunpack.i.l.bf16 %v2843_v17  ;;  %2415 = vmatmul.mubr.msk.f32.gmra.mrb[18].mxu1 %vm1097_vm2, %v5000_v27  ;;  %v5008_v27 = vld [vmem:[#allocation29_spill] sm:$0xff] }
  0xf6   : > { %v2840_v43 = vunpack.i.h.bf16 %v2838_v32  ;;  %v2839_v42 = vunpack.i.l.bf16 %v2838_v32  ;;  %1504 = vmatmul.mubr.f32.gmra.mrb[16].mxu0 %v1172_v40  ;;  %2417 = vmatprep.mubr.msk.f32.mxu1 %vm1097_vm2, %v5001_v60  ;;  %v5009_v60 = vld [vmem:[#allocation16_spill] sm:$0xff] }
  0xf8   : > { %v2853_v55 = vpop.permute.xlu1 %2852  ;;  %v1237_v37 = vsel %vm1130_vm3, %v1205_v26, %v2839_v42  ;;  %v1140_v57 = vsel %vm1130_vm3, %v1107_v44, %v2840_v43  ;;  %v3138_v26 = vld [vmem:[%s3248_s4 + $0x80] sm:$0xff] }
  0xf9   : > { %v2848_v36 = vpop.permute.xlu0 %2847  ;;  %v1269_v35 = vsel %vm1163_vm4, %v1237_v37, %v2844_v61  ;;  %2418 = vmatmul.mubr.msk.f32.gmra.mrb[20].mxu1 %vm1097_vm2, %v5003_v18  ;;  %v1173_v52 = vsel %vm1163_vm4, %v1140_v57, %v2845_v20  ;;  %v2855_v10 = vunpack.i.h.bf16 %v2853_v55  ;;  %v2854_v41 = vunpack.i.l.bf16 %v2853_v55 }
  0xfa   : > { %v2850_v15 = vunpack.i.h.bf16 %v2848_v36  ;;  %v2849_v56 = vunpack.i.l.bf16 %v2848_v36  ;;  %1508 = vmatprep.mubr.f32.mxu0 %v1269_v35  ;;  %2420 = vmatprep.mubr.msk.f32.mxu1 %vm1097_vm2, %v5004_v53 }
  0xfb   : > { %1509 = vmatmul.mubr.f32.gmra.mrb[18].mxu0 %v1173_v52 }
  0xfc   : > { %v2863_v47 = vpop.permute.xlu1 %2862  ;;  %v1206_v46 = vsel %vm1097_vm2, %v5005_v11, %v2849_v56  ;;  %v1108_v54 = vsel %vm1097_vm2, %v3137_v13, %v2850_v15 }
  0xfd   : > { %v2858_v9 = vpop.permute.xlu0 %2857  ;;  %2421 = vmatmul.mubr.msk.f32.gmra.mrb[22].mxu1 %vm1097_vm2, %v5006_v48  ;;  %v2865_v31 = vunpack.i.h.bf16 %v2863_v47  ;;  %v2864_v29 = vunpack.i.l.bf16 %v2863_v47  ;;  %v1238_v58 = vsel %vm1130_vm3, %v1206_v46, %v2854_v41  ;;  %v1141_v3 = vsel %vm1130_vm3, %v1108_v54, %v2855_v10  ;;  %v3139_v10 = vld [vmem:[%s3248_s4 + $0x90] sm:$0xff] }
  0xfe   : > { %v2860_v62 = vunpack.i.h.bf16 %v2858_v9  ;;  %v2859_v23 = vunpack.i.l.bf16 %v2858_v9  ;;  %2423 = vmatprep.mubr.msk.f32.mxu1 %vm1097_vm2, %v5007_v22 }
  0xff   : > { %v1207_v39 = vsel %vm1097_vm2, %v5009_v60, %v2864_v29  ;;  %v1109_v5 = vsel %vm1097_vm2, %v3138_v26, %v2865_v31  ;;  %v3140_v29 = vld [vmem:[%s3248_s4 + $0x98] sm:$0xff] }
 0x100   : > { %v1270_v34 = vsel %vm1163_vm4, %v1238_v58, %v2859_v23  ;;  %v2873_v17 = vpop.permute.xlu1 %2872  ;;  %v1174_v40 = vsel %vm1163_vm4, %v1141_v3, %v2860_v62 }
 0x101   : > { %v2868_v32 = vpop.permute.xlu0 %2867  ;;  %1513 = vmatprep.mubr.f32.mxu0 %v1270_v34  ;;  %v2875_v20 = vunpack.i.h.bf16 %v2873_v17  ;;  %v2874_v61 = vunpack.i.l.bf16 %v2873_v17  ;;  %2424 = vmatmul.mubr.msk.f32.gmra.mrb[24].mxu1 %vm1097_vm2, %v5008_v27 }
 0x102   : > { %v2870_v43 = vunpack.i.h.bf16 %v2868_v32  ;;  %v2869_v42 = vunpack.i.l.bf16 %v2868_v32  ;;  %1514 = vmatmul.mubr.f32.gmra.mrb[20].mxu0 %v1174_v40  ;;  %2426 = vmatprep.mubr.msk.f32.mxu1 %vm1097_vm2, %v3985_v1 }
 0x104   : > { %v2883_v44 = vpop.permute.xlu1 %2882  ;;  %v1239_v55 = vsel %vm1130_vm3, %v1207_v39, %v2869_v42  ;;  %v1142_v37 = vsel %vm1130_vm3, %v1109_v5, %v2870_v43  ;;  %v3141_v42 = vld [vmem:[%s3248_s4 + $0xa8] sm:$0xff] }
 0x105   : > { %v2878_v57 = vpop.permute.xlu0 %2877  ;;  %v1271_v36 = vsel %vm1163_vm4, %v1239_v55, %v2874_v61  ;;  %2427 = vmatmul.mubr.msk.f32.gmra.mrb[26].mxu1 %vm1097_vm2, %v3992_v28  ;;  %v1175_v1 = vsel %vm1163_vm4, %v1142_v37, %v2875_v20  ;;  %v2885_v52 = vunpack.i.h.bf16 %v2883_v44  ;;  %v2884_v15 = vunpack.i.l.bf16 %v2883_v44 }
 0x106   : > { %v2880_v35 = vunpack.i.h.bf16 %v2878_v57  ;;  %v2879_v18 = vunpack.i.l.bf16 %v2878_v57  ;;  %1518 = vmatprep.mubr.f32.mxu0 %v1271_v36  ;;  %2429 = vmatprep.mubr.msk.f32.mxu1 %vm1097_vm2, %v4044_v4 }
 0x107   : > { %1519 = vmatmul.mubr.f32.gmra.mrb[22].mxu0 %v1175_v1 }
 0x108   : > { %v2893_v56 = vpop.permute.xlu1 %2892  ;;  %v1208_v53 = vsel %vm1097_vm2, %v3965_v30, %v2879_v18  ;;  %v1110_v41 = vsel %vm1097_vm2, %v3139_v10, %v2880_v35  ;;  %v5010_v18 = vld [vmem:[#allocation4_spill] sm:$0xff] }
 0x109   : > { %v2888_v47 = vpop.permute.xlu0 %2887  ;;  %2430 = vmatmul.mubr.msk.f32.gmra.mrb[28].mxu1 %vm1097_vm2, %v4053_v50  ;;  %v2895_v4 = vunpack.i.h.bf16 %v2893_v56  ;;  %v2894_v46 = vunpack.i.l.bf16 %v2893_v56  ;;  %v1240_v13 = vsel %vm1130_vm3, %v1208_v53, %v2884_v15  ;;  %v1143_v54 = vsel %vm1130_vm3, %v1110_v41, %v2885_v52  ;;  %v3142_v15 = vld [vmem:[%s3248_s4 + $0xb0] sm:$0xff] }
 0x10a   : > { %v2890_v28 = vunpack.i.h.bf16 %v2888_v47  ;;  %v2889_v11 = vunpack.i.l.bf16 %v2888_v47  ;;  %2432 = vmatprep.mubr.msk.f32.mxu1 %vm1097_vm2, %v4096_v21 }
 0x10b   : > { %v1209_v31 = vsel %vm1097_vm2, %v3708_v51, %v2894_v46  ;;  %v1111_v58 = vsel %vm1097_vm2, %v3140_v29, %v2895_v4  ;;  %v5012_v46 = vld [vmem:[#allocation9_spill] sm:$0xff] }
 0x10c   : > { %v1272_v30 = vsel %vm1163_vm4, %v1240_v13, %v2889_v11  ;;  %v2903_v9 = vpop.permute.xlu1 %2902  ;;  %v1176_v48 = vsel %vm1163_vm4, %v1143_v54, %v2890_v28  ;;  %v5011_v28 = vld [vmem:[#allocation6_spill] sm:$0xff]  ;;  %v3144_v29 = vld [vmem:[%s3248_s4 + $0x198] sm:$0xff] }
 0x10d   : > { %v2898_v62 = vpop.permute.xlu0 %2897  ;;  %1523 = vmatprep.mubr.f32.mxu0 %v1272_v30  ;;  %v2905_v50 = vunpack.i.h.bf16 %v2903_v9  ;;  %v2904_v23 = vunpack.i.l.bf16 %v2903_v9  ;;  %2433 = vmatmul.mubr.msk.f32.gmra.mrb[30].mxu1 %vm1097_vm2, %v4106_v6 }
 0x10e   : > { %v2900_v21 = vunpack.i.h.bf16 %v2898_v62  ;;  %v2899_v22 = vunpack.i.l.bf16 %v2898_v62  ;;  %1524 = vmatmul.mubr.f32.gmra.mrb[24].mxu0 %v1176_v48  ;;  %2435 = vmatprep.mubr.msk.f32.mxu1 %vm1097_vm2, %v4151_v45  ;;  %v3143_v48 = vld [vmem:[%s3248_s4 + $0xc0] sm:$0xff] }
 0x110   : > { %v2913_v3 = vpop.permute.xlu1 %2912  ;;  %v1241_v34 = vsel %vm1130_vm3, %v1209_v31, %v2899_v22  ;;  %v1144_v17 = vsel %vm1130_vm3, %v1111_v58, %v2900_v21  ;;  %v5014_v31 = vld [vmem:[#allocation17_spill] sm:$0xff]  ;;  %v516_v58 = vrot.slane %v3144_v29, 2 }
 0x111   : > { %v2908_v40 = vpop.permute.xlu0 %2907  ;;  %v1273_v6 = vsel %vm1163_vm4, %v1241_v34, %v2904_v23  ;;  %2436 = vmatmul.mubr.msk.f32.gmra.mrb[32].mxu1 %vm1097_vm2, %v4161_v8  ;;  %v1177_v45 = vsel %vm1163_vm4, %v1144_v17, %v2905_v50  ;;  %v2915_v51 = vunpack.i.h.bf16 %v2913_v3  ;;  %v2914_v61 = vunpack.i.l.bf16 %v2913_v3  ;;  %v5013_v23 = vld [vmem:[#allocation13_spill] sm:$0xff]  ;;  %v3145_v3 = vld [vmem:[%s3248_s4 + $0x1a0] sm:$0xff] }
 0x112   : > { %v2910_v32 = vunpack.i.h.bf16 %v2908_v40  ;;  %v2909_v20 = vunpack.i.l.bf16 %v2908_v40  ;;  %1528 = vmatprep.mubr.f32.mxu0 %v1273_v6  ;;  %2438 = vmatprep.mubr.msk.f32.mxu1 %vm1097_vm2, %v4203_v19  ;;  %v517_v34 = vrot.slane %v3145_v3, 2 }
 0x113   : > { %1529 = vmatmul.mubr.f32.gmra.mrb[26].mxu0 %v1177_v45 }
 0x114   : > { %v2923_v27 = vpop.permute.xlu1 %2922  ;;  %v1210_v43 = vsel %vm1097_vm2, %v4000_v33, %v2909_v20  ;;  %v1112_v60 = vsel %vm1097_vm2, %v3141_v42, %v2910_v32 }
 0x115   : > { %v2918_v39 = vpop.permute.xlu0 %2917  ;;  %2439 = vmatmul.mubr.msk.f32.gmra.mrb[34].mxu1 %vm1097_vm2, %v4215_v38  ;;  %v2925_v19 = vunpack.i.h.bf16 %v2923_v27  ;;  %v2924_v5 = vunpack.i.l.bf16 %v2923_v27  ;;  %v1242_v44 = vsel %vm1130_vm3, %v1210_v43, %v2914_v61  ;;  %v1145_v55 = vsel %vm1130_vm3, %v1112_v60, %v2915_v51  ;;  %v5015_v43 = vld [vmem:[#allocation19_spill] sm:$0xff] }
 0x116   : > { %v2920_v8 = vunpack.i.h.bf16 %v2918_v39  ;;  %v2919_v26 = vunpack.i.l.bf16 %v2918_v39  ;;  %2441 = vmatprep.mubr.msk.f32.mxu1 %vm1097_vm2, %v4994_v63  ;;  %v5016_v39 = vld [vmem:[#allocation21_spill] sm:$0xff] }
 0x117   : > { %v1211_v52 = vsel %vm1097_vm2, %v3752_v0, %v2924_v5  ;;  %v1113_v56 = vsel %vm1097_vm2, %v3142_v15, %v2925_v19  ;;  %v3147_v5 = vld [vmem:[%s3248_s4 + $0xc8] sm:$0xff] }
 0x118   : > { %v1274_v33 = vsel %vm1163_vm4, %v1242_v44, %v2919_v26  ;;  %v2933_v37 = vpop.permute.xlu1 %2932  ;;  %v1178_v57 = vsel %vm1163_vm4, %v1145_v55, %v2920_v8  ;;  %v3146_v8 = vld [vmem:[%s3248_s4 + $0x1a8] sm:$0x3]  ;;  %v518_v55 = vsel %vm382_vm0, %v516_v58, %v517_v34 }
 0x119   : > { %v2928_v36 = vpop.permute.xlu0 %2927  ;;  %1533 = vmatprep.mubr.f32.mxu0 %v1274_v33  ;;  %v2935_v38 = vunpack.i.h.bf16 %v2933_v37  ;;  %v2934_v1 = vunpack.i.l.bf16 %v2933_v37  ;;  %2442 = vmatmul.mubr.msk.f32.gmra.mrb[36].mxu1 %vm1097_vm2, %v4995_v12  ;;  %v519_v26 = vrot.slane %v3146_v8, 2 }
 0x11a   : > { %v2930_v63 = vunpack.i.h.bf16 %v2928_v36  ;;  %v2929_v35 = vunpack.i.l.bf16 %v2928_v36  ;;  %1534 = vmatmul.mubr.f32.gmra.mrb[28].mxu0 %v1178_v57  ;;  %2444 = vmatprep.mubr.msk.f32.mxu1 %vm1097_vm2, %v5010_v18 }
 0x11b   : > { %v520_v18 = vsel %vm382_vm0, %v517_v34, %v519_v26 }
 0x11c   : > { %v2943_v53 = vpop.permute.xlu1 %2942  ;;  %v1243_v10 = vsel %vm1130_vm3, %v1211_v52, %v2929_v35  ;;  %v1146_v41 = vsel %vm1130_vm3, %v1113_v56, %v2930_v63 }
 0x11d   : > { %v2938_v47 = vpop.permute.xlu0 %2937  ;;  %v1275_v12 = vsel %vm1163_vm4, %v1243_v10, %v2934_v1  ;;  %2445 = vmatmul.mubr.msk.f32.gmra.mrb[38].mxu1 %vm1097_vm2, %v5011_v28  ;;  %v1179_v11 = vsel %vm1163_vm4, %v1146_v41, %v2935_v38  ;;  %v2945_v13 = vunpack.i.h.bf16 %v2943_v53  ;;  %v2944_v54 = vunpack.i.l.bf16 %v2943_v53  ;;  %v5017_v1 = vld [vmem:[#allocation23_spill] sm:$0xff]  ;;  %v3148_v10 = vld [vmem:[%s3248_s4 + $0xd8] sm:$0xff] }
 0x11e   : > { %v2940_v4 = vunpack.i.h.bf16 %v2938_v47  ;;  %v2939_v0 = vunpack.i.l.bf16 %v2938_v47  ;;  %1538 = vmatprep.mubr.f32.mxu0 %v1275_v12  ;;  %2447 = vmatprep.mubr.msk.f32.mxu1 %vm1097_vm2, %v5012_v46 }
 0x11f   : > { %1539 = vmatmul.mubr.f32.gmra.mrb[30].mxu0 %v1179_v11 }
 0x120   : > { %v2953_v30 = vpop.permute.xlu1 %2952  ;;  %v1212_v9 = vsel %vm1097_vm2, %v4059_v16, %v2939_v0  ;;  %v1114_v62 = vsel %vm1097_vm2, %v3143_v48, %v2940_v4 }
 0x121   : > { %v2948_v50 = vpop.permute.xlu0 %2947  ;;  %2448 = vmatmul.mubr.msk.f32.gmra.mrb[40].mxu1 %vm1097_vm2, %v5013_v23  ;;  %v2955_v17 = vunpack.i.h.bf16 %v2953_v30  ;;  %v2954_v40 = vunpack.i.l.bf16 %v2953_v30  ;;  %v1244_v16 = vsel %vm1130_vm3, %v1212_v9, %v2944_v54  ;;  %v1147_v6 = vsel %vm1130_vm3, %v1114_v62, %v2945_v13 }
 0x122   : > { %v2950_v21 = vunpack.i.h.bf16 %v2948_v50  ;;  %v2949_v22 = vunpack.i.l.bf16 %v2948_v50  ;;  %2450 = vmatprep.mubr.msk.f32.mxu1 %vm1097_vm2, %v5014_v31 }
 0x123   : > { %v1213_v19 = vsel %vm1097_vm2, %v3790_v59, %v2954_v40  ;;  %v1115_v44 = vsel %vm1097_vm2, %v3147_v5, %v2955_v17 }
 0x124   : > { %v1276_v45 = vsel %vm1163_vm4, %v1244_v16, %v2949_v22  ;;  %v2963_v32 = vpop.permute.xlu1 %2962  ;;  %v1180_v20 = vsel %vm1163_vm4, %v1147_v6, %v2950_v21  ;;  %v3149_v21 = vld [vmem:[%s3248_s4 + $0xe0] sm:$0xff] }
 0x125   : > { %v2958_v51 = vpop.permute.xlu0 %2957  ;;  %1543 = vmatprep.mubr.f32.mxu0 %v1276_v45  ;;  %v2965_v61 = vunpack.i.h.bf16 %v2963_v32  ;;  %v2964_v27 = vunpack.i.l.bf16 %v2963_v32  ;;  %2451 = vmatmul.mubr.msk.f32.gmra.mrb[42].mxu1 %vm1097_vm2, %v5015_v43 }
 0x126   : > { %v2960_v42 = vunpack.i.h.bf16 %v2958_v51  ;;  %v2959_v60 = vunpack.i.l.bf16 %v2958_v51  ;;  %1544 = vmatmul.mubr.f32.gmra.mrb[32].mxu0 %v1180_v20  ;;  %2453 = vmatprep.mubr.msk.f32.mxu1 %vm1097_vm2, %v5016_v39  ;;  %v3150_v20 = vld [vmem:[%s3248_s4 + $0xf0] sm:$0xff] }
 0x128   : > { %v2973_v33 = vpop.permute.xlu1 %2972  ;;  %v1245_v37 = vsel %vm1130_vm3, %v1213_v19, %v2959_v60  ;;  %v1148_v57 = vsel %vm1130_vm3, %v1115_v44, %v2960_v42 }
 0x129   : > { %v2968_v36 = vpop.permute.xlu0 %2967  ;;  %v1277_v38 = vsel %vm1163_vm4, %v1245_v37, %v2964_v27  ;;  %2454 = vmatmul.mubr.msk.f32.gmra.mrb[44].mxu1 %vm1097_vm2, %v5017_v1  ;;  %v1181_v63 = vsel %vm1163_vm4, %v1148_v57, %v2965_v61  ;;  %v2975_v52 = vunpack.i.h.bf16 %v2973_v33  ;;  %v2974_v15 = vunpack.i.l.bf16 %v2973_v33 }
 0x12a   : > { %v2970_v59 = vunpack.i.h.bf16 %v2968_v36  ;;  %v2969_v35 = vunpack.i.l.bf16 %v2968_v36  ;;  %1548 = vmatprep.mubr.f32.mxu0 %v1277_v38  ;;  %2456 = vmatprep.mubr.msk.f32.mxu1 %vm1097_vm2, %v518_v55  ;;  %v3151_v36 = vld [vmem:[%s3248_s4 + $0xf8] sm:$0xff] }
 0x12b   : > { %1549 = vmatmul.mubr.f32.gmra.mrb[34].mxu0 %v1181_v63 }
 0x12c   : > { %v2983_v56 = vpop.permute.xlu1 %2982  ;;  %v1214_v53 = vsel %vm1097_vm2, %v4111_v25, %v2969_v35  ;;  %v1116_v41 = vsel %vm1097_vm2, %v3148_v10, %v2970_v59 }
 0x12d   : > { %v2978_v47 = vpop.permute.xlu0 %2977  ;;  %2457 = vmatmul.mubr.msk.f32.gmra.mrb[46].mxu1 %vm1097_vm2, %v520_v18  ;;  %v2985_v11 = vunpack.i.h.bf16 %v2983_v56  ;;  %v2984_v4 = vunpack.i.l.bf16 %v2983_v56  ;;  %v1246_v0 = vsel %vm1130_vm3, %v1214_v53, %v2974_v15  ;;  %v1149_v46 = vsel %vm1130_vm3, %v1116_v41, %v2975_v52 }
 0x12e   : > { %v2980_v12 = vunpack.i.h.bf16 %v2978_v47  ;;  %v2979_v28 = vunpack.i.l.bf16 %v2978_v47  ;;  %v3152_v47 = vld [vmem:[%s3248_s4 + $0x108] sm:$0xff] }
 0x12f   : > { %v1215_v23 = vsel %vm1097_vm2, %v3822_v14, %v2984_v4  ;;  %v1117_v22 = vsel %vm1097_vm2, %v3149_v21, %v2985_v11 }
 0x130   : > { %v1278_v13 = vsel %vm1163_vm4, %v1246_v0, %v2979_v28  ;;  %v2993_v54 = vpop.permute.xlu1 %2992  ;;  %v1182_v25 = vsel %vm1163_vm4, %v1149_v46, %v2980_v12 }
 0x131   : > { %v2988_v30 = vpop.permute.xlu0 %2987  ;;  %1553 = vmatprep.mubr.f32.mxu0 %v1278_v13  ;;  %v2995_v9 = vunpack.i.h.bf16 %v2993_v54  ;;  %v2994_v48 = vunpack.i.l.bf16 %v2993_v54 }
 0x132   : > { %v2990_v62 = vunpack.i.h.bf16 %v2988_v30  ;;  %v2989_v50 = vunpack.i.l.bf16 %v2988_v30  ;;  %1554 = vmatmul.mubr.f32.gmra.mrb[36].mxu0 %v1182_v25 }
 0x134   : > { %v3003_v31 = vpop.permute.xlu1 %3002  ;;  %v1247_v29 = vsel %vm1130_vm3, %v1215_v23, %v2989_v50  ;;  %v1150_v58 = vsel %vm1130_vm3, %v1117_v22, %v2990_v62  ;;  %v3153_v22 = vld [vmem:[%s3248_s4 + $0x110] sm:$0xff] }
 0x135   : > { %v2998_v3 = vpop.permute.xlu0 %2997  ;;  %v1279_v34 = vsel %vm1163_vm4, %v1247_v29, %v2994_v48  ;;  %v1183_v17 = vsel %vm1163_vm4, %v1150_v58, %v2995_v9  ;;  %v3005_v6 = vunpack.i.h.bf16 %v3003_v31  ;;  %v3004_v45 = vunpack.i.l.bf16 %v3003_v31 }
 0x136   : > { %v3000_v40 = vunpack.i.h.bf16 %v2998_v3  ;;  %v2999_v16 = vunpack.i.l.bf16 %v2998_v3  ;;  %1558 = vmatprep.mubr.f32.mxu0 %v1279_v34 }
 0x137   : > { %1559 = vmatmul.mubr.f32.gmra.mrb[38].mxu0 %v1183_v17 }
 0x138   : > { %v3013_v14 = vpop.permute.xlu1 %3012  ;;  %v1216_v32 = vsel %vm1097_vm2, %v4166_v24, %v2999_v16  ;;  %v1118_v51 = vsel %vm1097_vm2, %v3150_v20, %v3000_v40 }
 0x139   : > { %v3008_v61 = vpop.permute.xlu0 %3007  ;;  %v3015_v42 = vunpack.i.h.bf16 %v3013_v14  ;;  %v3014_v60 = vunpack.i.l.bf16 %v3013_v14  ;;  %v1248_v39 = vsel %vm1130_vm3, %v1216_v32, %v3004_v45  ;;  %v1151_v8 = vsel %vm1130_vm3, %v1118_v51, %v3005_v6 }
 0x13a   : > { %v3010_v27 = vunpack.i.h.bf16 %v3008_v61  ;;  %v3009_v43 = vunpack.i.l.bf16 %v3008_v61 }
 0x13b   : > { %v1217_v57 = vsel %vm1097_vm2, %v3839_v2, %v3014_v60  ;;  %v1119_v38 = vsel %vm1097_vm2, %v3151_v36, %v3015_v42 }
 0x13c   : > { %v1280_v26 = vsel %vm1163_vm4, %v1248_v39, %v3009_v43  ;;  %v3023_v19 = vpop.permute.xlu1 %3022  ;;  %v1184_v5 = vsel %vm1163_vm4, %v1151_v8, %v3010_v27 }
 0x13d   : > { %v3018_v44 = vpop.permute.xlu0 %3017  ;;  %1563 = vmatprep.mubr.f32.mxu0 %v1280_v26  ;;  %v3025_v24 = vunpack.i.h.bf16 %v3023_v19  ;;  %v3024_v55 = vunpack.i.l.bf16 %v3023_v19 }
 0x13e   : > { %v3020_v33 = vunpack.i.h.bf16 %v3018_v44  ;;  %v3019_v37 = vunpack.i.l.bf16 %v3018_v44  ;;  %1564 = vmatmul.mubr.f32.gmra.mrb[40].mxu0 %v1184_v5 }
 0x140   : > { %v3033_v1 = vpop.permute.xlu1 %3032  ;;  %v1249_v63 = vsel %vm1130_vm3, %v1217_v57, %v3019_v37  ;;  %v1152_v59 = vsel %vm1130_vm3, %v1119_v38, %v3020_v33 }
 0x141   : > { %v3028_v35 = vpop.permute.xlu0 %3027  ;;  %v1281_v18 = vsel %vm1163_vm4, %v1249_v63, %v3024_v55  ;;  %v1185_v52 = vsel %vm1163_vm4, %v1152_v59, %v3025_v24  ;;  %v3035_v53 = vunpack.i.h.bf16 %v3033_v1  ;;  %v3034_v10 = vunpack.i.l.bf16 %v3033_v1  ;;  %v4530_v63 = vld [vmem:[%s4903_s2] ss:$0 sm:$0xff] }
 0x142   : > { %v3030_v15 = vunpack.i.h.bf16 %v3028_v35  ;;  %v3029_v56 = vunpack.i.l.bf16 %v3028_v35  ;;  %1568 = vmatprep.mubr.f32.mxu0 %v1281_v18 }
 0x143   : > { %1569 = vmatmul.mubr.f32.gmra.mrb[42].mxu0 %v1185_v52 }
 0x144   : > { %v3043_v2 = vpop.permute.xlu1 %3042  ;;  %v1218_v41 = vsel %vm1097_vm2, %v4991_v49, %v3029_v56  ;;  %v1120_v12 = vsel %vm1097_vm2, %v3152_v47, %v3030_v15 }
 0x145   : > { %v3038_v28 = vpop.permute.xlu0 %3037  ;;  %v3045_v0 = vunpack.i.h.bf16 %v3043_v2  ;;  %v3044_v46 = vunpack.i.l.bf16 %v3043_v2  ;;  %v1250_v13 = vsel %vm1130_vm3, %v1218_v41, %v3034_v10  ;;  %v1153_v54 = vsel %vm1130_vm3, %v1120_v12, %v3035_v53 }
 0x146   : > { %v3040_v11 = vunpack.i.h.bf16 %v3038_v28  ;;  %v3039_v4 = vunpack.i.l.bf16 %v3038_v28 }
 0x147   : > { %v1219_v21 = vsel %vm1097_vm2, %v4992_v7, %v3044_v46  ;;  %v1121_v31 = vsel %vm1097_vm2, %v3153_v22, %v3045_v0 }
 0x148   : > { %v1282_v25 = vsel %vm1163_vm4, %v1250_v13, %v3039_v4  ;;  %v3053_v30 = vpop.permute.xlu1 %3052  ;;  %v1186_v9 = vsel %vm1163_vm4, %v1153_v54, %v3040_v11 }
 0x149   : > { %v3048_v48 = vpop.permute.xlu0 %3047  ;;  %1573 = vmatprep.mubr.f32.mxu0 %v1282_v25  ;;  %v3055_v49 = vunpack.i.h.bf16 %v3053_v30  ;;  %v3054_v62 = vunpack.i.l.bf16 %v3053_v30 }
 0x14a   : > { %v3050_v50 = vunpack.i.h.bf16 %v3048_v48  ;;  %v3049_v23 = vunpack.i.l.bf16 %v3048_v48  ;;  %1574 = vmatmul.mubr.f32.gmra.mrb[44].mxu0 %v1186_v9 }
 0x14c   : > { %v1251_v29 = vsel %vm1130_vm3, %v1219_v21, %v3049_v23  ;;  %v1154_v58 = vsel %vm1130_vm3, %v1121_v31, %v3050_v50 }
 0x14d   : > { %v1283_v3 = vsel %vm1163_vm4, %v1251_v29, %v3054_v62  ;;  %v1187_v34 = vsel %vm1163_vm4, %v1154_v58, %v3055_v49 }
 0x14e   : > { %1578 = vmatprep.mubr.f32.mxu0 %v1283_v3 }
 0x14f   : > { %1579 = vmatmul.mubr.f32.gmra.mrb[46].mxu0 %v1187_v34 }
 0x16c   : > { %v4511_v17 = vpop.f32.mrb[0].mxu1 }
 0x16d   : > { %v1465_v40 = vpop.f32.mrb[0].mxu0  ;;  %v1587_v16 = vpop.f32.mrb[1].mxu1 }
 0x16e   : > { %v1467_v6 = vpop.f32.mrb[1].mxu0  ;;  %v1466_v15 = vadd.f32 %v4530_v63, %v1465_v40 }
 0x178   : > { %v4513_v45 = vpop.f32.mrb[2].mxu1 }
 0x179   : > { %v1470_v7 = vpop.f32.mrb[2].mxu0  ;;  %v1592_v14 = vpop.f32.mrb[3].mxu1 }
 0x17a   : > { %v1472_v32 = vpop.f32.mrb[3].mxu0  ;;  %v1471_v52 = vadd.f32 %v4530_v63, %v1470_v7 }
 0x184   : > { %v4515_v20 = vpop.f32.mrb[4].mxu1 }
 0x185   : > { %v1475_v51 = vpop.f32.mrb[4].mxu0  ;;  %v1597_v61 = vpop.f32.mrb[5].mxu1 }
 0x186   : > { %v1477_v27 = vpop.f32.mrb[5].mxu0  ;;  %v1476_v12 = vadd.f32 %v4530_v63, %v1475_v51 }
 0x190   : > { %v4517_v43 = vpop.f32.mrb[6].mxu1 }
 0x191   : > { %v1480_v42 = vpop.f32.mrb[6].mxu0  ;;  %v1602_v60 = vpop.f32.mrb[7].mxu1 }
 0x192   : > { %v1482_v39 = vpop.f32.mrb[7].mxu0  ;;  %v1481_v41 = vadd.f32 %v4530_v63, %v1480_v42 }
 0x19c   : > { %v4519_v8 = vpop.f32.mrb[8].mxu1 }
 0x19d   : > { %v1485_v26 = vpop.f32.mrb[8].mxu0  ;;  %v1607_v19 = vpop.f32.mrb[9].mxu1 }
 0x19e   : > { %v1487_v5 = vpop.f32.mrb[9].mxu0  ;;  %v1486_v50 = vadd.f32 %v4530_v63, %v1485_v26 }
 0x1a8   : > { %v4521_v44 = vpop.f32.mrb[10].mxu1 }
 0x1a9   : > { %v1490_v24 = vpop.f32.mrb[10].mxu0  ;;  %v1612_v55 = vpop.f32.mrb[11].mxu1 }
 0x1aa   : > { %v1492_v33 = vpop.f32.mrb[11].mxu0  ;;  %v1491_v48 = vadd.f32 %v4530_v63, %v1490_v24 }
 0x1b4   : > { %v4523_v37 = vpop.f32.mrb[12].mxu1 }
 0x1b5   : > { %v1495_v57 = vpop.f32.mrb[12].mxu0  ;;  %v1617_v36 = vpop.f32.mrb[13].mxu1 }
 0x1b6   : > { %v1497_v38 = vpop.f32.mrb[13].mxu0  ;;  %v1496_v51 = vadd.f32 %v4530_v63, %v1495_v57 }
 0x1c0   : > { %v4525_v1 = vpop.f32.mrb[14].mxu1 }
 0x1c1   : > { %v1500_v59 = vpop.f32.mrb[14].mxu0  ;;  %v1622_v35 = vpop.f32.mrb[15].mxu1 }
 0x1c2   : > { %v1502_v18 = vpop.f32.mrb[15].mxu0  ;;  %v1501_v7 = vadd.f32 %v4530_v63, %v1500_v59 }
 0x1c4   : > { %v2413_v56 = vpop.f32.mrb[16].mxu1 }
 0x1c5   : > { %v1696_v53 = vadd.f32 %v2413_v56, %v1471_v52  ;;  %v1690_v10 = vpop.f32.mrb[17].mxu1 }
 0x1c6   : > { %v1691_v2 = vadd.f32 %v1690_v10, %v1466_v15 }
 0x1c7   : > { %vm1850_vm5 = vcmp.ge.f32.partialorder %v1696_v53, 0.0  ;;  %v1882_v47 = vmul.f32 0.2, %v1696_v53 }
 0x1c8   : > { %vm1849_vm6 = vcmp.ge.f32.partialorder %v1691_v2, 0.0  ;;  %v1881_v28 = vmul.f32 0.2, %v1691_v2  ;;  %v2416_v11 = vpop.f32.mrb[18].mxu1 }
 0x1c9   : > { %v1505_v4 = vpop.f32.mrb[16].mxu0  ;;  %v1706_v0 = vadd.f32 %v2416_v11, %v1481_v41  ;;  %v1700_v46 = vpop.f32.mrb[19].mxu1  ;;  %v4536_v13 = vsel %vm1850_vm5, %v1696_v53, %v1882_v47 }
 0x1ca   : > { %v1507_v54 = vpop.f32.mrb[17].mxu0  ;;  %v1701_v25 = vadd.f32 %v1700_v46, %v1476_v12  ;;  %v1946_v30 = vmul.f32 %v4536_v13, %v4536_v13  ;;  %v4540_v9 = vsel %vm1849_vm6, %v1691_v2, %v1881_v28  ;;  %v1506_v36 = vadd.f32 %v4530_v63, %v1505_v4 }
 0x1cb   : > { %vm1852_vm7 = vcmp.ge.f32.partialorder %v1706_v0, 0.0  ;;  %v1884_v49 = vmul.f32 0.2, %v1706_v0  ;;  %v1945_v62 = vmul.f32 %v4540_v9, %v4540_v9 }
 0x1cc   : > { %vm1851_vm8 = vcmp.ge.f32.partialorder %v1701_v25, 0.0  ;;  %v1883_v23 = vmul.f32 0.2, %v1701_v25  ;;  %v2419_v21 = vpop.f32.mrb[20].mxu1  ;;  %v1980_v22 = vsel %vm1097_vm2, %v1946_v30, 0.0 }
 0x1cd   : > { %v1716_v31 = vadd.f32 %v2419_v21, %v1491_v48  ;;  %v1710_v29 = vpop.f32.mrb[21].mxu1  ;;  %1981 = vadd.xlane.f32.xlu1 %v1980_v22  ;;  %v1977_v58 = vsel %vm1097_vm2, %v1945_v62, 0.0  ;;  %v4548_v3 = vsel %vm1852_vm7, %v1706_v0, %v1884_v49 }
 0x1ce   : > { %v1510_v34 = vpop.f32.mrb[18].mxu0  ;;  %v1711_v40 = vadd.f32 %v1710_v29, %v1486_v50  ;;  %1978 = vadd.xlane.f32.xlu0 %v1977_v58  ;;  %v1948_v16 = vmul.f32 %v4548_v3, %v4548_v3  ;;  %v4552_v6 = vsel %vm1851_vm8, %v1701_v25, %v1883_v23 }
 0x1cf   : > { %vm1854_vm9 = vcmp.ge.f32.partialorder %v1716_v31, 0.0  ;;  %v1886_v14 = vmul.f32 0.2, %v1716_v31  ;;  %v1512_v32 = vpop.f32.mrb[19].mxu0  ;;  %v1947_v26 = vmul.f32 %v4552_v6, %v4552_v6  ;;  %v1511_v55 = vadd.f32 %v4530_v63, %v1510_v34 }
 0x1d0   : > { %vm1853_vm10 = vcmp.ge.f32.partialorder %v1711_v40, 0.0  ;;  %v1885_v61 = vmul.f32 0.2, %v1711_v40  ;;  %v2422_v27 = vpop.f32.mrb[22].mxu1  ;;  %v1986_v42 = vsel %vm1097_vm2, %v1948_v16, 0.0 }
 0x1d1   : > { %v1726_v60 = vadd.f32 %v2422_v27, %v1501_v7  ;;  %v1720_v39 = vpop.f32.mrb[23].mxu1  ;;  %v4561_v24 = vsel %vm1854_vm9, %v1716_v31, %v1886_v14  ;;  %v1983_v56 = vsel %vm1097_vm2, %v1947_v26, 0.0 }
 0x1d2   : > { %v1721_v19 = vadd.f32 %v1720_v39, %v1496_v51  ;;  %1987 = vadd.xlane.f32.xlu0 %v1986_v42  ;;  %v4559_v5 = vsel %vm1853_vm10, %v1711_v40, %v1885_v61  ;;  %v1950_v53 = vmul.f32 %v4561_v24, %v4561_v24 }
 0x1d3   : > { %vm1856_vm11 = vcmp.ge.f32.partialorder %v1726_v60, 0.0  ;;  %v1888_v33 = vmul.f32 0.2, %v1726_v60  ;;  %v1949_v57 = vmul.f32 %v4559_v5, %v4559_v5 }
 0x1d4   : > { %vm1855_vm12 = vcmp.ge.f32.partialorder %v1721_v19, 0.0  ;;  %v1887_v38 = vmul.f32 0.2, %v1721_v19  ;;  %v2425_v59 = vpop.f32.mrb[24].mxu1  ;;  %v1992_v25 = vsel %vm1097_vm2, %v1950_v53, 0.0 }
 0x1d5   : > { %v1515_v35 = vpop.f32.mrb[20].mxu0  ;;  %v1736_v18 = vadd.f32 %v2425_v59, %v1511_v55  ;;  %v1730_v52 = vpop.f32.mrb[25].mxu1  ;;  %v1989_v15 = vsel %vm1097_vm2, %v1949_v57, 0.0  ;;  %v4574_v47 = vsel %vm1856_vm11, %v1726_v60, %v1888_v33 }
 0x1d6   : > { %v1517_v10 = vpop.f32.mrb[21].mxu0  ;;  %v1731_v2 = vadd.f32 %v1730_v52, %v1506_v36  ;;  %1990 = vadd.xlane.f32.xlu1 %v1989_v15  ;;  %1984 = vadd.xlane.f32.xlu0 %v1983_v56  ;;  %v4571_v41 = vsel %vm1855_vm12, %v1721_v19, %v1887_v38  ;;  %v1516_v11 = vadd.f32 %v4530_v63, %v1515_v35 }
 0x1d7   : > { %vm1858_vm13 = vcmp.ge.f32.partialorder %v1736_v18, 0.0  ;;  %v1890_v12 = vmul.f32 0.2, %v1736_v18  ;;  %v1951_v28 = vmul.f32 %v4571_v41, %v4571_v41  ;;  %v1952_v30 = vmul.f32 %v4574_v47, %v4574_v47 }
 0x1d8   : > { %vm1857_vm14 = vcmp.ge.f32.partialorder %v1731_v2, 0.0  ;;  %v1889_v4 = vmul.f32 0.2, %v1731_v2  ;;  %v2428_v0 = vpop.f32.mrb[26].mxu1 }
 0x1d9   : > { %v1740_v46 = vpop.f32.mrb[27].mxu1  ;;  %v1995_v54 = vsel %vm1097_vm2, %v1951_v28, 0.0  ;;  %v4586_v50 = vsel %vm1858_vm13, %v1736_v18, %v1890_v12  ;;  %v1998_v40 = vsel %vm1097_vm2, %v1952_v30, 0.0 }
 0x1da   : > { %v1520_v48 = vpop.f32.mrb[22].mxu0  ;;  %v1741_v49 = vadd.f32 %v1740_v46, %v1516_v11  ;;  %1996 = vadd.xlane.f32.xlu1 %v1995_v54  ;;  %1993 = vadd.xlane.f32.xlu0 %v1992_v25  ;;  %v4583_v62 = vsel %vm1857_vm14, %v1731_v2, %v1889_v4  ;;  %v1954_v7 = vmul.f32 %v4586_v50, %v4586_v50 }
 0x1db   : > { %v1521_v23 = vadd.f32 %v4530_v63, %v1520_v48  ;;  %v1522_v21 = vpop.f32.mrb[23].mxu0  ;;  %v1953_v22 = vmul.f32 %v4583_v62, %v4583_v62 }
 0x1dc   : > { %vm1859_vm15 = vcmp.ge.f32.partialorder %v1741_v49, 0.0  ;;  %v1891_v31 = vmul.f32 0.2, %v1741_v49  ;;  %v2431_v29 = vpop.f32.mrb[28].mxu1  ;;  %v2004_v60 = vsel %vm1097_vm2, %v1954_v7, 0.0 }
 0x1dd   : > { %v1746_v58 = vadd.f32 %v2428_v0, %v1521_v23  ;;  %v2001_v34 = vsel %vm1097_vm2, %v1953_v22, 0.0  ;;  %v1750_v16 = vpop.f32.mrb[29].mxu1 }
 0x1de   : > { %2002 = vadd.xlane.f32.xlu1 %v2001_v34  ;;  %1999 = vadd.xlane.f32.xlu0 %v1998_v40  ;;  %v4595_v14 = vsel %vm1859_vm15, %v1741_v49, %v1891_v31 }
 0x1df   : > { %v1892_v32 = vmul.f32 0.2, %v1746_v58  ;;  %v1955_v51 = vmul.f32 %v4595_v14, %v4595_v14  ;;  %vm1860_vm0 = vcmp.ge.f32.partialorder %v1746_v58, 0.0 }
 0x1e0   : > { %v2434_v61 = vpop.f32.mrb[30].mxu1 }
 0x1e1   : > { %v1525_v27 = vpop.f32.mrb[24].mxu0  ;;  %v2007_v42 = vsel %vm1097_vm2, %v1955_v51, 0.0  ;;  %v4601_v39 = vsel %vm1860_vm0, %v1746_v58, %v1892_v32  ;;  %v1760_v26 = vpop.f32.mrb[31].mxu1  ;;  %v1591_v58 = vadd.f32 %v4530_v63, %v4513_v45  ;;  %v1601_v45 = vadd.f32 %v4530_v63, %v4517_v43 }
 0x1e2   : > { %v1526_v19 = vadd.f32 %v4530_v63, %v1525_v27  ;;  %v1527_v55 = vpop.f32.mrb[25].mxu0  ;;  %2008 = vadd.xlane.f32.xlu1 %v2007_v42  ;;  %2005 = vadd.xlane.f32.xlu0 %v2004_v60  ;;  %v1956_v33 = vmul.f32 %v4601_v39, %v4601_v39 }
 0x1e4   : > { %v1751_v57 = vadd.f32 %v1750_v16, %v1526_v19  ;;  %v4606_v36 = vpop.f32.mrb[32].mxu1  ;;  %v2010_v38 = vsel %vm1097_vm2, %v1956_v33, 0.0  ;;  %v1586_v16 = vadd.f32 %v4530_v63, %v4511_v17  ;;  %v1596_v17 = vadd.f32 %v4530_v63, %v4515_v20 }
 0x1e5   : > { %v1770_v59 = vpop.f32.mrb[33].mxu1  ;;  %v1611_v20 = vadd.f32 %v4530_v63, %v4521_v44 }
 0x1e6   : > { %vm1861_vm1 = vcmp.ge.f32.partialorder %v1751_v57, 0.0  ;;  %v1893_v35 = vmul.f32 0.2, %v1751_v57  ;;  %v1530_v18 = vpop.f32.mrb[26].mxu0  ;;  %2011 = vadd.xlane.f32.xlu0 %v2010_v38 }
 0x1e7   : > { %v1531_v52 = vadd.f32 %v4530_v63, %v1530_v18  ;;  %v1532_v15 = vpop.f32.mrb[27].mxu0 }
 0x1e8   : > { %v4610_v56 = vsel %vm1861_vm1, %v1751_v57, %v1893_v35  ;;  %v4612_v53 = vpop.f32.mrb[34].mxu1 }
 0x1e9   : > { %v1756_v10 = vadd.f32 %v2431_v29, %v1531_v52  ;;  %v1957_v2 = vmul.f32 %v4610_v56, %v4610_v56  ;;  %v4616_v12 = vpop.f32.mrb[35].mxu1 }
 0x1eb   : > { %v1894_v28 = vmul.f32 0.2, %v1756_v10  ;;  %v2013_v11 = vsel %vm1097_vm2, %v1957_v2, 0.0  ;;  %vm1862_vm3 = vcmp.ge.f32.partialorder %v1756_v10, 0.0 }
 0x1ec   : > { %2014 = vadd.xlane.f32.xlu1 %v2013_v11  ;;  %v4619_v4 = vpop.f32.mrb[36].mxu1 }
 0x1ed   : > { %v1535_v0 = vpop.f32.mrb[28].mxu0  ;;  %v4621_v46 = vsel %vm1862_vm3, %v1756_v10, %v1894_v28  ;;  %v4623_v54 = vpop.f32.mrb[37].mxu1  ;;  %v1606_v10 = vadd.f32 %v4530_v63, %v4519_v8  ;;  %v1616_v8 = vadd.f32 %v4530_v63, %v4523_v37 }
 0x1ee   : > { %v1536_v25 = vadd.f32 %v4530_v63, %v1535_v0  ;;  %v1537_v30 = vpop.f32.mrb[29].mxu0  ;;  %v1958_v48 = vmul.f32 %v4621_v46, %v4621_v46 }
 0x1f0   : > { %v1761_v49 = vadd.f32 %v1760_v26, %v1536_v25  ;;  %v2016_v23 = vsel %vm1097_vm2, %v1958_v48, 0.0  ;;  %v4629_v21 = vpop.f32.mrb[38].mxu1 }
 0x1f1   : > { %2017 = vadd.xlane.f32.xlu0 %v2016_v23  ;;  %v4631_v22 = vpop.f32.mrb[39].mxu1  ;;  %v1621_v23 = vadd.f32 %v4530_v63, %v4525_v1 }
 0x1f2   : > { %v1895_v31 = vmul.f32 0.2, %v1761_v49  ;;  %v1540_v29 = vpop.f32.mrb[30].mxu0  ;;  %vm1863_vm4 = vcmp.ge.f32.partialorder %v1761_v49, 0.0 }
 0x1f3   : > { %v1541_v34 = vadd.f32 %v4530_v63, %v1540_v29  ;;  %v1542_v40 = vpop.f32.mrb[31].mxu0 }
 0x1f4   : > { %v2449_v7 = vpop.f32.mrb[40].mxu1  ;;  %v4638_v32 = vsel %vm1863_vm4, %v1761_v49, %v1895_v31 }
 0x1f5   : > { %v1766_v51 = vadd.f32 %v2434_v61, %v1541_v34  ;;  %v4640_v27 = vadd.f32 %v2449_v7, %v1591_v58  ;;  %v1810_v42 = vpop.f32.mrb[41].mxu1  ;;  %v1959_v60 = vmul.f32 %v4638_v32, %v4638_v32 }
 0x1f6   : > { %v1811_v26 = vadd.f32 %v1810_v42, %v1586_v16 }
 0x1f7   : > { %v1896_v19 = vmul.f32 0.2, %v1766_v51  ;;  %v2019_v55 = vsel %vm1097_vm2, %v1959_v60, 0.0  ;;  %vm1864_vm5 = vcmp.ge.f32.partialorder %v1766_v51, 0.0  ;;  %vm1874_vm10 = vcmp.ge.f32.partialorder %v4640_v27, 0.0 }
 0x1f8   : > { %2020 = vadd.xlane.f32.xlu1 %v2019_v55  ;;  %v2452_v33 = vpop.f32.mrb[42].mxu1  ;;  %vm1873_vm8 = vcmp.ge.f32.partialorder %v1811_v26, 0.0 }
 0x1f9   : > { %v1545_v61 = vpop.f32.mrb[32].mxu0  ;;  %v4649_v57 = vadd.f32 %v2452_v33, %v1601_v45  ;;  %v1820_v38 = vpop.f32.mrb[43].mxu1  ;;  %v4651_v35 = vsel %vm1864_vm5, %v1766_v51, %v1896_v19  ;;  %v1905_v19 = vmul.f32 0.2, %v1811_v26 }
 0x1fa   : > { %v1546_v18 = vadd.f32 %v4530_v63, %v1545_v61  ;;  %v1547_v52 = vpop.f32.mrb[33].mxu0  ;;  %v4654_v15 = vadd.f32 %v1820_v38, %v1596_v17  ;;  %v1960_v43 = vmul.f32 %v4651_v35, %v4651_v35 }
 0x1fb   : > { %v1906_v52 = vmul.f32 0.2, %v4640_v27  ;;  %vm1876_vm12 = vcmp.ge.f32.partialorder %v4649_v57, 0.0 }
 0x1fc   : > { %v1771_v2 = vadd.f32 %v1770_v59, %v1546_v18  ;;  %v2455_v28 = vpop.f32.mrb[44].mxu1  ;;  %v2022_v11 = vsel %vm1097_vm2, %v1960_v43, 0.0  ;;  %vm1875_vm13 = vcmp.ge.f32.partialorder %v4654_v15, 0.0 }
 0x1fd   : > { %v4663_v0 = vadd.f32 %v2455_v28, %v1611_v20  ;;  %2023 = vadd.xlane.f32.xlu0 %v2022_v11  ;;  %v1830_v25 = vpop.f32.mrb[45].mxu1  ;;  %v4693_v20 = vsel %vm1873_vm8, %v1811_v26, %v1905_v19  ;;  %v1908_v26 = vmul.f32 0.2, %v4649_v57 }
 0x1fe   : > { %v1897_v30 = vmul.f32 0.2, %v1771_v2  ;;  %v1550_v48 = vpop.f32.mrb[34].mxu0  ;;  %v4665_v49 = vadd.f32 %v1830_v25, %v1606_v10  ;;  %vm1865_vm6 = vcmp.ge.f32.partialorder %v1771_v2, 0.0  ;;  %v1969_v11 = vmul.f32 %v4693_v20, %v4693_v20 }
 0x1ff   : > { %v1551_v44 = vadd.f32 %v4530_v63, %v1550_v48  ;;  %v1552_v31 = vpop.f32.mrb[35].mxu0  ;;  %v4703_v25 = vsel %vm1874_vm10, %v4640_v27, %v1906_v52  ;;  %v1907_v27 = vmul.f32 0.2, %v4654_v15  ;;  %vm1878_vm0 = vcmp.ge.f32.partialorder %v4663_v0, 0.0 }
 0x200   : > { %v2458_v59 = vpop.f32.mrb[46].mxu1  ;;  %v4672_v29 = vsel %vm1865_vm6, %v1771_v2, %v1897_v30  ;;  %v2049_v31 = vsel %vm1097_vm2, %v1969_v11, 0.0  ;;  %vm1877_vm15 = vcmp.ge.f32.partialorder %v4665_v49, 0.0 }
 0x201   : > { %v1776_v58 = vadd.f32 %v4606_v36, %v1551_v44  ;;  %v4675_v34 = vadd.f32 %v2458_v59, %v1621_v23  ;;  %v1840_v40 = vpop.f32.mrb[47].mxu1  ;;  %v1961_v16 = vmul.f32 %v4672_v29, %v4672_v29  ;;  %v4730_v19 = vsel %vm1875_vm13, %v4654_v15, %v1907_v27 }
 0x202   : > { %v4679_v7 = vadd.f32 %v1840_v40, %v1616_v8  ;;  %v1970_v8 = vmul.f32 %v4703_v25, %v4703_v25  ;;  %v4720_v40 = vsel %vm1876_vm12, %v4649_v57, %v1908_v26  ;;  %v1910_v57 = vmul.f32 0.2, %v4663_v0 }
 0x203   : > { %v1898_v1 = vmul.f32 0.2, %v1776_v58  ;;  %v2025_v51 = vsel %vm1097_vm2, %v1961_v16, 0.0  ;;  %vm1866_vm7 = vcmp.ge.f32.partialorder %v1776_v58, 0.0  ;;  %vm1880_vm5 = vcmp.ge.f32.partialorder %v4675_v34, 0.0 }
 0x204   : > { %2026 = vadd.xlane.f32.xlu1 %v2025_v51  ;;  %vm1879_vm3 = vcmp.ge.f32.partialorder %v4679_v7, 0.0 }
 0x205   : > { %v1555_v42 = vpop.f32.mrb[36].mxu0  ;;  %v4682_v37 = vsel %vm1866_vm7, %v1776_v58, %v1898_v1 }
 0x206   : > { %v1556_v60 = vadd.f32 %v4530_v63, %v1555_v42  ;;  %v1557_v45 = vpop.f32.mrb[37].mxu0  ;;  %v1962_v36 = vmul.f32 %v4682_v37, %v4682_v37 }
 0x207   : > { %v1909_v45 = vmul.f32 0.2, %v4665_v49 }
 0x208   : > { %v1781_v55 = vadd.f32 %v4616_v12, %v1556_v60  ;;  %v2028_v17 = vsel %vm1097_vm2, %v1962_v36, 0.0  ;;  %v2052_v60 = vsel %vm1097_vm2, %v1970_v8, 0.0  ;;  %v1972_v36 = vmul.f32 %v4720_v40, %v4720_v40 }
 0x209   : > { %2029 = vadd.xlane.f32.xlu0 %v2028_v17 }
 0x20a   : > { %v1899_v33 = vmul.f32 0.2, %v1781_v55  ;;  %v1560_v61 = vpop.f32.mrb[38].mxu0  ;;  %vm1867_vm9 = vcmp.ge.f32.partialorder %v1781_v55, 0.0  ;;  %v2058_v15 = vsel %vm1097_vm2, %v1972_v36, 0.0 }
 0x20b   : > { %v1561_v38 = vadd.f32 %v4530_v63, %v1560_v61  ;;  %v1562_v18 = vpop.f32.mrb[39].mxu0 }
 0x20c   : > { %v4691_v43 = vsel %vm1867_vm9, %v1781_v55, %v1899_v33  ;;  %v4743_v18 = vsel %vm1877_vm15, %v4665_v49, %v1909_v45  ;;  %v1911_v49 = vmul.f32 0.2, %v4679_v7 }
 0x20d   : > { %v1786_v12 = vadd.f32 %v4612_v53, %v1561_v38  ;;  %v1963_v10 = vmul.f32 %v4691_v43, %v4691_v43  ;;  %v1971_v38 = vmul.f32 %v4730_v19, %v4730_v19  ;;  %v1973_v26 = vmul.f32 %v4743_v18, %v4743_v18 }
 0x20f   : > { %v1900_v2 = vmul.f32 0.2, %v1786_v12  ;;  %v2031_v28 = vsel %vm1097_vm2, %v1963_v10, 0.0  ;;  %vm1868_vm11 = vcmp.ge.f32.partialorder %v1786_v12, 0.0  ;;  %v2055_v11 = vsel %vm1097_vm2, %v1971_v38, 0.0 }
 0x210   : > { %2032 = vadd.xlane.f32.xlu1 %v2031_v28  ;;  %v2061_v27 = vsel %vm1097_vm2, %v1973_v26, 0.0 }
 0x211   : > { %v1565_v30 = vpop.f32.mrb[40].mxu0  ;;  %v4706_v48 = vsel %vm1868_vm11, %v1786_v12, %v1900_v2  ;;  %v4748_v12 = vsel %vm1878_vm0, %v4663_v0, %v1910_v57 }
 0x212   : > { %v1566_v53 = vadd.f32 %v4530_v63, %v1565_v30  ;;  %v1567_v23 = vpop.f32.mrb[41].mxu0  ;;  %v1964_v44 = vmul.f32 %v4706_v48, %v4706_v48  ;;  %v1974_v0 = vmul.f32 %v4748_v12, %v4748_v12 }
 0x214   : > { %v1791_v59 = vadd.f32 %v4623_v54, %v1566_v53  ;;  %2050 = vadd.xlane.f32.xlu1 %v2049_v31  ;;  %v2034_v58 = vsel %vm1097_vm2, %v1964_v44, 0.0 }
 0x215   : > { %2035 = vadd.xlane.f32.xlu0 %v2034_v58  ;;  %v4768_v58 = vsel %vm1879_vm3, %v4679_v7, %v1911_v49 }
 0x216   : > { %v1901_v16 = vmul.f32 0.2, %v1791_v59  ;;  %v1570_v1 = vpop.f32.mrb[42].mxu0  ;;  %vm1869_vm14 = vcmp.ge.f32.partialorder %v1791_v59, 0.0 }
 0x217   : > { %v1571_v51 = vadd.f32 %v4530_v63, %v1570_v1  ;;  %v1572_v42 = vpop.f32.mrb[43].mxu0 }
 0x218   : > { %v4725_v54 = vsel %vm1869_vm14, %v1791_v59, %v1901_v16  ;;  %v1912_v16 = vmul.f32 0.2, %v4675_v34 }
 0x219   : > { %v1796_v55 = vadd.f32 %v4619_v4, %v1571_v51  ;;  %2053 = vadd.xlane.f32.xlu0 %v2052_v60  ;;  %v1965_v17 = vmul.f32 %v4725_v54, %v4725_v54  ;;  %v1975_v60 = vmul.f32 %v4768_v58, %v4768_v58 }
 0x21a   : > { %v4781_v45 = vsel %vm1880_vm5, %v4675_v34, %v1912_v16 }
 0x21b   : > { %v1902_v33 = vmul.f32 0.2, %v1796_v55  ;;  %v2037_v61 = vsel %vm1097_vm2, %v1965_v17, 0.0  ;;  %vm1870_vm1 = vcmp.ge.f32.partialorder %v1796_v55, 0.0  ;;  %v2067_v36 = vsel %vm1097_vm2, %v1975_v60, 0.0 }
 0x21c   : > { %2038 = vadd.xlane.f32.xlu1 %v2037_v61 }
 0x21d   : > { %v1575_v4 = vpop.f32.mrb[44].mxu0  ;;  %2059 = vadd.xlane.f32.xlu0 %v2058_v15  ;;  %v4745_v52 = vsel %vm1870_vm1, %v1796_v55, %v1902_v33  ;;  %v1976_v55 = vmul.f32 %v4781_v45, %v4781_v45 }
 0x21e   : > { %v1576_v10 = vadd.f32 %v4530_v63, %v1575_v4  ;;  %v1577_v2 = vpop.f32.mrb[45].mxu0  ;;  %v1966_v28 = vmul.f32 %v4745_v52, %v4745_v52 }
 0x21f   : > { %v2070_v17 = vsel %vm1097_vm2, %v1976_v55, 0.0 }
 0x220   : > { %v1801_v30 = vadd.f32 %v4631_v22, %v1576_v10  ;;  %2056 = vadd.xlane.f32.xlu1 %v2055_v11  ;;  %v2040_v53 = vsel %vm1097_vm2, %v1966_v28, 0.0  ;;  %v2064_v22 = vsel %vm1097_vm2, %v1974_v0, 0.0 }
 0x221   : > { %2041 = vadd.xlane.f32.xlu0 %v2040_v53 }
 0x222   : > { %v1903_v23 = vmul.f32 0.2, %v1801_v30  ;;  %v1580_v44 = vpop.f32.mrb[46].mxu0  ;;  %vm1871_vm4 = vcmp.ge.f32.partialorder %v1801_v30, 0.0 }
 0x223   : > { %v1581_v31 = vadd.f32 %v4530_v63, %v1580_v44  ;;  %v1582_v8 = vpop.f32.mrb[47].mxu0 }
 0x224   : > { %2062 = vadd.xlane.f32.xlu1 %v2061_v27  ;;  %v4765_v59 = vsel %vm1871_vm4, %v1801_v30, %v1903_v23 }
 0x225   : > { %v1806_v1 = vadd.f32 %v4629_v21, %v1581_v31  ;;  %2065 = vadd.xlane.f32.xlu0 %v2064_v22  ;;  %v1967_v51 = vmul.f32 %v4765_v59, %v4765_v59 }
 0x227   : > { %v1904_v63 = vmul.f32 0.2, %v1806_v1  ;;  %v2043_v42 = vsel %vm1097_vm2, %v1967_v51, 0.0  ;;  %vm1872_vm6 = vcmp.ge.f32.partialorder %v1806_v1, 0.0 }
 0x228   : > { %2044 = vadd.xlane.f32.xlu1 %v2043_v42 }
 0x229   : > { %v4778_v7 = vsel %vm1872_vm6, %v1806_v1, %v1904_v63 }
 0x22a   : > { %v1968_v21 = vmul.f32 %v4778_v7, %v4778_v7 }
 0x22c   : > { %2068 = vadd.xlane.f32.xlu1 %v2067_v36  ;;  %v2046_v57 = vsel %vm1097_vm2, %v1968_v21, 0.0 }
 0x22d   : > { %2047 = vadd.xlane.f32.xlu0 %v2046_v57 }
 0x231   : > { %2071 = vadd.xlane.f32.xlu0 %v2070_v17 }
 0x25a   : > { %v1982_v33 = vpop.xlane.xlu1 %1981 }
 0x25b   : > { %v2075_v61 = vmul.f32 0.03125, %v1982_v33  ;;  %v1979_v34 = vpop.xlane.xlu0 %1978 }
 0x25c   : > { %v2074_v38 = vmul.f32 0.03125, %v1979_v34 }
 0x25d   : > { %v2107_v15 = vadd.f32 1e-08, %v2075_v61 }
 0x25e   : > { %v2106_v4 = vadd.f32 1e-08, %v2074_v38 }
 0x25f   : > { %3056 = vrsqrt.f32 %v2107_v15  ;;  %v1988_v10 = vpop.xlane.xlu0 %1987 }
 0x260   : > { %3058 = vrsqrt.f32 %v2106_v4  ;;  %v2077_v2 = vmul.f32 0.03125, %v1988_v10 }
 0x262   : > { %v2109_v28 = vadd.f32 1e-08, %v2077_v2 }
 0x263   : > { %v1991_v11 = vpop.xlane.xlu1 %1990  ;;  %v1985_v26 = vpop.xlane.xlu0 %1984 }
 0x264   : > { %3060 = vrsqrt.f32 %v2109_v28  ;;  %v2078_v49 = vmul.f32 0.03125, %v1991_v11  ;;  %v2076_v30 = vmul.f32 0.03125, %v1985_v26 }
 0x266   : > { %v2110_v53 = vadd.f32 1e-08, %v2078_v49  ;;  %v2108_v0 = vadd.f32 1e-08, %v2076_v30 }
 0x267   : > { %v1997_v23 = vpop.xlane.xlu1 %1996  ;;  %v1994_v44 = vpop.xlane.xlu0 %1993 }
 0x268   : > { %3062 = vrsqrt.f32 %v2110_v53  ;;  %v2080_v31 = vmul.f32 0.03125, %v1997_v23  ;;  %v2079_v8 = vmul.f32 0.03125, %v1994_v44 }
 0x269   : > { %v3057_v27 = vpop.eup %3056  ;;  %3064 = vrsqrt.f32 %v2108_v0 }
 0x26a   : > { %v3059_v22 = vpop.eup %3058  ;;  %v2171_v16 = vmul.f32 %v3057_v27, %v4536_v13  ;;  %v2112_v1 = vadd.f32 1e-08, %v2080_v31  ;;  %v2111_v51 = vadd.f32 1e-08, %v2079_v8 }
 0x26b   : > { %v2170_v63 = vmul.f32 %v3059_v22, %v4540_v9  ;;  %v2003_v42 = vpop.xlane.xlu1 %2002  ;;  %v2000_v60 = vpop.xlane.xlu0 %1999 }
 0x26c   : > { %2203 = vst.msk [vmem:[%s4794_s10 + $0x8] sm:$0xff] %vm1097_vm2, %v2171_v16  ;;  %3066 = vrsqrt.f32 %v2112_v1  ;;  %v2082_v21 = vmul.f32 0.03125, %v2003_v42  ;;  %v2081_v36 = vmul.f32 0.03125, %v2000_v60 }
 0x26d   : > { %2202 = vst.msk [vmem:[%s4794_s10] sm:$0xff] %vm1097_vm2, %v2170_v63  ;;  %3068 = vrsqrt.f32 %v2111_v51 }
 0x26e   : > { %v3061_v57 = vpop.eup %3060  ;;  %v2114_v55 = vadd.f32 1e-08, %v2082_v21  ;;  %v2113_v17 = vadd.f32 1e-08, %v2081_v36 }
 0x26f   : > { %v2173_v13 = vmul.f32 %v3061_v57, %v4548_v3  ;;  %v2009_v33 = vpop.xlane.xlu1 %2008  ;;  %v2006_v61 = vpop.xlane.xlu0 %2005 }
 0x270   : > { %3070 = vrsqrt.f32 %v2114_v55  ;;  %v2084_v9 = vmul.f32 0.03125, %v2009_v33  ;;  %v2083_v34 = vmul.f32 0.03125, %v2006_v61 }
 0x271   : > { %2205 = vst.msk [vmem:[%s4794_s10 + $0x18] sm:$0xff] %vm1097_vm2, %v2173_v13  ;;  %3072 = vrsqrt.f32 %v2113_v17 }
 0x272   : > { %v3063_v38 = vpop.eup %3062  ;;  %v2116_v15 = vadd.f32 1e-08, %v2084_v9  ;;  %v2115_v4 = vadd.f32 1e-08, %v2083_v34 }
 0x273   : > { %v3065_v10 = vpop.eup %3064  ;;  %v2174_v2 = vmul.f32 %v3063_v38, %v4559_v5  ;;  %v2012_v28 = vpop.xlane.xlu0 %2011 }
 0x274   : > { %v2172_v3 = vmul.f32 %v3065_v10, %v4552_v6  ;;  %3074 = vrsqrt.f32 %v2116_v15  ;;  %v2085_v11 = vmul.f32 0.03125, %v2012_v28 }
 0x275   : > { %2206 = vst.msk [vmem:[%s4794_s10 + $0x20] sm:$0xff] %vm1097_vm2, %v2174_v2  ;;  %3076 = vrsqrt.f32 %v2115_v4 }
 0x276   : > { %v3067_v26 = vpop.eup %3066  ;;  %2204 = vst.msk [vmem:[%s4794_s10 + $0x10] sm:$0xff] %vm1097_vm2, %v2172_v3  ;;  %v2117_v49 = vadd.f32 1e-08, %v2085_v11 }
 0x277   : > { %v3069_v30 = vpop.eup %3068  ;;  %v2176_v53 = vmul.f32 %v3067_v26, %v4571_v41 }
 0x278   : > { %v2175_v5 = vmul.f32 %v3069_v30, %v4561_v24  ;;  %3078 = vrsqrt.f32 %v2117_v49 }
 0x279   : > { %2208 = vst.msk [vmem:[%s4794_s10 + $0x30] sm:$0xff] %vm1097_vm2, %v2176_v53  ;;  %v2015_v6 = vpop.xlane.xlu1 %2014 }
 0x27a   : > { %v3071_v0 = vpop.eup %3070  ;;  %2207 = vst.msk [vmem:[%s4794_s10 + $0x28] sm:$0xff] %vm1097_vm2, %v2175_v5  ;;  %v2086_v23 = vmul.f32 0.03125, %v2015_v6 }
 0x27b   : > { %v3073_v44 = vpop.eup %3072  ;;  %v2178_v31 = vmul.f32 %v3071_v0, %v4583_v62 }
 0x27c   : > { %v2177_v8 = vmul.f32 %v3073_v44, %v4574_v47  ;;  %v2118_v27 = vadd.f32 1e-08, %v2086_v23 }
 0x27d   : > { %2210 = vst.msk [vmem:[%s4794_s10 + $0x40] sm:$0xff] %vm1097_vm2, %v2178_v31 }
 0x27e   : > { %v3075_v24 = vpop.eup %3074  ;;  %2209 = vst.msk [vmem:[%s4794_s10 + $0x38] sm:$0xff] %vm1097_vm2, %v2177_v8  ;;  %3080 = vrsqrt.f32 %v2118_v27  ;;  %v2018_v41 = vpop.xlane.xlu0 %2017 }
 0x27f   : > { %v3077_v22 = vpop.eup %3076  ;;  %v2180_v16 = vmul.f32 %v3075_v24, %v4595_v14  ;;  %v2087_v1 = vmul.f32 0.03125, %v2018_v41 }
 0x280   : > { %v2179_v51 = vmul.f32 %v3077_v22, %v4586_v50 }
 0x281   : > { %2212 = vst.msk [vmem:[%s4794_s10 + $0x50] sm:$0xff] %vm1097_vm2, %v2180_v16  ;;  %v2119_v62 = vadd.f32 1e-08, %v2087_v1 }
 0x282   : > { %v3079_v47 = vpop.eup %3078  ;;  %2211 = vst.msk [vmem:[%s4794_s10 + $0x48] sm:$0xff] %vm1097_vm2, %v2179_v51 }
 0x283   : > { %v2181_v63 = vmul.f32 %v3079_v47, %v4601_v39  ;;  %3082 = vrsqrt.f32 %v2119_v62 }
 0x285   : > { %2213 = vst.msk [vmem:[%s4794_s10 + $0x58] sm:$0xff] %vm1097_vm2, %v2181_v63  ;;  %v2021_v42 = vpop.xlane.xlu1 %2020 }
 0x286   : > { %v2088_v60 = vmul.f32 0.03125, %v2021_v42 }
 0x288   : > { %v3081_v21 = vpop.eup %3080  ;;  %v2120_v14 = vadd.f32 1e-08, %v2088_v60 }
 0x289   : > { %v2182_v36 = vmul.f32 %v3081_v21, %v4610_v56 }
 0x28a   : > { %3084 = vrsqrt.f32 %v2120_v14  ;;  %v2024_v50 = vpop.xlane.xlu0 %2023 }
 0x28b   : > { %2214 = vst.msk [vmem:[%s4794_s10 + $0x60] sm:$0xff] %vm1097_vm2, %v2182_v36  ;;  %v2089_v57 = vmul.f32 0.03125, %v2024_v50 }
 0x28d   : > { %v3083_v55 = vpop.eup %3082  ;;  %v2121_v17 = vadd.f32 1e-08, %v2089_v57 }
 0x28e   : > { %v2183_v39 = vmul.f32 %v3083_v55, %v4621_v46 }
 0x28f   : > { %3086 = vrsqrt.f32 %v2121_v17 }
 0x290   : > { %2215 = vst.msk [vmem:[%s4794_s10 + $0x68] sm:$0xff] %vm1097_vm2, %v2183_v39 }
 0x291   : > { %v2027_v13 = vpop.xlane.xlu1 %2026 }
 0x292   : > { %v2090_v33 = vmul.f32 0.03125, %v2027_v13 }
 0x294   : > { %v3085_v61 = vpop.eup %3084  ;;  %v2122_v9 = vadd.f32 1e-08, %v2090_v33 }
 0x295   : > { %v2184_v56 = vmul.f32 %v3085_v61, %v4638_v32 }
 0x296   : > { %3088 = vrsqrt.f32 %v2122_v9  ;;  %v2030_v34 = vpop.xlane.xlu0 %2029 }
 0x297   : > { %2216 = vst.msk [vmem:[%s4794_s10 + $0x70] sm:$0xff] %vm1097_vm2, %v2184_v56  ;;  %v2091_v38 = vmul.f32 0.03125, %v2030_v34 }
 0x299   : > { %v3087_v15 = vpop.eup %3086  ;;  %v2123_v4 = vadd.f32 1e-08, %v2091_v38 }
 0x29a   : > { %v2185_v46 = vmul.f32 %v3087_v15, %v4651_v35 }
 0x29b   : > { %3090 = vrsqrt.f32 %v2123_v4 }
 0x29c   : > { %2217 = vst.msk [vmem:[%s4794_s10 + $0x78] sm:$0xff] %vm1097_vm2, %v2185_v46 }
 0x29d   : > { %v2033_v10 = vpop.xlane.xlu1 %2032 }
 0x29e   : > { %v2092_v2 = vmul.f32 0.03125, %v2033_v10 }
 0x2a0   : > { %v3089_v28 = vpop.eup %3088  ;;  %v2124_v3 = vadd.f32 1e-08, %v2092_v2 }
 0x2a1   : > { %v2186_v32 = vmul.f32 %v3089_v28, %v4672_v29  ;;  %v2051_v11 = vpop.xlane.xlu1 %2050 }
 0x2a2   : > { %3092 = vrsqrt.f32 %v2124_v3  ;;  %v2098_v26 = vmul.f32 0.03125, %v2051_v11  ;;  %v2036_v49 = vpop.xlane.xlu0 %2035 }
 0x2a3   : > { %2218 = vst.msk [vmem:[%s4794_s10 + $0x80] sm:$0xff] %vm1097_vm2, %v2186_v32  ;;  %v2093_v30 = vmul.f32 0.03125, %v2036_v49 }
 0x2a4   : > { %v2130_v53 = vadd.f32 1e-08, %v2098_v26 }
 0x2a5   : > { %v3091_v5 = vpop.eup %3090  ;;  %v2125_v35 = vadd.f32 1e-08, %v2093_v30 }
 0x2a6   : > { %v2187_v6 = vmul.f32 %v3091_v5, %v4682_v37  ;;  %3094 = vrsqrt.f32 %v2130_v53  ;;  %v2054_v0 = vpop.xlane.xlu0 %2053 }
 0x2a7   : > { %3096 = vrsqrt.f32 %v2125_v35  ;;  %v2099_v23 = vmul.f32 0.03125, %v2054_v0 }
 0x2a8   : > { %2219 = vst.msk [vmem:[%s4794_s10 + $0x88] sm:$0xff] %vm1097_vm2, %v2187_v6 }
 0x2a9   : > { %v2131_v29 = vadd.f32 1e-08, %v2099_v23  ;;  %v2039_v44 = vpop.xlane.xlu1 %2038 }
 0x2aa   : > { %v2094_v31 = vmul.f32 0.03125, %v2039_v44  ;;  %v2060_v8 = vpop.xlane.xlu0 %2059 }
 0x2ab   : > { %3098 = vrsqrt.f32 %v2131_v29  ;;  %v2101_v27 = vmul.f32 0.03125, %v2060_v8 }
 0x2ac   : > { %v3093_v24 = vpop.eup %3092  ;;  %v2126_v41 = vadd.f32 1e-08, %v2094_v31 }
 0x2ad   : > { %v2188_v22 = vmul.f32 %v3093_v24, %v4691_v43  ;;  %v2133_v16 = vadd.f32 1e-08, %v2101_v27  ;;  %v2057_v1 = vpop.xlane.xlu1 %2056 }
 0x2ae   : > { %3100 = vrsqrt.f32 %v2126_v41  ;;  %v2100_v37 = vmul.f32 0.03125, %v2057_v1  ;;  %v2042_v51 = vpop.xlane.xlu0 %2041 }
 0x2af   : > { %2220 = vst.msk [vmem:[%s4794_s10 + $0x90] sm:$0xff] %vm1097_vm2, %v2188_v22  ;;  %3102 = vrsqrt.f32 %v2133_v16  ;;  %v2095_v62 = vmul.f32 0.03125, %v2042_v51 }
 0x2b0   : > { %v3095_v47 = vpop.eup %3094  ;;  %v2132_v63 = vadd.f32 1e-08, %v2100_v37 }
 0x2b1   : > { %v3097_v42 = vpop.eup %3096  ;;  %v2194_v60 = vmul.f32 %v3095_v47, %v4693_v20  ;;  %v2127_v21 = vadd.f32 1e-08, %v2095_v62  ;;  %v2063_v14 = vpop.xlane.xlu1 %2062 }
 0x2b2   : > { %v2189_v43 = vmul.f32 %v3097_v42, %v4706_v48  ;;  %3104 = vrsqrt.f32 %v2132_v63  ;;  %v2102_v36 = vmul.f32 0.03125, %v2063_v14  ;;  %v2066_v50 = vpop.xlane.xlu0 %2065 }
 0x2b3   : > { %2226 = vst.msk [vmem:[%s4794_s10 + $0xc0] sm:$0xff] %vm1097_vm2, %v2194_v60  ;;  %3106 = vrsqrt.f32 %v2127_v21  ;;  %v2103_v57 = vmul.f32 0.03125, %v2066_v50 }
 0x2b4   : > { %2221 = vst.msk [vmem:[%s4794_s10 + $0x98] sm:$0xff] %vm1097_vm2, %v2189_v43  ;;  %v2134_v55 = vadd.f32 1e-08, %v2102_v36 }
 0x2b5   : > { %v3099_v17 = vpop.eup %3098  ;;  %v2135_v39 = vadd.f32 1e-08, %v2103_v57  ;;  %v2045_v13 = vpop.xlane.xlu1 %2044 }
 0x2b6   : > { %v2195_v20 = vmul.f32 %v3099_v17, %v4703_v25  ;;  %3108 = vrsqrt.f32 %v2134_v55  ;;  %v2096_v48 = vmul.f32 0.03125, %v2045_v13 }
 0x2b7   : > { %3110 = vrsqrt.f32 %v2135_v39 }
 0x2b8   : > { %v3101_v33 = vpop.eup %3100  ;;  %2227 = vst.msk [vmem:[%s4794_s10 + $0xc8] sm:$0xff] %vm1097_vm2, %v2195_v20  ;;  %v2128_v61 = vadd.f32 1e-08, %v2096_v48 }
 0x2b9   : > { %v3103_v9 = vpop.eup %3102  ;;  %v2190_v56 = vmul.f32 %v3101_v33, %v4725_v54  ;;  %v2069_v34 = vpop.xlane.xlu1 %2068 }
 0x2ba   : > { %v2197_v38 = vmul.f32 %v3103_v9, %v4720_v40  ;;  %3112 = vrsqrt.f32 %v2128_v61  ;;  %v2104_v15 = vmul.f32 0.03125, %v2069_v34  ;;  %v2048_v4 = vpop.xlane.xlu0 %2047 }
 0x2bb   : > { %2222 = vst.msk [vmem:[%s4794_s10 + $0xa0] sm:$0xff] %vm1097_vm2, %v2190_v56  ;;  %v2097_v25 = vmul.f32 0.03125, %v2048_v4 }
 0x2bc   : > { %v3105_v46 = vpop.eup %3104  ;;  %2229 = vst.msk [vmem:[%s4794_s10 + $0xd8] sm:$0xff] %vm1097_vm2, %v2197_v38  ;;  %v2136_v10 = vadd.f32 1e-08, %v2104_v15 }
 0x2bd   : > { %v3107_v2 = vpop.eup %3106  ;;  %v2196_v28 = vmul.f32 %v3105_v46, %v4730_v19  ;;  %v2129_v54 = vadd.f32 1e-08, %v2097_v25 }
 0x2be   : > { %v2191_v3 = vmul.f32 %v3107_v2, %v4745_v52  ;;  %3114 = vrsqrt.f32 %v2136_v10  ;;  %v2072_v40 = vpop.xlane.xlu0 %2071 }
 0x2bf   : > { %2228 = vst.msk [vmem:[%s4794_s10 + $0xd0] sm:$0xff] %vm1097_vm2, %v2196_v28  ;;  %3116 = vrsqrt.f32 %v2129_v54  ;;  %v2105_v32 = vmul.f32 0.03125, %v2072_v40 }
 0x2c0   : > { %v3109_v11 = vpop.eup %3108  ;;  %2223 = vst.msk [vmem:[%s4794_s10 + $0xa8] sm:$0xff] %vm1097_vm2, %v2191_v3 }
 0x2c1   : > { %v3111_v26 = vpop.eup %3110  ;;  %v2198_v49 = vmul.f32 %v3109_v11, %v4743_v18  ;;  %v2137_v19 = vadd.f32 1e-08, %v2105_v32 }
 0x2c2   : > { %v2199_v30 = vmul.f32 %v3111_v26, %v4748_v12 }
 0x2c3   : > { %2230 = vst.msk [vmem:[%s4794_s10 + $0xe0] sm:$0xff] %vm1097_vm2, %v2198_v49  ;;  %3118 = vrsqrt.f32 %v2137_v19 }
 0x2c4   : > { %v3113_v52 = vpop.eup %3112  ;;  %2231 = vst.msk [vmem:[%s4794_s10 + $0xe8] sm:$0xff] %vm1097_vm2, %v2199_v30 }
 0x2c5   : > { %v2192_v53 = vmul.f32 %v3113_v52, %v4765_v59 }
 0x2c7   : > { %2224 = vst.msk [vmem:[%s4794_s10 + $0xb0] sm:$0xff] %vm1097_vm2, %v2192_v53 }
 0x2c8   : > { %v3115_v5 = vpop.eup %3114 }
 0x2c9   : > { %v3117_v35 = vpop.eup %3116  ;;  %v2200_v6 = vmul.f32 %v3115_v5, %v4768_v58 }
 0x2ca   : > { %v2193_v18 = vmul.f32 %v3117_v35, %v4778_v7 }
 0x2cb   : > { %2232 = vst.msk [vmem:[%s4794_s10 + $0xf0] sm:$0xff] %vm1097_vm2, %v2200_v6 }
 0x2cc   : > { %2225 = vst.msk [vmem:[%s4794_s10 + $0xb8] sm:$0xff] %vm1097_vm2, %v2193_v18 }
 0x2cd   : > { %v3119_v12 = vpop.eup %3118 }
 0x2ce   : > { %v2201_v0 = vmul.f32 %v3119_v12, %v4781_v45 }
 0x2d0   : > { %2233 = vst.msk [vmem:[%s4794_s10 + $0xf8] sm:$0xff] %vm1097_vm2, %v2201_v0 }
 0x2d1 PF: > { %s13_s14 = sadd.s32 1, %s3176_s14   ;;  %s5018_s12 = smov %s3172_s13 }
 0x2d2   : > { %p10_p5 = scmp.ge.s32.totalorder %s13_s14, 4   ;;  %s5019_s13 = smov %s5021_s15 }
 0x2d4   :  { %12 = sbr.rel (!%p10_p5) target bundleno = 2 (0x2), region = 63 }

</bundles_post_ra>
